<compile_context>
chip_gen: v5e
topology: v5e:2x2
jax: 0.10.0
libtpu: 0.0.40
codegen_flags: <defaults>
</compile_context>

<pallas_src>
import functools

import jax
import jax.numpy as jnp
from jax.experimental import pallas as pl
from jax.experimental.pallas import tpu as pltpu

NUM_CLASSES = 36
POOL_H, POOL_W = 18, 2


def _round_up(x, m):
    return -(-x // m) * m


# ----------------------------------------------------------------------------
# Tiled matmul kernel with fused bias / ReLU epilogue
# ----------------------------------------------------------------------------
def _matmul_kernel(*refs, apply_relu, has_bias):
    if has_bias:
        a_ref, b_ref, bias_ref, o_ref, acc_ref = refs
    else:
        a_ref, b_ref, o_ref, acc_ref = refs
        bias_ref = None

    @pl.when(pl.program_id(2) == 0)
    def _():
        acc_ref[...] = jnp.zeros_like(acc_ref)

    acc_ref[...] += jnp.dot(a_ref[...], b_ref[...],
                            preferred_element_type=jnp.float32)

    @pl.when(pl.program_id(2) == pl.num_programs(2) - 1)
    def _():
        out = acc_ref[...]
        if has_bias:
            out = out + bias_ref[...]
        if apply_relu:
            out = jnp.maximum(out, 0.0)
        o_ref[...] = out.astype(o_ref.dtype)


def pallas_matmul(a, b, *, bias=None, apply_relu=False,
                  out_dtype=jnp.float32, tm, tn, tk):
    """C = act(A @ B + bias).  A:(M,K), B:(K,N); tiles must divide exactly."""
    M, K = a.shape
    K2, N = b.shape
    assert K == K2
    assert M % tm == 0 and K % tk == 0 and N % tn == 0, (M, K, N, tm, tk, tn)

    has_bias = bias is not None
    in_specs = [
        pl.BlockSpec((tm, tk), lambda i, j, k: (i, k)),
        pl.BlockSpec((tk, tn), lambda i, j, k: (k, j)),
    ]
    operands = [a, b]
    if has_bias:
        in_specs.append(pl.BlockSpec((1, tn), lambda i, j, k: (0, j)))
        operands.append(bias)

    return pl.pallas_call(
        functools.partial(_matmul_kernel, apply_relu=apply_relu,
                          has_bias=has_bias),
        out_shape=jax.ShapeDtypeStruct((M, N), out_dtype),
        grid_spec=pltpu.PrefetchScalarGridSpec(
            num_scalar_prefetch=0,
            grid=(M // tm, N // tn, K // tk),
            in_specs=in_specs,
            out_specs=pl.BlockSpec((tm, tn), lambda i, j, k: (i, j)),
            scratch_shapes=[pltpu.VMEM((tm, tn), jnp.float32)],
        ),
        compiler_params=pltpu.CompilerParams(
            dimension_semantics=("parallel", "parallel", "arbitrary")),
    )(*operands)


# ----------------------------------------------------------------------------
# Fused out-layer + bias + softmax kernel (all operands fit in VMEM)
# ----------------------------------------------------------------------------
def _out_softmax_kernel(x_ref, w_ref, b_ref, o_ref):
    logits = jnp.dot(x_ref[...], w_ref[...],
                     preferred_element_type=jnp.float32) + b_ref[...]
    m = jnp.max(logits, axis=-1, keepdims=True)
    e = jnp.exp(logits - m)
    o_ref[...] = (e / jnp.sum(e, axis=-1, keepdims=True)).astype(o_ref.dtype)


def out_softmax(x, w, b):
    m = x.shape[0]
    n = w.shape[1]
    return pl.pallas_call(
        _out_softmax_kernel,
        out_shape=jax.ShapeDtypeStruct((m, n), jnp.float32),
    )(x, w, b)


# ----------------------------------------------------------------------------
# Glue: im2col patch extraction (3x3, pad 1, stride 1), NHWC, bf16
# ----------------------------------------------------------------------------
def im2col_3x3(x_nhwc, k_pad):
    """3x3 patches -> (N*H*W, k_pad) matrix, K order (kh, kw, cin)."""
    n, h, w, c = x_nhwc.shape
    xp = jnp.pad(x_nhwc, ((0, 0), (1, 1), (1, 1), (0, 0)))
    patches = [xp[:, dh:dh + h, dw:dw + w, :]
               for dh in range(3) for dw in range(3)]
    a = jnp.concatenate(patches, axis=-1).reshape(n * h * w, 9 * c)
    if k_pad > 9 * c:
        a = jnp.pad(a, ((0, 0), (0, k_pad - 9 * c)))
    return a


def conv3x3(x_nhwc, w_kn, *, apply_relu, out_dtype):
    """3x3 same conv; w_kn is the pre-laid-out (k_pad, Cout) bf16 weight."""
    n, h, w, _ = x_nhwc.shape
    k_pad, cout = w_kn.shape
    a = im2col_3x3(x_nhwc, k_pad)                      # (N*H*W, k_pad) bf16
    m = a.shape[0]
    tm = m // 2 if m % 32 == 0 else m                  # M split -> v7x megacore
    y = pallas_matmul(a, w_kn, apply_relu=apply_relu, out_dtype=out_dtype,
                      tm=tm, tn=cout, tk=k_pad)
    return y.reshape(n, h, w, cout)


def fc_layer(x, w_kn, bias):
    m, k = x.shape
    n = w_kn.shape[1]
    tn = 512 if n % 512 == 0 else n                    # N split of 2 for v7x
    tk = 2304 if k % 2304 == 0 else k                  # grid (1, 2, 4), K last
    return pallas_matmul(x, w_kn, bias=bias, out_dtype=jnp.bfloat16,
                         tm=m, tn=tn, tk=tk)


# ----------------------------------------------------------------------------
# Parameters: PyTorch-layout init (f32) + one-time kernel layout / bf16 cast
# ----------------------------------------------------------------------------
def init_params(key):
    ks = jax.random.split(key, 6)

    def norm(k, shape, fan_in):
        return jax.random.normal(k, shape, jnp.float32) / jnp.sqrt(fan_in)

    return {
        "conv1_w": norm(ks[0], (256, 51, 3, 3), 51 * 9),
        "conv2_w": norm(ks[1], (256, 256, 3, 3), 256 * 9),
        "fc_w":    norm(ks[2], (1024, 18 * 2 * 256), 18 * 2 * 256),
        "fc_b":    norm(ks[3], (1024,), 18 * 2 * 256),
        "out_w":   norm(ks[4], (36, 1024), 1024),
        "out_b":   norm(ks[5], (36,), 1024),
    }


def prepare_params(params):
    """One-time weight layout: matmul-ready (K, N), K padded, bf16 storage."""
    def conv_w(w_torch):
        cout, cin = w_torch.shape[0], w_torch.shape[1]
        w = jnp.transpose(w_torch, (2, 3, 1, 0)).reshape(9 * cin, cout)
        k_pad = _round_up(9 * cin, 128)
        if k_pad > 9 * cin:
            w = jnp.pad(w, ((0, k_pad - 9 * cin), (0, 0)))
        return w.astype(jnp.bfloat16)

    n_pad = _round_up(NUM_CLASSES, 128)                # lane-dense out layer
    out_w = jnp.pad(params["out_w"].T, ((0, 0), (0, n_pad - NUM_CLASSES)))
    out_b = jnp.pad(params["out_b"].reshape(1, -1),
                    ((0, 0), (0, n_pad - NUM_CLASSES)),
                    constant_values=-1e30)             # padded logits -> exp=0

    return {
        "conv1_w": conv_w(params["conv1_w"]),               # (512, 256)  bf16
        "conv2_w": conv_w(params["conv2_w"]),               # (2304, 256) bf16
        "fc_w":    params["fc_w"].T.astype(jnp.bfloat16),   # (9216,1024) bf16
        "fc_b":    params["fc_b"].reshape(1, -1),           # (1, 1024)   f32
        "out_w":   out_w.astype(jnp.bfloat16),              # (1024, 128) bf16
        "out_b":   out_b.astype(jnp.float32),               # (1, 128)    f32
    }


# ----------------------------------------------------------------------------
# Forward pass (input in PyTorch NCHW layout)
# ----------------------------------------------------------------------------
def network_forward(kparams, x_nchw):
    n, c, h, w = x_nchw.shape
    # TODO(synk): general (non-divisible) adaptive average pooling bins.
    assert h % POOL_H == 0 and w % POOL_W == 0

    x = jnp.transpose(x_nchw, (0, 2, 3, 1)).astype(jnp.bfloat16)   # NHWC bf16

    x = conv3x3(x, kparams["conv1_w"], apply_relu=False,
                out_dtype=jnp.bfloat16)                            # (n,h,w,256)
    x = conv3x3(x, kparams["conv2_w"], apply_relu=True,
                out_dtype=jnp.float32)                             # (n,h,w,256)

    # AdaptiveAvgPool2d((18, 2)) with exact bins (f32)
    cout = x.shape[-1]
    x = x.reshape(n, POOL_H, h // POOL_H, POOL_W, w // POOL_W, cout)
    x = jnp.mean(x, axis=(2, 4))                                   # (n,18,2,C)

    # flatten in PyTorch NCHW order: (C, H, W)
    x = jnp.transpose(x, (0, 3, 1, 2)).reshape(n, -1).astype(jnp.bfloat16)

    # pad the (tiny) batch dim once to a sublane multiple
    m_pad = max(8, _round_up(n, 8))
    if m_pad != n:
        x = jnp.pad(x, ((0, m_pad - n), (0, 0)))

    x = fc_layer(x, kparams["fc_w"], kparams["fc_b"])              # (m_pad,1024)
    y = out_softmax(x, kparams["out_w"], kparams["out_b"])         # (m_pad,128)
    return y[:n, :NUM_CLASSES]


# ----------------------------------------------------------------------------
# Pure-JAX f32 reference for correctness checking
# ----------------------------------------------------------------------------
def network_reference(params, x_nchw):
    n, c, h, w = x_nchw.shape
    x = jnp.transpose(x_nchw, (0, 2, 3, 1))

    def conv(x, w_torch):
        w_hwio = jnp.transpose(w_torch, (2, 3, 1, 0))
        return jax.lax.conv_general_dilated(
            x, w_hwio, (1, 1), "SAME",
            dimension_numbers=("NHWC", "HWIO", "NHWC"))

    x = conv(x, params["conv1_w"])
    x = jax.nn.relu(conv(x, params["conv2_w"]))
    x = x.reshape(n, POOL_H, h // POOL_H, POOL_W, w // POOL_W, 256)
    x = x.mean(axis=(2, 4))
    x = jnp.transpose(x, (0, 3, 1, 2)).reshape(n, -1)
    x = x @ params["fc_w"].T + params["fc_b"]
    x = x @ params["out_w"].T + params["out_b"]
    return jax.nn.softmax(x, axis=1)


if __name__ == "__main__":
    key = jax.random.PRNGKey(0)
    pkey, xkey = jax.random.split(key)
    torch_params = init_params(pkey)
    kparams = prepare_params(torch_params)     # one-time layout / bf16 cast

    # small input: batch=2, 51 channels, 36x4 spatial (divisible by 18x2 pool)
    x = jax.random.normal(xkey, (2, 51, 36, 4), jnp.float32)

    forward = jax.jit(network_forward)
    y = jax.block_until_ready(forward(kparams, x))
    y_ref = jax.block_until_ready(network_reference(torch_params, x))

    assert y.shape == (2, NUM_CLASSES), y.shape
    assert jnp.allclose(jnp.sum(y, axis=1), 1.0, atol=1e-4)
    # bf16 matmul inputs (f32 accumulation) vs the pure-f32 reference
    assert jnp.allclose(y, y_ref, atol=3e-3, rtol=3e-3), (
        float(jnp.max(jnp.abs(y - y_ref))))

    print("KERNEL_OK")
</pallas_src>

<mosaic_0001>
module attributes {stable_mosaic.version = 11 : i64} {
  func.func @_matmul_kernel(%arg0: i32, %arg1: i32, %arg2: i32, %arg3: memref<144x512xbf16, #tpu.memory_space<vmem>>, %arg4: memref<512x256xbf16, #tpu.memory_space<vmem>>, %arg5: memref<144x256xbf16, #tpu.memory_space<vmem>>, %arg6: memref<144x256xf32, #tpu.memory_space<vmem>>) attributes {dimension_semantics = [#tpu.dimension_semantics<parallel>, #tpu.dimension_semantics<parallel>, #tpu.dimension_semantics<arbitrary>], iteration_bounds = array<i64: 2, 1, 1>, scalar_prefetch = 0 : i64, scratch_operands = 1 : i64, tpu.core_type = #tpu.core_type<tc>, window_params = [{transform_indices = @transform_0, window_bounds = array<i64: 144, 512>}, {transform_indices = @transform_1, window_bounds = array<i64: 512, 256>}, {transform_indices = @transform_2, window_bounds = array<i64: 144, 256>}]} {
    %c0_i32 = arith.constant 0 : i32
    %0 = arith.cmpi eq, %arg2, %c0_i32 : i32
    %1 = arith.extui %0 : i1 to i32
    %c0_i32_0 = arith.constant 0 : i32
    %2 = arith.cmpi ne, %1, %c0_i32_0 : i32
    scf.if %2 {
      %cst_10 = arith.constant 0.000000e+00 : f32
      %12 = vector.broadcast %cst_10 : f32 to vector<144x256xf32>
      %c0_11 = arith.constant 0 : index
      %c0_12 = arith.constant 0 : index
      %13 = vector.load %arg6[%c0_11, %c0_12] : memref<144x256xf32, #tpu.memory_space<vmem>>, vector<144x256xf32>
      tpu.vector_store %arg6[%c0_11, %c0_12], %12 {strides = array<i32>} : memref<144x256xf32, #tpu.memory_space<vmem>>, vector<144x256xf32>,
    } else {
    }
    %c0 = arith.constant 0 : index
    %c0_1 = arith.constant 0 : index
    %3 = vector.load %arg6[%c0, %c0_1] : memref<144x256xf32, #tpu.memory_space<vmem>>, vector<144x256xf32>
    %c0_2 = arith.constant 0 : index
    %c0_3 = arith.constant 0 : index
    %4 = vector.load %arg3[%c0_2, %c0_3] : memref<144x512xbf16, #tpu.memory_space<vmem>>, vector<144x512xbf16>
    %c0_4 = arith.constant 0 : index
    %c0_5 = arith.constant 0 : index
    %5 = vector.load %arg4[%c0_4, %c0_5] : memref<512x256xbf16, #tpu.memory_space<vmem>>, vector<512x256xbf16>
    %cst = arith.constant dense<0.000000e+00> : vector<144x256xf32>
    %6 = tpu.matmul %4, %5, %cst {dimension_numbers = #tpu.dot_dimension_numbers<[1], [0], [0], [1], [0, 0, 1, 1], [], []>} : vector<144x512xbf16>, vector<512x256xbf16>, vector<144x256xf32> -> vector<144x256xf32>
    %7 = arith.addf %3, %6 : vector<144x256xf32>
    %c0_6 = arith.constant 0 : index
    %c0_7 = arith.constant 0 : index
    %8 = vector.load %arg6[%c0_6, %c0_7] : memref<144x256xf32, #tpu.memory_space<vmem>>, vector<144x256xf32>
    tpu.vector_store %arg6[%c0_6, %c0_7], %7 {strides = array<i32>} : memref<144x256xf32, #tpu.memory_space<vmem>>, vector<144x256xf32>,
    %c0_i32_8 = arith.constant 0 : i32
    %9 = arith.cmpi eq, %arg2, %c0_i32_8 : i32
    %10 = arith.extui %9 : i1 to i32
    %c0_i32_9 = arith.constant 0 : i32
    %11 = arith.cmpi ne, %10, %c0_i32_9 : i32
    scf.if %11 {
      %c0_10 = arith.constant 0 : index
      %c0_11 = arith.constant 0 : index
      %12 = vector.load %arg6[%c0_10, %c0_11] : memref<144x256xf32, #tpu.memory_space<vmem>>, vector<144x256xf32>
      %13 = arith.truncf %12 : vector<144x256xf32> to vector<144x256xbf16>
      %c0_12 = arith.constant 0 : index
      %c0_13 = arith.constant 0 : index
      %14 = vector.load %arg5[%c0_12, %c0_13] : memref<144x256xbf16, #tpu.memory_space<vmem>>, vector<144x256xbf16>
      tpu.vector_store %arg5[%c0_12, %c0_13], %13 {strides = array<i32>} : memref<144x256xbf16, #tpu.memory_space<vmem>>, vector<144x256xbf16>,
    } else {
    }
    return
  }
  func.func @transform_0(%arg0: i32, %arg1: i32, %arg2: i32) -> (i32, i32) {
    %c0_i32 = arith.constant 0 : i32
    return %arg0, %arg2 : i32, i32
  }
  func.func @transform_1(%arg0: i32, %arg1: i32, %arg2: i32) -> (i32, i32) {
    %c0_i32 = arith.constant 0 : i32
    return %arg2, %arg1 : i32, i32
  }
  func.func @transform_2(%arg0: i32, %arg1: i32, %arg2: i32) -> (i32, i32) {
    %c0_i32 = arith.constant 0 : i32
    return %arg0, %arg1 : i32, i32
  }
}

module attributes {stable_mosaic.version = 11 : i64} {
  func.func @_matmul_kernel(%arg0: i32, %arg1: i32, %arg2: i32, %arg3: memref<144x2304xbf16, #tpu.memory_space<vmem>>, %arg4: memref<2304x256xbf16, #tpu.memory_space<vmem>>, %arg5: memref<144x256xf32, #tpu.memory_space<vmem>>, %arg6: memref<144x256xf32, #tpu.memory_space<vmem>>) attributes {dimension_semantics = [#tpu.dimension_semantics<parallel>, #tpu.dimension_semantics<parallel>, #tpu.dimension_semantics<arbitrary>], iteration_bounds = array<i64: 2, 1, 1>, scalar_prefetch = 0 : i64, scratch_operands = 1 : i64, tpu.core_type = #tpu.core_type<tc>, window_params = [{transform_indices = @transform_0, window_bounds = array<i64: 144, 2304>}, {transform_indices = @transform_1, window_bounds = array<i64: 2304, 256>}, {transform_indices = @transform_2, window_bounds = array<i64: 144, 256>}]} {
    %c0_i32 = arith.constant 0 : i32
    %0 = arith.cmpi eq, %arg2, %c0_i32 : i32
    %1 = arith.extui %0 : i1 to i32
    %c0_i32_0 = arith.constant 0 : i32
    %2 = arith.cmpi ne, %1, %c0_i32_0 : i32
    scf.if %2 {
      %cst_10 = arith.constant 0.000000e+00 : f32
      %12 = vector.broadcast %cst_10 : f32 to vector<144x256xf32>
      %c0_11 = arith.constant 0 : index
      %c0_12 = arith.constant 0 : index
      %13 = vector.load %arg6[%c0_11, %c0_12] : memref<144x256xf32, #tpu.memory_space<vmem>>, vector<144x256xf32>
      tpu.vector_store %arg6[%c0_11, %c0_12], %12 {strides = array<i32>} : memref<144x256xf32, #tpu.memory_space<vmem>>, vector<144x256xf32>,
    } else {
    }
    %c0 = arith.constant 0 : index
    %c0_1 = arith.constant 0 : index
    %3 = vector.load %arg6[%c0, %c0_1] : memref<144x256xf32, #tpu.memory_space<vmem>>, vector<144x256xf32>
    %c0_2 = arith.constant 0 : index
    %c0_3 = arith.constant 0 : index
    %4 = vector.load %arg3[%c0_2, %c0_3] : memref<144x2304xbf16, #tpu.memory_space<vmem>>, vector<144x2304xbf16>
    %c0_4 = arith.constant 0 : index
    %c0_5 = arith.constant 0 : index
    %5 = vector.load %arg4[%c0_4, %c0_5] : memref<2304x256xbf16, #tpu.memory_space<vmem>>, vector<2304x256xbf16>
    %cst = arith.constant dense<0.000000e+00> : vector<144x256xf32>
    %6 = tpu.matmul %4, %5, %cst {dimension_numbers = #tpu.dot_dimension_numbers<[1], [0], [0], [1], [0, 0, 1, 1], [], []>} : vector<144x2304xbf16>, vector<2304x256xbf16>, vector<144x256xf32> -> vector<144x256xf32>
    %7 = arith.addf %3, %6 : vector<144x256xf32>
    %c0_6 = arith.constant 0 : index
    %c0_7 = arith.constant 0 : index
    %8 = vector.load %arg6[%c0_6, %c0_7] : memref<144x256xf32, #tpu.memory_space<vmem>>, vector<144x256xf32>
    tpu.vector_store %arg6[%c0_6, %c0_7], %7 {strides = array<i32>} : memref<144x256xf32, #tpu.memory_space<vmem>>, vector<144x256xf32>,
    %c0_i32_8 = arith.constant 0 : i32
    %9 = arith.cmpi eq, %arg2, %c0_i32_8 : i32
    %10 = arith.extui %9 : i1 to i32
    %c0_i32_9 = arith.constant 0 : i32
    %11 = arith.cmpi ne, %10, %c0_i32_9 : i32
    scf.if %11 {
      %c0_10 = arith.constant 0 : index
      %c0_11 = arith.constant 0 : index
      %12 = vector.load %arg6[%c0_10, %c0_11] : memref<144x256xf32, #tpu.memory_space<vmem>>, vector<144x256xf32>
      %cst_12 = arith.constant 0.000000e+00 : f32
      %13 = vector.broadcast %cst_12 : f32 to vector<144x256xf32>
      %14 = arith.maximumf %12, %13 : vector<144x256xf32>
      %c0_13 = arith.constant 0 : index
      %c0_14 = arith.constant 0 : index
      %15 = vector.load %arg5[%c0_13, %c0_14] : memref<144x256xf32, #tpu.memory_space<vmem>>, vector<144x256xf32>
      tpu.vector_store %arg5[%c0_13, %c0_14], %14 {strides = array<i32>} : memref<144x256xf32, #tpu.memory_space<vmem>>, vector<144x256xf32>,
    } else {
    }
    return
  }
  func.func @transform_0(%arg0: i32, %arg1: i32, %arg2: i32) -> (i32, i32) {
    %c0_i32 = arith.constant 0 : i32
    return %arg0, %arg2 : i32, i32
  }
  func.func @transform_1(%arg0: i32, %arg1: i32, %arg2: i32) -> (i32, i32) {
    %c0_i32 = arith.constant 0 : i32
    return %arg2, %arg1 : i32, i32
  }
  func.func @transform_2(%arg0: i32, %arg1: i32, %arg2: i32) -> (i32, i32) {
    %c0_i32 = arith.constant 0 : i32
    return %arg0, %arg1 : i32, i32
  }
}

module attributes {stable_mosaic.version = 11 : i64} {
  func.func @_matmul_kernel(%arg0: i32, %arg1: i32, %arg2: i32, %arg3: memref<8x2304xbf16, #tpu.memory_space<vmem>>, %arg4: memref<2304x512xbf16, #tpu.memory_space<vmem>>, %arg5: memref<1x512xf32, #tpu.memory_space<vmem>>, %arg6: memref<8x512xbf16, #tpu.memory_space<vmem>>, %arg7: memref<8x512xf32, #tpu.memory_space<vmem>>) attributes {dimension_semantics = [#tpu.dimension_semantics<parallel>, #tpu.dimension_semantics<parallel>, #tpu.dimension_semantics<arbitrary>], iteration_bounds = array<i64: 1, 2, 4>, scalar_prefetch = 0 : i64, scratch_operands = 1 : i64, tpu.core_type = #tpu.core_type<tc>, window_params = [{transform_indices = @transform_0, window_bounds = array<i64: 8, 2304>}, {transform_indices = @transform_1, window_bounds = array<i64: 2304, 512>}, {transform_indices = @transform_2, window_bounds = array<i64: 1, 512>}, {transform_indices = @transform_3, window_bounds = array<i64: 8, 512>}]} {
    %c0_i32 = arith.constant 0 : i32
    %0 = arith.cmpi eq, %arg2, %c0_i32 : i32
    %1 = arith.extui %0 : i1 to i32
    %c0_i32_0 = arith.constant 0 : i32
    %2 = arith.cmpi ne, %1, %c0_i32_0 : i32
    scf.if %2 {
      %cst_9 = arith.constant 0.000000e+00 : f32
      %12 = vector.broadcast %cst_9 : f32 to vector<8x512xf32>
      %c0_10 = arith.constant 0 : index
      %c0_11 = arith.constant 0 : index
      %13 = vector.load %arg7[%c0_10, %c0_11] : memref<8x512xf32, #tpu.memory_space<vmem>>, vector<8x512xf32>
      tpu.vector_store %arg7[%c0_10, %c0_11], %12 {strides = array<i32>} : memref<8x512xf32, #tpu.memory_space<vmem>>, vector<8x512xf32>,
    } else {
    }
    %c0 = arith.constant 0 : index
    %c0_1 = arith.constant 0 : index
    %3 = vector.load %arg7[%c0, %c0_1] : memref<8x512xf32, #tpu.memory_space<vmem>>, vector<8x512xf32>
    %c0_2 = arith.constant 0 : index
    %c0_3 = arith.constant 0 : index
    %4 = vector.load %arg3[%c0_2, %c0_3] : memref<8x2304xbf16, #tpu.memory_space<vmem>>, vector<8x2304xbf16>
    %c0_4 = arith.constant 0 : index
    %c0_5 = arith.constant 0 : index
    %5 = vector.load %arg4[%c0_4, %c0_5] : memref<2304x512xbf16, #tpu.memory_space<vmem>>, vector<2304x512xbf16>
    %cst = arith.constant dense<0.000000e+00> : vector<8x512xf32>
    %6 = tpu.matmul %4, %5, %cst {dimension_numbers = #tpu.dot_dimension_numbers<[1], [0], [0], [1], [0, 0, 1, 1], [], []>} : vector<8x2304xbf16>, vector<2304x512xbf16>, vector<8x512xf32> -> vector<8x512xf32>
    %7 = arith.addf %3, %6 : vector<8x512xf32>
    %c0_6 = arith.constant 0 : index
    %c0_7 = arith.constant 0 : index
    %8 = vector.load %arg7[%c0_6, %c0_7] : memref<8x512xf32, #tpu.memory_space<vmem>>, vector<8x512xf32>
    tpu.vector_store %arg7[%c0_6, %c0_7], %7 {strides = array<i32>} : memref<8x512xf32, #tpu.memory_space<vmem>>, vector<8x512xf32>,
    %c3_i32 = arith.constant 3 : i32
    %9 = arith.cmpi eq, %arg2, %c3_i32 : i32
    %10 = arith.extui %9 : i1 to i32
    %c0_i32_8 = arith.constant 0 : i32
    %11 = arith.cmpi ne, %10, %c0_i32_8 : i32
    scf.if %11 {
      %c0_9 = arith.constant 0 : index
      %c0_10 = arith.constant 0 : index
      %12 = vector.load %arg7[%c0_9, %c0_10] : memref<8x512xf32, #tpu.memory_space<vmem>>, vector<8x512xf32>
      %c0_11 = arith.constant 0 : index
      %c0_12 = arith.constant 0 : index
      %13 = vector.load %arg5[%c0_11, %c0_12] : memref<1x512xf32, #tpu.memory_space<vmem>>, vector<1x512xf32>
      %14 = vector.broadcast %13 : vector<1x512xf32> to vector<8x512xf32>
      %15 = arith.addf %12, %14 : vector<8x512xf32>
      %16 = arith.truncf %15 : vector<8x512xf32> to vector<8x512xbf16>
      %c0_13 = arith.constant 0 : index
      %c0_14 = arith.constant 0 : index
      %17 = vector.load %arg6[%c0_13, %c0_14] : memref<8x512xbf16, #tpu.memory_space<vmem>>, vector<8x512xbf16>
      tpu.vector_store %arg6[%c0_13, %c0_14], %16 {strides = array<i32>} : memref<8x512xbf16, #tpu.memory_space<vmem>>, vector<8x512xbf16>,
    } else {
    }
    return
  }
  func.func @transform_0(%arg0: i32, %arg1: i32, %arg2: i32) -> (i32, i32) {
    %c0_i32 = arith.constant 0 : i32
    return %arg0, %arg2 : i32, i32
  }
  func.func @transform_1(%arg0: i32, %arg1: i32, %arg2: i32) -> (i32, i32) {
    %c0_i32 = arith.constant 0 : i32
    return %arg2, %arg1 : i32, i32
  }
  func.func @transform_2(%arg0: i32, %arg1: i32, %arg2: i32) -> (i32, i32) {
    %c0_i32 = arith.constant 0 : i32
    %c0_i32_0 = arith.constant 0 : i32
    return %c0_i32, %arg1 : i32, i32
  }
  func.func @transform_3(%arg0: i32, %arg1: i32, %arg2: i32) -> (i32, i32) {
    %c0_i32 = arith.constant 0 : i32
    return %arg0, %arg1 : i32, i32
  }
}

module attributes {stable_mosaic.version = 11 : i64} {
  func.func @_out_softmax_kernel(%arg0: memref<8x1024xbf16, #tpu.memory_space<vmem>>, %arg1: memref<1024x128xbf16, #tpu.memory_space<vmem>>, %arg2: memref<1x128xf32, #tpu.memory_space<vmem>>, %arg3: memref<8x128xf32, #tpu.memory_space<vmem>>) attributes {dimension_semantics = [], scalar_prefetch = 0 : i64, scratch_operands = 0 : i64, tpu.core_type = #tpu.core_type<tc>} {
    %c0 = arith.constant 0 : index
    %c0_0 = arith.constant 0 : index
    %0 = vector.load %arg0[%c0, %c0_0] : memref<8x1024xbf16, #tpu.memory_space<vmem>>, vector<8x1024xbf16>
    %c0_1 = arith.constant 0 : index
    %c0_2 = arith.constant 0 : index
    %1 = vector.load %arg1[%c0_1, %c0_2] : memref<1024x128xbf16, #tpu.memory_space<vmem>>, vector<1024x128xbf16>
    %cst = arith.constant dense<0.000000e+00> : vector<8x128xf32>
    %2 = tpu.matmul %0, %1, %cst {dimension_numbers = #tpu.dot_dimension_numbers<[1], [0], [0], [1], [0, 0, 1, 1], [], []>} : vector<8x1024xbf16>, vector<1024x128xbf16>, vector<8x128xf32> -> vector<8x128xf32>
    %c0_3 = arith.constant 0 : index
    %c0_4 = arith.constant 0 : index
    %3 = vector.load %arg2[%c0_3, %c0_4] : memref<1x128xf32, #tpu.memory_space<vmem>>, vector<1x128xf32>
    %4 = vector.broadcast %3 : vector<1x128xf32> to vector<8x128xf32>
    %5 = arith.addf %2, %4 : vector<8x128xf32>
    %cst_5 = arith.constant dense<0xFF800000> : vector<8xf32>
    %6 = vector.multi_reduction <maximumf>, %5, %cst_5 [1] : vector<8x128xf32> to vector<8xf32>
    %7 = vector.shape_cast %6 : vector<8xf32> to vector<8x1xf32>
    %8 = vector.broadcast %7 : vector<8x1xf32> to vector<8x128xf32>
    %9 = arith.subf %5, %8 : vector<8x128xf32>
    %10 = math.exp %9 : vector<8x128xf32>
    %cst_6 = arith.constant dense<0.000000e+00> : vector<8xf32>
    %11 = vector.multi_reduction <add>, %10, %cst_6 [1] : vector<8x128xf32> to vector<8xf32>
    %12 = vector.shape_cast %11 : vector<8xf32> to vector<8x1xf32>
    %13 = vector.broadcast %12 : vector<8x1xf32> to vector<8x128xf32>
    %14 = arith.divf %10, %13 : vector<8x128xf32>
    %c0_7 = arith.constant 0 : index
    %c0_8 = arith.constant 0 : index
    %15 = vector.load %arg3[%c0_7, %c0_8] : memref<8x128xf32, #tpu.memory_space<vmem>>, vector<8x128xf32>
    tpu.vector_store %arg3[%c0_7, %c0_8], %14 {strides = array<i32>} : memref<8x128xf32, #tpu.memory_space<vmem>>, vector<8x128xf32>,
    return
  }
}

</mosaic_0001>

<bundles_post_ra>
// kernel: network_forward.4
= control target key start
LH: loop header
LB: loop body
LE: loop exit
PB: predicated region body
PF: predicated region fallthrough
CT: control target
= control target key end

     0   :  { %s2185_s9 = smov 0   ;;  %s2187_s10 = smov 0   ;;  %s2901_s0 = inlined_call_operand.vmem [shape: bf16[288,512], index: 0, kind: input, shape index: {}]   ;;  %s2902_s1 = inlined_call_operand.vmem [shape: bf16[512,256], index: 1, kind: input, shape index: {}]   ;;  %s2903_s2 = inlined_call_operand.vmem [shape: bf16[288,256], index: 2, kind: output, shape index: {}]  }
   0x1   :  { %s2189_s11 = smov 0  }
   0x2 LB: > { %s31_s12 = sadd.s32 1, %s2164_s10  ;;  %p1613_p0 = scmp.ge.s32.totalorder %s2168_s11, 1  ;;  %s2168_s11 = sphi %s2189_s11, %s12_s11   ;;  %s2164_s10 = sphi %s2187_s10, %s2905_s10   ;;  %s2160_s9 = sphi %s2185_s9, %s2904_s9  }
   0x3   : > { %p33_p1 = scmp.ge.s32.totalorder %s31_s12, 2  ;;  %p161_p2 = scmp.lt.s32.totalorder %s2168_s11, 3 }
   0x5   : > { %s2907_s12 = smov (%p33_p1, %s31_s12), 0  ;;  %p162_p3 = pnand %p1613_p0, %p161_p2 }
   0x6   : > { %s203_s27 = smul.u32 (!%p162_p3), 18, %s2160_s9 }
   0x7   : > { %165 = sbr.rel (%p162_p3) target bundleno = 467 (0x1d3), region = 28 }
   0x8   : > { %p205_p4 = scmp.lt.s32.totalorder (!%p162_p3), %s203_s27, 35 }
   0xc   : > { %v1820_v0 = vld [vmem:[%s2902_s1 + $0x70] sm:$0xf]  ;;  %v2073_v1 = vld [vmem:[%s2902_s1 + $0x74] sm:$0xf0]  ;;  %v1812_v11 = vld [vmem:[%s2902_s1 + $0x60] sm:$0xf] }
   0xd   : > { %v1884_v2 = vld [vmem:[%s2902_s1 + $0xf0] sm:$0xf]  ;;  %v1821_v3 = vor.u32 %v2073_v1, %v1820_v0  ;;  %v2089_v4 = vld [vmem:[%s2902_s1 + $0xf4] sm:$0xf0]  ;;  %v2071_v13 = vld [vmem:[%s2902_s1 + $0x64] sm:$0xf0] }
   0xe   : > { %v1948_v5 = vld [vmem:[%s2902_s1 + $0x170] sm:$0xf]  ;;  %v2105_v6 = vld [vmem:[%s2902_s1 + $0x174] sm:$0xf0]  ;;  %v1885_v7 = vor.u32 %v2089_v4, %v1884_v2  ;;  %v1876_v14 = vld [vmem:[%s2902_s1 + $0xe0] sm:$0xf]  ;;  %v1813_v16 = vor.u32 %v2071_v13, %v1812_v11 }
   0xf   : > { %v1949_v8 = vor.u32 %v2105_v6, %v1948_v5  ;;  %v2012_v9 = vld [vmem:[%s2902_s1 + $0x1f0] sm:$0xf]  ;;  %v2121_v10 = vld [vmem:[%s2902_s1 + $0x1f4] sm:$0xf0]  ;;  %915 = vmatpush.bf16.msra.mxu0 %v1821_v3  ;;  %v2087_v15 = vld [vmem:[%s2902_s1 + $0xe4] sm:$0xf0] }
  0x10   : > { %v2013_v12 = vor.u32 %v2121_v10, %v2012_v9  ;;  %969 = vmatpush.bf16.msra.mxu1 %v1885_v7  ;;  %v1877_v17 = vor.u32 %v2087_v15, %v1876_v14  ;;  %v1940_v18 = vld [vmem:[%s2902_s1 + $0x160] sm:$0xf]  ;;  %v2103_v19 = vld [vmem:[%s2902_s1 + $0x164] sm:$0xf0]  ;;  %v1804_v23 = vld [vmem:[%s2902_s1 + $0x50] sm:$0xf] }
  0x11   : > { %1023 = vmatpush.bf16.msra.mxu2 %v1949_v8  ;;  %v2004_v20 = vld [vmem:[%s2902_s1 + $0x1e0] sm:$0xf]  ;;  %v1941_v21 = vor.u32 %v2103_v19, %v1940_v18  ;;  %v2119_v22 = vld [vmem:[%s2902_s1 + $0x1e4] sm:$0xf0]  ;;  %v2069_v24 = vld [vmem:[%s2902_s1 + $0x54] sm:$0xf0] }
  0x12   : > { %1077 = vmatpush.bf16.msra.mxu3 %v2013_v12  ;;  %v2005_v25 = vor.u32 %v2119_v22, %v2004_v20  ;;  %v1868_v26 = vld [vmem:[%s2902_s1 + $0xd0] sm:$0xf]  ;;  %v2085_v27 = vld [vmem:[%s2902_s1 + $0xd4] sm:$0xf0]  ;;  %v1805_v29 = vor.u32 %v2069_v24, %v1804_v23  ;;  %v1796_v35 = vld [vmem:[%s2902_s1 + $0x40] sm:$0xf] }
  0x13   : > { %v1932_v28 = vld [vmem:[%s2902_s1 + $0x150] sm:$0xf]  ;;  %916 = vmatpush.bf16.msra.mxu0 %v1813_v16  ;;  %v2101_v30 = vld [vmem:[%s2902_s1 + $0x154] sm:$0xf0]  ;;  %v1869_v33 = vor.u32 %v2085_v27, %v1868_v26  ;;  %v2067_v36 = vld [vmem:[%s2902_s1 + $0x44] sm:$0xf0] }
  0x14   : > { %v1996_v31 = vld [vmem:[%s2902_s1 + $0x1d0] sm:$0xf]  ;;  %v2117_v32 = vld [vmem:[%s2902_s1 + $0x1d4] sm:$0xf0]  ;;  %970 = vmatpush.bf16.msra.mxu1 %v1877_v17  ;;  %v1933_v34 = vor.u32 %v2101_v30, %v1932_v28  ;;  %v1860_v37 = vld [vmem:[%s2902_s1 + $0xc0] sm:$0xf]  ;;  %v1797_v44 = vor.u32 %v2067_v36, %v1796_v35 }
  0x15   : > { %1024 = vmatpush.bf16.msra.mxu2 %v1941_v21  ;;  %v1997_v38 = vor.u32 %v2117_v32, %v1996_v31  ;;  %v2083_v39 = vld [vmem:[%s2902_s1 + $0xc4] sm:$0xf0]  ;;  %v1924_v40 = vld [vmem:[%s2902_s1 + $0x140] sm:$0xf]  ;;  %v1788_v47 = vld [vmem:[%s2902_s1 + $0x30] sm:$0xf] }
  0x16   : > { %1078 = vmatpush.bf16.msra.mxu3 %v2005_v25  ;;  %v2099_v41 = vld [vmem:[%s2902_s1 + $0x144] sm:$0xf0]  ;;  %v1988_v42 = vld [vmem:[%s2902_s1 + $0x1c0] sm:$0xf]  ;;  %v1861_v45 = vor.u32 %v2083_v39, %v1860_v37  ;;  %v2065_v48 = vld [vmem:[%s2902_s1 + $0x34] sm:$0xf0] }
  0x17   : > { %v2115_v43 = vld [vmem:[%s2902_s1 + $0x1c4] sm:$0xf0]  ;;  %917 = vmatpush.bf16.msra.mxu0 %v1805_v29  ;;  %v1925_v46 = vor.u32 %v2099_v41, %v1924_v40  ;;  %v1852_v49 = vld [vmem:[%s2902_s1 + $0xb0] sm:$0xf]  ;;  %v2081_v51 = vld [vmem:[%s2902_s1 + $0xb4] sm:$0xf0]  ;;  %v1789_v56 = vor.u32 %v2065_v48, %v1788_v47 }
  0x18   : > { %971 = vmatpush.bf16.msra.mxu1 %v1869_v33  ;;  %v1989_v50 = vor.u32 %v2115_v43, %v1988_v42  ;;  %v1916_v52 = vld [vmem:[%s2902_s1 + $0x130] sm:$0xf]  ;;  %v2097_v53 = vld [vmem:[%s2902_s1 + $0x134] sm:$0xf0]  ;;  %v1853_v57 = vor.u32 %v2081_v51, %v1852_v49  ;;  %v1780_v59 = vld [vmem:[%s2902_s1 + $0x20] sm:$0xf] }
  0x19   : > { %1025 = vmatpush.bf16.msra.mxu2 %v1933_v34  ;;  %v1980_v54 = vld [vmem:[%s2902_s1 + $0x1b0] sm:$0xf]  ;;  %v2113_v55 = vld [vmem:[%s2902_s1 + $0x1b4] sm:$0xf0]  ;;  %v1917_v58 = vor.u32 %v2097_v53, %v1916_v52  ;;  %v2063_v60 = vld [vmem:[%s2902_s1 + $0x24] sm:$0xf0] }
  0x1a   : > { %1079 = vmatpush.bf16.msra.mxu3 %v1997_v38  ;;  %v1844_v61 = vld [vmem:[%s2902_s1 + $0xa0] sm:$0xf]  ;;  %v1981_v62 = vor.u32 %v2113_v55, %v1980_v54  ;;  %v2079_v63 = vld [vmem:[%s2902_s1 + $0xa4] sm:$0xf0]  ;;  %v1781_v4 = vor.u32 %v2063_v60, %v1780_v59  ;;  %v1772_v5 = vld [vmem:[%s2902_s1 + $0x10] sm:$0xf] }
  0x1b   : > { %918 = vmatpush.bf16.msra.mxu0 %v1797_v44  ;;  %v1908_v0 = vld [vmem:[%s2902_s1 + $0x120] sm:$0xf]  ;;  %v2095_v1 = vld [vmem:[%s2902_s1 + $0x124] sm:$0xf0]  ;;  %v2061_v6 = vld [vmem:[%s2902_s1 + $0x14] sm:$0xf0]  ;;  %v1845_v7 = vor.u32 %v2079_v63, %v1844_v61 }
  0x1c   : > { %972 = vmatpush.bf16.msra.mxu1 %v1861_v45  ;;  %v1972_v2 = vld [vmem:[%s2902_s1 + $0x1a0] sm:$0xf]  ;;  %v2111_v3 = vld [vmem:[%s2902_s1 + $0x1a4] sm:$0xf0]  ;;  %v1909_v8 = vor.u32 %v2095_v1, %v1908_v0  ;;  %v1836_v9 = vld [vmem:[%s2902_s1 + $0x90] sm:$0xf]  ;;  %v1773_v18 = vor.u32 %v2061_v6, %v1772_v5 }
  0x1d   : > { %1026 = vmatpush.bf16.msra.mxu2 %v1925_v46  ;;  %v2077_v10 = vld [vmem:[%s2902_s1 + $0x94] sm:$0xf0]  ;;  %v1900_v11 = vld [vmem:[%s2902_s1 + $0x110] sm:$0xf]  ;;  %v1973_v12 = vor.u32 %v2111_v3, %v1972_v2  ;;  %v1764_v16 = vld [vmem:[%s2902_s1] sm:$0xf] }
  0x1e   : > { %1080 = vmatpush.bf16.msra.mxu3 %v1989_v50  ;;  %v2093_v13 = vld [vmem:[%s2902_s1 + $0x114] sm:$0xf0]  ;;  %v1964_v14 = vld [vmem:[%s2902_s1 + $0x190] sm:$0xf]  ;;  %v2059_v17 = vld [vmem:[%s2902_s1 + $0x4] sm:$0xf0]  ;;  %v1837_v21 = vor.u32 %v2077_v10, %v1836_v9 }
  0x1f   : > { %919 = vmatpush.bf16.msra.mxu0 %v1789_v56  ;;  %v2109_v15 = vld [vmem:[%s2902_s1 + $0x194] sm:$0xf0]  ;;  %v1828_v19 = vld [vmem:[%s2902_s1 + $0x80] sm:$0xf]  ;;  %v2075_v20 = vld [vmem:[%s2902_s1 + $0x84] sm:$0xf0]  ;;  %v1901_v22 = vor.u32 %v2093_v13, %v1900_v11  ;;  %v1765_v32 = vor.u32 %v2059_v17, %v1764_v16 }
  0x20   : > { %973 = vmatpush.bf16.msra.mxu1 %v1853_v57  ;;  %v1892_v23 = vld [vmem:[%s2902_s1 + $0x100] sm:$0xf]  ;;  %v2091_v24 = vld [vmem:[%s2902_s1 + $0x104] sm:$0xf0]  ;;  %v1965_v26 = vor.u32 %v2109_v15, %v1964_v14  ;;  %s2909_s27 = smov (!%p205_p4, %s203_s27), 35  ;;  %v1829_v35 = vor.u32 %v2075_v20, %v1828_v19 }
  0x21   : > { %1027 = vmatpush.bf16.msra.mxu2 %v1917_v58  ;;  %v1956_v25 = vld [vmem:[%s2902_s1 + $0x180] sm:$0xf]  ;;  %v2107_v27 = vld [vmem:[%s2902_s1 + $0x184] sm:$0xf0]  ;;  %v2104_v28 = vld [vmem:[%s2902_s1 + $0x174] sm:$0xf]  ;;  %v1893_v36 = vor.u32 %v2091_v24, %v1892_v23 }
  0x22   : > { %1081 = vmatpush.bf16.msra.mxu3 %v1981_v62  ;;  %v1950_v29 = vld [vmem:[%s2902_s1 + $0x178] sm:$0xf0]  ;;  %v2120_v30 = vld [vmem:[%s2902_s1 + $0x1f4] sm:$0xf]  ;;  %s2020_s30 = sshll.u32 %s2909_s27, 4  ;;  %v1957_v41 = vor.u32 %v2107_v27, %v1956_v25 }
  0x23   : > { %920 = vmatpush.bf16.msra.mxu0 %v1781_v4  ;;  %v2014_v31 = vld [vmem:[%s2902_s1 + $0x1f8] sm:$0xf0]  ;;  %v2072_v33 = vld [vmem:[%s2902_s1 + $0x74] sm:$0xf]  ;;  %s2422_s9 = scalar_lea.vmem %s2901_s0, %s2020_s30  ;;  %v2102_v39 = vld [vmem:[%s2902_s1 + $0x164] sm:$0xf]  ;;  %v1953_v45 = vor.u32 %v2104_v28, %v1950_v29 }
  0x24   : > { %974 = vmatpush.bf16.msra.mxu1 %v1845_v7  ;;  %v1822_v34 = vld [vmem:[%s2902_s1 + $0x78] sm:$0xf0]  ;;  %v2088_v37 = vld [vmem:[%s2902_s1 + $0xf4] sm:$0xf]  ;;  %v1942_v40 = vld [vmem:[%s2902_s1 + $0x168] sm:$0xf0]  ;;  %v2017_v51 = vor.u32 %v2120_v30, %v2014_v31 }
  0x25   : > { %1028 = vmatpush.bf16.msra.mxu2 %v1909_v8  ;;  %v1886_v38 = vld [vmem:[%s2902_s1 + $0xf8] sm:$0xf0]  ;;  %v1620_v42 = vld [vmem:[%s2422_s9] sm:$0xf]  ;;  %v2024_v43 = vld [vmem:[%s2422_s9 + $0xc] sm:$0xf0]  ;;  %v1825_v58 = vor.u32 %v2072_v33, %v1822_v34  ;;  %v1945_v60 = vor.u32 %v2102_v39, %v1942_v40 }
  0x26   : > { %1082 = vmatpush.bf16.msra.mxu3 %v1973_v12  ;;  %v2022_v44 = vld [vmem:[%s2422_s9 + $0x4] sm:$0xf]  ;;  %v2442_v47 = vor.u32 %v2024_v43, %v1620_v42  ;;  %v1622_v48 = vld [vmem:[%s2422_s9 + $0x10] sm:$0xf0]  ;;  %v1628_v49 = vld [vmem:[%s2422_s9 + $0x8] sm:$0xf]  ;;  %v1889_v59 = vor.u32 %v2088_v37, %v1886_v38 }
  0x27   : > { %921 = vmatpush.bf16.msra.mxu0 %v1773_v18  ;;  %v2118_v46 = vld [vmem:[%s2902_s1 + $0x1e4] sm:$0xf]  ;;  %v2025_v50 = vld [vmem:[%s2422_s9 + $0x14] sm:$0xf0]  ;;  %v2447_v52 = vor.u32 %v2022_v44, %v1622_v48  ;;  %v2023_v54 = vld [vmem:[%s2422_s9 + $0xc] sm:$0xf] }
  0x28   : > { %975 = vmatpush.bf16.msra.mxu1 %v1837_v21  ;;  %v2449_v53 = vor.u32 %v2025_v50, %v1628_v49  ;;  %v1630_v55 = vld [vmem:[%s2422_s9 + $0x18] sm:$0xf0]  ;;  %v2006_v56 = vld [vmem:[%s2902_s1 + $0x1e8] sm:$0xf0]  ;;  %v2070_v61 = vld [vmem:[%s2902_s1 + $0x64] sm:$0xf] }
  0x29   : > { %1029 = vmatpush.bf16.msra.mxu2 %v1901_v22  ;;  %v2456_v57 = vor.u32 %v2023_v54, %v1630_v55  ;;  %v1814_v62 = vld [vmem:[%s2902_s1 + $0x68] sm:$0xf0]  ;;  %v2009_v63 = vor.u32 %v2118_v46, %v2006_v56  ;;  %v2086_v0 = vld [vmem:[%s2902_s1 + $0xe4] sm:$0xf]  ;;  %v2100_v4 = vld [vmem:[%s2902_s1 + $0x154] sm:$0xf] }
  0x2a   : > { %1083 = vmatpush.bf16.msra.mxu3 %v1965_v26  ;;  %v1878_v1 = vld [vmem:[%s2902_s1 + $0xe8] sm:$0xf0]  ;;  %v1817_v2 = vor.u32 %v2070_v61, %v1814_v62  ;;  %v1934_v5 = vld [vmem:[%s2902_s1 + $0x158] sm:$0xf0]  ;;  %v2116_v6 = vld [vmem:[%s2902_s1 + $0x1d4] sm:$0xf] }
  0x2b   : > { %922 = vmatpush.bf16.msra.mxu0 %v1765_v32  ;;  %v1881_v3 = vor.u32 %v2086_v0, %v1878_v1  ;;  %v1937_v7 = vor.u32 %v2100_v4, %v1934_v5  ;;  %v1998_v8 = vld [vmem:[%s2902_s1 + $0x1d8] sm:$0xf0]  ;;  %v2068_v9 = vld [vmem:[%s2902_s1 + $0x54] sm:$0xf]  ;;  %v1636_v16 = vld [vmem:[%s2422_s9 + $0x20] sm:$0xf] }
  0x2c   : > { %976 = vmatpush.bf16.msra.mxu1 %v1829_v35  ;;  %v1806_v10 = vld [vmem:[%s2902_s1 + $0x58] sm:$0xf0]  ;;  %v2001_v11 = vor.u32 %v2116_v6, %v1998_v8  ;;  %v2084_v12 = vld [vmem:[%s2902_s1 + $0xd4] sm:$0xf]  ;;  %v2028_v17 = vld [vmem:[%s2422_s9 + $0x2c] sm:$0xf0] }
  0x2d   : > { %1030 = vmatpush.bf16.msra.mxu2 %v1893_v36  ;;  %v1870_v13 = vld [vmem:[%s2902_s1 + $0xd8] sm:$0xf0]  ;;  %v1809_v14 = vor.u32 %v2068_v9, %v1806_v10  ;;  %v2026_v18 = vld [vmem:[%s2422_s9 + $0x24] sm:$0xf]  ;;  %v1638_v19 = vld [vmem:[%s2422_s9 + $0x30] sm:$0xf0]  ;;  %v2506_v24 = vor.u32 %v2028_v17, %v1636_v16 }
  0x2e   : > { %1084 = vmatpush.bf16.msra.mxu3 %v1957_v41  ;;  %923 = vmatmul.bf16.vlgmr.msra.gmra.mxu0 %v2442_v47  ;;  %v1873_v15 = vor.u32 %v2084_v12, %v1870_v13  ;;  %v1644_v20 = vld [vmem:[%s2422_s9 + $0x28] sm:$0xf]  ;;  %v2029_v21 = vld [vmem:[%s2422_s9 + $0x34] sm:$0xf0]  ;;  %v2027_v22 = vld [vmem:[%s2422_s9 + $0x2c] sm:$0xf]  ;;  %v2508_v25 = vor.u32 %v2026_v18, %v1638_v19 }
  0x2f   : > { %977 = vmatmul.bf16.vlgmr.msra.gmra.mxu1 %v2447_v52  ;;  %1131 = vmatpush.bf16.msrb.mxu0 %v1825_v58  ;;  %v1646_v23 = vld [vmem:[%s2422_s9 + $0x38] sm:$0xf0]  ;;  %v2510_v26 = vor.u32 %v2029_v21, %v1644_v20  ;;  %v2098_v28 = vld [vmem:[%s2902_s1 + $0x144] sm:$0xf]  ;;  %v1926_v29 = vld [vmem:[%s2902_s1 + $0x148] sm:$0xf0] }
  0x30   : > { %1031 = vmatmul.bf16.vlgmr.msra.gmra.mxu2 %v2449_v53  ;;  %1185 = vmatpush.bf16.msrb.mxu1 %v1889_v59  ;;  %v2512_v27 = vor.u32 %v2027_v22, %v1646_v23  ;;  %v2114_v30 = vld [vmem:[%s2902_s1 + $0x1c4] sm:$0xf]  ;;  %v1929_v31 = vor.u32 %v2098_v28, %v1926_v29  ;;  %v1990_v32 = vld [vmem:[%s2902_s1 + $0x1c8] sm:$0xf0]  ;;  %v1652_v40 = vld [vmem:[%s2422_s9 + $0x40] sm:$0xf] }
  0x31   : > { %1239 = vmatpush.bf16.msrb.mxu2 %v1953_v45  ;;  %1085 = vmatmul.bf16.vlgmr.msra.gmra.mxu3 %v2456_v57  ;;  %v2066_v33 = vld [vmem:[%s2902_s1 + $0x44] sm:$0xf]  ;;  %v1798_v34 = vld [vmem:[%s2902_s1 + $0x48] sm:$0xf0]  ;;  %v1993_v35 = vor.u32 %v2114_v30, %v1990_v32  ;;  %v2032_v41 = vld [vmem:[%s2422_s9 + $0x4c] sm:$0xf0] }
  0x32   : > { %1293 = vmatpush.bf16.msrb.mxu3 %v2017_v51  ;;  %v1801_v36 = vor.u32 %v2066_v33, %v1798_v34  ;;  %v2082_v37 = vld [vmem:[%s2902_s1 + $0xc4] sm:$0xf]  ;;  %v1862_v38 = vld [vmem:[%s2902_s1 + $0xc8] sm:$0xf0]  ;;  %v1654_v43 = vld [vmem:[%s2422_s9 + $0x50] sm:$0xf0]  ;;  %v2550_v49 = vor.u32 %v2032_v41, %v1652_v40 }
  0x33   : > { %1132 = vmatpush.bf16.msrb.mxu0 %v1817_v2  ;;  %v1865_v39 = vor.u32 %v2082_v37, %v1862_v38  ;;  %v2030_v42 = vld [vmem:[%s2422_s9 + $0x44] sm:$0xf]  ;;  %v1660_v44 = vld [vmem:[%s2422_s9 + $0x48] sm:$0xf]  ;;  %v2033_v45 = vld [vmem:[%s2422_s9 + $0x54] sm:$0xf0] }
  0x34   : > { %1186 = vmatpush.bf16.msrb.mxu1 %v1881_v3  ;;  %v2031_v46 = vld [vmem:[%s2422_s9 + $0x4c] sm:$0xf]  ;;  %v1662_v48 = vld [vmem:[%s2422_s9 + $0x58] sm:$0xf0]  ;;  %v2552_v50 = vor.u32 %v2030_v42, %v1654_v43  ;;  %v2554_v51 = vor.u32 %v2033_v45, %v1660_v44  ;;  %v2096_v55 = vld [vmem:[%s2902_s1 + $0x134] sm:$0xf] }
  0x35   : > { %1240 = vmatpush.bf16.msrb.mxu2 %v1945_v60  ;;  %v2556_v54 = vor.u32 %v2031_v46, %v1662_v48  ;;  %v1918_v56 = vld [vmem:[%s2902_s1 + $0x138] sm:$0xf0]  ;;  %v2112_v58 = vld [vmem:[%s2902_s1 + $0x1b4] sm:$0xf]  ;;  %v1668_v4 = vld [vmem:[%s2422_s9 + $0x60] sm:$0xf] }
  0x36   : > { %1294 = vmatpush.bf16.msrb.mxu3 %v2009_v63  ;;  %v1921_v59 = vor.u32 %v2096_v55, %v1918_v56  ;;  %v1982_v60 = vld [vmem:[%s2902_s1 + $0x1b8] sm:$0xf0]  ;;  %v2064_v61 = vld [vmem:[%s2902_s1 + $0x34] sm:$0xf]  ;;  %v2036_v5 = vld [vmem:[%s2422_s9 + $0x6c] sm:$0xf0] }
  0x37   : > { %1133 = vmatpush.bf16.msrb.mxu0 %v1809_v14  ;;  %v1790_v62 = vld [vmem:[%s2902_s1 + $0x38] sm:$0xf0]  ;;  %v1985_v63 = vor.u32 %v2112_v58, %v1982_v60  ;;  %v2080_v1 = vld [vmem:[%s2902_s1 + $0xb4] sm:$0xf]  ;;  %v2034_v6 = vld [vmem:[%s2422_s9 + $0x64] sm:$0xf]  ;;  %v2594_v12 = vor.u32 %v2036_v5, %v1668_v4 }
  0x38   : > { %1187 = vmatpush.bf16.msrb.mxu1 %v1873_v15  ;;  %v1793_v0 = vor.u32 %v2064_v61, %v1790_v62  ;;  %v1854_v2 = vld [vmem:[%s2902_s1 + $0xb8] sm:$0xf0]  ;;  %v1676_v8 = vld [vmem:[%s2422_s9 + $0x68] sm:$0xf]  ;;  %v2037_v9 = vld [vmem:[%s2422_s9 + $0x74] sm:$0xf0] }
  0x39   : > { %1241 = vmatpush.bf16.msrb.mxu2 %v1937_v7  ;;  %v1857_v3 = vor.u32 %v2080_v1, %v1854_v2  ;;  %v1670_v7 = vld [vmem:[%s2422_s9 + $0x70] sm:$0xf0]  ;;  %v2035_v10 = vld [vmem:[%s2422_s9 + $0x6c] sm:$0xf]  ;;  %v2598_v14 = vor.u32 %v2037_v9, %v1676_v8  ;;  %v2094_v16 = vld [vmem:[%s2902_s1 + $0x124] sm:$0xf] }
  0x3a   : > { %1295 = vmatpush.bf16.msrb.mxu3 %v2001_v11  ;;  %v1678_v11 = vld [vmem:[%s2422_s9 + $0x78] sm:$0xf0]  ;;  %v2596_v13 = vor.u32 %v2034_v6, %v1670_v7  ;;  %v1910_v17 = vld [vmem:[%s2902_s1 + $0x128] sm:$0xf0]  ;;  %v2110_v18 = vld [vmem:[%s2902_s1 + $0x1a4] sm:$0xf] }
  0x3b   : > { %1134 = vmatpush.bf16.msrb.mxu0 %v1801_v36  ;;  %v2600_v15 = vor.u32 %v2035_v10, %v1678_v11  ;;  %v1913_v19 = vor.u32 %v2094_v16, %v1910_v17  ;;  %v1974_v20 = vld [vmem:[%s2902_s1 + $0x1a8] sm:$0xf0]  ;;  %v2062_v21 = vld [vmem:[%s2902_s1 + $0x24] sm:$0xf]  ;;  %v1684_v32 = vld [vmem:[%s2422_s9 + $0x80] sm:$0xf] }
  0x3c   : > { %1188 = vmatpush.bf16.msrb.mxu1 %v1865_v39  ;;  %v1782_v22 = vld [vmem:[%s2902_s1 + $0x28] sm:$0xf0]  ;;  %v1977_v23 = vor.u32 %v2110_v18, %v1974_v20  ;;  %v2078_v29 = vld [vmem:[%s2902_s1 + $0xa4] sm:$0xf]  ;;  %v2040_v33 = vld [vmem:[%s2422_s9 + $0x8c] sm:$0xf0] }
  0x3d   : > { %1242 = vmatpush.bf16.msrb.mxu2 %v1929_v31  ;;  %v1785_v28 = vor.u32 %v2062_v21, %v1782_v22  ;;  %v1846_v30 = vld [vmem:[%s2902_s1 + $0xa8] sm:$0xf0]  ;;  %v2038_v34 = vld [vmem:[%s2422_s9 + $0x84] sm:$0xf]  ;;  %v1692_v36 = vld [vmem:[%s2422_s9 + $0x88] sm:$0xf]  ;;  %v2638_v40 = vor.u32 %v2040_v33, %v1684_v32 }
  0x3e   : > { %928 = vmatmul.bf16.gmra.mxu0 %v2506_v24  ;;  %1296 = vmatpush.bf16.msrb.mxu3 %v1993_v35  ;;  %v1849_v31 = vor.u32 %v2078_v29, %v1846_v30  ;;  %v1686_v35 = vld [vmem:[%s2422_s9 + $0x90] sm:$0xf0]  ;;  %v2041_v37 = vld [vmem:[%s2422_s9 + $0x94] sm:$0xf0]  ;;  %v2039_v38 = vld [vmem:[%s2422_s9 + $0x8c] sm:$0xf] }
  0x3f   : > { %982 = vmatmul.bf16.gmra.mxu1 %v2508_v25  ;;  %1135 = vmatpush.bf16.msrb.mxu0 %v1793_v0  ;;  %v1694_v39 = vld [vmem:[%s2422_s9 + $0x98] sm:$0xf0]  ;;  %v2640_v41 = vor.u32 %v2038_v34, %v1686_v35  ;;  %v2642_v42 = vor.u32 %v2041_v37, %v1692_v36  ;;  %v2092_v44 = vld [vmem:[%s2902_s1 + $0x114] sm:$0xf]  ;;  %v1700_v58 = vld [vmem:[%s2422_s9 + $0xa0] sm:$0xf] }
  0x40   : > { %1036 = vmatmul.bf16.gmra.mxu2 %v2510_v26  ;;  %1189 = vmatpush.bf16.msrb.mxu1 %v1857_v3  ;;  %v2644_v43 = vor.u32 %v2039_v38, %v1694_v39  ;;  %v1902_v45 = vld [vmem:[%s2902_s1 + $0x118] sm:$0xf0]  ;;  %v2108_v46 = vld [vmem:[%s2902_s1 + $0x194] sm:$0xf]  ;;  %v2042_v60 = vld [vmem:[%s2422_s9 + $0xa4] sm:$0xf] }
  0x41   : > { %1090 = vmatmul.bf16.gmra.mxu3 %v2512_v27  ;;  %1243 = vmatpush.bf16.msrb.mxu2 %v1921_v59  ;;  %v1905_v48 = vor.u32 %v2092_v44, %v1902_v45  ;;  %v1966_v55 = vld [vmem:[%s2902_s1 + $0x198] sm:$0xf0]  ;;  %v2044_v59 = vld [vmem:[%s2422_s9 + $0xac] sm:$0xf0]  ;;  %v1702_v61 = vld [vmem:[%s2422_s9 + $0xb0] sm:$0xf0] }
  0x42   : > { %1297 = vmatpush.bf16.msrb.mxu3 %v1985_v63  ;;  %v1969_v56 = vor.u32 %v2108_v46, %v1966_v55  ;;  %v1708_v62 = vld [vmem:[%s2422_s9 + $0xa8] sm:$0xf]  ;;  %v2045_v63 = vld [vmem:[%s2422_s9 + $0xb4] sm:$0xf0]  ;;  %v2043_v0 = vld [vmem:[%s2422_s9 + $0xac] sm:$0xf]  ;;  %v2670_v2 = vor.u32 %v2044_v59, %v1700_v58  ;;  %v2672_v3 = vor.u32 %v2042_v60, %v1702_v61 }
  0x43   : > { %1136 = vmatpush.bf16.msrb.mxu0 %v1785_v28  ;;  %v1710_v1 = vld [vmem:[%s2422_s9 + $0xb8] sm:$0xf0]  ;;  %v2674_v4 = vor.u32 %v2045_v63, %v1708_v62  ;;  %v2060_v6 = vld [vmem:[%s2902_s1 + $0x14] sm:$0xf]  ;;  %v1716_v16 = vld [vmem:[%s2422_s9 + $0xc0] sm:$0xf] }
  0x44   : > { %1190 = vmatpush.bf16.msrb.mxu1 %v1849_v31  ;;  %v2676_v5 = vor.u32 %v2043_v0, %v1710_v1  ;;  %v1774_v7 = vld [vmem:[%s2902_s1 + $0x18] sm:$0xf0]  ;;  %v2076_v8 = vld [vmem:[%s2902_s1 + $0x94] sm:$0xf]  ;;  %v2048_v17 = vld [vmem:[%s2422_s9 + $0xcc] sm:$0xf0] }
  0x45   : > { %1244 = vmatpush.bf16.msrb.mxu2 %v1913_v19  ;;  %v1777_v9 = vor.u32 %v2060_v6, %v1774_v7  ;;  %v1838_v10 = vld [vmem:[%s2902_s1 + $0x98] sm:$0xf0]  ;;  %v2046_v18 = vld [vmem:[%s2422_s9 + $0xc4] sm:$0xf]  ;;  %v1718_v19 = vld [vmem:[%s2422_s9 + $0xd0] sm:$0xf0]  ;;  %v2702_v28 = vor.u32 %v2048_v17, %v1716_v16 }
  0x46   : > { %1298 = vmatpush.bf16.msrb.mxu3 %v1977_v23  ;;  %v1841_v11 = vor.u32 %v2076_v8, %v1838_v10  ;;  %v1724_v20 = vld [vmem:[%s2422_s9 + $0xc8] sm:$0xf]  ;;  %v2049_v21 = vld [vmem:[%s2422_s9 + $0xd4] sm:$0xf0]  ;;  %v2047_v22 = vld [vmem:[%s2422_s9 + $0xcc] sm:$0xf]  ;;  %v2704_v29 = vor.u32 %v2046_v18, %v1718_v19 }
  0x47   : > { %1137 = vmatpush.bf16.msrb.mxu0 %v1777_v9  ;;  %v1726_v23 = vld [vmem:[%s2422_s9 + $0xd8] sm:$0xf0]  ;;  %v2706_v30 = vor.u32 %v2049_v21, %v1724_v20  ;;  %v2090_v32 = vld [vmem:[%s2902_s1 + $0x104] sm:$0xf]  ;;  %v1894_v33 = vld [vmem:[%s2902_s1 + $0x108] sm:$0xf0] }
  0x48   : > { %1191 = vmatpush.bf16.msrb.mxu1 %v1841_v11  ;;  %v2708_v31 = vor.u32 %v2047_v22, %v1726_v23  ;;  %v1897_v34 = vor.u32 %v2090_v32, %v1894_v33  ;;  %v2106_v35 = vld [vmem:[%s2902_s1 + $0x184] sm:$0xf]  ;;  %v1958_v36 = vld [vmem:[%s2902_s1 + $0x188] sm:$0xf0]  ;;  %v1732_v55 = vld [vmem:[%s2422_s9 + $0xe0] sm:$0xf] }
  0x49   : > { %1245 = vmatpush.bf16.msrb.mxu2 %v1905_v48  ;;  %v1961_v37 = vor.u32 %v2106_v35, %v1958_v36  ;;  %v2058_v38 = vld [vmem:[%s2902_s1 + $0x4] sm:$0xf]  ;;  %v1766_v39 = vld [vmem:[%s2902_s1 + $0x8] sm:$0xf0]  ;;  %v1734_v59 = vld [vmem:[%s2422_s9 + $0xf0] sm:$0xf0] }
  0x4a   : > { %1299 = vmatpush.bf16.msrb.mxu3 %v1969_v56  ;;  %v2074_v44 = vld [vmem:[%s2902_s1 + $0x84] sm:$0xf]  ;;  %v1769_v45 = vor.u32 %v2058_v38, %v1766_v39  ;;  %v1830_v46 = vld [vmem:[%s2902_s1 + $0x88] sm:$0xf0]  ;;  %v2052_v56 = vld [vmem:[%s2422_s9 + $0xec] sm:$0xf0] }
  0x4b   : > { %v1833_v48 = vor.u32 %v2074_v44, %v1830_v46  ;;  %v2050_v58 = vld [vmem:[%s2422_s9 + $0xe4] sm:$0xf]  ;;  %v1740_v60 = vld [vmem:[%s2422_s9 + $0xe8] sm:$0xf]  ;;  %v2053_v61 = vld [vmem:[%s2422_s9 + $0xf4] sm:$0xf0]  ;;  %v2746_v0 = vor.u32 %v2052_v56, %v1732_v55 }
  0x4c   : > { %1138 = vmatpush.bf16.msrb.mxu0 %v1769_v45  ;;  %v2051_v62 = vld [vmem:[%s2422_s9 + $0xec] sm:$0xf]  ;;  %v1742_v63 = vld [vmem:[%s2422_s9 + $0xf8] sm:$0xf0]  ;;  %v2748_v1 = vor.u32 %v2050_v58, %v1734_v59  ;;  %v2750_v6 = vor.u32 %v2053_v61, %v1740_v60  ;;  %v1748_v8 = vld [vmem:[%s2422_s9 + $0x100] sm:$0xf] }
  0x4d   : > { %1246 = vmatpush.bf16.msrb.mxu2 %v1897_v34  ;;  %1192 = vmatpush.bf16.msrb.mxu1 %v1833_v48  ;;  %v2752_v7 = vor.u32 %v2051_v62, %v1742_v63  ;;  %v2056_v9 = vld [vmem:[%s2422_s9 + $0x10c] sm:$0xf0]  ;;  %v2054_v10 = vld [vmem:[%s2422_s9 + $0x104] sm:$0xf]  ;;  %v1750_v11 = vld [vmem:[%s2422_s9 + $0x110] sm:$0xf0] }
  0x4e   : > { %933 = vmatmul.bf16.gmra.mxu0 %v2550_v49  ;;  %1300 = vmatpush.bf16.msrb.mxu3 %v1961_v37  ;;  %v1756_v16 = vld [vmem:[%s2422_s9 + $0x108] sm:$0xf]  ;;  %v2057_v17 = vld [vmem:[%s2422_s9 + $0x114] sm:$0xf0]  ;;  %v2055_v18 = vld [vmem:[%s2422_s9 + $0x10c] sm:$0xf]  ;;  %v2766_v20 = vor.u32 %v2056_v9, %v1748_v8  ;;  %v2768_v22 = vor.u32 %v2054_v10, %v1750_v11 }
  0x4f   : > { %987 = vmatmul.bf16.gmra.mxu1 %v2552_v50  ;;  %v1758_v19 = vld [vmem:[%s2422_s9 + $0x118] sm:$0xf0]  ;;  %v2770_v23 = vor.u32 %v2057_v17, %v1756_v16  ;;  %s2021_s9 = sshll.u32 %s2909_s27, 3 }
  0x50   : > { %1041 = vmatmul.bf16.gmra.mxu2 %v2554_v51  ;;  %v2772_v33 = vor.u32 %v2055_v18, %v1758_v19  ;;  %s2854_s16 = scalar_lea.vmem %s2903_s2, %s2021_s9 }
  0x51   : > { %1095 = vmatmul.bf16.gmra.mxu3 %v2556_v54 }
  0x5e   : > { %938 = vmatmul.bf16.gmra.mxu0 %v2594_v12 }
  0x5f   : > { %992 = vmatmul.bf16.gmra.mxu1 %v2596_v13 }
  0x60   : > { %1046 = vmatmul.bf16.gmra.mxu2 %v2598_v14 }
  0x61   : > { %1100 = vmatmul.bf16.gmra.mxu3 %v2600_v15 }
  0x6e   : > { %943 = vmatmul.bf16.gmra.mxu0 %v2638_v40 }
  0x6f   : > { %997 = vmatmul.bf16.gmra.mxu1 %v2640_v41 }
  0x70   : > { %1051 = vmatmul.bf16.gmra.mxu2 %v2642_v42 }
  0x71   : > { %1105 = vmatmul.bf16.gmra.mxu3 %v2644_v43 }
  0x7e   : > { %948 = vmatmul.bf16.gmra.mxu0 %v2670_v2 }
  0x7f   : > { %1002 = vmatmul.bf16.gmra.mxu1 %v2672_v3 }
  0x80   : > { %1056 = vmatmul.bf16.gmra.mxu2 %v2674_v4 }
  0x81   : > { %1110 = vmatmul.bf16.gmra.mxu3 %v2676_v5 }
  0x8e   : > { %953 = vmatmul.bf16.gmra.mxu0 %v2702_v28 }
  0x8f   : > { %1007 = vmatmul.bf16.gmra.mxu1 %v2704_v29 }
  0x90   : > { %1061 = vmatmul.bf16.gmra.mxu2 %v2706_v30 }
  0x91   : > { %1115 = vmatmul.bf16.gmra.mxu3 %v2708_v31 }
  0x9e   : > { %958 = vmatmul.bf16.gmra.mxu0 %v2746_v0 }
  0x9f   : > { %1012 = vmatmul.bf16.gmra.mxu1 %v2748_v1 }
  0xa0   : > { %1066 = vmatmul.bf16.gmra.mxu2 %v2750_v6 }
  0xa1   : > { %1120 = vmatmul.bf16.gmra.mxu3 %v2752_v7 }
  0xab   : > { %v924_v21 = vpop.f32.mrf.mxu0 }
  0xac   : > { %v978_v32 = vpop.f32.mrf.mxu1 }
  0xad   : > { %v979_v34 = vadd.f32 %v978_v32, %v924_v21 }
  0xae   : > { %963 = vmatmul.bf16.gmra.mxu0 %v2766_v20 }
  0xaf   : > { %1017 = vmatmul.bf16.gmra.mxu1 %v2768_v22 }
  0xb0   : > { %1071 = vmatmul.bf16.gmra.mxu2 %v2770_v23 }
  0xb1   : > { %1125 = vmatmul.bf16.gmra.mxu3 %v2772_v33 }
  0xb3   : > { %v1032_v35 = vpop.f32.mrf.mxu2  ;;  %v926_v38 = vpop.f32.mrf.mxu0 }
  0xb4   : > { %v1033_v36 = vadd.f32 %v1032_v35, %v979_v34  ;;  %v1086_v37 = vpop.f32.mrf.mxu3  ;;  %v980_v39 = vpop.f32.mrf.mxu1 }
  0xb5   : > { %v981_v45 = vadd.f32 %v980_v39, %v926_v38 }
  0xb6   : > { %v2778_v44 = vadd.f32 %v1086_v37, %v1033_v36 }
  0xbb   : > { %v1034_v46 = vpop.f32.mrf.mxu2  ;;  %v929_v56 = vpop.f32.mrf.mxu0 }
  0xbc   : > { %v1035_v48 = vadd.f32 %v1034_v46, %v981_v45  ;;  %v1088_v55 = vpop.f32.mrf.mxu3  ;;  %v983_v58 = vpop.f32.mrf.mxu1 }
  0xbd   : > { %v984_v60 = vadd.f32 %v983_v58, %v929_v56 }
  0xbe   : > { %v2780_v59 = vadd.f32 %v1088_v55, %v1035_v48  ;;  %1139 = vmatmul.bf16.vlgmr.msrb.gmra.mxu0 %v2442_v47 }
  0xbf   : > { %1193 = vmatmul.bf16.vlgmr.msrb.gmra.mxu1 %v2447_v52 }
  0xc0   : > { %1247 = vmatmul.bf16.vlgmr.msrb.gmra.mxu2 %v2449_v53 }
  0xc1   : > { %1301 = vmatmul.bf16.vlgmr.msrb.gmra.mxu3 %v2456_v57 }
  0xc3   : > { %v1037_v61 = vpop.f32.mrf.mxu2  ;;  %v931_v8 = vpop.f32.mrf.mxu0 }
  0xc4   : > { %v1038_v62 = vadd.f32 %v1037_v61, %v984_v60  ;;  %v1091_v63 = vpop.f32.mrf.mxu3  ;;  %v985_v9 = vpop.f32.mrf.mxu1 }
  0xc5   : > { %v986_v11 = vadd.f32 %v985_v9, %v931_v8 }
  0xc6   : > { %v2786_v10 = vadd.f32 %v1091_v63, %v1038_v62 }
  0xcb   : > { %v1039_v16 = vpop.f32.mrf.mxu2  ;;  %v934_v19 = vpop.f32.mrf.mxu0 }
  0xcc   : > { %v1040_v17 = vadd.f32 %v1039_v16, %v986_v11  ;;  %v1093_v18 = vpop.f32.mrf.mxu3  ;;  %v988_v21 = vpop.f32.mrf.mxu1 }
  0xcd   : > { %v989_v52 = vadd.f32 %v988_v21, %v934_v19 }
  0xce   : > { %v2788_v47 = vadd.f32 %v1093_v18, %v1040_v17  ;;  %1144 = vmatmul.bf16.gmra.mxu0 %v2506_v24 }
  0xcf   : > { %1198 = vmatmul.bf16.gmra.mxu1 %v2508_v25 }
  0xd0   : > { %1252 = vmatmul.bf16.gmra.mxu2 %v2510_v26 }
  0xd1   : > { %1306 = vmatmul.bf16.gmra.mxu3 %v2512_v27 }
  0xd3   : > { %v1042_v53 = vpop.f32.mrf.mxu2  ;;  %v936_v34 = vpop.f32.mrf.mxu0 }
  0xd4   : > { %v1043_v57 = vadd.f32 %v1042_v53, %v989_v52  ;;  %v1096_v32 = vpop.f32.mrf.mxu3  ;;  %v990_v35 = vpop.f32.mrf.mxu1 }
  0xd5   : > { %v991_v37 = vadd.f32 %v990_v35, %v936_v34 }
  0xd6   : > { %v2794_v36 = vadd.f32 %v1096_v32, %v1043_v57 }
  0xdb   : > { %v1044_v38 = vpop.f32.mrf.mxu2  ;;  %v939_v46 = vpop.f32.mrf.mxu0 }
  0xdc   : > { %v1045_v39 = vadd.f32 %v1044_v38, %v991_v37  ;;  %v1098_v45 = vpop.f32.mrf.mxu3  ;;  %v993_v48 = vpop.f32.mrf.mxu1 }
  0xdd   : > { %v994_v25 = vadd.f32 %v993_v48, %v939_v46 }
  0xde   : > { %v2796_v24 = vadd.f32 %v1098_v45, %v1045_v39  ;;  %1149 = vmatmul.bf16.gmra.mxu0 %v2550_v49 }
  0xdf   : > { %1203 = vmatmul.bf16.gmra.mxu1 %v2552_v50 }
  0xe0   : > { %1257 = vmatmul.bf16.gmra.mxu2 %v2554_v51 }
  0xe1   : > { %1311 = vmatmul.bf16.gmra.mxu3 %v2556_v54 }
  0xe3   : > { %v1047_v26 = vpop.f32.mrf.mxu2  ;;  %v941_v56 = vpop.f32.mrf.mxu0 }
  0xe4   : > { %v1048_v27 = vadd.f32 %v1047_v26, %v994_v25  ;;  %v1101_v55 = vpop.f32.mrf.mxu3  ;;  %v995_v58 = vpop.f32.mrf.mxu1 }
  0xe5   : > { %v996_v61 = vadd.f32 %v995_v58, %v941_v56 }
  0xe6   : > { %v2802_v60 = vadd.f32 %v1101_v55, %v1048_v27 }
  0xeb   : > { %v1049_v62 = vpop.f32.mrf.mxu2  ;;  %v944_v9 = vpop.f32.mrf.mxu0 }
  0xec   : > { %v1050_v63 = vadd.f32 %v1049_v62, %v996_v61  ;;  %v1103_v8 = vpop.f32.mrf.mxu3  ;;  %v998_v11 = vpop.f32.mrf.mxu1 }
  0xed   : > { %v999_v50 = vadd.f32 %v998_v11, %v944_v9 }
  0xee   : > { %v2804_v49 = vadd.f32 %v1103_v8, %v1050_v63  ;;  %1154 = vmatmul.bf16.gmra.mxu0 %v2594_v12 }
  0xef   : > { %1208 = vmatmul.bf16.gmra.mxu1 %v2596_v13 }
  0xf0   : > { %1262 = vmatmul.bf16.gmra.mxu2 %v2598_v14 }
  0xf1   : > { %1316 = vmatmul.bf16.gmra.mxu3 %v2600_v15 }
  0xf3   : > { %v1052_v51 = vpop.f32.mrf.mxu2  ;;  %v946_v17 = vpop.f32.mrf.mxu0 }
  0xf4   : > { %v1053_v54 = vadd.f32 %v1052_v51, %v999_v50  ;;  %v1106_v16 = vpop.f32.mrf.mxu3  ;;  %v1000_v18 = vpop.f32.mrf.mxu1 }
  0xf5   : > { %v1001_v21 = vadd.f32 %v1000_v18, %v946_v17 }
  0xf6   : > { %v2810_v19 = vadd.f32 %v1106_v16, %v1053_v54 }
  0xfb   : > { %v1054_v52 = vpop.f32.mrf.mxu2  ;;  %v949_v32 = vpop.f32.mrf.mxu0 }
  0xfc   : > { %v1055_v53 = vadd.f32 %v1054_v52, %v1001_v21  ;;  %v1108_v57 = vpop.f32.mrf.mxu3  ;;  %v1003_v34 = vpop.f32.mrf.mxu1 }
  0xfd   : > { %v1004_v13 = vadd.f32 %v1003_v34, %v949_v32 }
  0xfe   : > { %v2812_v12 = vadd.f32 %v1108_v57, %v1055_v53  ;;  %1159 = vmatmul.bf16.gmra.mxu0 %v2638_v40 }
  0xff   : > { %1213 = vmatmul.bf16.gmra.mxu1 %v2640_v41 }
 0x100   : > { %1267 = vmatmul.bf16.gmra.mxu2 %v2642_v42 }
 0x101   : > { %1321 = vmatmul.bf16.gmra.mxu3 %v2644_v43 }
 0x103   : > { %v1057_v14 = vpop.f32.mrf.mxu2  ;;  %v951_v37 = vpop.f32.mrf.mxu0 }
 0x104   : > { %v1058_v15 = vadd.f32 %v1057_v14, %v1004_v13  ;;  %v1111_v35 = vpop.f32.mrf.mxu3  ;;  %v1005_v38 = vpop.f32.mrf.mxu1 }
 0x105   : > { %v1006_v45 = vadd.f32 %v1005_v38, %v951_v37 }
 0x106   : > { %v2818_v39 = vadd.f32 %v1111_v35, %v1058_v15 }
 0x10b   : > { %v1059_v46 = vpop.f32.mrf.mxu2  ;;  %v954_v26 = vpop.f32.mrf.mxu0 }
 0x10c   : > { %v1060_v48 = vadd.f32 %v1059_v46, %v1006_v45  ;;  %v1113_v25 = vpop.f32.mrf.mxu3  ;;  %v1008_v27 = vpop.f32.mrf.mxu1 }
 0x10d   : > { %v1009_v41 = vadd.f32 %v1008_v27, %v954_v26 }
 0x10e   : > { %v2820_v40 = vadd.f32 %v1113_v25, %v1060_v48  ;;  %1164 = vmatmul.bf16.gmra.mxu0 %v2670_v2 }
 0x10f   : > { %1218 = vmatmul.bf16.gmra.mxu1 %v2672_v3 }
 0x110   : > { %1272 = vmatmul.bf16.gmra.mxu2 %v2674_v4 }
 0x111   : > { %1326 = vmatmul.bf16.gmra.mxu3 %v2676_v5 }
 0x113   : > { %v1062_v42 = vpop.f32.mrf.mxu2  ;;  %v956_v56 = vpop.f32.mrf.mxu0 }
 0x114   : > { %v1063_v43 = vadd.f32 %v1062_v42, %v1009_v41  ;;  %v1116_v55 = vpop.f32.mrf.mxu3  ;;  %v1010_v58 = vpop.f32.mrf.mxu1 }
 0x115   : > { %v1011_v62 = vadd.f32 %v1010_v58, %v956_v56 }
 0x116   : > { %v2826_v61 = vadd.f32 %v1116_v55, %v1063_v43 }
 0x11b   : > { %v1064_v63 = vpop.f32.mrf.mxu2  ;;  %v959_v11 = vpop.f32.mrf.mxu0 }
 0x11c   : > { %v1065_v8 = vadd.f32 %v1064_v63, %v1011_v62  ;;  %v1118_v9 = vpop.f32.mrf.mxu3  ;;  %v1013_v50 = vpop.f32.mrf.mxu1 }
 0x11d   : > { %v1014_v3 = vadd.f32 %v1013_v50, %v959_v11 }
 0x11e   : > { %v2828_v2 = vadd.f32 %v1118_v9, %v1065_v8  ;;  %1169 = vmatmul.bf16.gmra.mxu0 %v2702_v28 }
 0x11f   : > { %1223 = vmatmul.bf16.gmra.mxu1 %v2704_v29 }
 0x120   : > { %1277 = vmatmul.bf16.gmra.mxu2 %v2706_v30 }
 0x121   : > { %1331 = vmatmul.bf16.gmra.mxu3 %v2708_v31 }
 0x123   : > { %v1067_v4 = vpop.f32.mrf.mxu2  ;;  %v961_v54 = vpop.f32.mrf.mxu0 }
 0x124   : > { %v1068_v5 = vadd.f32 %v1067_v4, %v1014_v3  ;;  %v1121_v51 = vpop.f32.mrf.mxu3  ;;  %v1015_v16 = vpop.f32.mrf.mxu1 }
 0x125   : > { %v1016_v18 = vadd.f32 %v1015_v16, %v961_v54 }
 0x126   : > { %v2834_v17 = vadd.f32 %v1121_v51, %v1068_v5 }
 0x12b   : > { %v1069_v21 = vpop.f32.mrf.mxu2  ;;  %v964_v57 = vpop.f32.mrf.mxu0 }
 0x12c   : > { %v1070_v52 = vadd.f32 %v1069_v21, %v1016_v18  ;;  %v1123_v53 = vpop.f32.mrf.mxu3  ;;  %v1018_v32 = vpop.f32.mrf.mxu1 }
 0x12d   : > { %v1019_v29 = vadd.f32 %v1018_v32, %v964_v57 }
 0x12e   : > { %v2836_v28 = vadd.f32 %v1123_v53, %v1070_v52  ;;  %1174 = vmatmul.bf16.gmra.mxu0 %v2746_v0 }
 0x12f   : > { %1228 = vmatmul.bf16.gmra.mxu1 %v2748_v1 }
 0x130   : > { %1282 = vmatmul.bf16.gmra.mxu2 %v2750_v6 }
 0x131   : > { %1336 = vmatmul.bf16.gmra.mxu3 %v2752_v7 }
 0x133   : > { %v1072_v30 = vpop.f32.mrf.mxu2  ;;  %v966_v13 = vpop.f32.mrf.mxu0 }
 0x134   : > { %v1073_v31 = vadd.f32 %v1072_v30, %v1019_v29  ;;  %v1126_v34 = vpop.f32.mrf.mxu3  ;;  %v1020_v14 = vpop.f32.mrf.mxu1 }
 0x135   : > { %v1021_v35 = vadd.f32 %v1020_v14, %v966_v13 }
 0x136   : > { %v2842_v15 = vadd.f32 %v1126_v34, %v1073_v31 }
 0x13b   : > { %v1074_v37 = vpop.f32.mrf.mxu2  ;;  %v1140_v46 = vpop.f32.mrf.mxu0 }
 0x13c   : > { %v1075_v38 = vadd.f32 %v1074_v37, %v1021_v35  ;;  %v1128_v45 = vpop.f32.mrf.mxu3  ;;  %v1194_v0 = vpop.f32.mrf.mxu1 }
 0x13d   : > { %v1195_v1 = vadd.f32 %v1194_v0, %v1140_v46 }
 0x13e   : > { %v2844_v48 = vadd.f32 %v1128_v45, %v1075_v38  ;;  %1179 = vmatmul.bf16.gmra.mxu0 %v2766_v20 }
 0x13f   : > { %1233 = vmatmul.bf16.gmra.mxu1 %v2768_v22 }
 0x140   : > { %1287 = vmatmul.bf16.gmra.mxu2 %v2770_v23 }
 0x141   : > { %1341 = vmatmul.bf16.gmra.mxu3 %v2772_v33 }
 0x143   : > { %v1248_v6 = vpop.f32.mrf.mxu2  ;;  %v1142_v26 = vpop.f32.mrf.mxu0 }
 0x144   : > { %v1249_v7 = vadd.f32 %v1248_v6, %v1195_v1  ;;  %v1302_v25 = vpop.f32.mrf.mxu3  ;;  %v1196_v27 = vpop.f32.mrf.mxu1 }
 0x145   : > { %v1197_v22 = vadd.f32 %v1196_v27, %v1142_v26 }
 0x146   : > { %v1303_v41 = vadd.f32 %v1302_v25, %v1249_v7 }
 0x148   : > { %v1458_v20 = vpack.c.bf16 %v1303_v41, %v2778_v44 }
 0x14a   : > { %1476 = vst [vmem:[%s2854_s16] sm:$0xff] %v1458_v20 }
 0x14b   : > { %v1250_v23 = vpop.f32.mrf.mxu2  ;;  %v1145_v43 = vpop.f32.mrf.mxu0 }
 0x14c   : > { %v1251_v33 = vadd.f32 %v1250_v23, %v1197_v22  ;;  %v1304_v42 = vpop.f32.mrf.mxu3  ;;  %v1199_v55 = vpop.f32.mrf.mxu1 }
 0x14d   : > { %v1200_v62 = vadd.f32 %v1199_v55, %v1145_v43 }
 0x14e   : > { %v1305_v56 = vadd.f32 %v1304_v42, %v1251_v33 }
 0x150   : > { %v1459_v58 = vpack.c.bf16 %v1305_v56, %v2780_v59 }
 0x152   : > { %1477 = vst [vmem:[%s2854_s16 + $0x8] sm:$0xff] %v1459_v58 }
 0x153   : > { %v1253_v63 = vpop.f32.mrf.mxu2  ;;  %v1147_v11 = vpop.f32.mrf.mxu0 }
 0x154   : > { %v1254_v8 = vadd.f32 %v1253_v63, %v1200_v62  ;;  %v1307_v9 = vpop.f32.mrf.mxu3  ;;  %v1201_v50 = vpop.f32.mrf.mxu1 }
 0x155   : > { %v1202_v4 = vadd.f32 %v1201_v50, %v1147_v11 }
 0x156   : > { %v1308_v44 = vadd.f32 %v1307_v9, %v1254_v8 }
 0x158   : > { %v1460_v3 = vpack.c.bf16 %v1308_v44, %v2786_v10 }
 0x15a   : > { %1478 = vst [vmem:[%s2854_s16 + $0x10] sm:$0xff] %v1460_v3 }
 0x15b   : > { %v1255_v5 = vpop.f32.mrf.mxu2  ;;  %v1150_v16 = vpop.f32.mrf.mxu0 }
 0x15c   : > { %v1256_v51 = vadd.f32 %v1255_v5, %v1202_v4  ;;  %v1309_v54 = vpop.f32.mrf.mxu3  ;;  %v1204_v18 = vpop.f32.mrf.mxu1 }
 0x15d   : > { %v1205_v52 = vadd.f32 %v1204_v18, %v1150_v16 }
 0x15e   : > { %v1310_v59 = vadd.f32 %v1309_v54, %v1256_v51 }
 0x160   : > { %v1461_v21 = vpack.c.bf16 %v1310_v59, %v2788_v47 }
 0x162   : > { %1479 = vst [vmem:[%s2854_s16 + $0x18] sm:$0xff] %v1461_v21 }
 0x163   : > { %v1258_v53 = vpop.f32.mrf.mxu2  ;;  %v1152_v29 = vpop.f32.mrf.mxu0 }
 0x164   : > { %v1259_v57 = vadd.f32 %v1258_v53, %v1205_v52  ;;  %v1312_v32 = vpop.f32.mrf.mxu3  ;;  %v1206_v30 = vpop.f32.mrf.mxu1 }
 0x165   : > { %v1207_v34 = vadd.f32 %v1206_v30, %v1152_v29 }
 0x166   : > { %v1313_v10 = vadd.f32 %v1312_v32, %v1259_v57 }
 0x168   : > { %v1462_v31 = vpack.c.bf16 %v1313_v10, %v2794_v36 }
 0x16a   : > { %1480 = vst [vmem:[%s2854_s16 + $0x20] sm:$0xff] %v1462_v31 }
 0x16b   : > { %v1260_v13 = vpop.f32.mrf.mxu2  ;;  %v1155_v37 = vpop.f32.mrf.mxu0 }
 0x16c   : > { %v1261_v14 = vadd.f32 %v1260_v13, %v1207_v34  ;;  %v1314_v35 = vpop.f32.mrf.mxu3  ;;  %v1209_v38 = vpop.f32.mrf.mxu1 }
 0x16d   : > { %v1210_v46 = vadd.f32 %v1209_v38, %v1155_v37 }
 0x16e   : > { %v1315_v47 = vadd.f32 %v1314_v35, %v1261_v14 }
 0x170   : > { %v1463_v45 = vpack.c.bf16 %v1315_v47, %v2796_v24 }
 0x172   : > { %1481 = vst [vmem:[%s2854_s16 + $0x28] sm:$0xff] %v1463_v45 }
 0x173   : > { %v1263_v0 = vpop.f32.mrf.mxu2  ;;  %v1157_v7 = vpop.f32.mrf.mxu0 }
 0x174   : > { %v1264_v1 = vadd.f32 %v1263_v0, %v1210_v46  ;;  %v1317_v6 = vpop.f32.mrf.mxu3  ;;  %v1211_v25 = vpop.f32.mrf.mxu1 }
 0x175   : > { %v1212_v27 = vadd.f32 %v1211_v25, %v1157_v7 }
 0x176   : > { %v1318_v36 = vadd.f32 %v1317_v6, %v1264_v1 }
 0x178   : > { %v1464_v26 = vpack.c.bf16 %v1318_v36, %v2802_v60 }
 0x17a   : > { %1482 = vst [vmem:[%s2854_s16 + $0x30] sm:$0xff] %v1464_v26 }
 0x17b   : > { %v1265_v41 = vpop.f32.mrf.mxu2  ;;  %v1160_v23 = vpop.f32.mrf.mxu0 }
 0x17c   : > { %v1266_v20 = vadd.f32 %v1265_v41, %v1212_v27  ;;  %v1319_v22 = vpop.f32.mrf.mxu3  ;;  %v1214_v33 = vpop.f32.mrf.mxu1 }
 0x17d   : > { %v1215_v43 = vadd.f32 %v1214_v33, %v1160_v23 }
 0x17e   : > { %v1320_v24 = vadd.f32 %v1319_v22, %v1266_v20 }
 0x180   : > { %v1465_v42 = vpack.c.bf16 %v1320_v24, %v2804_v49 }
 0x182   : > { %1483 = vst [vmem:[%s2854_s16 + $0x38] sm:$0xff] %v1465_v42 }
 0x183   : > { %v1268_v55 = vpop.f32.mrf.mxu2  ;;  %v1162_v62 = vpop.f32.mrf.mxu0 }
 0x184   : > { %v1269_v56 = vadd.f32 %v1268_v55, %v1215_v43  ;;  %v1322_v58 = vpop.f32.mrf.mxu3  ;;  %v1216_v63 = vpop.f32.mrf.mxu1 }
 0x185   : > { %v1217_v9 = vadd.f32 %v1216_v63, %v1162_v62 }
 0x186   : > { %v1323_v60 = vadd.f32 %v1322_v58, %v1269_v56 }
 0x188   : > { %v1466_v8 = vpack.c.bf16 %v1323_v60, %v2810_v19 }
 0x18a   : > { %1484 = vst [vmem:[%s2854_s16 + $0x40] sm:$0xff] %v1466_v8 }
 0x18b   : > { %v1270_v11 = vpop.f32.mrf.mxu2  ;;  %v1165_v3 = vpop.f32.mrf.mxu0 }
 0x18c   : > { %v1271_v50 = vadd.f32 %v1270_v11, %v1217_v9  ;;  %v1324_v44 = vpop.f32.mrf.mxu3  ;;  %v1219_v4 = vpop.f32.mrf.mxu1 }
 0x18d   : > { %v1220_v51 = vadd.f32 %v1219_v4, %v1165_v3 }
 0x18e   : > { %v1325_v49 = vadd.f32 %v1324_v44, %v1271_v50 }
 0x190   : > { %v1467_v5 = vpack.c.bf16 %v1325_v49, %v2812_v12 }
 0x192   : > { %1485 = vst [vmem:[%s2854_s16 + $0x48] sm:$0xff] %v1467_v5 }
 0x193   : > { %v1273_v54 = vpop.f32.mrf.mxu2  ;;  %v1167_v59 = vpop.f32.mrf.mxu0 }
 0x194   : > { %v1274_v16 = vadd.f32 %v1273_v54, %v1220_v51  ;;  %v1327_v18 = vpop.f32.mrf.mxu3  ;;  %v1221_v21 = vpop.f32.mrf.mxu1 }
 0x195   : > { %v1222_v53 = vadd.f32 %v1221_v21, %v1167_v59 }
 0x196   : > { %v1328_v19 = vadd.f32 %v1327_v18, %v1274_v16 }
 0x198   : > { %v1468_v52 = vpack.c.bf16 %v1328_v19, %v2818_v39 }
 0x19a   : > { %1486 = vst [vmem:[%s2854_s16 + $0x50] sm:$0xff] %v1468_v52 }
 0x19b   : > { %v1275_v57 = vpop.f32.mrf.mxu2  ;;  %v1170_v30 = vpop.f32.mrf.mxu0 }
 0x19c   : > { %v1276_v32 = vadd.f32 %v1275_v57, %v1222_v53  ;;  %v1329_v29 = vpop.f32.mrf.mxu3  ;;  %v1224_v10 = vpop.f32.mrf.mxu1 }
 0x19d   : > { %v1225_v34 = vadd.f32 %v1224_v10, %v1170_v30 }
 0x19e   : > { %v1330_v12 = vadd.f32 %v1329_v29, %v1276_v32 }
 0x1a0   : > { %v1469_v31 = vpack.c.bf16 %v1330_v12, %v2820_v40 }
 0x1a2   : > { %1487 = vst [vmem:[%s2854_s16 + $0x58] sm:$0xff] %v1469_v31 }
 0x1a3   : > { %v1278_v13 = vpop.f32.mrf.mxu2  ;;  %v1172_v37 = vpop.f32.mrf.mxu0 }
 0x1a4   : > { %v1279_v14 = vadd.f32 %v1278_v13, %v1225_v34  ;;  %v1332_v35 = vpop.f32.mrf.mxu3  ;;  %v1226_v38 = vpop.f32.mrf.mxu1 }
 0x1a5   : > { %v1227_v45 = vadd.f32 %v1226_v38, %v1172_v37 }
 0x1a6   : > { %v1333_v39 = vadd.f32 %v1332_v35, %v1279_v14 }
 0x1a8   : > { %v1470_v47 = vpack.c.bf16 %v1333_v39, %v2826_v61 }
 0x1aa   : > { %1488 = vst [vmem:[%s2854_s16 + $0x60] sm:$0xff] %v1470_v47 }
 0x1ab   : > { %v1280_v46 = vpop.f32.mrf.mxu2  ;;  %v1175_v6 = vpop.f32.mrf.mxu0 }
 0x1ac   : > { %v1281_v0 = vadd.f32 %v1280_v46, %v1227_v45  ;;  %v1334_v1 = vpop.f32.mrf.mxu3  ;;  %v1229_v7 = vpop.f32.mrf.mxu1 }
 0x1ad   : > { %v1230_v36 = vadd.f32 %v1229_v7, %v1175_v6 }
 0x1ae   : > { %v1335_v40 = vadd.f32 %v1334_v1, %v1281_v0 }
 0x1b0   : > { %v1471_v25 = vpack.c.bf16 %v1335_v40, %v2828_v2 }
 0x1b2   : > { %1489 = vst [vmem:[%s2854_s16 + $0x68] sm:$0xff] %v1471_v25 }
 0x1b3   : > { %v1283_v26 = vpop.f32.mrf.mxu2  ;;  %v1177_v20 = vpop.f32.mrf.mxu0 }
 0x1b4   : > { %v1284_v27 = vadd.f32 %v1283_v26, %v1230_v36  ;;  %v1337_v41 = vpop.f32.mrf.mxu3  ;;  %v1231_v22 = vpop.f32.mrf.mxu1 }
 0x1b5   : > { %v1232_v33 = vadd.f32 %v1231_v22, %v1177_v20 }
 0x1b6   : > { %v1338_v61 = vadd.f32 %v1337_v41, %v1284_v27 }
 0x1b8   : > { %v1472_v23 = vpack.c.bf16 %v1338_v61, %v2834_v17 }
 0x1ba   : > { %1490 = vst [vmem:[%s2854_s16 + $0x70] sm:$0xff] %v1472_v23 }
 0x1bb   : > { %v1285_v24 = vpop.f32.mrf.mxu2  ;;  %v1180_v55 = vpop.f32.mrf.mxu0 }
 0x1bc   : > { %v1286_v42 = vadd.f32 %v1285_v24, %v1232_v33  ;;  %v1339_v43 = vpop.f32.mrf.mxu3  ;;  %v1234_v56 = vpop.f32.mrf.mxu1 }
 0x1bd   : > { %v1235_v62 = vadd.f32 %v1234_v56, %v1180_v55 }
 0x1be   : > { %v1340_v2 = vadd.f32 %v1339_v43, %v1286_v42 }
 0x1c0   : > { %v1473_v58 = vpack.c.bf16 %v1340_v2, %v2836_v28 }
 0x1c2   : > { %1491 = vst [vmem:[%s2854_s16 + $0x78] sm:$0xff] %v1473_v58 }
 0x1c3   : > { %v1288_v63 = vpop.f32.mrf.mxu2  ;;  %v1182_v11 = vpop.f32.mrf.mxu0 }
 0x1c4   : > { %v1289_v60 = vadd.f32 %v1288_v63, %v1235_v62  ;;  %v1342_v8 = vpop.f32.mrf.mxu3  ;;  %v1236_v17 = vpop.f32.mrf.mxu1 }
 0x1c5   : > { %v1237_v44 = vadd.f32 %v1236_v17, %v1182_v11 }
 0x1c6   : > { %v1343_v9 = vadd.f32 %v1342_v8, %v1289_v60 }
 0x1c8   : > { %v1474_v50 = vpack.c.bf16 %v1343_v9, %v2842_v15 }
 0x1ca   : > { %1492 = vst [vmem:[%s2854_s16 + $0x80] sm:$0xff] %v1474_v50 }
 0x1cb   : > { %v1290_v3 = vpop.f32.mrf.mxu2 }
 0x1cc   : > { %v1291_v4 = vadd.f32 %v1290_v3, %v1237_v44  ;;  %v1344_v49 = vpop.f32.mrf.mxu3 }
 0x1ce   : > { %v1345_v5 = vadd.f32 %v1344_v49, %v1291_v4 }
 0x1d0   : > { %v1475_v51 = vpack.c.bf16 %v1345_v5, %v2844_v48 }
 0x1d2   : > { %1493 = vst [vmem:[%s2854_s16 + $0x88] sm:$0xff] %v1475_v51 }
 0x1d3 PF: > { %s12_s11 = sadd.s32 1, %s2168_s11   ;;  %s2904_s9 = smov %s2164_s10 }
 0x1d4   : > { %p9_p5 = scmp.ge.s32.totalorder %s12_s11, 4   ;;  %s2905_s10 = smov %s2907_s12 }
 0x1d6   :  { %11 = sbr.rel (!%p9_p5) target bundleno = 2 (0x2), region = 69 }

// kernel: network_forward.5
= control target key start
LH: loop header
LB: loop body
LE: loop exit
PB: predicated region body
PF: predicated region fallthrough
CT: control target
= control target key end

     0   :  { %s7582_s9 = smov 0   ;;  %s7584_s10 = smov 0   ;;  %s10794_s0 = inlined_call_operand.vmem [shape: bf16[288,2304], index: 0, kind: input, shape index: {}]   ;;  %s10795_s1 = inlined_call_operand.vmem [shape: bf16[2304,256], index: 1, kind: input, shape index: {}]   ;;  %s10796_s2 = inlined_call_operand.vmem [shape: f32[288,256], index: 2, kind: output, shape index: {}]  }
   0x1   :  { %s7586_s11 = smov 0  }
   0x2 LB: > { %s31_s12 = sadd.s32 1, %s7561_s10  ;;  %p5261_p0 = scmp.ge.s32.totalorder %s7565_s11, 1  ;;  %s7565_s11 = sphi %s7586_s11, %s12_s11   ;;  %s7561_s10 = sphi %s7584_s10, %s11155_s10   ;;  %s7557_s9 = sphi %s7582_s9, %s11154_s9  }
   0x3   : > { %p33_p1 = scmp.ge.s32.totalorder %s31_s12, 2  ;;  %p161_p2 = scmp.lt.s32.totalorder %s7565_s11, 3 }
   0x5   : > { %s11157_s12 = smov (%p33_p1, %s31_s12), 0  ;;  %p162_p3 = pnand %p5261_p0, %p161_p2 }
   0x7   : > { %165 = sbr.rel (%p162_p3) target bundleno = 1475 (0x5c3), region = 28 }
   0xc   : > { %v5971_v0 = vld [vmem:[%s10795_s1 + $0x70] sm:$0xf]  ;;  %v7245_v1 = vld [vmem:[%s10795_s1 + $0x74] sm:$0xf0]  ;;  %v5963_v11 = vld [vmem:[%s10795_s1 + $0x60] sm:$0xf] }
   0xd   : > { %v6035_v2 = vld [vmem:[%s10795_s1 + $0xf0] sm:$0xf]  ;;  %v5972_v3 = vor.u32 %v7245_v1, %v5971_v0  ;;  %v7261_v4 = vld [vmem:[%s10795_s1 + $0xf4] sm:$0xf0]  ;;  %v7243_v13 = vld [vmem:[%s10795_s1 + $0x64] sm:$0xf0] }
   0xe   : > { %v6099_v5 = vld [vmem:[%s10795_s1 + $0x170] sm:$0xf]  ;;  %v7277_v6 = vld [vmem:[%s10795_s1 + $0x174] sm:$0xf0]  ;;  %v6036_v7 = vor.u32 %v7261_v4, %v6035_v2  ;;  %v6027_v14 = vld [vmem:[%s10795_s1 + $0xe0] sm:$0xf]  ;;  %v5964_v16 = vor.u32 %v7243_v13, %v5963_v11 }
   0xf   : > { %v6100_v8 = vor.u32 %v7277_v6, %v6099_v5  ;;  %v6163_v9 = vld [vmem:[%s10795_s1 + $0x1f0] sm:$0xf]  ;;  %v7293_v10 = vld [vmem:[%s10795_s1 + $0x1f4] sm:$0xf0]  ;;  %3015 = vmatpush.bf16.msra.mxu0 %v5972_v3  ;;  %v7259_v15 = vld [vmem:[%s10795_s1 + $0xe4] sm:$0xf0] }
  0x10   : > { %v6164_v12 = vor.u32 %v7293_v10, %v6163_v9  ;;  %3069 = vmatpush.bf16.msra.mxu1 %v6036_v7  ;;  %v6028_v17 = vor.u32 %v7259_v15, %v6027_v14  ;;  %v6091_v18 = vld [vmem:[%s10795_s1 + $0x160] sm:$0xf]  ;;  %v7275_v19 = vld [vmem:[%s10795_s1 + $0x164] sm:$0xf0]  ;;  %v5955_v23 = vld [vmem:[%s10795_s1 + $0x50] sm:$0xf] }
  0x11   : > { %3123 = vmatpush.bf16.msra.mxu2 %v6100_v8  ;;  %v6155_v20 = vld [vmem:[%s10795_s1 + $0x1e0] sm:$0xf]  ;;  %v6092_v21 = vor.u32 %v7275_v19, %v6091_v18  ;;  %v7291_v22 = vld [vmem:[%s10795_s1 + $0x1e4] sm:$0xf0]  ;;  %v7241_v24 = vld [vmem:[%s10795_s1 + $0x54] sm:$0xf0] }
  0x12   : > { %3177 = vmatpush.bf16.msra.mxu3 %v6164_v12  ;;  %v6156_v25 = vor.u32 %v7291_v22, %v6155_v20  ;;  %v6019_v26 = vld [vmem:[%s10795_s1 + $0xd0] sm:$0xf]  ;;  %v7257_v27 = vld [vmem:[%s10795_s1 + $0xd4] sm:$0xf0]  ;;  %v5956_v29 = vor.u32 %v7241_v24, %v5955_v23  ;;  %v5947_v35 = vld [vmem:[%s10795_s1 + $0x40] sm:$0xf] }
  0x13   : > { %v6083_v28 = vld [vmem:[%s10795_s1 + $0x150] sm:$0xf]  ;;  %3016 = vmatpush.bf16.msra.mxu0 %v5964_v16  ;;  %v7273_v30 = vld [vmem:[%s10795_s1 + $0x154] sm:$0xf0]  ;;  %v6020_v33 = vor.u32 %v7257_v27, %v6019_v26  ;;  %v7239_v36 = vld [vmem:[%s10795_s1 + $0x44] sm:$0xf0] }
  0x14   : > { %v6147_v31 = vld [vmem:[%s10795_s1 + $0x1d0] sm:$0xf]  ;;  %v7289_v32 = vld [vmem:[%s10795_s1 + $0x1d4] sm:$0xf0]  ;;  %3070 = vmatpush.bf16.msra.mxu1 %v6028_v17  ;;  %v6084_v34 = vor.u32 %v7273_v30, %v6083_v28  ;;  %v6011_v37 = vld [vmem:[%s10795_s1 + $0xc0] sm:$0xf]  ;;  %v5948_v44 = vor.u32 %v7239_v36, %v5947_v35 }
  0x15   : > { %3124 = vmatpush.bf16.msra.mxu2 %v6092_v21  ;;  %v6148_v38 = vor.u32 %v7289_v32, %v6147_v31  ;;  %v7255_v39 = vld [vmem:[%s10795_s1 + $0xc4] sm:$0xf0]  ;;  %v6075_v40 = vld [vmem:[%s10795_s1 + $0x140] sm:$0xf]  ;;  %v5939_v47 = vld [vmem:[%s10795_s1 + $0x30] sm:$0xf] }
  0x16   : > { %3178 = vmatpush.bf16.msra.mxu3 %v6156_v25  ;;  %v7271_v41 = vld [vmem:[%s10795_s1 + $0x144] sm:$0xf0]  ;;  %v6139_v42 = vld [vmem:[%s10795_s1 + $0x1c0] sm:$0xf]  ;;  %v6012_v45 = vor.u32 %v7255_v39, %v6011_v37  ;;  %v7237_v48 = vld [vmem:[%s10795_s1 + $0x34] sm:$0xf0] }
  0x17   : > { %v7287_v43 = vld [vmem:[%s10795_s1 + $0x1c4] sm:$0xf0]  ;;  %3017 = vmatpush.bf16.msra.mxu0 %v5956_v29  ;;  %v6076_v46 = vor.u32 %v7271_v41, %v6075_v40  ;;  %v6003_v49 = vld [vmem:[%s10795_s1 + $0xb0] sm:$0xf]  ;;  %v7253_v51 = vld [vmem:[%s10795_s1 + $0xb4] sm:$0xf0]  ;;  %v5940_v56 = vor.u32 %v7237_v48, %v5939_v47 }
  0x18   : > { %3071 = vmatpush.bf16.msra.mxu1 %v6020_v33  ;;  %v6140_v50 = vor.u32 %v7287_v43, %v6139_v42  ;;  %v6067_v52 = vld [vmem:[%s10795_s1 + $0x130] sm:$0xf]  ;;  %v7269_v53 = vld [vmem:[%s10795_s1 + $0x134] sm:$0xf0]  ;;  %v6004_v57 = vor.u32 %v7253_v51, %v6003_v49  ;;  %v5931_v59 = vld [vmem:[%s10795_s1 + $0x20] sm:$0xf] }
  0x19   : > { %3125 = vmatpush.bf16.msra.mxu2 %v6084_v34  ;;  %v6131_v54 = vld [vmem:[%s10795_s1 + $0x1b0] sm:$0xf]  ;;  %v7285_v55 = vld [vmem:[%s10795_s1 + $0x1b4] sm:$0xf0]  ;;  %v6068_v58 = vor.u32 %v7269_v53, %v6067_v52  ;;  %v7235_v60 = vld [vmem:[%s10795_s1 + $0x24] sm:$0xf0] }
  0x1a   : > { %3179 = vmatpush.bf16.msra.mxu3 %v6148_v38  ;;  %v5995_v61 = vld [vmem:[%s10795_s1 + $0xa0] sm:$0xf]  ;;  %v6132_v62 = vor.u32 %v7285_v55, %v6131_v54  ;;  %v7251_v63 = vld [vmem:[%s10795_s1 + $0xa4] sm:$0xf0]  ;;  %v5932_v4 = vor.u32 %v7235_v60, %v5931_v59  ;;  %v5923_v5 = vld [vmem:[%s10795_s1 + $0x10] sm:$0xf] }
  0x1b   : > { %3018 = vmatpush.bf16.msra.mxu0 %v5948_v44  ;;  %v6059_v0 = vld [vmem:[%s10795_s1 + $0x120] sm:$0xf]  ;;  %v7267_v1 = vld [vmem:[%s10795_s1 + $0x124] sm:$0xf0]  ;;  %v5996_v6 = vor.u32 %v7251_v63, %v5995_v61  ;;  %v7233_v8 = vld [vmem:[%s10795_s1 + $0x14] sm:$0xf0] }
  0x1c   : > { %3072 = vmatpush.bf16.msra.mxu1 %v6012_v45  ;;  %v6123_v2 = vld [vmem:[%s10795_s1 + $0x1a0] sm:$0xf]  ;;  %v7283_v3 = vld [vmem:[%s10795_s1 + $0x1a4] sm:$0xf0]  ;;  %v6060_v7 = vor.u32 %v7267_v1, %v6059_v0  ;;  %v5987_v9 = vld [vmem:[%s10795_s1 + $0x90] sm:$0xf]  ;;  %v5924_v16 = vor.u32 %v7233_v8, %v5923_v5 }
  0x1d   : > { %3126 = vmatpush.bf16.msra.mxu2 %v6076_v46  ;;  %v7249_v10 = vld [vmem:[%s10795_s1 + $0x94] sm:$0xf0]  ;;  %v6124_v11 = vor.u32 %v7283_v3, %v6123_v2  ;;  %v6051_v12 = vld [vmem:[%s10795_s1 + $0x110] sm:$0xf]  ;;  %s203_s25 = smul.u32 18, %s7557_s9 }
  0x1e   : > { %3180 = vmatpush.bf16.msra.mxu3 %v6140_v50  ;;  %v7265_v13 = vld [vmem:[%s10795_s1 + $0x114] sm:$0xf0]  ;;  %v6115_v14 = vld [vmem:[%s10795_s1 + $0x190] sm:$0xf]  ;;  %v5915_v17 = vld [vmem:[%s10795_s1] sm:$0xf]  ;;  %v5988_v19 = vor.u32 %v7249_v10, %v5987_v9 }
  0x1f   : > { %3019 = vmatpush.bf16.msra.mxu0 %v5940_v56  ;;  %v7281_v15 = vld [vmem:[%s10795_s1 + $0x194] sm:$0xf0]  ;;  %v7231_v18 = vld [vmem:[%s10795_s1 + $0x4] sm:$0xf0]  ;;  %p205_p4 = scmp.lt.s32.totalorder %s203_s25, 35  ;;  %v6052_v20 = vor.u32 %v7265_v13, %v6051_v12 }
  0x20   : > { %3073 = vmatpush.bf16.msra.mxu1 %v6004_v57  ;;  %v5979_v21 = vld [vmem:[%s10795_s1 + $0x80] sm:$0xf]  ;;  %v7247_v22 = vld [vmem:[%s10795_s1 + $0x84] sm:$0xf0]  ;;  %v6116_v24 = vor.u32 %v7281_v15, %v6115_v14  ;;  %v6355_v28 = vld [vmem:[%s10795_s1 + $0x370] sm:$0xf]  ;;  %v5916_v30 = vor.u32 %v7231_v18, %v5915_v17 }
  0x21   : > { %3127 = vmatpush.bf16.msra.mxu2 %v6068_v58  ;;  %v6043_v23 = vld [vmem:[%s10795_s1 + $0x100] sm:$0xf]  ;;  %v7263_v25 = vld [vmem:[%s10795_s1 + $0x104] sm:$0xf0]  ;;  %s11159_s25 = smov (!%p205_p4, %s203_s25), 35  ;;  %v5980_v35 = vor.u32 %v7247_v22, %v5979_v21 }
  0x22   : > { %3181 = vmatpush.bf16.msra.mxu3 %v6132_v62  ;;  %v6107_v26 = vld [vmem:[%s10795_s1 + $0x180] sm:$0xf]  ;;  %v7279_v27 = vld [vmem:[%s10795_s1 + $0x184] sm:$0xf0]  ;;  %v7341_v29 = vld [vmem:[%s10795_s1 + $0x374] sm:$0xf0]  ;;  %v6044_v36 = vor.u32 %v7263_v25, %v6043_v23 }
  0x23   : > { %3020 = vmatpush.bf16.msra.mxu0 %v5932_v4  ;;  %s7518_s26 = smul.u32 72, %s11159_s25  ;;  %v6227_v31 = vld [vmem:[%s10795_s1 + $0x270] sm:$0xf]  ;;  %v7309_v32 = vld [vmem:[%s10795_s1 + $0x274] sm:$0xf0]  ;;  %v6108_v40 = vor.u32 %v7279_v27, %v6107_v26  ;;  %v6356_v41 = vor.u32 %v7341_v29, %v6355_v28  ;;  %s7067_s8 = sshll.u32 %s11159_s25, 4 }
  0x24   : > { %3074 = vmatpush.bf16.msra.mxu1 %v5996_v6  ;;  %v6419_v33 = vld [vmem:[%s10795_s1 + $0x3f0] sm:$0xf]  ;;  %v7357_v34 = vld [vmem:[%s10795_s1 + $0x3f4] sm:$0xf0]  ;;  %v6347_v39 = vld [vmem:[%s10795_s1 + $0x360] sm:$0xf]  ;;  %v6228_v57 = vor.u32 %v7309_v32, %v6227_v31 }
  0x25   : > { %3128 = vmatpush.bf16.msra.mxu2 %v6060_v7  ;;  %v6291_v37 = vld [vmem:[%s10795_s1 + $0x2f0] sm:$0xf]  ;;  %v7325_v38 = vld [vmem:[%s10795_s1 + $0x2f4] sm:$0xf0]  ;;  %s7828_s18 = scalar_lea.vmem %s10794_s0, %s7518_s26  ;;  %v7339_v42 = vld [vmem:[%s10795_s1 + $0x364] sm:$0xf0]  ;;  %v6420_v48 = vor.u32 %v7357_v34, %v6419_v33 }
  0x26   : > { %3182 = vmatpush.bf16.msra.mxu3 %v6124_v11  ;;  %v6411_v43 = vld [vmem:[%s10795_s1 + $0x3e0] sm:$0xf]  ;;  %v7355_v44 = vld [vmem:[%s10795_s1 + $0x3e4] sm:$0xf0]  ;;  %v7068_v47 = vld [vmem:[%s7828_s18 + $0x4] sm:$0xf]  ;;  %v6292_v59 = vor.u32 %v7325_v38, %v6291_v37  ;;  %v6348_v60 = vor.u32 %v7339_v42, %v6347_v39 }
  0x27   : > { %3021 = vmatpush.bf16.msra.mxu0 %v5924_v16  ;;  %v5267_v45 = vld [vmem:[%s7828_s18] sm:$0xf]  ;;  %v7077_v46 = vld [vmem:[%s7828_s18 + $0x44] sm:$0xf0]  ;;  %v5269_v50 = vld [vmem:[%s7828_s18 + $0x48] sm:$0xf0]  ;;  %v6412_v63 = vor.u32 %v7355_v44, %v6411_v43 }
  0x28   : > { %3075 = vmatpush.bf16.msra.mxu1 %v5988_v19  ;;  %v7842_v49 = vor.u32 %v7077_v46, %v5267_v45  ;;  %v5275_v51 = vld [vmem:[%s7828_s18 + $0x8] sm:$0xf]  ;;  %v7078_v52 = vld [vmem:[%s7828_s18 + $0x4c] sm:$0xf0]  ;;  %v7847_v53 = vor.u32 %v7068_v47, %v5269_v50  ;;  %v7069_v55 = vld [vmem:[%s7828_s18 + $0xc] sm:$0xf] }
  0x29   : > { %3129 = vmatpush.bf16.msra.mxu2 %v6052_v20  ;;  %v7849_v54 = vor.u32 %v7078_v52, %v5275_v51  ;;  %v5277_v56 = vld [vmem:[%s7828_s18 + $0x50] sm:$0xf0]  ;;  %v6219_v61 = vld [vmem:[%s10795_s1 + $0x260] sm:$0xf]  ;;  %v7307_v62 = vld [vmem:[%s10795_s1 + $0x264] sm:$0xf0] }
  0x2a   : > { %3183 = vmatpush.bf16.msra.mxu3 %v6116_v24  ;;  %v7853_v58 = vor.u32 %v7069_v55, %v5277_v56  ;;  %v6283_v0 = vld [vmem:[%s10795_s1 + $0x2e0] sm:$0xf]  ;;  %v7323_v1 = vld [vmem:[%s10795_s1 + $0x2e4] sm:$0xf0]  ;;  %v6220_v2 = vor.u32 %v7307_v62, %v6219_v61  ;;  %v6339_v4 = vld [vmem:[%s10795_s1 + $0x350] sm:$0xf] }
  0x2b   : > { %3022 = vmatpush.bf16.msra.mxu0 %v5916_v30  ;;  %v6284_v3 = vor.u32 %v7323_v1, %v6283_v0  ;;  %v7337_v5 = vld [vmem:[%s10795_s1 + $0x354] sm:$0xf0]  ;;  %v6211_v6 = vld [vmem:[%s10795_s1 + $0x250] sm:$0xf]  ;;  %v7086_v18 = vld [vmem:[%s7828_s18 + $0x94] sm:$0xf] }
  0x2c   : > { %3076 = vmatpush.bf16.msra.mxu1 %v5980_v35  ;;  %v6340_v7 = vor.u32 %v7337_v5, %v6339_v4  ;;  %v7305_v8 = vld [vmem:[%s10795_s1 + $0x254] sm:$0xf0]  ;;  %v6403_v9 = vld [vmem:[%s10795_s1 + $0x3d0] sm:$0xf]  ;;  %v5341_v19 = vld [vmem:[%s7828_s18 + $0xd8] sm:$0xf0] }
  0x2d   : > { %3130 = vmatpush.bf16.msra.mxu2 %v6044_v36  ;;  %v7353_v10 = vld [vmem:[%s10795_s1 + $0x3d4] sm:$0xf0]  ;;  %v6212_v11 = vor.u32 %v7305_v8, %v6211_v6  ;;  %v6275_v13 = vld [vmem:[%s10795_s1 + $0x2d0] sm:$0xf]  ;;  %v7096_v21 = vld [vmem:[%s7828_s18 + $0xdc] sm:$0xf0]  ;;  %v7905_v25 = vor.u32 %v7086_v18, %v5341_v19 }
  0x2e   : > { %3184 = vmatpush.bf16.msra.mxu3 %v6108_v40  ;;  %3023 = vmatmul.bf16.vlgmr.msra.gmra.mxu0 %v7842_v49  ;;  %v6404_v12 = vor.u32 %v7353_v10, %v6403_v9  ;;  %v7321_v14 = vld [vmem:[%s10795_s1 + $0x2d4] sm:$0xf0]  ;;  %v5339_v16 = vld [vmem:[%s7828_s18 + $0x90] sm:$0xf]  ;;  %v7087_v22 = vld [vmem:[%s7828_s18 + $0x9c] sm:$0xf] }
  0x2f   : > { %3077 = vmatmul.bf16.vlgmr.msra.gmra.mxu1 %v7847_v53  ;;  %3231 = vmatpush.bf16.msrb.mxu0 %v6228_v57  ;;  %v6276_v15 = vor.u32 %v7321_v14, %v6275_v13  ;;  %v7095_v17 = vld [vmem:[%s7828_s18 + $0xd4] sm:$0xf0]  ;;  %v5349_v23 = vld [vmem:[%s7828_s18 + $0xe0] sm:$0xf0]  ;;  %v6331_v28 = vld [vmem:[%s10795_s1 + $0x340] sm:$0xf] }
  0x30   : > { %3131 = vmatmul.bf16.vlgmr.msra.gmra.mxu2 %v7849_v54  ;;  %3285 = vmatpush.bf16.msrb.mxu1 %v6292_v59  ;;  %v5347_v20 = vld [vmem:[%s7828_s18 + $0x98] sm:$0xf]  ;;  %v7903_v24 = vor.u32 %v7095_v17, %v5339_v16  ;;  %v7909_v27 = vor.u32 %v7087_v22, %v5349_v23  ;;  %v7335_v29 = vld [vmem:[%s10795_s1 + $0x344] sm:$0xf0]  ;;  %v6203_v30 = vld [vmem:[%s10795_s1 + $0x240] sm:$0xf] }
  0x31   : > { %3339 = vmatpush.bf16.msrb.mxu2 %v6356_v41  ;;  %3185 = vmatmul.bf16.vlgmr.msra.gmra.mxu3 %v7853_v58  ;;  %v7907_v26 = vor.u32 %v7096_v21, %v5347_v20  ;;  %v6332_v31 = vor.u32 %v7335_v29, %v6331_v28  ;;  %v7303_v32 = vld [vmem:[%s10795_s1 + $0x244] sm:$0xf0]  ;;  %v6395_v33 = vld [vmem:[%s10795_s1 + $0x3c0] sm:$0xf]  ;;  %v7104_v42 = vld [vmem:[%s7828_s18 + $0x124] sm:$0xf] }
  0x32   : > { %3393 = vmatpush.bf16.msrb.mxu3 %v6420_v48  ;;  %10917 = vst [vmem:[#allocation4_spill] sm:$0xff] %v7909_v27  ;;  %v7351_v34 = vld [vmem:[%s10795_s1 + $0x3c4] sm:$0xf0]  ;;  %v6204_v35 = vor.u32 %v7303_v32, %v6203_v30  ;;  %v6267_v37 = vld [vmem:[%s10795_s1 + $0x2c0] sm:$0xf] }
  0x33   : > { %3232 = vmatpush.bf16.msrb.mxu0 %v6220_v2  ;;  %10916 = vst [vmem:[#allocation3_spill] sm:$0xff] %v7907_v26  ;;  %v6396_v36 = vor.u32 %v7351_v34, %v6395_v33  ;;  %v7319_v38 = vld [vmem:[%s10795_s1 + $0x2c4] sm:$0xf0]  ;;  %v5411_v40 = vld [vmem:[%s7828_s18 + $0x120] sm:$0xf] }
  0x34   : > { %3286 = vmatpush.bf16.msrb.mxu1 %v6284_v3  ;;  %v6268_v39 = vor.u32 %v7319_v38, %v6267_v37  ;;  %v7113_v41 = vld [vmem:[%s7828_s18 + $0x164] sm:$0xf0]  ;;  %v5413_v43 = vld [vmem:[%s7828_s18 + $0x168] sm:$0xf0]  ;;  %v7114_v45 = vld [vmem:[%s7828_s18 + $0x16c] sm:$0xf0] }
  0x35   : > { %3340 = vmatpush.bf16.msrb.mxu2 %v6348_v60  ;;  %v5419_v44 = vld [vmem:[%s7828_s18 + $0x128] sm:$0xf]  ;;  %v7105_v46 = vld [vmem:[%s7828_s18 + $0x12c] sm:$0xf]  ;;  %v5421_v47 = vld [vmem:[%s7828_s18 + $0x170] sm:$0xf0]  ;;  %v7947_v48 = vor.u32 %v7113_v41, %v5411_v40  ;;  %v7949_v50 = vor.u32 %v7104_v42, %v5413_v43 }
  0x36   : > { %3394 = vmatpush.bf16.msrb.mxu3 %v6412_v63  ;;  %v7951_v51 = vor.u32 %v7114_v45, %v5419_v44  ;;  %v7953_v52 = vor.u32 %v7105_v46, %v5421_v47  ;;  %v6323_v55 = vld [vmem:[%s10795_s1 + $0x330] sm:$0xf]  ;;  %v7333_v56 = vld [vmem:[%s10795_s1 + $0x334] sm:$0xf0]  ;;  %v7122_v6 = vld [vmem:[%s7828_s18 + $0x1b4] sm:$0xf] }
  0x37   : > { %3233 = vmatpush.bf16.msrb.mxu0 %v6212_v11  ;;  %v6195_v57 = vld [vmem:[%s10795_s1 + $0x230] sm:$0xf]  ;;  %v6324_v59 = vor.u32 %v7333_v56, %v6323_v55  ;;  %v7301_v60 = vld [vmem:[%s10795_s1 + $0x234] sm:$0xf0]  ;;  %v7132_v9 = vld [vmem:[%s7828_s18 + $0x1fc] sm:$0xf0] }
  0x38   : > { %3287 = vmatpush.bf16.msrb.mxu1 %v6276_v15  ;;  %10918 = vst [vmem:[#allocation5_spill] sm:$0xff] %v7951_v51  ;;  %v6387_v61 = vld [vmem:[%s10795_s1 + $0x3b0] sm:$0xf]  ;;  %v7349_v62 = vld [vmem:[%s10795_s1 + $0x3b4] sm:$0xf0]  ;;  %v6196_v63 = vor.u32 %v7301_v60, %v6195_v57 }
  0x39   : > { %3341 = vmatpush.bf16.msrb.mxu2 %v6340_v7  ;;  %10919 = vst [vmem:[#allocation6_spill] sm:$0xff] %v7953_v52  ;;  %v6388_v0 = vor.u32 %v7349_v62, %v6387_v61  ;;  %v6259_v1 = vld [vmem:[%s10795_s1 + $0x2b0] sm:$0xf]  ;;  %v7317_v2 = vld [vmem:[%s10795_s1 + $0x2b4] sm:$0xf0] }
  0x3a   : > { %3395 = vmatpush.bf16.msrb.mxu3 %v6404_v12  ;;  %v6260_v3 = vor.u32 %v7317_v2, %v6259_v1  ;;  %v5483_v4 = vld [vmem:[%s7828_s18 + $0x1b0] sm:$0xf]  ;;  %v7131_v5 = vld [vmem:[%s7828_s18 + $0x1f4] sm:$0xf0]  ;;  %v5485_v7 = vld [vmem:[%s7828_s18 + $0x1f8] sm:$0xf0] }
  0x3b   : > { %3234 = vmatpush.bf16.msrb.mxu0 %v6204_v35  ;;  %v5491_v8 = vld [vmem:[%s7828_s18 + $0x1b8] sm:$0xf]  ;;  %v7123_v10 = vld [vmem:[%s7828_s18 + $0x1bc] sm:$0xf]  ;;  %v5493_v11 = vld [vmem:[%s7828_s18 + $0x200] sm:$0xf0]  ;;  %v7991_v12 = vor.u32 %v7131_v5, %v5483_v4  ;;  %v7993_v13 = vor.u32 %v7122_v6, %v5485_v7 }
  0x3c   : > { %3288 = vmatpush.bf16.msrb.mxu1 %v6268_v39  ;;  %v7995_v14 = vor.u32 %v7132_v9, %v5491_v8  ;;  %v7997_v15 = vor.u32 %v7123_v10, %v5493_v11  ;;  %v6315_v16 = vld [vmem:[%s10795_s1 + $0x320] sm:$0xf]  ;;  %v7331_v17 = vld [vmem:[%s10795_s1 + $0x324] sm:$0xf0]  ;;  %v7140_v34 = vld [vmem:[%s7828_s18 + $0x244] sm:$0xf] }
  0x3d   : > { %3342 = vmatpush.bf16.msrb.mxu2 %v6332_v31  ;;  %v6187_v18 = vld [vmem:[%s10795_s1 + $0x220] sm:$0xf]  ;;  %v6316_v19 = vor.u32 %v7331_v17, %v6315_v16  ;;  %v7299_v20 = vld [vmem:[%s10795_s1 + $0x224] sm:$0xf0]  ;;  %v5557_v35 = vld [vmem:[%s7828_s18 + $0x288] sm:$0xf0] }
  0x3e   : > { %3028 = vmatmul.bf16.gmra.mxu0 %v7903_v24  ;;  %3396 = vmatpush.bf16.msrb.mxu3 %v6396_v36  ;;  %10920 = vst [vmem:[#allocation7_spill] sm:$0xff] %v7995_v14  ;;  %v6379_v21 = vld [vmem:[%s10795_s1 + $0x3a0] sm:$0xf]  ;;  %v7347_v22 = vld [vmem:[%s10795_s1 + $0x3a4] sm:$0xf0]  ;;  %v6188_v23 = vor.u32 %v7299_v20, %v6187_v18  ;;  %v8037_v41 = vor.u32 %v7140_v34, %v5557_v35 }
  0x3f   : > { %3082 = vmatmul.bf16.gmra.mxu1 %v7905_v25  ;;  %3235 = vmatpush.bf16.msrb.mxu0 %v6196_v63  ;;  %10921 = vst [vmem:[#allocation8_spill] sm:$0xff] %v7997_v15  ;;  %v6380_v28 = vor.u32 %v7347_v22, %v6379_v21  ;;  %v6251_v29 = vld [vmem:[%s10795_s1 + $0x2a0] sm:$0xf]  ;;  %v7315_v30 = vld [vmem:[%s10795_s1 + $0x2a4] sm:$0xf0] }
  0x40   : > { %3136 = vmatmul.bf16.gmra.mxu2 %v7907_v26  ;;  %3289 = vmatpush.bf16.msrb.mxu1 %v6260_v3  ;;  %v6252_v31 = vor.u32 %v7315_v30, %v6251_v29  ;;  %v5555_v32 = vld [vmem:[%s7828_s18 + $0x240] sm:$0xf]  ;;  %v7149_v33 = vld [vmem:[%s7828_s18 + $0x284] sm:$0xf0]  ;;  %v7150_v37 = vld [vmem:[%s7828_s18 + $0x28c] sm:$0xf0] }
  0x41   : > { %3190 = vmatmul.bf16.gmra.mxu3 %v7909_v27  ;;  %3343 = vmatpush.bf16.msrb.mxu2 %v6324_v59  ;;  %v5563_v36 = vld [vmem:[%s7828_s18 + $0x248] sm:$0xf]  ;;  %v7141_v38 = vld [vmem:[%s7828_s18 + $0x24c] sm:$0xf]  ;;  %v5565_v39 = vld [vmem:[%s7828_s18 + $0x290] sm:$0xf0]  ;;  %v8035_v40 = vor.u32 %v7149_v33, %v5555_v32 }
  0x42   : > { %3397 = vmatpush.bf16.msrb.mxu3 %v6388_v0  ;;  %v8039_v42 = vor.u32 %v7150_v37, %v5563_v36  ;;  %v8041_v43 = vor.u32 %v7141_v38, %v5565_v39  ;;  %v6307_v44 = vld [vmem:[%s10795_s1 + $0x310] sm:$0xf]  ;;  %v7329_v45 = vld [vmem:[%s10795_s1 + $0x314] sm:$0xf0]  ;;  %v7158_v63 = vld [vmem:[%s7828_s18 + $0x2d4] sm:$0xf] }
  0x43   : > { %3236 = vmatpush.bf16.msrb.mxu0 %v6188_v23  ;;  %v6179_v46 = vld [vmem:[%s10795_s1 + $0x210] sm:$0xf]  ;;  %v6308_v47 = vor.u32 %v7329_v45, %v6307_v44  ;;  %v7297_v55 = vld [vmem:[%s10795_s1 + $0x214] sm:$0xf0]  ;;  %v5629_v0 = vld [vmem:[%s7828_s18 + $0x318] sm:$0xf0] }
  0x44   : > { %3290 = vmatpush.bf16.msrb.mxu1 %v6252_v31  ;;  %10922 = vst [vmem:[#allocation9_spill] sm:$0xff] %v8039_v42  ;;  %v6371_v56 = vld [vmem:[%s10795_s1 + $0x390] sm:$0xf]  ;;  %v7345_v57 = vld [vmem:[%s10795_s1 + $0x394] sm:$0xf0]  ;;  %v6180_v59 = vor.u32 %v7297_v55, %v6179_v46  ;;  %v8075_v6 = vor.u32 %v7158_v63, %v5629_v0 }
  0x45   : > { %3344 = vmatpush.bf16.msrb.mxu2 %v6316_v19  ;;  %10923 = vst [vmem:[#allocation10_spill] sm:$0xff] %v8041_v43  ;;  %v6372_v60 = vor.u32 %v7345_v57, %v6371_v56  ;;  %v5627_v61 = vld [vmem:[%s7828_s18 + $0x2d0] sm:$0xf]  ;;  %v7167_v62 = vld [vmem:[%s7828_s18 + $0x314] sm:$0xf0] }
  0x46   : > { %3398 = vmatpush.bf16.msrb.mxu3 %v6380_v28  ;;  %v5635_v1 = vld [vmem:[%s7828_s18 + $0x2d8] sm:$0xf]  ;;  %v7168_v2 = vld [vmem:[%s7828_s18 + $0x31c] sm:$0xf0]  ;;  %v7159_v3 = vld [vmem:[%s7828_s18 + $0x2dc] sm:$0xf]  ;;  %v8073_v5 = vor.u32 %v7167_v62, %v5627_v61 }
  0x47   : > { %3237 = vmatpush.bf16.msrb.mxu0 %v6180_v59  ;;  %v5637_v4 = vld [vmem:[%s7828_s18 + $0x320] sm:$0xf0]  ;;  %v8077_v7 = vor.u32 %v7168_v2, %v5635_v1  ;;  %v6243_v9 = vld [vmem:[%s10795_s1 + $0x290] sm:$0xf]  ;;  %v7313_v10 = vld [vmem:[%s10795_s1 + $0x294] sm:$0xf0] }
  0x48   : > { %v8079_v8 = vor.u32 %v7159_v3, %v5637_v4  ;;  %v6244_v11 = vor.u32 %v7313_v10, %v6243_v9  ;;  %v5699_v16 = vld [vmem:[%s7828_s18 + $0x360] sm:$0xf]  ;;  %v7185_v17 = vld [vmem:[%s7828_s18 + $0x3a4] sm:$0xf0]  ;;  %v7176_v18 = vld [vmem:[%s7828_s18 + $0x364] sm:$0xf] }
  0x49   : > { %3345 = vmatpush.bf16.msrb.mxu2 %v6308_v47  ;;  %10924 = vst [vmem:[#allocation11_spill] sm:$0xff] %v8077_v7  ;;  %v5701_v19 = vld [vmem:[%s7828_s18 + $0x3a8] sm:$0xf0]  ;;  %v5707_v20 = vld [vmem:[%s7828_s18 + $0x368] sm:$0xf]  ;;  %v8099_v28 = vor.u32 %v7185_v17, %v5699_v16 }
  0x4a   : > { %3399 = vmatpush.bf16.msrb.mxu3 %v6372_v60  ;;  %10925 = vst [vmem:[#allocation12_spill] sm:$0xff] %v8079_v8  ;;  %3291 = vmatpush.bf16.msrb.mxu1 %v6244_v11  ;;  %v7186_v21 = vld [vmem:[%s7828_s18 + $0x3ac] sm:$0xf0]  ;;  %v7177_v22 = vld [vmem:[%s7828_s18 + $0x36c] sm:$0xf]  ;;  %v8101_v29 = vor.u32 %v7176_v18, %v5701_v19 }
  0x4b   : > { %v5709_v23 = vld [vmem:[%s7828_s18 + $0x3b0] sm:$0xf0]  ;;  %v8103_v30 = vor.u32 %v7186_v21, %v5707_v20  ;;  %v6299_v32 = vld [vmem:[%s10795_s1 + $0x300] sm:$0xf]  ;;  %v7327_v33 = vld [vmem:[%s10795_s1 + $0x304] sm:$0xf0] }
  0x4c   : > { %v8105_v31 = vor.u32 %v7177_v22, %v5709_v23  ;;  %v6300_v34 = vor.u32 %v7327_v33, %v6299_v32  ;;  %v6171_v35 = vld [vmem:[%s10795_s1 + $0x200] sm:$0xf]  ;;  %v7295_v36 = vld [vmem:[%s10795_s1 + $0x204] sm:$0xf0]  ;;  %v5771_v55 = vld [vmem:[%s7828_s18 + $0x3f0] sm:$0xf] }
  0x4d   : > { %10926 = vst [vmem:[#allocation13_spill] sm:$0xff] %v8103_v30  ;;  %v6172_v37 = vor.u32 %v7295_v36, %v6171_v35  ;;  %v6363_v38 = vld [vmem:[%s10795_s1 + $0x380] sm:$0xf]  ;;  %v7343_v39 = vld [vmem:[%s10795_s1 + $0x384] sm:$0xf0] }
  0x4e   : > { %3033 = vmatmul.bf16.gmra.mxu0 %v7947_v48  ;;  %10927 = vst [vmem:[#allocation14_spill] sm:$0xff] %v8105_v31  ;;  %3346 = vmatpush.bf16.msrb.mxu2 %v6300_v34  ;;  %v6235_v44 = vld [vmem:[%s10795_s1 + $0x280] sm:$0xf]  ;;  %v6364_v45 = vor.u32 %v7343_v39, %v6363_v38  ;;  %v7311_v46 = vld [vmem:[%s10795_s1 + $0x284] sm:$0xf0] }
  0x4f   : > { %3087 = vmatmul.bf16.gmra.mxu1 %v7949_v50  ;;  %3238 = vmatpush.bf16.msrb.mxu0 %v6172_v37  ;;  %v6236_v47 = vor.u32 %v7311_v46, %v6235_v44  ;;  %v7203_v56 = vld [vmem:[%s7828_s18 + $0x434] sm:$0xf0]  ;;  %v7194_v57 = vld [vmem:[%s7828_s18 + $0x3f4] sm:$0xf]  ;;  %v5773_v59 = vld [vmem:[%s7828_s18 + $0x438] sm:$0xf0] }
  0x50   : > { %3141 = vmatmul.bf16.gmra.mxu2 %v7951_v51  ;;  %3400 = vmatpush.bf16.msrb.mxu3 %v6364_v45  ;;  %v5779_v60 = vld [vmem:[%s7828_s18 + $0x3f8] sm:$0xf]  ;;  %v7204_v61 = vld [vmem:[%s7828_s18 + $0x43c] sm:$0xf0]  ;;  %v7195_v62 = vld [vmem:[%s7828_s18 + $0x3fc] sm:$0xf]  ;;  %v8143_v0 = vor.u32 %v7203_v56, %v5771_v55  ;;  %v8145_v1 = vor.u32 %v7194_v57, %v5773_v59 }
  0x51   : > { %3195 = vmatmul.bf16.gmra.mxu3 %v7953_v52  ;;  %3292 = vmatpush.bf16.msrb.mxu1 %v6236_v47  ;;  %v5781_v63 = vld [vmem:[%s7828_s18 + $0x440] sm:$0xf0]  ;;  %v8147_v2 = vor.u32 %v7204_v61, %v5779_v60  ;;  %v6611_v4 = vld [vmem:[%s10795_s1 + $0x570] sm:$0xf]  ;;  %v7405_v9 = vld [vmem:[%s10795_s1 + $0x574] sm:$0xf0] }
  0x52   : > { %v8149_v3 = vor.u32 %v7195_v62, %v5781_v63  ;;  %v6483_v10 = vld [vmem:[%s10795_s1 + $0x470] sm:$0xf]  ;;  %v6612_v11 = vor.u32 %v7405_v9, %v6611_v4  ;;  %v7373_v16 = vld [vmem:[%s10795_s1 + $0x474] sm:$0xf0]  ;;  %v5843_v32 = vld [vmem:[%s7828_s18 + $0x480] sm:$0xf] }
  0x53   : > { %10928 = vst [vmem:[#allocation15_spill] sm:$0xff] %v8147_v2  ;;  %v6675_v17 = vld [vmem:[%s10795_s1 + $0x5f0] sm:$0xf]  ;;  %v7421_v18 = vld [vmem:[%s10795_s1 + $0x5f4] sm:$0xf0]  ;;  %v6484_v19 = vor.u32 %v7373_v16, %v6483_v10 }
  0x54   : > { %10929 = vst [vmem:[#allocation16_spill] sm:$0xff] %v8149_v3  ;;  %v6676_v20 = vor.u32 %v7421_v18, %v6675_v17  ;;  %3555 = vmatpush.bf16.msra.mxu2 %v6612_v11  ;;  %v6547_v21 = vld [vmem:[%s10795_s1 + $0x4f0] sm:$0xf]  ;;  %v7389_v22 = vld [vmem:[%s10795_s1 + $0x4f4] sm:$0xf0] }
  0x55   : > { %3447 = vmatpush.bf16.msra.mxu0 %v6484_v19  ;;  %v6548_v23 = vor.u32 %v7389_v22, %v6547_v21  ;;  %v7221_v33 = vld [vmem:[%s7828_s18 + $0x4c4] sm:$0xf0]  ;;  %v7212_v34 = vld [vmem:[%s7828_s18 + $0x484] sm:$0xf]  ;;  %v5845_v35 = vld [vmem:[%s7828_s18 + $0x4c8] sm:$0xf0] }
  0x56   : > { %3609 = vmatpush.bf16.msra.mxu3 %v6676_v20  ;;  %v5851_v36 = vld [vmem:[%s7828_s18 + $0x488] sm:$0xf]  ;;  %v7222_v37 = vld [vmem:[%s7828_s18 + $0x4cc] sm:$0xf0]  ;;  %v7213_v38 = vld [vmem:[%s7828_s18 + $0x48c] sm:$0xf]  ;;  %v8187_v44 = vor.u32 %v7221_v33, %v5843_v32  ;;  %v8189_v46 = vor.u32 %v7212_v34, %v5845_v35 }
  0x57   : > { %3501 = vmatpush.bf16.msra.mxu1 %v6548_v23  ;;  %v5853_v39 = vld [vmem:[%s7828_s18 + $0x4d0] sm:$0xf0]  ;;  %v8191_v47 = vor.u32 %v7222_v37, %v5851_v36  ;;  %v6603_v59 = vld [vmem:[%s10795_s1 + $0x560] sm:$0xf]  ;;  %v7403_v60 = vld [vmem:[%s10795_s1 + $0x564] sm:$0xf0] }
  0x58   : > { %v8193_v56 = vor.u32 %v7213_v38, %v5853_v39  ;;  %v6604_v61 = vor.u32 %v7403_v60, %v6603_v59  ;;  %v6475_v17 = vld [vmem:[%s10795_s1 + $0x460] sm:$0xf]  ;;  %v7371_v18 = vld [vmem:[%s10795_s1 + $0x464] sm:$0xf0]  ;;  %v5283_v32 = vld [vmem:[%s7828_s18 + $0x10] sm:$0xf] }
  0x59   : > { %10930 = vst [vmem:[#allocation17_spill] sm:$0xff] %v8191_v47  ;;  %v6667_v19 = vld [vmem:[%s10795_s1 + $0x5e0] sm:$0xf]  ;;  %v6476_v20 = vor.u32 %v7371_v18, %v6475_v17  ;;  %v7419_v21 = vld [vmem:[%s10795_s1 + $0x5e4] sm:$0xf0] }
  0x5a   : > { %10931 = vst [vmem:[#allocation18_spill] sm:$0xff] %v8193_v56  ;;  %3556 = vmatpush.bf16.msra.mxu2 %v6604_v61  ;;  %v6539_v22 = vld [vmem:[%s10795_s1 + $0x4e0] sm:$0xf]  ;;  %v7387_v23 = vld [vmem:[%s10795_s1 + $0x4e4] sm:$0xf0]  ;;  %v6668_v35 = vor.u32 %v7419_v21, %v6667_v19 }
  0x5b   : > { %v7079_v33 = vld [vmem:[%s7828_s18 + $0x54] sm:$0xf0]  ;;  %v7070_v34 = vld [vmem:[%s7828_s18 + $0x14] sm:$0xf]  ;;  %v6540_v36 = vor.u32 %v7387_v23, %v6539_v22  ;;  %v5285_v37 = vld [vmem:[%s7828_s18 + $0x58] sm:$0xf0]  ;;  %3448 = vmatpush.bf16.msra.mxu0 %v6476_v20 }
  0x5c   : > { %v5291_v38 = vld [vmem:[%s7828_s18 + $0x18] sm:$0xf]  ;;  %v7080_v39 = vld [vmem:[%s7828_s18 + $0x5c] sm:$0xf0]  ;;  %3610 = vmatpush.bf16.msra.mxu3 %v6668_v35  ;;  %v8233_v59 = vor.u32 %v7079_v33, %v5283_v32  ;;  %v6595_v35 = vld [vmem:[%s10795_s1 + $0x550] sm:$0xf] }
  0x5d   : > { %3502 = vmatpush.bf16.msra.mxu1 %v6540_v36  ;;  %v5355_v33 = vld [vmem:[%s7828_s18 + $0xa0] sm:$0xf]  ;;  %v7401_v36 = vld [vmem:[%s10795_s1 + $0x554] sm:$0xf0] }
  0x5e   : > { %3038 = vmatmul.bf16.gmra.mxu0 %v7991_v12 }
  0x5f   : > { %3092 = vmatmul.bf16.gmra.mxu1 %v7993_v13 }
  0x60   : > { %3146 = vmatmul.bf16.gmra.mxu2 %v7995_v14 }
  0x61   : > { %3200 = vmatmul.bf16.gmra.mxu3 %v7997_v15 }
  0x6e   : > { %3043 = vmatmul.bf16.gmra.mxu0 %v8035_v40 }
  0x6f   : > { %3097 = vmatmul.bf16.gmra.mxu1 %v8037_v41 }
  0x70   : > { %3151 = vmatmul.bf16.gmra.mxu2 %v8039_v42 }
  0x71   : > { %3205 = vmatmul.bf16.gmra.mxu3 %v8041_v43 }
  0x7e   : > { %3048 = vmatmul.bf16.gmra.mxu0 %v8073_v5 }
  0x7f   : > { %3102 = vmatmul.bf16.gmra.mxu1 %v8075_v6 }
  0x80   : > { %3156 = vmatmul.bf16.gmra.mxu2 %v8077_v7 }
  0x81   : > { %3210 = vmatmul.bf16.gmra.mxu3 %v8079_v8 }
  0x8e   : > { %3053 = vmatmul.bf16.gmra.mxu0 %v8099_v28 }
  0x8f   : > { %3107 = vmatmul.bf16.gmra.mxu1 %v8101_v29 }
  0x90   : > { %3161 = vmatmul.bf16.gmra.mxu2 %v8103_v30 }
  0x91   : > { %3215 = vmatmul.bf16.gmra.mxu3 %v8105_v31 }
  0x9e   : > { %3058 = vmatmul.bf16.gmra.mxu0 %v8143_v0 }
  0x9f   : > { %3112 = vmatmul.bf16.gmra.mxu1 %v8145_v1 }
  0xa0   : > { %3166 = vmatmul.bf16.gmra.mxu2 %v8147_v2 }
  0xa1   : > { %3220 = vmatmul.bf16.gmra.mxu3 %v8149_v3 }
  0xab   : > { %v3024_v45 = vpop.f32.mrf.mxu0 }
  0xac   : > { %v3078_v55 = vpop.f32.mrf.mxu1 }
  0xad   : > { %v3079_v57 = vadd.f32 %v3078_v55, %v3024_v45  ;;  %v7071_v45 = vld [vmem:[%s7828_s18 + $0x1c] sm:$0xf]  ;;  %v5293_v55 = vld [vmem:[%s7828_s18 + $0x60] sm:$0xf0] }
  0xae   : > { %3063 = vmatmul.bf16.gmra.mxu0 %v8187_v44 }
  0xaf   : > { %3117 = vmatmul.bf16.gmra.mxu1 %v8189_v46 }
  0xb0   : > { %3171 = vmatmul.bf16.gmra.mxu2 %v8191_v47 }
  0xb1   : > { %3225 = vmatmul.bf16.gmra.mxu3 %v8193_v56 }
  0xb3   : > { %v3132_v62 = vpop.f32.mrf.mxu2  ;;  %v3026_v9 = vpop.f32.mrf.mxu0 }
  0xb4   : > { %v3133_v63 = vadd.f32 %v3132_v62, %v3079_v57  ;;  %v3186_v4 = vpop.f32.mrf.mxu3  ;;  %v3080_v10 = vpop.f32.mrf.mxu1 }
  0xb5   : > { %v3081_v16 = vadd.f32 %v3080_v10, %v3026_v9  ;;  %v8239_v10 = vor.u32 %v7071_v45, %v5293_v55  ;;  %v6659_v45 = vld [vmem:[%s10795_s1 + $0x5d0] sm:$0xf]  ;;  %v7417_v55 = vld [vmem:[%s10795_s1 + $0x5d4] sm:$0xf0] }
  0xb6   : > { %v8205_v11 = vadd.f32 %v3186_v4, %v3133_v63  ;;  %v8235_v63 = vor.u32 %v7070_v34, %v5285_v37  ;;  %v8237_v4 = vor.u32 %v7080_v39, %v5291_v38  ;;  %v7097_v34 = vld [vmem:[%s7828_s18 + $0xe4] sm:$0xf0]  ;;  %v6467_v37 = vld [vmem:[%s10795_s1 + $0x450] sm:$0xf]  ;;  %v6596_v38 = vor.u32 %v7401_v36, %v6595_v35  ;;  %v7369_v39 = vld [vmem:[%s10795_s1 + $0x454] sm:$0xf0] }
  0xb7   : > { %10933 = vst [vmem:[#allocation20_spill] sm:$0xff] %v8239_v10  ;;  %v8281_v36 = vor.u32 %v7097_v34, %v5355_v33 }
  0xb8   : > { %10932 = vst [vmem:[#allocation19_spill] sm:$0xff] %v8237_v4  ;;  %3557 = vmatpush.bf16.msra.mxu2 %v6596_v38 }
  0xb9   : > { %10934 = vst [vmem:[#allocation21_spill] sm:$0xff] %v8281_v36 }
  0xbb   : > { %v3134_v57 = vpop.f32.mrf.mxu2  ;;  %v3029_v62 = vpop.f32.mrf.mxu0 }
  0xbc   : > { %v3135_v60 = vadd.f32 %v3134_v57, %v3081_v16  ;;  %v3188_v61 = vpop.f32.mrf.mxu3  ;;  %v3083_v9 = vpop.f32.mrf.mxu1  ;;  %v7088_v57 = vld [vmem:[%s7828_s18 + $0xa4] sm:$0xf] }
  0xbd   : > { %v3084_v18 = vadd.f32 %v3083_v9, %v3029_v62  ;;  %v6531_v62 = vld [vmem:[%s10795_s1 + $0x4d0] sm:$0xf]  ;;  %v7385_v9 = vld [vmem:[%s10795_s1 + $0x4d4] sm:$0xf0] }
  0xbe   : > { %v8241_v17 = vadd.f32 %v3188_v61, %v3135_v60  ;;  %3239 = vmatmul.bf16.vlgmr.msrb.gmra.mxu0 %v8233_v59  ;;  %v6468_v60 = vor.u32 %v7369_v39, %v6467_v37  ;;  %v6660_v61 = vor.u32 %v7417_v55, %v6659_v45 }
  0xbf   : > { %3293 = vmatmul.bf16.vlgmr.msrb.gmra.mxu1 %v8235_v63 }
  0xc0   : > { %3347 = vmatmul.bf16.vlgmr.msrb.gmra.mxu2 %v8237_v4  ;;  %3449 = vmatpush.bf16.msra.mxu0 %v6468_v60 }
  0xc1   : > { %3401 = vmatmul.bf16.vlgmr.msrb.gmra.mxu3 %v8239_v10 }
  0xc2   : > { %3611 = vmatpush.bf16.msra.mxu3 %v6660_v61 }
  0xc3   : > { %v3137_v16 = vpop.f32.mrf.mxu2  ;;  %v3031_v21 = vpop.f32.mrf.mxu0 }
  0xc4   : > { %v3138_v19 = vadd.f32 %v3137_v16, %v3084_v18  ;;  %v3191_v20 = vpop.f32.mrf.mxu3  ;;  %v3085_v22 = vpop.f32.mrf.mxu1  ;;  %v5357_v18 = vld [vmem:[%s7828_s18 + $0xe8] sm:$0xf0]  ;;  %v5363_v16 = vld [vmem:[%s7828_s18 + $0xa8] sm:$0xf] }
  0xc5   : > { %v3086_v32 = vadd.f32 %v3085_v22, %v3031_v21  ;;  %v7089_v21 = vld [vmem:[%s7828_s18 + $0xac] sm:$0xf]  ;;  %v5365_v22 = vld [vmem:[%s7828_s18 + $0xf0] sm:$0xf0]  ;;  %v8283_v55 = vor.u32 %v7088_v57, %v5357_v18 }
  0xc6   : > { %v8247_v23 = vadd.f32 %v3191_v20, %v3138_v19  ;;  %v7098_v19 = vld [vmem:[%s7828_s18 + $0xec] sm:$0xf0]  ;;  %v6532_v20 = vor.u32 %v7385_v9, %v6531_v62  ;;  %v8287_v38 = vor.u32 %v7089_v21, %v5365_v22  ;;  %v6459_v21 = vld [vmem:[%s10795_s1 + $0x440] sm:$0xf] }
  0xc7   : > { %10935 = vst [vmem:[#allocation22_spill] sm:$0xff] %v8283_v55  ;;  %v8285_v10 = vor.u32 %v7098_v19, %v5363_v16  ;;  %v7115_v16 = vld [vmem:[%s7828_s18 + $0x174] sm:$0xf0]  ;;  %v6587_v19 = vld [vmem:[%s10795_s1 + $0x540] sm:$0xf] }
  0xc8   : > { %3503 = vmatpush.bf16.msra.mxu1 %v6532_v20  ;;  %10937 = vst [vmem:[#allocation24_spill] sm:$0xff] %v8287_v38  ;;  %v7399_v20 = vld [vmem:[%s10795_s1 + $0x544] sm:$0xf0] }
  0xc9   : > { %10936 = vst [vmem:[#allocation23_spill] sm:$0xff] %v8285_v10  ;;  %v6588_v22 = vor.u32 %v7399_v20, %v6587_v19  ;;  %v7116_v19 = vld [vmem:[%s7828_s18 + $0x17c] sm:$0xf0] }
  0xcb   : > { %v3139_v35 = vpop.f32.mrf.mxu2  ;;  %v3034_v45 = vpop.f32.mrf.mxu0  ;;  %3558 = vmatpush.bf16.msra.mxu2 %v6588_v22 }
  0xcc   : > { %v3140_v37 = vadd.f32 %v3139_v35, %v3086_v32  ;;  %v3193_v39 = vpop.f32.mrf.mxu3  ;;  %v3088_v4 = vpop.f32.mrf.mxu1  ;;  %v7367_v35 = vld [vmem:[%s10795_s1 + $0x444] sm:$0xf0] }
  0xcd   : > { %v3089_v60 = vadd.f32 %v3088_v4, %v3034_v45  ;;  %v5427_v4 = vld [vmem:[%s7828_s18 + $0x130] sm:$0xf]  ;;  %v7106_v45 = vld [vmem:[%s7828_s18 + $0x134] sm:$0xf] }
  0xce   : > { %v8289_v62 = vadd.f32 %v3193_v39, %v3140_v37  ;;  %3244 = vmatmul.bf16.gmra.mxu0 %v8281_v36  ;;  %v6651_v37 = vld [vmem:[%s10795_s1 + $0x5c0] sm:$0xf]  ;;  %v7415_v39 = vld [vmem:[%s10795_s1 + $0x5c4] sm:$0xf0] }
  0xcf   : > { %3298 = vmatmul.bf16.gmra.mxu1 %v8283_v55 }
  0xd0   : > { %3352 = vmatmul.bf16.gmra.mxu2 %v8285_v10  ;;  %v5437_v10 = vld [vmem:[%s7828_s18 + $0x180] sm:$0xf0] }
  0xd1   : > { %3406 = vmatmul.bf16.gmra.mxu3 %v8287_v38  ;;  %v7107_v38 = vld [vmem:[%s7828_s18 + $0x13c] sm:$0xf] }
  0xd2   : > { %v8335_v31 = vor.u32 %v7107_v38, %v5437_v10 }
  0xd3   : > { %v3142_v32 = vpop.f32.mrf.mxu2  ;;  %v3036_v57 = vpop.f32.mrf.mxu0 }
  0xd4   : > { %v3143_v33 = vadd.f32 %v3142_v32, %v3089_v60  ;;  %v3196_v34 = vpop.f32.mrf.mxu3  ;;  %v3090_v61 = vpop.f32.mrf.mxu1  ;;  %v6460_v60 = vor.u32 %v7367_v35, %v6459_v21  ;;  %v6652_v32 = vor.u32 %v7415_v39, %v6651_v37  ;;  %v8329_v21 = vor.u32 %v7115_v16, %v5427_v4  ;;  %10941 = vst [vmem:[#allocation28_spill] sm:$0xff] %v8335_v31 }
  0xd5   : > { %v3091_v18 = vadd.f32 %v3090_v61, %v3036_v57  ;;  %v5429_v57 = vld [vmem:[%s7828_s18 + $0x178] sm:$0xf0]  ;;  %v5435_v61 = vld [vmem:[%s7828_s18 + $0x138] sm:$0xf] }
  0xd6   : > { %v8295_v9 = vadd.f32 %v3196_v34, %v3143_v33  ;;  %v6523_v33 = vld [vmem:[%s10795_s1 + $0x4c0] sm:$0xf]  ;;  %v7383_v34 = vld [vmem:[%s10795_s1 + $0x4c4] sm:$0xf0]  ;;  %3450 = vmatpush.bf16.msra.mxu0 %v6460_v60  ;;  %3612 = vmatpush.bf16.msra.mxu3 %v6652_v32  ;;  %10938 = vst [vmem:[#allocation25_spill] sm:$0xff] %v8329_v21  ;;  %v8331_v47 = vor.u32 %v7106_v45, %v5429_v57 }
  0xd7   : > { %v6524_v20 = vor.u32 %v7383_v34, %v6523_v33  ;;  %v8333_v3 = vor.u32 %v7116_v19, %v5435_v61  ;;  %v6579_v45 = vld [vmem:[%s10795_s1 + $0x530] sm:$0xf]  ;;  %v7397_v60 = vld [vmem:[%s10795_s1 + $0x534] sm:$0xf0] }
  0xd8   : > { %10939 = vst [vmem:[#allocation26_spill] sm:$0xff] %v8331_v47  ;;  %v6451_v32 = vld [vmem:[%s10795_s1 + $0x430] sm:$0xf]  ;;  %v6580_v34 = vor.u32 %v7397_v60, %v6579_v45  ;;  %v7365_v57 = vld [vmem:[%s10795_s1 + $0x434] sm:$0xf0] }
  0xd9   : > { %3504 = vmatpush.bf16.msra.mxu1 %v6524_v20  ;;  %10940 = vst [vmem:[#allocation27_spill] sm:$0xff] %v8333_v3  ;;  %v6643_v61 = vld [vmem:[%s10795_s1 + $0x5b0] sm:$0xf]  ;;  %v7413_v19 = vld [vmem:[%s10795_s1 + $0x5b4] sm:$0xf0] }
  0xda   : > { %v5499_v20 = vld [vmem:[%s7828_s18 + $0x1c0] sm:$0xf]  ;;  %3559 = vmatpush.bf16.msra.mxu2 %v6580_v34 }
  0xdb   : > { %v3144_v56 = vpop.f32.mrf.mxu2  ;;  %v3039_v39 = vpop.f32.mrf.mxu0 }
  0xdc   : > { %v3145_v35 = vadd.f32 %v3144_v56, %v3091_v18  ;;  %v3198_v37 = vpop.f32.mrf.mxu3  ;;  %v3093_v2 = vpop.f32.mrf.mxu1 }
  0xdd   : > { %v3094_v33 = vadd.f32 %v3093_v2, %v3039_v39  ;;  %v6452_v39 = vor.u32 %v7365_v57, %v6451_v32 }
  0xde   : > { %v8337_v22 = vadd.f32 %v3198_v37, %v3145_v35  ;;  %3249 = vmatmul.bf16.gmra.mxu0 %v8329_v21  ;;  %v7133_v35 = vld [vmem:[%s7828_s18 + $0x204] sm:$0xf0]  ;;  %v7124_v37 = vld [vmem:[%s7828_s18 + $0x1c4] sm:$0xf] }
  0xdf   : > { %3303 = vmatmul.bf16.gmra.mxu1 %v8331_v47  ;;  %3451 = vmatpush.bf16.msra.mxu0 %v6452_v39  ;;  %v8371_v60 = vor.u32 %v7133_v35, %v5499_v20 }
  0xe0   : > { %3357 = vmatmul.bf16.gmra.mxu2 %v8333_v3 }
  0xe1   : > { %3411 = vmatmul.bf16.gmra.mxu3 %v8335_v31  ;;  %10942 = vst [vmem:[#allocation29_spill] sm:$0xff] %v8371_v60 }
  0xe3   : > { %v3147_v56 = vpop.f32.mrf.mxu2  ;;  %v3041_v16 = vpop.f32.mrf.mxu0 }
  0xe4   : > { %v3148_v18 = vadd.f32 %v3147_v56, %v3094_v33  ;;  %v3201_v4 = vpop.f32.mrf.mxu3  ;;  %v3095_v10 = vpop.f32.mrf.mxu1  ;;  %v6644_v33 = vor.u32 %v7413_v19, %v6643_v61  ;;  %v5501_v56 = vld [vmem:[%s7828_s18 + $0x208] sm:$0xf0]  ;;  %v6515_v19 = vld [vmem:[%s10795_s1 + $0x4b0] sm:$0xf] }
  0xe5   : > { %v3096_v2 = vadd.f32 %v3095_v10, %v3041_v16  ;;  %v7125_v16 = vld [vmem:[%s7828_s18 + $0x1cc] sm:$0xf]  ;;  %v5509_v10 = vld [vmem:[%s7828_s18 + $0x210] sm:$0xf0]  ;;  %v8373_v8 = vor.u32 %v7124_v37, %v5501_v56  ;;  %v6571_v56 = vld [vmem:[%s10795_s1 + $0x520] sm:$0xf] }
  0xe6   : > { %v8343_v38 = vadd.f32 %v3201_v4, %v3148_v18  ;;  %v5507_v18 = vld [vmem:[%s7828_s18 + $0x1c8] sm:$0xf]  ;;  %v7134_v4 = vld [vmem:[%s7828_s18 + $0x20c] sm:$0xf0]  ;;  %3613 = vmatpush.bf16.msra.mxu3 %v6644_v33  ;;  %v8377_v57 = vor.u32 %v7125_v16, %v5509_v10  ;;  %v7151_v10 = vld [vmem:[%s7828_s18 + $0x294] sm:$0xf0] }
  0xe7   : > { %10943 = vst [vmem:[#allocation30_spill] sm:$0xff] %v8373_v8  ;;  %v8375_v7 = vor.u32 %v7134_v4, %v5507_v18  ;;  %v7395_v18 = vld [vmem:[%s10795_s1 + $0x524] sm:$0xf0]  ;;  %v5571_v16 = vld [vmem:[%s7828_s18 + $0x250] sm:$0xf] }
  0xe8   : > { %10945 = vst [vmem:[#allocation32_spill] sm:$0xff] %v8377_v57  ;;  %v6572_v4 = vor.u32 %v7395_v18, %v6571_v56 }
  0xe9   : > { %10944 = vst [vmem:[#allocation31_spill] sm:$0xff] %v8375_v7 }
  0xea   : > { %3560 = vmatpush.bf16.msra.mxu2 %v6572_v4  ;;  %v6443_v4 = vld [vmem:[%s10795_s1 + $0x420] sm:$0xf] }
  0xeb   : > { %v3149_v45 = vpop.f32.mrf.mxu2  ;;  %v3044_v30 = vpop.f32.mrf.mxu0 }
  0xec   : > { %v3150_v31 = vadd.f32 %v3149_v45, %v3096_v2  ;;  %v3203_v3 = vpop.f32.mrf.mxu3  ;;  %v3098_v32 = vpop.f32.mrf.mxu1  ;;  %v7381_v2 = vld [vmem:[%s10795_s1 + $0x4b4] sm:$0xf0]  ;;  %v7142_v45 = vld [vmem:[%s7828_s18 + $0x254] sm:$0xf] }
  0xed   : > { %v3099_v34 = vadd.f32 %v3098_v32, %v3044_v30  ;;  %v6516_v20 = vor.u32 %v7381_v2, %v6515_v19  ;;  %v5573_v32 = vld [vmem:[%s7828_s18 + $0x298] sm:$0xf0]  ;;  %v7152_v19 = vld [vmem:[%s7828_s18 + $0x29c] sm:$0xf0] }
  0xee   : > { %v8379_v61 = vadd.f32 %v3203_v3, %v3150_v31  ;;  %3254 = vmatmul.bf16.gmra.mxu0 %v8371_v60  ;;  %v7143_v2 = vld [vmem:[%s7828_s18 + $0x25c] sm:$0xf]  ;;  %v6563_v60 = vld [vmem:[%s10795_s1 + $0x510] sm:$0xf] }
  0xef   : > { %3308 = vmatmul.bf16.gmra.mxu1 %v8373_v8 }
  0xf0   : > { %3362 = vmatmul.bf16.gmra.mxu2 %v8375_v7  ;;  %3505 = vmatpush.bf16.msra.mxu1 %v6516_v20  ;;  %v5581_v20 = vld [vmem:[%s7828_s18 + $0x2a0] sm:$0xf0] }
  0xf1   : > { %3416 = vmatmul.bf16.gmra.mxu3 %v8377_v57  ;;  %v8409_v57 = vor.u32 %v7142_v45, %v5573_v32  ;;  %v8413_v18 = vor.u32 %v7143_v2, %v5581_v20  ;;  %v7411_v45 = vld [vmem:[%s10795_s1 + $0x5a4] sm:$0xf0]  ;;  %v6507_v32 = vld [vmem:[%s10795_s1 + $0x4a0] sm:$0xf] }
  0xf3   : > { %v3152_v30 = vpop.f32.mrf.mxu2  ;;  %v3046_v35 = vpop.f32.mrf.mxu0  ;;  %10947 = vst [vmem:[#allocation34_spill] sm:$0xff] %v8409_v57 }
  0xf4   : > { %v3153_v31 = vadd.f32 %v3152_v30, %v3099_v34  ;;  %v3206_v3 = vpop.f32.mrf.mxu3  ;;  %v3100_v37 = vpop.f32.mrf.mxu1  ;;  %v5579_v34 = vld [vmem:[%s7828_s18 + $0x258] sm:$0xf]  ;;  %10949 = vst [vmem:[#allocation36_spill] sm:$0xff] %v8413_v18 }
  0xf5   : > { %v3101_v33 = vadd.f32 %v3100_v37, %v3046_v35  ;;  %v8411_v7 = vor.u32 %v7152_v19, %v5579_v34  ;;  %v7379_v34 = vld [vmem:[%s10795_s1 + $0x4a4] sm:$0xf0] }
  0xf6   : > { %v8391_v39 = vadd.f32 %v3206_v3, %v3153_v31  ;;  %v8407_v31 = vor.u32 %v7151_v10, %v5571_v16  ;;  %v6635_v16 = vld [vmem:[%s10795_s1 + $0x5a0] sm:$0xf]  ;;  %v6508_v2 = vor.u32 %v7379_v34, %v6507_v32  ;;  %v5645_v32 = vld [vmem:[%s7828_s18 + $0x328] sm:$0xf0]  ;;  %v5651_v34 = vld [vmem:[%s7828_s18 + $0x2e8] sm:$0xf] }
  0xf7   : > { %10948 = vst [vmem:[#allocation35_spill] sm:$0xff] %v8411_v7  ;;  %v6636_v19 = vor.u32 %v7411_v45, %v6635_v16  ;;  %v7169_v16 = vld [vmem:[%s7828_s18 + $0x324] sm:$0xf0]  ;;  %v7160_v45 = vld [vmem:[%s7828_s18 + $0x2e4] sm:$0xf] }
  0xf8   : > { %10946 = vst [vmem:[#allocation33_spill] sm:$0xff] %v8407_v31  ;;  %3506 = vmatpush.bf16.msra.mxu1 %v6508_v2 }
  0xf9   : > { %3614 = vmatpush.bf16.msra.mxu3 %v6636_v19 }
  0xfb   : > { %v3154_v30 = vpop.f32.mrf.mxu2  ;;  %v3049_v37 = vpop.f32.mrf.mxu0 }
  0xfc   : > { %v3155_v3 = vadd.f32 %v3154_v30, %v3101_v33  ;;  %v3208_v35 = vpop.f32.mrf.mxu3  ;;  %v3103_v56 = vpop.f32.mrf.mxu1  ;;  %v7363_v33 = vld [vmem:[%s10795_s1 + $0x424] sm:$0xf0] }
  0xfd   : > { %v3104_v42 = vadd.f32 %v3103_v56, %v3049_v37  ;;  %v6444_v10 = vor.u32 %v7363_v33, %v6443_v4  ;;  %v5643_v33 = vld [vmem:[%s7828_s18 + $0x2e0] sm:$0xf] }
  0xfe   : > { %v8415_v43 = vadd.f32 %v3208_v35, %v3155_v3  ;;  %3259 = vmatmul.bf16.gmra.mxu0 %v8407_v31  ;;  %v8449_v19 = vor.u32 %v7169_v16, %v5643_v33  ;;  %v7409_v33 = vld [vmem:[%s10795_s1 + $0x594] sm:$0xf0] }
  0xff   : > { %3313 = vmatmul.bf16.gmra.mxu1 %v8409_v57  ;;  %3452 = vmatpush.bf16.msra.mxu0 %v6444_v10  ;;  %v5653_v10 = vld [vmem:[%s7828_s18 + $0x330] sm:$0xf0] }
 0x100   : > { %3367 = vmatmul.bf16.gmra.mxu2 %v8411_v7  ;;  %v7161_v7 = vld [vmem:[%s7828_s18 + $0x2ec] sm:$0xf]  ;;  %10950 = vst [vmem:[#allocation37_spill] sm:$0xff] %v8449_v19 }
 0x101   : > { %3421 = vmatmul.bf16.gmra.mxu3 %v8413_v18  ;;  %v7170_v18 = vld [vmem:[%s7828_s18 + $0x32c] sm:$0xf0] }
 0x102   : > { %v8453_v8 = vor.u32 %v7170_v18, %v5651_v34  ;;  %v7377_v34 = vld [vmem:[%s10795_s1 + $0x494] sm:$0xf0] }
 0x103   : > { %v3157_v20 = vpop.f32.mrf.mxu2  ;;  %v3051_v35 = vpop.f32.mrf.mxu0 }
 0x104   : > { %v3158_v30 = vadd.f32 %v3157_v20, %v3104_v42  ;;  %v3211_v3 = vpop.f32.mrf.mxu3  ;;  %v3105_v37 = vpop.f32.mrf.mxu1  ;;  %v8451_v20 = vor.u32 %v7160_v45, %v5645_v32  ;;  %10952 = vst [vmem:[#allocation39_spill] sm:$0xff] %v8453_v8 }
 0x105   : > { %v3106_v4 = vadd.f32 %v3105_v37, %v3051_v35 }
 0x106   : > { %v8439_v56 = vadd.f32 %v3211_v3, %v3158_v30  ;;  %10951 = vst [vmem:[#allocation38_spill] sm:$0xff] %v8451_v20  ;;  %v8455_v3 = vor.u32 %v7161_v7, %v5653_v10  ;;  %v7361_v7 = vld [vmem:[%s10795_s1 + $0x414] sm:$0xf0] }
 0x108   : > { %10953 = vst [vmem:[#allocation40_spill] sm:$0xff] %v8455_v3 }
 0x10b   : > { %v3159_v57 = vpop.f32.mrf.mxu2  ;;  %v3054_v42 = vpop.f32.mrf.mxu0 }
 0x10c   : > { %v3160_v2 = vadd.f32 %v3159_v57, %v3106_v4  ;;  %v3213_v31 = vpop.f32.mrf.mxu3  ;;  %v3108_v30 = vpop.f32.mrf.mxu1  ;;  %v7393_v57 = vld [vmem:[%s10795_s1 + $0x514] sm:$0xf0]  ;;  %v6435_v4 = vld [vmem:[%s10795_s1 + $0x410] sm:$0xf] }
 0x10d   : > { %v3109_v37 = vadd.f32 %v3108_v30, %v3054_v42  ;;  %v6564_v18 = vor.u32 %v7393_v57, %v6563_v60  ;;  %v6436_v16 = vor.u32 %v7361_v7, %v6435_v4  ;;  %v6499_v60 = vld [vmem:[%s10795_s1 + $0x490] sm:$0xf] }
 0x10e   : > { %v8457_v35 = vadd.f32 %v3213_v31, %v3160_v2  ;;  %3264 = vmatmul.bf16.gmra.mxu0 %v8449_v19  ;;  %v6627_v31 = vld [vmem:[%s10795_s1 + $0x590] sm:$0xf]  ;;  %v6500_v30 = vor.u32 %v7377_v34, %v6499_v60 }
 0x10f   : > { %3318 = vmatmul.bf16.gmra.mxu1 %v8451_v20  ;;  %v6628_v45 = vor.u32 %v7409_v33, %v6627_v31  ;;  %3561 = vmatpush.bf16.msra.mxu2 %v6564_v18  ;;  %v5715_v7 = vld [vmem:[%s7828_s18 + $0x370] sm:$0xf]  ;;  %v7187_v31 = vld [vmem:[%s7828_s18 + $0x3b4] sm:$0xf0]  ;;  %v7178_v33 = vld [vmem:[%s7828_s18 + $0x374] sm:$0xf] }
 0x110   : > { %3372 = vmatmul.bf16.gmra.mxu2 %v8453_v8  ;;  %3453 = vmatpush.bf16.msra.mxu0 %v6436_v16  ;;  %v5717_v16 = vld [vmem:[%s7828_s18 + $0x3b8] sm:$0xf0]  ;;  %v5725_v20 = vld [vmem:[%s7828_s18 + $0x3c0] sm:$0xf0]  ;;  %v8497_v15 = vor.u32 %v7187_v31, %v5715_v7  ;;  %v7407_v7 = vld [vmem:[%s10795_s1 + $0x584] sm:$0xf0] }
 0x111   : > { %3426 = vmatmul.bf16.gmra.mxu3 %v8455_v3  ;;  %3507 = vmatpush.bf16.msra.mxu1 %v6500_v30  ;;  %v7188_v3 = vld [vmem:[%s7828_s18 + $0x3bc] sm:$0xf0]  ;;  %v7179_v8 = vld [vmem:[%s7828_s18 + $0x37c] sm:$0xf]  ;;  %v8499_v60 = vor.u32 %v7178_v33, %v5717_v16 }
 0x112   : > { %3615 = vmatpush.bf16.msra.mxu3 %v6628_v45  ;;  %v5723_v45 = vld [vmem:[%s7828_s18 + $0x378] sm:$0xf]  ;;  %10954 = vst [vmem:[#allocation41_spill] sm:$0xff] %v8497_v15  ;;  %v6491_v31 = vld [vmem:[%s10795_s1 + $0x480] sm:$0xf] }
 0x113   : > { %v3162_v32 = vpop.f32.mrf.mxu2  ;;  %v3056_v42 = vpop.f32.mrf.mxu0  ;;  %10955 = vst [vmem:[#allocation42_spill] sm:$0xff] %v8499_v60  ;;  %v8501_v34 = vor.u32 %v7188_v3, %v5723_v45  ;;  %v7375_v45 = vld [vmem:[%s10795_s1 + $0x484] sm:$0xf0] }
 0x114   : > { %v3163_v10 = vadd.f32 %v3162_v32, %v3109_v37  ;;  %v3216_v2 = vpop.f32.mrf.mxu3  ;;  %v3110_v57 = vpop.f32.mrf.mxu1 }
 0x115   : > { %v3111_v18 = vadd.f32 %v3110_v57, %v3056_v42  ;;  %10956 = vst [vmem:[#allocation43_spill] sm:$0xff] %v8501_v34  ;;  %v6555_v57 = vld [vmem:[%s10795_s1 + $0x500] sm:$0xf] }
 0x116   : > { %v8487_v4 = vadd.f32 %v3216_v2, %v3163_v10  ;;  %v8503_v2 = vor.u32 %v7179_v8, %v5725_v20  ;;  %v7359_v8 = vld [vmem:[%s10795_s1 + $0x404] sm:$0xf0] }
 0x118   : > { %10957 = vst [vmem:[#allocation44_spill] sm:$0xff] %v8503_v2 }
 0x11b   : > { %v3164_v19 = vpop.f32.mrf.mxu2  ;;  %v3059_v14 = vpop.f32.mrf.mxu0 }
 0x11c   : > { %v3165_v37 = vadd.f32 %v3164_v19, %v3111_v18  ;;  %v3218_v32 = vpop.f32.mrf.mxu3  ;;  %v3113_v10 = vpop.f32.mrf.mxu1  ;;  %v7391_v19 = vld [vmem:[%s10795_s1 + $0x504] sm:$0xf0]  ;;  %v6619_v18 = vld [vmem:[%s10795_s1 + $0x580] sm:$0xf] }
 0x11d   : > { %v3114_v30 = vadd.f32 %v3113_v10, %v3059_v14  ;;  %v6556_v3 = vor.u32 %v7391_v19, %v6555_v57  ;;  %v6427_v14 = vld [vmem:[%s10795_s1 + $0x400] sm:$0xf]  ;;  %v6620_v16 = vor.u32 %v7407_v7, %v6619_v18  ;;  %v6492_v57 = vor.u32 %v7375_v45, %v6491_v31  ;;  %v7205_v18 = vld [vmem:[%s7828_s18 + $0x444] sm:$0xf0]  ;;  %v7196_v7 = vld [vmem:[%s7828_s18 + $0x404] sm:$0xf] }
 0x11e   : > { %v8505_v42 = vadd.f32 %v3218_v32, %v3165_v37  ;;  %3269 = vmatmul.bf16.gmra.mxu0 %v8497_v15  ;;  %v6428_v20 = vor.u32 %v7359_v8, %v6427_v14  ;;  %v5787_v8 = vld [vmem:[%s7828_s18 + $0x400] sm:$0xf]  ;;  %v7197_v15 = vld [vmem:[%s7828_s18 + $0x40c] sm:$0xf] }
 0x11f   : > { %3323 = vmatmul.bf16.gmra.mxu1 %v8499_v60  ;;  %3562 = vmatpush.bf16.msra.mxu2 %v6556_v3  ;;  %v7206_v60 = vld [vmem:[%s7828_s18 + $0x44c] sm:$0xf0]  ;;  %v8545_v47 = vor.u32 %v7205_v18, %v5787_v8 }
 0x120   : > { %3377 = vmatmul.bf16.gmra.mxu2 %v8501_v34  ;;  %3454 = vmatpush.bf16.msra.mxu0 %v6428_v20  ;;  %v5795_v34 = vld [vmem:[%s7828_s18 + $0x408] sm:$0xf] }
 0x121   : > { %3431 = vmatmul.bf16.gmra.mxu3 %v8503_v2  ;;  %3508 = vmatpush.bf16.msra.mxu1 %v6492_v57  ;;  %v5789_v2 = vld [vmem:[%s7828_s18 + $0x448] sm:$0xf0]  ;;  %10958 = vst [vmem:[#allocation45_spill] sm:$0xff] %v8545_v47 }
 0x122   : > { %3616 = vmatpush.bf16.msra.mxu3 %v6620_v16  ;;  %v8547_v45 = vor.u32 %v7196_v7, %v5789_v2  ;;  %v8549_v16 = vor.u32 %v7206_v60, %v5795_v34  ;;  %v6867_v2 = vld [vmem:[%s10795_s1 + $0x770] sm:$0xf]  ;;  %v7437_v34 = vld [vmem:[%s10795_s1 + $0x674] sm:$0xf0] }
 0x123   : > { %v3167_v33 = vpop.f32.mrf.mxu2  ;;  %v3061_v10 = vpop.f32.mrf.mxu0 }
 0x124   : > { %v3168_v37 = vadd.f32 %v3167_v33, %v3114_v30  ;;  %v3221_v32 = vpop.f32.mrf.mxu3  ;;  %v3115_v19 = vpop.f32.mrf.mxu1  ;;  %v5797_v30 = vld [vmem:[%s7828_s18 + $0x450] sm:$0xf0]  ;;  %10959 = vst [vmem:[#allocation46_spill] sm:$0xff] %v8547_v45 }
 0x125   : > { %v3116_v14 = vadd.f32 %v3115_v19, %v3061_v10  ;;  %10960 = vst [vmem:[#allocation47_spill] sm:$0xff] %v8549_v16  ;;  %v6931_v19 = vld [vmem:[%s10795_s1 + $0x7f0] sm:$0xf] }
 0x126   : > { %v8535_v3 = vadd.f32 %v3221_v32, %v3168_v37  ;;  %v8551_v32 = vor.u32 %v7197_v15, %v5797_v30  ;;  %v7469_v15 = vld [vmem:[%s10795_s1 + $0x774] sm:$0xf0] }
 0x127   : > { %v6868_v60 = vor.u32 %v7469_v15, %v6867_v2  ;;  %v6803_v15 = vld [vmem:[%s10795_s1 + $0x6f0] sm:$0xf] }
 0x128   : > { %10961 = vst [vmem:[#allocation48_spill] sm:$0xff] %v8551_v32 }
 0x129   : > { %3771 = vmatpush.bf16.msrb.mxu2 %v6868_v60  ;;  %v7214_v60 = vld [vmem:[%s7828_s18 + $0x494] sm:$0xf] }
 0x12b   : > { %v3169_v33 = vpop.f32.mrf.mxu2  ;;  %v3064_v31 = vpop.f32.mrf.mxu0 }
 0x12c   : > { %v3170_v21 = vadd.f32 %v3169_v33, %v3116_v14  ;;  %v3223_v20 = vpop.f32.mrf.mxu3  ;;  %v3118_v37 = vpop.f32.mrf.mxu1  ;;  %v7485_v14 = vld [vmem:[%s10795_s1 + $0x7f4] sm:$0xf0] }
 0x12d   : > { %v3119_v57 = vadd.f32 %v3118_v37, %v3064_v31  ;;  %v6932_v7 = vor.u32 %v7485_v14, %v6931_v19  ;;  %v7223_v19 = vld [vmem:[%s7828_s18 + $0x4d4] sm:$0xf0]  ;;  %v5861_v14 = vld [vmem:[%s7828_s18 + $0x4d8] sm:$0xf0] }
 0x12e   : > { %v8553_v10 = vadd.f32 %v3223_v20, %v3170_v21  ;;  %3274 = vmatmul.bf16.gmra.mxu0 %v8545_v47  ;;  %v6739_v21 = vld [vmem:[%s10795_s1 + $0x670] sm:$0xf] }
 0x12f   : > { %3328 = vmatmul.bf16.gmra.mxu1 %v8547_v45  ;;  %v6740_v18 = vor.u32 %v7437_v34, %v6739_v21  ;;  %3825 = vmatpush.bf16.msrb.mxu3 %v6932_v7  ;;  %v5859_v34 = vld [vmem:[%s7828_s18 + $0x490] sm:$0xf]  ;;  %v5869_v7 = vld [vmem:[%s7828_s18 + $0x4e0] sm:$0xf0]  ;;  %v8595_v45 = vor.u32 %v7214_v60, %v5861_v14 }
 0x130   : > { %3382 = vmatmul.bf16.gmra.mxu2 %v8549_v16 }
 0x131   : > { %3436 = vmatmul.bf16.gmra.mxu3 %v8551_v32  ;;  %3663 = vmatpush.bf16.msrb.mxu0 %v6740_v18  ;;  %v7224_v32 = vld [vmem:[%s7828_s18 + $0x4dc] sm:$0xf0]  ;;  %v7215_v18 = vld [vmem:[%s7828_s18 + $0x49c] sm:$0xf]  ;;  %10963 = vst [vmem:[#allocation50_spill] sm:$0xff] %v8595_v45 }
 0x132   : > { %v8600_v52 = vor.u32 %v7215_v18, %v5869_v7  ;;  %v6731_v7 = vld [vmem:[%s10795_s1 + $0x660] sm:$0xf] }
 0x133   : > { %v3172_v8 = vpop.f32.mrf.mxu2  ;;  %v3066_v20 = vpop.f32.mrf.mxu0 }
 0x134   : > { %v3173_v30 = vadd.f32 %v3172_v8, %v3119_v57  ;;  %v3226_v33 = vpop.f32.mrf.mxu3  ;;  %v3120_v31 = vpop.f32.mrf.mxu1  ;;  %v7453_v57 = vld [vmem:[%s10795_s1 + $0x6f4] sm:$0xf0]  ;;  %10965 = vst [vmem:[#allocation52_spill] sm:$0xff] %v8600_v52 }
 0x135   : > { %v3121_v2 = vadd.f32 %v3120_v31, %v3066_v20  ;;  %v6804_v21 = vor.u32 %v7453_v57, %v6803_v15  ;;  %v5867_v8 = vld [vmem:[%s7828_s18 + $0x498] sm:$0xf] }
 0x136   : > { %v8577_v37 = vadd.f32 %v3226_v33, %v3173_v30  ;;  %v8593_v33 = vor.u32 %v7223_v19, %v5859_v34  ;;  %v8597_v47 = vor.u32 %v7224_v32, %v5867_v8  ;;  %v6859_v32 = vld [vmem:[%s10795_s1 + $0x760] sm:$0xf] }
 0x137   : > { %3717 = vmatpush.bf16.msrb.mxu1 %v6804_v21 }
 0x138   : > { %10962 = vst [vmem:[#allocation49_spill] sm:$0xff] %v8593_v33 }
 0x139   : > { %10964 = vst [vmem:[#allocation51_spill] sm:$0xff] %v8597_v47 }
 0x13b   : > { %v3174_v30 = vpop.f32.mrf.mxu2  ;;  %v3240_v16 = vpop.f32.mrf.mxu0 }
 0x13c   : > { %v3175_v20 = vadd.f32 %v3174_v30, %v3121_v2  ;;  %v3228_v31 = vpop.f32.mrf.mxu3  ;;  %v3241_v15 = vadd.f32 %v3240_v16, %v8205_v11  ;;  %v3294_v57 = vpop.f32.mrf.mxu1  ;;  %v7467_v11 = vld [vmem:[%s10795_s1 + $0x764] sm:$0xf0] }
 0x13d   : > { %v6860_v16 = vor.u32 %v7467_v11, %v6859_v32  ;;  %v7435_v30 = vld [vmem:[%s10795_s1 + $0x664] sm:$0xf0]  ;;  %v5299_v32 = vld [vmem:[%s7828_s18 + $0x20] sm:$0xf] }
 0x13e   : > { %v8602_v51 = vadd.f32 %v3228_v31, %v3175_v20  ;;  %v3295_v21 = vadd.f32 %v3294_v57, %v3241_v15  ;;  %3279 = vmatmul.bf16.gmra.mxu0 %v8593_v33  ;;  %v6923_v20 = vld [vmem:[%s10795_s1 + $0x7e0] sm:$0xf]  ;;  %v6732_v31 = vor.u32 %v7435_v30, %v6731_v7  ;;  %v7483_v15 = vld [vmem:[%s10795_s1 + $0x7e4] sm:$0xf0]  ;;  %v5309_v7 = vld [vmem:[%s7828_s18 + $0x70] sm:$0xf0] }
 0x13f   : > { %3333 = vmatmul.bf16.gmra.mxu1 %v8595_v45  ;;  %3772 = vmatpush.bf16.msrb.mxu2 %v6860_v16  ;;  %v6795_v57 = vld [vmem:[%s10795_s1 + $0x6e0] sm:$0xf]  ;;  %v7081_v11 = vld [vmem:[%s7828_s18 + $0x64] sm:$0xf0]  ;;  %v7072_v16 = vld [vmem:[%s7828_s18 + $0x24] sm:$0xf] }
 0x140   : > { %3387 = vmatmul.bf16.gmra.mxu2 %v8597_v47  ;;  %3664 = vmatpush.bf16.msrb.mxu0 %v6732_v31 }
 0x141   : > { %3441 = vmatmul.bf16.gmra.mxu3 %v8600_v52  ;;  %v8643_v52 = vor.u32 %v7081_v11, %v5299_v32 }
 0x143   : > { %v3348_v2 = vpop.f32.mrf.mxu2  ;;  %v3242_v60 = vpop.f32.mrf.mxu0  ;;  %10966 = vst [vmem:[#allocation53_spill] sm:$0xff] %v8643_v52 }
 0x144   : > { %v3349_v34 = vadd.f32 %v3348_v2, %v3295_v21  ;;  %v3402_v19 = vpop.f32.mrf.mxu3  ;;  %v3243_v14 = vadd.f32 %v3242_v60, %v8241_v17  ;;  %v3296_v8 = vpop.f32.mrf.mxu1  ;;  %v7451_v21 = vld [vmem:[%s10795_s1 + $0x6e4] sm:$0xf0]  ;;  %v6924_v2 = vor.u32 %v7483_v15, %v6923_v20 }
 0x145   : > { %v5307_v60 = vld [vmem:[%s7828_s18 + $0x28] sm:$0xf] }
 0x146   : > { %v8615_v18 = vadd.f32 %v3402_v19, %v3349_v34  ;;  %v3297_v17 = vadd.f32 %v3296_v8, %v3243_v14  ;;  %v6796_v34 = vor.u32 %v7451_v21, %v6795_v57  ;;  %v5301_v19 = vld [vmem:[%s7828_s18 + $0x68] sm:$0xf0]  ;;  %v7082_v14 = vld [vmem:[%s7828_s18 + $0x6c] sm:$0xf0]  ;;  %3826 = vmatpush.bf16.msrb.mxu3 %v6924_v2  ;;  %v7099_v2 = vld [vmem:[%s7828_s18 + $0xf4] sm:$0xf0] }
 0x147   : > { %v7073_v8 = vld [vmem:[%s7828_s18 + $0x2c] sm:$0xf]  ;;  %v8645_v55 = vor.u32 %v7072_v16, %v5301_v19  ;;  %v8647_v36 = vor.u32 %v7082_v14, %v5307_v60  ;;  %v7465_v19 = vld [vmem:[%s10795_s1 + $0x754] sm:$0xf0]  ;;  %v7090_v14 = vld [vmem:[%s7828_s18 + $0xb4] sm:$0xf] }
 0x148   : > { %3718 = vmatpush.bf16.msrb.mxu1 %v6796_v34  ;;  %v8650_v31 = vor.u32 %v7073_v8, %v5309_v7  ;;  %v6851_v34 = vld [vmem:[%s10795_s1 + $0x750] sm:$0xf]  ;;  %v7433_v7 = vld [vmem:[%s10795_s1 + $0x654] sm:$0xf0] }
 0x149   : > { %10967 = vst [vmem:[#allocation54_spill] sm:$0xff] %v8645_v55  ;;  %v6723_v8 = vld [vmem:[%s10795_s1 + $0x650] sm:$0xf] }
 0x14a   : > { %10968 = vst [vmem:[#allocation55_spill] sm:$0xff] %v8647_v36 }
 0x14b   : > { %v3350_v30 = vpop.f32.mrf.mxu2  ;;  %v3245_v33 = vpop.f32.mrf.mxu0  ;;  %10969 = vst [vmem:[#allocation56_spill] sm:$0xff] %v8650_v31 }
 0x14c   : > { %v3351_v47 = vadd.f32 %v3350_v30, %v3297_v17  ;;  %v3404_v45 = vpop.f32.mrf.mxu3  ;;  %v3246_v20 = vadd.f32 %v3245_v33, %v8247_v23  ;;  %v3299_v15 = vpop.f32.mrf.mxu1  ;;  %v6915_v30 = vld [vmem:[%s10795_s1 + $0x7d0] sm:$0xf] }
 0x14e   : > { %v8652_v57 = vadd.f32 %v3404_v45, %v3351_v47  ;;  %v3300_v21 = vadd.f32 %v3299_v15, %v3246_v20  ;;  %3455 = vmatmul.bf16.vlgmr.msra.gmra.mxu0 %v8643_v52  ;;  %v5371_v45 = vld [vmem:[%s7828_s18 + $0xb0] sm:$0xf]  ;;  %v6724_v20 = vor.u32 %v7433_v7, %v6723_v8  ;;  %v7481_v15 = vld [vmem:[%s10795_s1 + $0x7d4] sm:$0xf0] }
 0x14f   : > { %3509 = vmatmul.bf16.vlgmr.msra.gmra.mxu1 %v8645_v55  ;;  %v8693_v7 = vor.u32 %v7099_v2, %v5371_v45 }
 0x150   : > { %3563 = vmatmul.bf16.vlgmr.msra.gmra.mxu2 %v8647_v36  ;;  %3665 = vmatpush.bf16.msrb.mxu0 %v6724_v20 }
 0x151   : > { %3617 = vmatmul.bf16.vlgmr.msra.gmra.mxu3 %v8650_v31  ;;  %10970 = vst [vmem:[#allocation57_spill] sm:$0xff] %v8693_v7 }
 0x153   : > { %v3353_v17 = vpop.f32.mrf.mxu2  ;;  %v3247_v33 = vpop.f32.mrf.mxu0 }
 0x154   : > { %v3354_v32 = vadd.f32 %v3353_v17, %v3300_v21  ;;  %v3407_v23 = vpop.f32.mrf.mxu3  ;;  %v3248_v11 = vadd.f32 %v3247_v33, %v8289_v62  ;;  %v3301_v16 = vpop.f32.mrf.mxu1  ;;  %v6852_v62 = vor.u32 %v7465_v19, %v6851_v34  ;;  %v6787_v21 = vld [vmem:[%s10795_s1 + $0x6d0] sm:$0xf]  ;;  %v7449_v17 = vld [vmem:[%s10795_s1 + $0x6d4] sm:$0xf0]  ;;  %v7100_v33 = vld [vmem:[%s7828_s18 + $0xfc] sm:$0xf0] }
 0x155   : > { %v7091_v34 = vld [vmem:[%s7828_s18 + $0xbc] sm:$0xf]  ;;  %v5381_v19 = vld [vmem:[%s7828_s18 + $0x100] sm:$0xf0] }
 0x156   : > { %v8659_v47 = vadd.f32 %v3407_v23, %v3354_v32  ;;  %v3302_v60 = vadd.f32 %v3301_v16, %v3248_v11  ;;  %v5373_v32 = vld [vmem:[%s7828_s18 + $0xf8] sm:$0xf0]  ;;  %v5379_v23 = vld [vmem:[%s7828_s18 + $0xb8] sm:$0xf]  ;;  %3773 = vmatpush.bf16.msrb.mxu2 %v6852_v62  ;;  %v6916_v11 = vor.u32 %v7481_v15, %v6915_v30  ;;  %v6788_v16 = vor.u32 %v7449_v17, %v6787_v21  ;;  %v7117_v15 = vld [vmem:[%s7828_s18 + $0x184] sm:$0xf0] }
 0x157   : > { %v8695_v52 = vor.u32 %v7090_v14, %v5373_v32  ;;  %v8697_v27 = vor.u32 %v7100_v33, %v5379_v23  ;;  %v8700_v30 = vor.u32 %v7091_v34, %v5381_v19  ;;  %v7108_v17 = vld [vmem:[%s7828_s18 + $0x144] sm:$0xf]  ;;  %v5445_v32 = vld [vmem:[%s7828_s18 + $0x188] sm:$0xf0]  ;;  %v5451_v23 = vld [vmem:[%s7828_s18 + $0x148] sm:$0xf] }
 0x158   : > { %3827 = vmatpush.bf16.msrb.mxu3 %v6916_v11  ;;  %3719 = vmatpush.bf16.msrb.mxu1 %v6788_v16  ;;  %v6843_v33 = vld [vmem:[%s10795_s1 + $0x740] sm:$0xf]  ;;  %v7431_v34 = vld [vmem:[%s10795_s1 + $0x644] sm:$0xf0] }
 0x159   : > { %10971 = vst [vmem:[#allocation58_spill] sm:$0xff] %v8695_v52  ;;  %v6715_v11 = vld [vmem:[%s10795_s1 + $0x640] sm:$0xf] }
 0x15a   : > { %10972 = vst [vmem:[#allocation59_spill] sm:$0xff] %v8697_v27  ;;  %v6907_v19 = vld [vmem:[%s10795_s1 + $0x7c0] sm:$0xf] }
 0x15b   : > { %v3355_v8 = vpop.f32.mrf.mxu2  ;;  %v3250_v55 = vpop.f32.mrf.mxu0  ;;  %10973 = vst [vmem:[#allocation60_spill] sm:$0xff] %v8700_v30 }
 0x15c   : > { %v3356_v31 = vadd.f32 %v3355_v8, %v3302_v60  ;;  %v3409_v36 = vpop.f32.mrf.mxu3  ;;  %v3251_v26 = vadd.f32 %v3250_v55, %v8295_v9  ;;  %v3304_v62 = vpop.f32.mrf.mxu1  ;;  %v7479_v8 = vld [vmem:[%s10795_s1 + $0x7c4] sm:$0xf0] }
 0x15e   : > { %v8702_v20 = vadd.f32 %v3409_v36, %v3356_v31  ;;  %v3305_v45 = vadd.f32 %v3304_v62, %v3251_v26  ;;  %3460 = vmatmul.bf16.gmra.mxu0 %v8693_v7  ;;  %v5443_v26 = vld [vmem:[%s7828_s18 + $0x140] sm:$0xf]  ;;  %v7118_v62 = vld [vmem:[%s7828_s18 + $0x18c] sm:$0xf0] }
 0x15f   : > { %3514 = vmatmul.bf16.gmra.mxu1 %v8695_v52 }
 0x160   : > { %3568 = vmatmul.bf16.gmra.mxu2 %v8697_v27 }
 0x161   : > { %3622 = vmatmul.bf16.gmra.mxu3 %v8700_v30 }
 0x163   : > { %v3358_v55 = vpop.f32.mrf.mxu2  ;;  %v3252_v60 = vpop.f32.mrf.mxu0 }
 0x164   : > { %v3359_v9 = vadd.f32 %v3358_v55, %v3305_v45  ;;  %v3412_v2 = vpop.f32.mrf.mxu3  ;;  %v3253_v14 = vadd.f32 %v3252_v60, %v8337_v22  ;;  %v3306_v36 = vpop.f32.mrf.mxu1  ;;  %v7463_v22 = vld [vmem:[%s10795_s1 + $0x744] sm:$0xf0]  ;;  %v6716_v45 = vor.u32 %v7431_v34, %v6715_v11  ;;  %v6908_v55 = vor.u32 %v7479_v8, %v6907_v19  ;;  %v7109_v60 = vld [vmem:[%s7828_s18 + $0x14c] sm:$0xf] }
 0x165   : > { %v6844_v16 = vor.u32 %v7463_v22, %v6843_v33  ;;  %v8743_v22 = vor.u32 %v7117_v15, %v5443_v26  ;;  %v8745_v19 = vor.u32 %v7108_v17, %v5445_v32  ;;  %v8747_v8 = vor.u32 %v7118_v62, %v5451_v23 }
 0x166   : > { %v8709_v31 = vadd.f32 %v3412_v2, %v3359_v9  ;;  %v3307_v21 = vadd.f32 %v3306_v36, %v3253_v14  ;;  %v6779_v9 = vld [vmem:[%s10795_s1 + $0x6c0] sm:$0xf]  ;;  %v7447_v2 = vld [vmem:[%s10795_s1 + $0x6c4] sm:$0xf0]  ;;  %v5453_v14 = vld [vmem:[%s7828_s18 + $0x190] sm:$0xf0]  ;;  %3666 = vmatpush.bf16.msrb.mxu0 %v6716_v45  ;;  %3828 = vmatpush.bf16.msrb.mxu3 %v6908_v55 }
 0x167   : > { %3774 = vmatpush.bf16.msrb.mxu2 %v6844_v16  ;;  %v6780_v36 = vor.u32 %v7447_v2, %v6779_v9  ;;  %10974 = vst [vmem:[#allocation61_spill] sm:$0xff] %v8743_v22  ;;  %v8750_v16 = vor.u32 %v7109_v60, %v5453_v14  ;;  %v7126_v45 = vld [vmem:[%s7828_s18 + $0x1d4] sm:$0xf]  ;;  %v6835_v55 = vld [vmem:[%s10795_s1 + $0x730] sm:$0xf] }
 0x168   : > { %10975 = vst [vmem:[#allocation62_spill] sm:$0xff] %v8745_v19  ;;  %v7461_v2 = vld [vmem:[%s10795_s1 + $0x734] sm:$0xf0] }
 0x169   : > { %10976 = vst [vmem:[#allocation63_spill] sm:$0xff] %v8747_v8  ;;  %3720 = vmatpush.bf16.msrb.mxu1 %v6780_v36  ;;  %v6836_v60 = vor.u32 %v7461_v2, %v6835_v55  ;;  %v7429_v14 = vld [vmem:[%s10795_s1 + $0x634] sm:$0xf0]  ;;  %v6899_v36 = vld [vmem:[%s10795_s1 + $0x7b0] sm:$0xf] }
 0x16a   : > { %10977 = vst [vmem:[#allocation64_spill] sm:$0xff] %v8750_v16 }
 0x16b   : > { %v3360_v33 = vpop.f32.mrf.mxu2  ;;  %v3255_v34 = vpop.f32.mrf.mxu0  ;;  %3775 = vmatpush.bf16.msrb.mxu2 %v6836_v60 }
 0x16c   : > { %v3361_v30 = vadd.f32 %v3360_v33, %v3307_v21  ;;  %v3414_v11 = vpop.f32.mrf.mxu3  ;;  %v3256_v27 = vadd.f32 %v3255_v34, %v8343_v38  ;;  %v3309_v52 = vpop.f32.mrf.mxu1  ;;  %v7477_v33 = vld [vmem:[%s10795_s1 + $0x7b4] sm:$0xf0] }
 0x16d   : > { %v5523_v34 = vld [vmem:[%s7828_s18 + $0x1d8] sm:$0xf] }
 0x16e   : > { %v8752_v9 = vadd.f32 %v3414_v11, %v3361_v30  ;;  %v3310_v26 = vadd.f32 %v3309_v52, %v3256_v27  ;;  %3465 = vmatmul.bf16.gmra.mxu0 %v8743_v22  ;;  %v5515_v27 = vld [vmem:[%s7828_s18 + $0x1d0] sm:$0xf]  ;;  %v7135_v52 = vld [vmem:[%s7828_s18 + $0x214] sm:$0xf0]  ;;  %v5517_v11 = vld [vmem:[%s7828_s18 + $0x218] sm:$0xf0] }
 0x16f   : > { %3519 = vmatmul.bf16.gmra.mxu1 %v8745_v19 }
 0x170   : > { %3573 = vmatmul.bf16.gmra.mxu2 %v8747_v8  ;;  %v8789_v8 = vor.u32 %v7126_v45, %v5517_v11 }
 0x171   : > { %3627 = vmatmul.bf16.gmra.mxu3 %v8750_v16 }
 0x172   : > { %10979 = vst [vmem:[#allocation66_spill] sm:$0xff] %v8789_v8 }
 0x173   : > { %v3363_v15 = vpop.f32.mrf.mxu2  ;;  %v3257_v17 = vpop.f32.mrf.mxu0 }
 0x174   : > { %v3364_v21 = vadd.f32 %v3363_v15, %v3310_v26  ;;  %v3417_v38 = vpop.f32.mrf.mxu3  ;;  %v3258_v32 = vadd.f32 %v3257_v17, %v8379_v61  ;;  %v3311_v30 = vpop.f32.mrf.mxu1  ;;  %v6707_v61 = vld [vmem:[%s10795_s1 + $0x630] sm:$0xf]  ;;  %v7136_v26 = vld [vmem:[%s7828_s18 + $0x21c] sm:$0xf0]  ;;  %v5525_v17 = vld [vmem:[%s7828_s18 + $0x220] sm:$0xf0] }
 0x175   : > { %v6708_v15 = vor.u32 %v7429_v14, %v6707_v61  ;;  %v8791_v19 = vor.u32 %v7136_v26, %v5523_v34  ;;  %v6827_v34 = vld [vmem:[%s10795_s1 + $0x720] sm:$0xf]  ;;  %v7459_v26 = vld [vmem:[%s10795_s1 + $0x724] sm:$0xf0] }
 0x176   : > { %v8759_v23 = vadd.f32 %v3417_v38, %v3364_v21  ;;  %v3312_v62 = vadd.f32 %v3311_v30, %v3258_v32  ;;  %v6900_v21 = vor.u32 %v7477_v33, %v6899_v36  ;;  %v7127_v38 = vld [vmem:[%s7828_s18 + $0x1dc] sm:$0xf]  ;;  %v8787_v30 = vor.u32 %v7135_v52, %v5515_v27  ;;  %v6771_v27 = vld [vmem:[%s10795_s1 + $0x6b0] sm:$0xf]  ;;  %v7445_v52 = vld [vmem:[%s10795_s1 + $0x6b4] sm:$0xf0] }
 0x177   : > { %3667 = vmatpush.bf16.msrb.mxu0 %v6708_v15  ;;  %10980 = vst [vmem:[#allocation67_spill] sm:$0xff] %v8791_v19  ;;  %v8794_v61 = vor.u32 %v7127_v38, %v5525_v17  ;;  %v6772_v45 = vor.u32 %v7445_v52, %v6771_v27  ;;  %v5587_v15 = vld [vmem:[%s7828_s18 + $0x260] sm:$0xf]  ;;  %v7144_v38 = vld [vmem:[%s7828_s18 + $0x264] sm:$0xf]  ;;  %v6828_v17 = vor.u32 %v7459_v26, %v6827_v34 }
 0x178   : > { %10978 = vst [vmem:[#allocation65_spill] sm:$0xff] %v8787_v30  ;;  %3829 = vmatpush.bf16.msrb.mxu3 %v6900_v21  ;;  %v7153_v21 = vld [vmem:[%s7828_s18 + $0x2a4] sm:$0xf0]  ;;  %v5597_v27 = vld [vmem:[%s7828_s18 + $0x2b0] sm:$0xf0] }
 0x179   : > { %10981 = vst [vmem:[#allocation68_spill] sm:$0xff] %v8794_v61  ;;  %3721 = vmatpush.bf16.msrb.mxu1 %v6772_v45  ;;  %3776 = vmatpush.bf16.msrb.mxu2 %v6828_v17  ;;  %v6699_v17 = vld [vmem:[%s10795_s1 + $0x620] sm:$0xf] }
 0x17b   : > { %v3365_v32 = vpop.f32.mrf.mxu2  ;;  %v3260_v16 = vpop.f32.mrf.mxu0 }
 0x17c   : > { %v3366_v55 = vadd.f32 %v3365_v32, %v3312_v62  ;;  %v3419_v2 = vpop.f32.mrf.mxu3  ;;  %v3261_v22 = vadd.f32 %v3260_v16, %v8391_v39  ;;  %v3314_v7 = vpop.f32.mrf.mxu1  ;;  %v5589_v32 = vld [vmem:[%s7828_s18 + $0x2a8] sm:$0xf0] }
 0x17e   : > { %v8796_v14 = vadd.f32 %v3419_v2, %v3366_v55  ;;  %v3315_v62 = vadd.f32 %v3314_v7, %v3261_v22  ;;  %3470 = vmatmul.bf16.gmra.mxu0 %v8787_v30  ;;  %v5595_v55 = vld [vmem:[%s7828_s18 + $0x268] sm:$0xf]  ;;  %v7154_v2 = vld [vmem:[%s7828_s18 + $0x2ac] sm:$0xf0] }
 0x17f   : > { %3524 = vmatmul.bf16.gmra.mxu1 %v8789_v8 }
 0x180   : > { %3578 = vmatmul.bf16.gmra.mxu2 %v8791_v19 }
 0x181   : > { %3632 = vmatmul.bf16.gmra.mxu3 %v8794_v61 }
 0x183   : > { %v3368_v39 = vpop.f32.mrf.mxu2  ;;  %v3262_v22 = vpop.f32.mrf.mxu0 }
 0x184   : > { %v3369_v16 = vadd.f32 %v3368_v39, %v3315_v62  ;;  %v3422_v7 = vpop.f32.mrf.mxu3  ;;  %v3263_v60 = vadd.f32 %v3262_v22, %v8415_v43  ;;  %v3316_v36 = vpop.f32.mrf.mxu1  ;;  %v7145_v43 = vld [vmem:[%s7828_s18 + $0x26c] sm:$0xf]  ;;  %v8825_v62 = vor.u32 %v7153_v21, %v5587_v15  ;;  %v8829_v22 = vor.u32 %v7154_v2, %v5595_v55  ;;  %v6891_v15 = vld [vmem:[%s10795_s1 + $0x7a0] sm:$0xf]  ;;  %v7443_v55 = vld [vmem:[%s10795_s1 + $0x6a4] sm:$0xf0] }
 0x185   : > { %v8832_v34 = vor.u32 %v7145_v43, %v5597_v27 }
 0x186   : > { %v8809_v33 = vadd.f32 %v3422_v7, %v3369_v16  ;;  %v3317_v11 = vadd.f32 %v3316_v36, %v3263_v60  ;;  %10982 = vst [vmem:[#allocation69_spill] sm:$0xff] %v8825_v62  ;;  %v8827_v7 = vor.u32 %v7144_v38, %v5589_v32  ;;  %v7475_v38 = vld [vmem:[%s10795_s1 + $0x7a4] sm:$0xf0]  ;;  %v6763_v32 = vld [vmem:[%s10795_s1 + $0x6a0] sm:$0xf] }
 0x187   : > { %10984 = vst [vmem:[#allocation71_spill] sm:$0xff] %v8829_v22  ;;  %v6892_v2 = vor.u32 %v7475_v38, %v6891_v15  ;;  %v6764_v43 = vor.u32 %v7443_v55, %v6763_v32  ;;  %v7171_v15 = vld [vmem:[%s7828_s18 + $0x334] sm:$0xf0]  ;;  %v7162_v38 = vld [vmem:[%s7828_s18 + $0x2f4] sm:$0xf] }
 0x188   : > { %10983 = vst [vmem:[#allocation70_spill] sm:$0xff] %v8827_v7  ;;  %v5661_v32 = vld [vmem:[%s7828_s18 + $0x338] sm:$0xf0]  ;;  %v7172_v55 = vld [vmem:[%s7828_s18 + $0x33c] sm:$0xf0] }
 0x189   : > { %10985 = vst [vmem:[#allocation72_spill] sm:$0xff] %v8832_v34  ;;  %3830 = vmatpush.bf16.msrb.mxu3 %v6892_v2  ;;  %3722 = vmatpush.bf16.msrb.mxu1 %v6764_v43  ;;  %v7163_v2 = vld [vmem:[%s7828_s18 + $0x2fc] sm:$0xf]  ;;  %v8871_v19 = vor.u32 %v7162_v38, %v5661_v32  ;;  %v7473_v32 = vld [vmem:[%s10795_s1 + $0x794] sm:$0xf0] }
 0x18b   : > { %v3370_v52 = vpop.f32.mrf.mxu2  ;;  %v3265_v16 = vpop.f32.mrf.mxu0  ;;  %10987 = vst [vmem:[#allocation74_spill] sm:$0xff] %v8871_v19 }
 0x18c   : > { %v3371_v45 = vadd.f32 %v3370_v52, %v3317_v11  ;;  %v3424_v39 = vpop.f32.mrf.mxu3  ;;  %v3266_v60 = vadd.f32 %v3265_v16, %v8439_v56  ;;  %v3319_v36 = vpop.f32.mrf.mxu1  ;;  %v7427_v11 = vld [vmem:[%s10795_s1 + $0x624] sm:$0xf0] }
 0x18d   : > { %v6700_v56 = vor.u32 %v7427_v11, %v6699_v17  ;;  %v5659_v11 = vld [vmem:[%s7828_s18 + $0x2f0] sm:$0xf] }
 0x18e   : > { %v8834_v26 = vadd.f32 %v3424_v39, %v3371_v45  ;;  %v3320_v21 = vadd.f32 %v3319_v36, %v3266_v60  ;;  %3475 = vmatmul.bf16.gmra.mxu0 %v8825_v62 }
 0x18f   : > { %3529 = vmatmul.bf16.gmra.mxu1 %v8827_v7  ;;  %3668 = vmatpush.bf16.msrb.mxu0 %v6700_v56  ;;  %v5667_v56 = vld [vmem:[%s7828_s18 + $0x2f8] sm:$0xf] }
 0x190   : > { %3583 = vmatmul.bf16.gmra.mxu2 %v8829_v22  ;;  %v8869_v22 = vor.u32 %v7171_v15, %v5659_v11 }
 0x191   : > { %3637 = vmatmul.bf16.gmra.mxu3 %v8832_v34  ;;  %v5669_v34 = vld [vmem:[%s7828_s18 + $0x340] sm:$0xf0] }
 0x192   : > { %10986 = vst [vmem:[#allocation73_spill] sm:$0xff] %v8869_v22 }
 0x193   : > { %v3373_v27 = vpop.f32.mrf.mxu2  ;;  %v3267_v39 = vpop.f32.mrf.mxu0 }
 0x194   : > { %v3374_v52 = vadd.f32 %v3373_v27, %v3320_v21  ;;  %v3427_v45 = vpop.f32.mrf.mxu3  ;;  %v3268_v16 = vadd.f32 %v3267_v39, %v8457_v35  ;;  %v3321_v60 = vpop.f32.mrf.mxu1  ;;  %v8873_v35 = vor.u32 %v7172_v55, %v5667_v56  ;;  %v8876_v39 = vor.u32 %v7163_v2, %v5669_v34  ;;  %v6883_v34 = vld [vmem:[%s10795_s1 + $0x790] sm:$0xf] }
 0x195   : > { %v6884_v56 = vor.u32 %v7473_v32, %v6883_v34  ;;  %v6755_v55 = vld [vmem:[%s10795_s1 + $0x690] sm:$0xf]  ;;  %v7189_v34 = vld [vmem:[%s7828_s18 + $0x3c4] sm:$0xf0]  ;;  %v5733_v32 = vld [vmem:[%s7828_s18 + $0x3c8] sm:$0xf0] }
 0x196   : > { %v8859_v36 = vadd.f32 %v3427_v45, %v3374_v52  ;;  %v3322_v17 = vadd.f32 %v3321_v60, %v3268_v16  ;;  %10988 = vst [vmem:[#allocation75_spill] sm:$0xff] %v8873_v35  ;;  %v6819_v60 = vld [vmem:[%s10795_s1 + $0x710] sm:$0xf] }
 0x197   : > { %10989 = vst [vmem:[#allocation76_spill] sm:$0xff] %v8876_v39  ;;  %3831 = vmatpush.bf16.msrb.mxu3 %v6884_v56  ;;  %v5739_v56 = vld [vmem:[%s7828_s18 + $0x388] sm:$0xf] }
 0x19b   : > { %v3375_v43 = vpop.f32.mrf.mxu2  ;;  %v3270_v61 = vpop.f32.mrf.mxu0 }
 0x19c   : > { %v3376_v21 = vadd.f32 %v3375_v43, %v3322_v17  ;;  %v3429_v27 = vpop.f32.mrf.mxu3  ;;  %v3271_v52 = vadd.f32 %v3270_v61, %v8487_v4  ;;  %v3324_v45 = vpop.f32.mrf.mxu1  ;;  %v7457_v17 = vld [vmem:[%s10795_s1 + $0x714] sm:$0xf0]  ;;  %v6691_v4 = vld [vmem:[%s10795_s1 + $0x610] sm:$0xf] }
 0x19d   : > { %v6820_v15 = vor.u32 %v7457_v17, %v6819_v60  ;;  %v7425_v61 = vld [vmem:[%s10795_s1 + $0x614] sm:$0xf0] }
 0x19e   : > { %v8878_v16 = vadd.f32 %v3429_v27, %v3376_v21  ;;  %v3325_v11 = vadd.f32 %v3324_v45, %v3271_v52  ;;  %3480 = vmatmul.bf16.gmra.mxu0 %v8869_v22  ;;  %v6692_v38 = vor.u32 %v7425_v61, %v6691_v4  ;;  %v7441_v43 = vld [vmem:[%s10795_s1 + $0x694] sm:$0xf0]  ;;  %v5731_v61 = vld [vmem:[%s7828_s18 + $0x380] sm:$0xf] }
 0x19f   : > { %3534 = vmatmul.bf16.gmra.mxu1 %v8871_v19  ;;  %3777 = vmatpush.bf16.msrb.mxu2 %v6820_v15  ;;  %v6756_v45 = vor.u32 %v7441_v43, %v6755_v55  ;;  %v5741_v19 = vld [vmem:[%s7828_s18 + $0x3d0] sm:$0xf0] }
 0x1a0   : > { %3588 = vmatmul.bf16.gmra.mxu2 %v8873_v35  ;;  %3669 = vmatpush.bf16.msrb.mxu0 %v6692_v38  ;;  %v7180_v38 = vld [vmem:[%s7828_s18 + $0x384] sm:$0xf]  ;;  %v7181_v35 = vld [vmem:[%s7828_s18 + $0x38c] sm:$0xf] }
 0x1a1   : > { %3642 = vmatmul.bf16.gmra.mxu3 %v8876_v39  ;;  %3723 = vmatpush.bf16.msrb.mxu1 %v6756_v45  ;;  %v7190_v39 = vld [vmem:[%s7828_s18 + $0x3cc] sm:$0xf0]  ;;  %v8926_v45 = vor.u32 %v7181_v35, %v5741_v19  ;;  %v6683_v19 = vld [vmem:[%s10795_s1 + $0x600] sm:$0xf] }
 0x1a3   : > { %v3378_v2 = vpop.f32.mrf.mxu2  ;;  %v3272_v52 = vpop.f32.mrf.mxu0  ;;  %10993 = vst [vmem:[#allocation80_spill] sm:$0xff] %v8926_v45 }
 0x1a4   : > { %v3379_v21 = vadd.f32 %v3378_v2, %v3325_v11  ;;  %v3432_v27 = vpop.f32.mrf.mxu3  ;;  %v3273_v60 = vadd.f32 %v3272_v52, %v8505_v42  ;;  %v3326_v17 = vpop.f32.mrf.mxu1  ;;  %v8919_v2 = vor.u32 %v7189_v34, %v5731_v61  ;;  %v8921_v42 = vor.u32 %v7180_v38, %v5733_v32  ;;  %v7455_v61 = vld [vmem:[%s10795_s1 + $0x704] sm:$0xf0]  ;;  %v6747_v38 = vld [vmem:[%s10795_s1 + $0x680] sm:$0xf] }
 0x1a5   : > { %v7471_v34 = vld [vmem:[%s10795_s1 + $0x784] sm:$0xf0] }
 0x1a6   : > { %v8909_v15 = vadd.f32 %v3432_v27, %v3379_v21  ;;  %v3327_v4 = vadd.f32 %v3326_v17, %v3273_v60  ;;  %10990 = vst [vmem:[#allocation77_spill] sm:$0xff] %v8919_v2  ;;  %v8923_v21 = vor.u32 %v7190_v39, %v5739_v56  ;;  %v6875_v39 = vld [vmem:[%s10795_s1 + $0x780] sm:$0xf] }
 0x1a7   : > { %10991 = vst [vmem:[#allocation78_spill] sm:$0xff] %v8921_v42  ;;  %v6876_v56 = vor.u32 %v7471_v34, %v6875_v39  ;;  %v7207_v39 = vld [vmem:[%s7828_s18 + $0x454] sm:$0xf0]  ;;  %v7198_v34 = vld [vmem:[%s7828_s18 + $0x414] sm:$0xf] }
 0x1a8   : > { %10992 = vst [vmem:[#allocation79_spill] sm:$0xff] %v8923_v21 }
 0x1a9   : > { %3832 = vmatpush.bf16.msrb.mxu3 %v6876_v56 }
 0x1ab   : > { %v3380_v11 = vpop.f32.mrf.mxu2  ;;  %v3275_v43 = vpop.f32.mrf.mxu0 }
 0x1ac   : > { %v3381_v22 = vadd.f32 %v3380_v11, %v3327_v4  ;;  %v3434_v55 = vpop.f32.mrf.mxu3  ;;  %v3276_v27 = vadd.f32 %v3275_v43, %v8535_v3  ;;  %v3329_v52 = vpop.f32.mrf.mxu1  ;;  %v6811_v4 = vld [vmem:[%s10795_s1 + $0x700] sm:$0xf]  ;;  %v7439_v11 = vld [vmem:[%s10795_s1 + $0x684] sm:$0xf0] }
 0x1ad   : > { %v6812_v3 = vor.u32 %v7455_v61, %v6811_v4 }
 0x1ae   : > { %v8928_v60 = vadd.f32 %v3434_v55, %v3381_v22  ;;  %v3330_v17 = vadd.f32 %v3329_v52, %v3276_v27  ;;  %3485 = vmatmul.bf16.gmra.mxu0 %v8919_v2  ;;  %v7423_v22 = vld [vmem:[%s10795_s1 + $0x604] sm:$0xf0]  ;;  %v6748_v52 = vor.u32 %v7439_v11, %v6747_v38 }
 0x1af   : > { %3539 = vmatmul.bf16.gmra.mxu1 %v8921_v42  ;;  %3778 = vmatpush.bf16.msrb.mxu2 %v6812_v3  ;;  %v6684_v35 = vor.u32 %v7423_v22, %v6683_v19  ;;  %v5803_v22 = vld [vmem:[%s7828_s18 + $0x410] sm:$0xf]  ;;  %v5813_v42 = vld [vmem:[%s7828_s18 + $0x460] sm:$0xf0] }
 0x1b0   : > { %3593 = vmatmul.bf16.gmra.mxu2 %v8923_v21  ;;  %3724 = vmatpush.bf16.msrb.mxu1 %v6748_v52  ;;  %v7199_v21 = vld [vmem:[%s7828_s18 + $0x41c] sm:$0xf]  ;;  %v8969_v7 = vor.u32 %v7207_v39, %v5803_v22 }
 0x1b1   : > { %3647 = vmatmul.bf16.gmra.mxu3 %v8926_v45  ;;  %3670 = vmatpush.bf16.msrb.mxu0 %v6684_v35  ;;  %v5805_v45 = vld [vmem:[%s7828_s18 + $0x458] sm:$0xf0] }
 0x1b2   : > { %10994 = vst [vmem:[#allocation81_spill] sm:$0xff] %v8969_v7  ;;  %v8971_v11 = vor.u32 %v7198_v34, %v5805_v45  ;;  %v7501_v45 = vld [vmem:[%s10795_s1 + $0x874] sm:$0xf0] }
 0x1b3   : > { %v3383_v32 = vpop.f32.mrf.mxu2  ;;  %v3277_v27 = vpop.f32.mrf.mxu0 }
 0x1b4   : > { %v3384_v55 = vadd.f32 %v3383_v32, %v3330_v17  ;;  %v3437_v43 = vpop.f32.mrf.mxu3  ;;  %v3278_v4 = vadd.f32 %v3277_v27, %v8553_v10  ;;  %v3331_v61 = vpop.f32.mrf.mxu1  ;;  %v5811_v17 = vld [vmem:[%s7828_s18 + $0x418] sm:$0xf]  ;;  %v7208_v32 = vld [vmem:[%s7828_s18 + $0x45c] sm:$0xf0]  ;;  %10995 = vst [vmem:[#allocation82_spill] sm:$0xff] %v8971_v11  ;;  %v8976_v27 = vor.u32 %v7199_v21, %v5813_v42 }
 0x1b5   : > { %v8973_v56 = vor.u32 %v7208_v32, %v5811_v17  ;;  %v6995_v42 = vld [vmem:[%s10795_s1 + $0x870] sm:$0xf] }
 0x1b6   : > { %v8959_v3 = vadd.f32 %v3437_v43, %v3384_v55  ;;  %v3332_v19 = vadd.f32 %v3331_v61, %v3278_v4  ;;  %10997 = vst [vmem:[#allocation84_spill] sm:$0xff] %v8976_v27  ;;  %v7260_v61 = vld [vmem:[%s10795_s1 + $0xf4] sm:$0xf]  ;;  %v6996_v39 = vor.u32 %v7501_v45, %v6995_v42  ;;  %v5875_v42 = vld [vmem:[%s7828_s18 + $0x4a0] sm:$0xf] }
 0x1b7   : > { %10996 = vst [vmem:[#allocation83_spill] sm:$0xff] %v8973_v56  ;;  %v5877_v45 = vld [vmem:[%s7828_s18 + $0x4e8] sm:$0xf0] }
 0x1b8   : > { %3879 = vmatpush.bf16.msra.mxu0 %v6996_v39  ;;  %v5885_v39 = vld [vmem:[%s7828_s18 + $0x4f0] sm:$0xf0] }
 0x1bb   : > { %v3385_v2 = vpop.f32.mrf.mxu2  ;;  %v3280_v10 = vpop.f32.mrf.mxu0 }
 0x1bc   : > { %v3386_v35 = vadd.f32 %v3385_v2, %v3332_v19  ;;  %v3439_v38 = vpop.f32.mrf.mxu3  ;;  %v3281_v55 = vadd.f32 %v3280_v10, %v8577_v37  ;;  %v3334_v43 = vpop.f32.mrf.mxu1  ;;  %v7244_v2 = vld [vmem:[%s10795_s1 + $0x74] sm:$0xf]  ;;  %v5973_v37 = vld [vmem:[%s10795_s1 + $0x78] sm:$0xf0] }
 0x1bd   : > { %v5976_v21 = vor.u32 %v7244_v2, %v5973_v37  ;;  %v6037_v19 = vld [vmem:[%s10795_s1 + $0xf8] sm:$0xf0] }
 0x1be   : > { %v8978_v52 = vadd.f32 %v3439_v38, %v3386_v35  ;;  %v3335_v4 = vadd.f32 %v3334_v43, %v3281_v55  ;;  %3490 = vmatmul.bf16.gmra.mxu0 %v8969_v7  ;;  %v6040_v34 = vor.u32 %v7260_v61, %v6037_v19  ;;  %v7059_v43 = vld [vmem:[%s10795_s1 + $0x8f0] sm:$0xf]  ;;  %v5883_v61 = vld [vmem:[%s7828_s18 + $0x4a8] sm:$0xf] }
 0x1bf   : > { %3544 = vmatmul.bf16.gmra.mxu1 %v8971_v11  ;;  %3987 = vmatpush.bf16.msra.mxu2 %v5976_v21  ;;  %v7225_v21 = vld [vmem:[%s7828_s18 + $0x4e4] sm:$0xf0]  ;;  %v7226_v19 = vld [vmem:[%s7828_s18 + $0x4ec] sm:$0xf0] }
 0x1c0   : > { %3598 = vmatmul.bf16.gmra.mxu2 %v8973_v56  ;;  %4041 = vmatpush.bf16.msra.mxu3 %v6040_v34  ;;  %v9023_v11 = vor.u32 %v7226_v19, %v5883_v61 }
 0x1c1   : > { %3652 = vmatmul.bf16.gmra.mxu3 %v8976_v27 }
 0x1c2   : > { %11000 = vst [vmem:[#allocation87_spill] sm:$0xff] %v9023_v11 }
 0x1c3   : > { %v3388_v22 = vpop.f32.mrf.mxu2  ;;  %v3282_v35 = vpop.f32.mrf.mxu0 }
 0x1c4   : > { %v3389_v17 = vadd.f32 %v3388_v22, %v3335_v4  ;;  %v3442_v32 = vpop.f32.mrf.mxu3  ;;  %v3283_v38 = vadd.f32 %v3282_v35, %v8602_v51  ;;  %v3336_v10 = vpop.f32.mrf.mxu1  ;;  %v7517_v4 = vld [vmem:[%s10795_s1 + $0x8f4] sm:$0xf0]  ;;  %v7216_v51 = vld [vmem:[%s7828_s18 + $0x4a4] sm:$0xf]  ;;  %v7217_v22 = vld [vmem:[%s7828_s18 + $0x4ac] sm:$0xf] }
 0x1c5   : > { %v7060_v37 = vor.u32 %v7517_v4, %v7059_v43  ;;  %v9021_v56 = vor.u32 %v7216_v51, %v5877_v45  ;;  %v9026_v43 = vor.u32 %v7217_v22, %v5885_v39  ;;  %v6987_v39 = vld [vmem:[%s10795_s1 + $0x860] sm:$0xf] }
 0x1c6   : > { %v9003_v55 = vadd.f32 %v3442_v32, %v3389_v17  ;;  %v3337_v2 = vadd.f32 %v3336_v10, %v3283_v38  ;;  %v9019_v17 = vor.u32 %v7225_v21, %v5875_v42 }
 0x1c7   : > { %3933 = vmatpush.bf16.msra.mxu1 %v7060_v37  ;;  %10999 = vst [vmem:[#allocation86_spill] sm:$0xff] %v9021_v56 }
 0x1c8   : > { %10998 = vst [vmem:[#allocation85_spill] sm:$0xff] %v9019_v17 }
 0x1c9   : > { %11001 = vst [vmem:[#allocation88_spill] sm:$0xff] %v9026_v43 }
 0x1cb   : > { %v3390_v34 = vpop.f32.mrf.mxu2  ;;  %v3456_v27 = vpop.f32.mrf.mxu0 }
 0x1cc   : > { %v3391_v32 = vadd.f32 %v3390_v34, %v3337_v2  ;;  %v3444_v35 = vpop.f32.mrf.mxu3  ;;  %v3457_v38 = vadd.f32 %v3456_v27, %v8615_v18  ;;  %v3510_v10 = vpop.f32.mrf.mxu1  ;;  %v7242_v2 = vld [vmem:[%s10795_s1 + $0x64] sm:$0xf]  ;;  %v5965_v18 = vld [vmem:[%s10795_s1 + $0x68] sm:$0xf0]  ;;  %v7499_v34 = vld [vmem:[%s10795_s1 + $0x864] sm:$0xf0] }
 0x1cd   : > { %v5968_v27 = vor.u32 %v7242_v2, %v5965_v18  ;;  %v5315_v2 = vld [vmem:[%s7828_s18 + $0x30] sm:$0xf]  ;;  %v7083_v18 = vld [vmem:[%s7828_s18 + $0x74] sm:$0xf0] }
 0x1ce   : > { %v9028_v4 = vadd.f32 %v3444_v35, %v3391_v32  ;;  %v3511_v37 = vadd.f32 %v3510_v10, %v3457_v38  ;;  %3495 = vmatmul.bf16.gmra.mxu0 %v9019_v17  ;;  %v7258_v32 = vld [vmem:[%s10795_s1 + $0xe4] sm:$0xf]  ;;  %v6988_v35 = vor.u32 %v7499_v34, %v6987_v39  ;;  %v6029_v38 = vld [vmem:[%s10795_s1 + $0xe8] sm:$0xf0]  ;;  %v7051_v10 = vld [vmem:[%s10795_s1 + $0x8e0] sm:$0xf] }
 0x1cf   : > { %3549 = vmatmul.bf16.gmra.mxu1 %v9021_v56  ;;  %3988 = vmatpush.bf16.msra.mxu2 %v5968_v27  ;;  %v7074_v27 = vld [vmem:[%s7828_s18 + $0x34] sm:$0xf]  ;;  %v5325_v39 = vld [vmem:[%s7828_s18 + $0x80] sm:$0xf0] }
 0x1d0   : > { %3603 = vmatmul.bf16.gmra.mxu2 %v9023_v11  ;;  %3880 = vmatpush.bf16.msra.mxu0 %v6988_v35 }
 0x1d1   : > { %3657 = vmatmul.bf16.gmra.mxu3 %v9026_v43  ;;  %v9069_v43 = vor.u32 %v7083_v18, %v5315_v2 }
 0x1d3   : > { %v3564_v42 = vpop.f32.mrf.mxu2  ;;  %v3458_v45 = vpop.f32.mrf.mxu0  ;;  %11002 = vst [vmem:[#allocation89_spill] sm:$0xff] %v9069_v43 }
 0x1d4   : > { %v3565_v21 = vadd.f32 %v3564_v42, %v3511_v37  ;;  %v3618_v51 = vpop.f32.mrf.mxu3  ;;  %v3459_v61 = vadd.f32 %v3458_v45, %v8652_v57  ;;  %v3512_v19 = vpop.f32.mrf.mxu1  ;;  %v7515_v37 = vld [vmem:[%s10795_s1 + $0x8e4] sm:$0xf0]  ;;  %v6032_v42 = vor.u32 %v7258_v32, %v6029_v38  ;;  %v5323_v45 = vld [vmem:[%s7828_s18 + $0x38] sm:$0xf] }
 0x1d6   : > { %v9041_v22 = vadd.f32 %v3618_v51, %v3565_v21  ;;  %v3513_v57 = vadd.f32 %v3512_v19, %v3459_v61  ;;  %v7052_v21 = vor.u32 %v7515_v37, %v7051_v10  ;;  %v5317_v51 = vld [vmem:[%s7828_s18 + $0x78] sm:$0xf0]  ;;  %v7084_v61 = vld [vmem:[%s7828_s18 + $0x7c] sm:$0xf0]  ;;  %4042 = vmatpush.bf16.msra.mxu3 %v6032_v42  ;;  %v7101_v42 = vld [vmem:[%s7828_s18 + $0x104] sm:$0xf0] }
 0x1d7   : > { %v7075_v19 = vld [vmem:[%s7828_s18 + $0x3c] sm:$0xf]  ;;  %v9071_v7 = vor.u32 %v7074_v27, %v5317_v51  ;;  %v9073_v62 = vor.u32 %v7084_v61, %v5323_v45  ;;  %v7092_v61 = vld [vmem:[%s7828_s18 + $0xc4] sm:$0xf] }
 0x1d8   : > { %3934 = vmatpush.bf16.msra.mxu1 %v7052_v21  ;;  %v9076_v35 = vor.u32 %v7075_v19, %v5325_v39  ;;  %v7240_v21 = vld [vmem:[%s10795_s1 + $0x54] sm:$0xf]  ;;  %v5957_v51 = vld [vmem:[%s10795_s1 + $0x58] sm:$0xf0]  ;;  %v6979_v19 = vld [vmem:[%s10795_s1 + $0x850] sm:$0xf] }
 0x1d9   : > { %11003 = vst [vmem:[#allocation90_spill] sm:$0xff] %v9071_v7  ;;  %v7497_v39 = vld [vmem:[%s10795_s1 + $0x854] sm:$0xf0] }
 0x1da   : > { %11004 = vst [vmem:[#allocation91_spill] sm:$0xff] %v9073_v62 }
 0x1db   : > { %v3566_v34 = vpop.f32.mrf.mxu2  ;;  %v3461_v17 = vpop.f32.mrf.mxu0  ;;  %11005 = vst [vmem:[#allocation92_spill] sm:$0xff] %v9076_v35 }
 0x1dc   : > { %v3567_v11 = vadd.f32 %v3566_v34, %v3513_v57  ;;  %v3620_v56 = vpop.f32.mrf.mxu3  ;;  %v3462_v32 = vadd.f32 %v3461_v17, %v8659_v47  ;;  %v3515_v38 = vpop.f32.mrf.mxu1  ;;  %v7256_v34 = vld [vmem:[%s10795_s1 + $0xd4] sm:$0xf] }
 0x1de   : > { %v9078_v10 = vadd.f32 %v3620_v56, %v3567_v11  ;;  %v3516_v37 = vadd.f32 %v3515_v38, %v3462_v32  ;;  %3671 = vmatmul.bf16.vlgmr.msrb.gmra.mxu0 %v9069_v43  ;;  %v5387_v56 = vld [vmem:[%s7828_s18 + $0xc0] sm:$0xf]  ;;  %v6980_v32 = vor.u32 %v7497_v39, %v6979_v19  ;;  %v6021_v38 = vld [vmem:[%s10795_s1 + $0xd8] sm:$0xf0] }
 0x1df   : > { %3725 = vmatmul.bf16.vlgmr.msrb.gmra.mxu1 %v9071_v7  ;;  %v9119_v39 = vor.u32 %v7101_v42, %v5387_v56 }
 0x1e0   : > { %3779 = vmatmul.bf16.vlgmr.msrb.gmra.mxu2 %v9073_v62  ;;  %3881 = vmatpush.bf16.msra.mxu0 %v6980_v32 }
 0x1e1   : > { %3833 = vmatmul.bf16.vlgmr.msrb.gmra.mxu3 %v9076_v35  ;;  %11006 = vst [vmem:[#allocation93_spill] sm:$0xff] %v9119_v39 }
 0x1e3   : > { %v3569_v57 = vpop.f32.mrf.mxu2  ;;  %v3463_v17 = vpop.f32.mrf.mxu0 }
 0x1e4   : > { %v3570_v2 = vadd.f32 %v3569_v57, %v3516_v37  ;;  %v3623_v47 = vpop.f32.mrf.mxu3  ;;  %v3464_v18 = vadd.f32 %v3463_v17, %v8702_v20  ;;  %v3517_v27 = vpop.f32.mrf.mxu1  ;;  %v5960_v20 = vor.u32 %v7240_v21, %v5957_v51  ;;  %v7043_v37 = vld [vmem:[%s10795_s1 + $0x8d0] sm:$0xf]  ;;  %v7513_v57 = vld [vmem:[%s10795_s1 + $0x8d4] sm:$0xf0]  ;;  %v7093_v21 = vld [vmem:[%s7828_s18 + $0xcc] sm:$0xf] }
 0x1e5   : > { %v7102_v17 = vld [vmem:[%s7828_s18 + $0x10c] sm:$0xf0]  ;;  %v5397_v51 = vld [vmem:[%s7828_s18 + $0x110] sm:$0xf0] }
 0x1e6   : > { %v9085_v11 = vadd.f32 %v3623_v47, %v3570_v2  ;;  %v3518_v45 = vadd.f32 %v3517_v27, %v3464_v18  ;;  %v5389_v2 = vld [vmem:[%s7828_s18 + $0x108] sm:$0xf0]  ;;  %v5395_v47 = vld [vmem:[%s7828_s18 + $0xc8] sm:$0xf]  ;;  %3989 = vmatpush.bf16.msra.mxu2 %v5960_v20  ;;  %v6024_v18 = vor.u32 %v7256_v34, %v6021_v38  ;;  %v7044_v27 = vor.u32 %v7513_v57, %v7043_v37  ;;  %v7119_v38 = vld [vmem:[%s7828_s18 + $0x194] sm:$0xf0] }
 0x1e7   : > { %v9121_v43 = vor.u32 %v7092_v61, %v5389_v2  ;;  %v9123_v8 = vor.u32 %v7102_v17, %v5395_v47  ;;  %v9126_v34 = vor.u32 %v7093_v21, %v5397_v51  ;;  %v7110_v57 = vld [vmem:[%s7828_s18 + $0x154] sm:$0xf]  ;;  %v5461_v2 = vld [vmem:[%s7828_s18 + $0x198] sm:$0xf0]  ;;  %v5467_v47 = vld [vmem:[%s7828_s18 + $0x158] sm:$0xf] }
 0x1e8   : > { %4043 = vmatpush.bf16.msra.mxu3 %v6024_v18  ;;  %3935 = vmatpush.bf16.msra.mxu1 %v7044_v27  ;;  %v7238_v17 = vld [vmem:[%s10795_s1 + $0x44] sm:$0xf]  ;;  %v6971_v18 = vld [vmem:[%s10795_s1 + $0x840] sm:$0xf]  ;;  %v7495_v21 = vld [vmem:[%s10795_s1 + $0x844] sm:$0xf0] }
 0x1e9   : > { %11007 = vst [vmem:[#allocation94_spill] sm:$0xff] %v9121_v43  ;;  %v7254_v51 = vld [vmem:[%s10795_s1 + $0xc4] sm:$0xf] }
 0x1ea   : > { %11008 = vst [vmem:[#allocation95_spill] sm:$0xff] %v9123_v8 }
 0x1eb   : > { %v3571_v19 = vpop.f32.mrf.mxu2  ;;  %v3466_v7 = vpop.f32.mrf.mxu0  ;;  %11009 = vst [vmem:[#allocation96_spill] sm:$0xff] %v9126_v34 }
 0x1ec   : > { %v3572_v35 = vadd.f32 %v3571_v19, %v3518_v45  ;;  %v3625_v62 = vpop.f32.mrf.mxu3  ;;  %v3467_v30 = vadd.f32 %v3466_v7, %v8709_v31  ;;  %v3520_v20 = vpop.f32.mrf.mxu1  ;;  %v6013_v19 = vld [vmem:[%s10795_s1 + $0xc8] sm:$0xf0] }
 0x1ee   : > { %v9128_v32 = vadd.f32 %v3625_v62, %v3572_v35  ;;  %v3521_v56 = vadd.f32 %v3520_v20, %v3467_v30  ;;  %3676 = vmatmul.bf16.gmra.mxu0 %v9119_v39  ;;  %v5459_v30 = vld [vmem:[%s7828_s18 + $0x150] sm:$0xf]  ;;  %v7120_v20 = vld [vmem:[%s7828_s18 + $0x19c] sm:$0xf0] }
 0x1ef   : > { %3730 = vmatmul.bf16.gmra.mxu1 %v9121_v43 }
 0x1f0   : > { %3784 = vmatmul.bf16.gmra.mxu2 %v9123_v8 }
 0x1f1   : > { %3838 = vmatmul.bf16.gmra.mxu3 %v9126_v34 }
 0x1f3   : > { %v3574_v31 = vpop.f32.mrf.mxu2  ;;  %v3468_v45 = vpop.f32.mrf.mxu0 }
 0x1f4   : > { %v3575_v7 = vadd.f32 %v3574_v31, %v3521_v56  ;;  %v3628_v42 = vpop.f32.mrf.mxu3  ;;  %v3469_v61 = vadd.f32 %v3468_v45, %v8752_v9  ;;  %v3522_v62 = vpop.f32.mrf.mxu1  ;;  %v5949_v9 = vld [vmem:[%s10795_s1 + $0x48] sm:$0xf0]  ;;  %v6972_v56 = vor.u32 %v7495_v21, %v6971_v18  ;;  %v6016_v31 = vor.u32 %v7254_v51, %v6013_v19  ;;  %v7111_v45 = vld [vmem:[%s7828_s18 + $0x15c] sm:$0xf] }
 0x1f5   : > { %v5952_v27 = vor.u32 %v7238_v17, %v5949_v9  ;;  %v9169_v9 = vor.u32 %v7119_v38, %v5459_v30  ;;  %v9171_v51 = vor.u32 %v7110_v57, %v5461_v2  ;;  %v9173_v19 = vor.u32 %v7120_v20, %v5467_v47 }
 0x1f6   : > { %v9135_v35 = vadd.f32 %v3628_v42, %v3575_v7  ;;  %v3523_v37 = vadd.f32 %v3522_v62, %v3469_v61  ;;  %v7035_v7 = vld [vmem:[%s10795_s1 + $0x8c0] sm:$0xf]  ;;  %v7511_v42 = vld [vmem:[%s10795_s1 + $0x8c4] sm:$0xf0]  ;;  %v5469_v61 = vld [vmem:[%s7828_s18 + $0x1a0] sm:$0xf0]  ;;  %3882 = vmatpush.bf16.msra.mxu0 %v6972_v56  ;;  %4044 = vmatpush.bf16.msra.mxu3 %v6016_v31 }
 0x1f7   : > { %3990 = vmatpush.bf16.msra.mxu2 %v5952_v27  ;;  %v7036_v62 = vor.u32 %v7511_v42, %v7035_v7  ;;  %11010 = vst [vmem:[#allocation97_spill] sm:$0xff] %v9169_v9  ;;  %v9176_v27 = vor.u32 %v7111_v45, %v5469_v61  ;;  %v7128_v56 = vld [vmem:[%s7828_s18 + $0x1e4] sm:$0xf]  ;;  %v7236_v31 = vld [vmem:[%s10795_s1 + $0x34] sm:$0xf] }
 0x1f8   : > { %11011 = vst [vmem:[#allocation98_spill] sm:$0xff] %v9171_v51  ;;  %v5941_v42 = vld [vmem:[%s10795_s1 + $0x38] sm:$0xf0]  ;;  %v7493_v61 = vld [vmem:[%s10795_s1 + $0x834] sm:$0xf0] }
 0x1f9   : > { %11012 = vst [vmem:[#allocation99_spill] sm:$0xff] %v9173_v19  ;;  %3936 = vmatpush.bf16.msra.mxu1 %v7036_v62  ;;  %v5944_v45 = vor.u32 %v7236_v31, %v5941_v42  ;;  %v7252_v62 = vld [vmem:[%s10795_s1 + $0xb4] sm:$0xf] }
 0x1fa   : > { %11013 = vst [vmem:[#allocation100_spill] sm:$0xff] %v9176_v27 }
 0x1fb   : > { %v3576_v17 = vpop.f32.mrf.mxu2  ;;  %v3471_v21 = vpop.f32.mrf.mxu0  ;;  %3991 = vmatpush.bf16.msra.mxu2 %v5944_v45 }
 0x1fc   : > { %v3577_v34 = vadd.f32 %v3576_v17, %v3523_v37  ;;  %v3630_v18 = vpop.f32.mrf.mxu3  ;;  %v3472_v8 = vadd.f32 %v3471_v21, %v8759_v23  ;;  %v3525_v43 = vpop.f32.mrf.mxu1  ;;  %v6005_v17 = vld [vmem:[%s10795_s1 + $0xb8] sm:$0xf0]  ;;  %v5539_v21 = vld [vmem:[%s7828_s18 + $0x1e8] sm:$0xf] }
 0x1fe   : > { %v9178_v7 = vadd.f32 %v3630_v18, %v3577_v34  ;;  %v3526_v30 = vadd.f32 %v3525_v43, %v3472_v8  ;;  %3681 = vmatmul.bf16.gmra.mxu0 %v9169_v9  ;;  %v5531_v8 = vld [vmem:[%s7828_s18 + $0x1e0] sm:$0xf]  ;;  %v7137_v43 = vld [vmem:[%s7828_s18 + $0x224] sm:$0xf0]  ;;  %v5533_v18 = vld [vmem:[%s7828_s18 + $0x228] sm:$0xf0] }
 0x1ff   : > { %3735 = vmatmul.bf16.gmra.mxu1 %v9171_v51 }
 0x200   : > { %3789 = vmatmul.bf16.gmra.mxu2 %v9173_v19  ;;  %v9215_v19 = vor.u32 %v7128_v56, %v5533_v18 }
 0x201   : > { %3843 = vmatmul.bf16.gmra.mxu3 %v9176_v27 }
 0x203   : > { %v3579_v38 = vpop.f32.mrf.mxu2  ;;  %v3473_v57 = vpop.f32.mrf.mxu0 }
 0x204   : > { %v3580_v37 = vadd.f32 %v3579_v38, %v3526_v30  ;;  %v3633_v23 = vpop.f32.mrf.mxu3  ;;  %v3474_v2 = vadd.f32 %v3473_v57, %v8796_v14  ;;  %v3527_v34 = vpop.f32.mrf.mxu1  ;;  %v6963_v14 = vld [vmem:[%s10795_s1 + $0x830] sm:$0xf]  ;;  %v5541_v57 = vld [vmem:[%s7828_s18 + $0x230] sm:$0xf0] }
 0x205   : > { %v7138_v30 = vld [vmem:[%s7828_s18 + $0x22c] sm:$0xf0]  ;;  %v6964_v38 = vor.u32 %v7493_v61, %v6963_v14 }
 0x206   : > { %v9185_v47 = vadd.f32 %v3633_v23, %v3580_v37  ;;  %v3528_v20 = vadd.f32 %v3527_v34, %v3474_v2  ;;  %v6008_v37 = vor.u32 %v7252_v62, %v6005_v17  ;;  %v7129_v23 = vld [vmem:[%s7828_s18 + $0x1ec] sm:$0xf]  ;;  %v9213_v34 = vor.u32 %v7137_v43, %v5531_v8  ;;  %v7027_v8 = vld [vmem:[%s10795_s1 + $0x8b0] sm:$0xf]  ;;  %v7509_v43 = vld [vmem:[%s10795_s1 + $0x8b4] sm:$0xf0] }
 0x207   : > { %3883 = vmatpush.bf16.msra.mxu0 %v6964_v38  ;;  %v9217_v51 = vor.u32 %v7138_v30, %v5539_v21  ;;  %v9220_v14 = vor.u32 %v7129_v23, %v5541_v57  ;;  %v7028_v56 = vor.u32 %v7509_v43, %v7027_v8  ;;  %v7234_v21 = vld [vmem:[%s10795_s1 + $0x24] sm:$0xf]  ;;  %v5933_v30 = vld [vmem:[%s10795_s1 + $0x28] sm:$0xf0]  ;;  %v5603_v38 = vld [vmem:[%s7828_s18 + $0x270] sm:$0xf] }
 0x208   : > { %4045 = vmatpush.bf16.msra.mxu3 %v6008_v37  ;;  %v7155_v37 = vld [vmem:[%s7828_s18 + $0x2b4] sm:$0xf0]  ;;  %v7146_v23 = vld [vmem:[%s7828_s18 + $0x274] sm:$0xf]  ;;  %v5936_v57 = vor.u32 %v7234_v21, %v5933_v30  ;;  %v5613_v8 = vld [vmem:[%s7828_s18 + $0x2c0] sm:$0xf0] }
 0x209   : > { %11014 = vst [vmem:[#allocation101_spill] sm:$0xff] %v9217_v51  ;;  %3937 = vmatpush.bf16.msra.mxu1 %v7028_v56 }
 0x20a   : > { %11015 = vst [vmem:[#allocation102_spill] sm:$0xff] %v9220_v14  ;;  %3992 = vmatpush.bf16.msra.mxu2 %v5936_v57  ;;  %v6955_v57 = vld [vmem:[%s10795_s1 + $0x820] sm:$0xf] }
 0x20b   : > { %v3581_v2 = vpop.f32.mrf.mxu2  ;;  %v3476_v27 = vpop.f32.mrf.mxu0 }
 0x20c   : > { %v3582_v31 = vadd.f32 %v3581_v2, %v3528_v20  ;;  %v3635_v42 = vpop.f32.mrf.mxu3  ;;  %v3477_v9 = vadd.f32 %v3476_v27, %v8809_v33  ;;  %v3530_v39 = vpop.f32.mrf.mxu1  ;;  %v5605_v2 = vld [vmem:[%s7828_s18 + $0x2b8] sm:$0xf0] }
 0x20e   : > { %v9222_v61 = vadd.f32 %v3635_v42, %v3582_v31  ;;  %v3531_v20 = vadd.f32 %v3530_v39, %v3477_v9  ;;  %3686 = vmatmul.bf16.gmra.mxu0 %v9213_v34  ;;  %v5611_v31 = vld [vmem:[%s7828_s18 + $0x278] sm:$0xf]  ;;  %v7156_v42 = vld [vmem:[%s7828_s18 + $0x2bc] sm:$0xf0] }
 0x20f   : > { %3740 = vmatmul.bf16.gmra.mxu1 %v9215_v19 }
 0x210   : > { %3794 = vmatmul.bf16.gmra.mxu2 %v9217_v51 }
 0x211   : > { %3848 = vmatmul.bf16.gmra.mxu3 %v9220_v14 }
 0x213   : > { %v3584_v33 = vpop.f32.mrf.mxu2  ;;  %v3478_v9 = vpop.f32.mrf.mxu0 }
 0x214   : > { %v3585_v27 = vadd.f32 %v3584_v33, %v3531_v20  ;;  %v3638_v39 = vpop.f32.mrf.mxu3  ;;  %v3479_v45 = vadd.f32 %v3478_v9, %v8834_v26  ;;  %v3532_v62 = vpop.f32.mrf.mxu1  ;;  %v7147_v26 = vld [vmem:[%s7828_s18 + $0x27c] sm:$0xf]  ;;  %v9251_v20 = vor.u32 %v7155_v37, %v5603_v38  ;;  %v9255_v9 = vor.u32 %v7156_v42, %v5611_v31  ;;  %v7250_v38 = vld [vmem:[%s10795_s1 + $0xa4] sm:$0xf]  ;;  %v7507_v31 = vld [vmem:[%s10795_s1 + $0x8a4] sm:$0xf0] }
 0x215   : > { %v9258_v21 = vor.u32 %v7147_v26, %v5613_v8 }
 0x216   : > { %v9235_v17 = vadd.f32 %v3638_v39, %v3585_v27  ;;  %v3533_v18 = vadd.f32 %v3532_v62, %v3479_v45  ;;  %v9253_v39 = vor.u32 %v7146_v23, %v5605_v2  ;;  %11017 = vst [vmem:[#allocation104_spill] sm:$0xff] %v9255_v9  ;;  %v5997_v23 = vld [vmem:[%s10795_s1 + $0xa8] sm:$0xf0]  ;;  %v7019_v2 = vld [vmem:[%s10795_s1 + $0x8a0] sm:$0xf] }
 0x217   : > { %11018 = vst [vmem:[#allocation105_spill] sm:$0xff] %v9258_v21  ;;  %v6000_v42 = vor.u32 %v7250_v38, %v5997_v23  ;;  %v7020_v26 = vor.u32 %v7507_v31, %v7019_v2  ;;  %v7173_v38 = vld [vmem:[%s7828_s18 + $0x344] sm:$0xf0]  ;;  %v7164_v23 = vld [vmem:[%s7828_s18 + $0x304] sm:$0xf] }
 0x218   : > { %11016 = vst [vmem:[#allocation103_spill] sm:$0xff] %v9253_v39  ;;  %v5677_v2 = vld [vmem:[%s7828_s18 + $0x348] sm:$0xf0]  ;;  %v7174_v31 = vld [vmem:[%s7828_s18 + $0x34c] sm:$0xf0] }
 0x219   : > { %4046 = vmatpush.bf16.msra.mxu3 %v6000_v42  ;;  %3938 = vmatpush.bf16.msra.mxu1 %v7020_v26  ;;  %v7165_v42 = vld [vmem:[%s7828_s18 + $0x30c] sm:$0xf]  ;;  %v9297_v51 = vor.u32 %v7164_v23, %v5677_v2  ;;  %v5989_v2 = vld [vmem:[%s10795_s1 + $0x98] sm:$0xf0] }
 0x21b   : > { %v3586_v43 = vpop.f32.mrf.mxu2  ;;  %v3481_v27 = vpop.f32.mrf.mxu0  ;;  %11020 = vst [vmem:[#allocation107_spill] sm:$0xff] %v9297_v51 }
 0x21c   : > { %v3587_v56 = vadd.f32 %v3586_v43, %v3533_v18  ;;  %v3640_v33 = vpop.f32.mrf.mxu3  ;;  %v3482_v45 = vadd.f32 %v3481_v27, %v8859_v36  ;;  %v3535_v62 = vpop.f32.mrf.mxu1  ;;  %v7491_v18 = vld [vmem:[%s10795_s1 + $0x824] sm:$0xf0] }
 0x21d   : > { %v6956_v36 = vor.u32 %v7491_v18, %v6955_v57  ;;  %v5675_v18 = vld [vmem:[%s7828_s18 + $0x300] sm:$0xf] }
 0x21e   : > { %v9260_v30 = vadd.f32 %v3640_v33, %v3587_v56  ;;  %v3536_v37 = vadd.f32 %v3535_v62, %v3482_v45  ;;  %3691 = vmatmul.bf16.gmra.mxu0 %v9251_v20 }
 0x21f   : > { %3745 = vmatmul.bf16.gmra.mxu1 %v9253_v39  ;;  %3884 = vmatpush.bf16.msra.mxu0 %v6956_v36  ;;  %v5683_v36 = vld [vmem:[%s7828_s18 + $0x308] sm:$0xf] }
 0x220   : > { %3799 = vmatmul.bf16.gmra.mxu2 %v9255_v9  ;;  %v9295_v9 = vor.u32 %v7173_v38, %v5675_v18 }
 0x221   : > { %3853 = vmatmul.bf16.gmra.mxu3 %v9258_v21  ;;  %v5685_v21 = vld [vmem:[%s7828_s18 + $0x350] sm:$0xf0] }
 0x222   : > { %11019 = vst [vmem:[#allocation106_spill] sm:$0xff] %v9295_v9 }
 0x223   : > { %v3589_v8 = vpop.f32.mrf.mxu2  ;;  %v3483_v33 = vpop.f32.mrf.mxu0 }
 0x224   : > { %v3590_v43 = vadd.f32 %v3589_v8, %v3536_v37  ;;  %v3643_v56 = vpop.f32.mrf.mxu3  ;;  %v3484_v27 = vadd.f32 %v3483_v33, %v8878_v16  ;;  %v3537_v45 = vpop.f32.mrf.mxu1  ;;  %v9299_v16 = vor.u32 %v7174_v31, %v5683_v36  ;;  %v9302_v33 = vor.u32 %v7165_v42, %v5685_v21  ;;  %v7248_v21 = vld [vmem:[%s10795_s1 + $0x94] sm:$0xf]  ;;  %v7011_v31 = vld [vmem:[%s10795_s1 + $0x890] sm:$0xf] }
 0x225   : > { %v5992_v36 = vor.u32 %v7248_v21, %v5989_v2  ;;  %v7191_v21 = vld [vmem:[%s7828_s18 + $0x3d4] sm:$0xf0]  ;;  %v5749_v2 = vld [vmem:[%s7828_s18 + $0x3d8] sm:$0xf0] }
 0x226   : > { %v9285_v62 = vadd.f32 %v3643_v56, %v3590_v43  ;;  %v3538_v57 = vadd.f32 %v3537_v45, %v3484_v27  ;;  %11021 = vst [vmem:[#allocation108_spill] sm:$0xff] %v9299_v16  ;;  %v7232_v45 = vld [vmem:[%s10795_s1 + $0x14] sm:$0xf] }
 0x227   : > { %11022 = vst [vmem:[#allocation109_spill] sm:$0xff] %v9302_v33  ;;  %4047 = vmatpush.bf16.msra.mxu3 %v5992_v36  ;;  %v5755_v36 = vld [vmem:[%s7828_s18 + $0x398] sm:$0xf] }
 0x22b   : > { %v3591_v26 = vpop.f32.mrf.mxu2  ;;  %v3486_v14 = vpop.f32.mrf.mxu0 }
 0x22c   : > { %v3592_v37 = vadd.f32 %v3591_v26, %v3538_v57  ;;  %v3645_v8 = vpop.f32.mrf.mxu3  ;;  %v3487_v43 = vadd.f32 %v3486_v14, %v8909_v15  ;;  %v3540_v56 = vpop.f32.mrf.mxu1  ;;  %v5925_v57 = vld [vmem:[%s10795_s1 + $0x18] sm:$0xf0]  ;;  %v6947_v15 = vld [vmem:[%s10795_s1 + $0x810] sm:$0xf]  ;;  %v7489_v14 = vld [vmem:[%s10795_s1 + $0x814] sm:$0xf0] }
 0x22d   : > { %v5928_v38 = vor.u32 %v7232_v45, %v5925_v57  ;;  %v6948_v23 = vor.u32 %v7489_v14, %v6947_v15  ;;  %v7505_v26 = vld [vmem:[%s10795_s1 + $0x894] sm:$0xf0]  ;;  %v5747_v14 = vld [vmem:[%s7828_s18 + $0x390] sm:$0xf] }
 0x22e   : > { %v9304_v27 = vadd.f32 %v3645_v8, %v3592_v37  ;;  %v3541_v18 = vadd.f32 %v3540_v56, %v3487_v43  ;;  %3696 = vmatmul.bf16.gmra.mxu0 %v9295_v9  ;;  %v7012_v56 = vor.u32 %v7505_v26, %v7011_v31 }
 0x22f   : > { %3750 = vmatmul.bf16.gmra.mxu1 %v9297_v51  ;;  %3993 = vmatpush.bf16.msra.mxu2 %v5928_v38  ;;  %v5757_v51 = vld [vmem:[%s7828_s18 + $0x3e0] sm:$0xf0] }
 0x230   : > { %3804 = vmatmul.bf16.gmra.mxu2 %v9299_v16  ;;  %3885 = vmatpush.bf16.msra.mxu0 %v6948_v23  ;;  %v7182_v23 = vld [vmem:[%s7828_s18 + $0x394] sm:$0xf]  ;;  %v7183_v16 = vld [vmem:[%s7828_s18 + $0x39c] sm:$0xf] }
 0x231   : > { %3858 = vmatmul.bf16.gmra.mxu3 %v9302_v33  ;;  %3939 = vmatpush.bf16.msra.mxu1 %v7012_v56  ;;  %v7192_v33 = vld [vmem:[%s7828_s18 + $0x3dc] sm:$0xf0]  ;;  %v9352_v56 = vor.u32 %v7183_v16, %v5757_v51 }
 0x232   : > { %v6939_v51 = vld [vmem:[%s10795_s1 + $0x800] sm:$0xf] }
 0x233   : > { %v3594_v42 = vpop.f32.mrf.mxu2  ;;  %v3488_v43 = vpop.f32.mrf.mxu0  ;;  %11026 = vst [vmem:[#allocation113_spill] sm:$0xff] %v9352_v56 }
 0x234   : > { %v3595_v37 = vadd.f32 %v3594_v42, %v3541_v18  ;;  %v3648_v8 = vpop.f32.mrf.mxu3  ;;  %v3489_v45 = vadd.f32 %v3488_v43, %v8928_v60  ;;  %v3542_v57 = vpop.f32.mrf.mxu1  ;;  %v9345_v42 = vor.u32 %v7191_v21, %v5747_v14  ;;  %v9347_v60 = vor.u32 %v7182_v23, %v5749_v2  ;;  %v5917_v14 = vld [vmem:[%s10795_s1 + $0x8] sm:$0xf0]  ;;  %v7003_v23 = vld [vmem:[%s10795_s1 + $0x880] sm:$0xf] }
 0x235   : > { %v5981_v21 = vld [vmem:[%s10795_s1 + $0x88] sm:$0xf0] }
 0x236   : > { %v9335_v38 = vadd.f32 %v3648_v8, %v3595_v37  ;;  %v3543_v15 = vadd.f32 %v3542_v57, %v3489_v45  ;;  %11023 = vst [vmem:[#allocation110_spill] sm:$0xff] %v9345_v42  ;;  %v9349_v37 = vor.u32 %v7192_v33, %v5755_v36  ;;  %v7246_v33 = vld [vmem:[%s10795_s1 + $0x84] sm:$0xf] }
 0x237   : > { %11024 = vst [vmem:[#allocation111_spill] sm:$0xff] %v9347_v60  ;;  %v5984_v36 = vor.u32 %v7246_v33, %v5981_v21  ;;  %v7209_v33 = vld [vmem:[%s7828_s18 + $0x464] sm:$0xf0]  ;;  %v7200_v21 = vld [vmem:[%s7828_s18 + $0x424] sm:$0xf] }
 0x238   : > { %11025 = vst [vmem:[#allocation112_spill] sm:$0xff] %v9349_v37 }
 0x239   : > { %4048 = vmatpush.bf16.msra.mxu3 %v5984_v36 }
 0x23b   : > { %v3596_v18 = vpop.f32.mrf.mxu2  ;;  %v3491_v26 = vpop.f32.mrf.mxu0 }
 0x23c   : > { %v3597_v9 = vadd.f32 %v3596_v18, %v3543_v15  ;;  %v3650_v31 = vpop.f32.mrf.mxu3  ;;  %v3492_v8 = vadd.f32 %v3491_v26, %v8959_v3  ;;  %v3545_v43 = vpop.f32.mrf.mxu1  ;;  %v7230_v15 = vld [vmem:[%s10795_s1 + $0x4] sm:$0xf]  ;;  %v7503_v18 = vld [vmem:[%s10795_s1 + $0x884] sm:$0xf0] }
 0x23d   : > { %v5920_v3 = vor.u32 %v7230_v15, %v5917_v14 }
 0x23e   : > { %v9354_v45 = vadd.f32 %v3650_v31, %v3597_v9  ;;  %v3546_v57 = vadd.f32 %v3545_v43, %v3492_v8  ;;  %3701 = vmatmul.bf16.gmra.mxu0 %v9345_v42  ;;  %v7487_v9 = vld [vmem:[%s10795_s1 + $0x804] sm:$0xf0]  ;;  %v7004_v43 = vor.u32 %v7503_v18, %v7003_v23 }
 0x23f   : > { %3755 = vmatmul.bf16.gmra.mxu1 %v9347_v60  ;;  %3994 = vmatpush.bf16.msra.mxu2 %v5920_v3  ;;  %v6940_v16 = vor.u32 %v7487_v9, %v6939_v51  ;;  %v5819_v9 = vld [vmem:[%s7828_s18 + $0x420] sm:$0xf]  ;;  %v5829_v60 = vld [vmem:[%s7828_s18 + $0x470] sm:$0xf0] }
 0x240   : > { %3809 = vmatmul.bf16.gmra.mxu2 %v9349_v37  ;;  %3940 = vmatpush.bf16.msra.mxu1 %v7004_v43  ;;  %v7201_v37 = vld [vmem:[%s7828_s18 + $0x42c] sm:$0xf]  ;;  %v9395_v39 = vor.u32 %v7209_v33, %v5819_v9 }
 0x241   : > { %3863 = vmatmul.bf16.gmra.mxu3 %v9352_v56  ;;  %3886 = vmatpush.bf16.msra.mxu0 %v6940_v16  ;;  %v5821_v56 = vld [vmem:[%s7828_s18 + $0x468] sm:$0xf0] }
 0x242   : > { %v9397_v18 = vor.u32 %v7200_v21, %v5821_v56  ;;  %v6101_v56 = vld [vmem:[%s10795_s1 + $0x178] sm:$0xf0] }
 0x243   : > { %v3599_v2 = vpop.f32.mrf.mxu2  ;;  %v3493_v8 = vpop.f32.mrf.mxu0 }
 0x244   : > { %v3600_v31 = vadd.f32 %v3599_v2, %v3546_v57  ;;  %v3653_v26 = vpop.f32.mrf.mxu3  ;;  %v3494_v15 = vadd.f32 %v3493_v8, %v8978_v52  ;;  %v3547_v14 = vpop.f32.mrf.mxu1  ;;  %v5827_v57 = vld [vmem:[%s7828_s18 + $0x428] sm:$0xf]  ;;  %v7210_v2 = vld [vmem:[%s7828_s18 + $0x46c] sm:$0xf0]  ;;  %11027 = vst [vmem:[#allocation114_spill] sm:$0xff] %v9397_v18  ;;  %v9402_v8 = vor.u32 %v7201_v37, %v5829_v60 }
 0x245   : > { %v9399_v36 = vor.u32 %v7210_v2, %v5827_v57  ;;  %v7276_v60 = vld [vmem:[%s10795_s1 + $0x174] sm:$0xf] }
 0x246   : > { %v9385_v3 = vadd.f32 %v3653_v26, %v3600_v31  ;;  %v3548_v51 = vadd.f32 %v3547_v14, %v3494_v15  ;;  %11029 = vst [vmem:[#allocation116_spill] sm:$0xff] %v9402_v8  ;;  %v7324_v14 = vld [vmem:[%s10795_s1 + $0x2f4] sm:$0xf]  ;;  %v6104_v33 = vor.u32 %v7276_v60, %v6101_v56  ;;  %v5891_v60 = vld [vmem:[%s7828_s18 + $0x4b0] sm:$0xf] }
 0x247   : > { %11028 = vst [vmem:[#allocation115_spill] sm:$0xff] %v9399_v36  ;;  %v5893_v56 = vld [vmem:[%s7828_s18 + $0x4f8] sm:$0xf0] }
 0x248   : > { %4095 = vmatpush.bf16.msrb.mxu0 %v6104_v33  ;;  %v5901_v33 = vld [vmem:[%s7828_s18 + $0x500] sm:$0xf0] }
 0x24b   : > { %v3601_v42 = vpop.f32.mrf.mxu2  ;;  %v3496_v52 = vpop.f32.mrf.mxu0 }
 0x24c   : > { %v3602_v16 = vadd.f32 %v3601_v42, %v3548_v51  ;;  %v3655_v23 = vpop.f32.mrf.mxu3  ;;  %v3497_v31 = vadd.f32 %v3496_v52, %v9003_v55  ;;  %v3550_v26 = vpop.f32.mrf.mxu1  ;;  %v7308_v42 = vld [vmem:[%s10795_s1 + $0x274] sm:$0xf]  ;;  %v6229_v55 = vld [vmem:[%s10795_s1 + $0x278] sm:$0xf0] }
 0x24d   : > { %v6232_v37 = vor.u32 %v7308_v42, %v6229_v55  ;;  %v6293_v51 = vld [vmem:[%s10795_s1 + $0x2f8] sm:$0xf0] }
 0x24e   : > { %v9404_v43 = vadd.f32 %v3655_v23, %v3602_v16  ;;  %v3551_v15 = vadd.f32 %v3550_v26, %v3497_v31  ;;  %3706 = vmatmul.bf16.gmra.mxu0 %v9395_v39  ;;  %v6296_v21 = vor.u32 %v7324_v14, %v6293_v51  ;;  %v7292_v26 = vld [vmem:[%s10795_s1 + $0x1f4] sm:$0xf]  ;;  %v5899_v14 = vld [vmem:[%s7828_s18 + $0x4b8] sm:$0xf]  ;;  %v7228_v51 = vld [vmem:[%s7828_s18 + $0x4fc] sm:$0xf0] }
 0x24f   : > { %3760 = vmatmul.bf16.gmra.mxu1 %v9397_v18  ;;  %4203 = vmatpush.bf16.msrb.mxu2 %v6232_v37  ;;  %v7227_v37 = vld [vmem:[%s7828_s18 + $0x4f4] sm:$0xf0]  ;;  %v9449_v18 = vor.u32 %v7228_v51, %v5899_v14 }
 0x250   : > { %3814 = vmatmul.bf16.gmra.mxu2 %v9399_v36  ;;  %4257 = vmatpush.bf16.msrb.mxu3 %v6296_v21 }
 0x251   : > { %3868 = vmatmul.bf16.gmra.mxu3 %v9402_v8  ;;  %11031 = vst [vmem:[#allocation118_spill] sm:$0xff] %v9449_v18 }
 0x253   : > { %v3604_v9 = vpop.f32.mrf.mxu2  ;;  %v3498_v16 = vpop.f32.mrf.mxu0 }
 0x254   : > { %v3605_v57 = vadd.f32 %v3604_v9, %v3551_v15  ;;  %v3658_v2 = vpop.f32.mrf.mxu3  ;;  %v3499_v23 = vadd.f32 %v3498_v16, %v9028_v4  ;;  %v3552_v52 = vpop.f32.mrf.mxu1  ;;  %v6165_v15 = vld [vmem:[%s10795_s1 + $0x1f8] sm:$0xf0]  ;;  %v7218_v4 = vld [vmem:[%s7828_s18 + $0x4b4] sm:$0xf] }
 0x255   : > { %v6168_v55 = vor.u32 %v7292_v26, %v6165_v15  ;;  %v7219_v9 = vld [vmem:[%s7828_s18 + $0x4bc] sm:$0xf]  ;;  %v9447_v36 = vor.u32 %v7218_v4, %v5893_v56 }
 0x256   : > { %v9429_v31 = vadd.f32 %v3658_v2, %v3605_v57  ;;  %v3553_v42 = vadd.f32 %v3552_v52, %v3499_v23  ;;  %v9445_v57 = vor.u32 %v7227_v37, %v5891_v60  ;;  %v9452_v26 = vor.u32 %v7219_v9, %v5901_v33  ;;  %v7274_v33 = vld [vmem:[%s10795_s1 + $0x164] sm:$0xf] }
 0x257   : > { %4149 = vmatpush.bf16.msrb.mxu1 %v6168_v55  ;;  %11030 = vst [vmem:[#allocation117_spill] sm:$0xff] %v9447_v36 }
 0x258   : > { %11032 = vst [vmem:[#allocation119_spill] sm:$0xff] %v9452_v26 }
 0x25b   : > { %v3606_v21 = vpop.f32.mrf.mxu2  ;;  %v3672_v8 = vpop.f32.mrf.mxu0 }
 0x25c   : > { %v3607_v2 = vadd.f32 %v3606_v21, %v3553_v42  ;;  %v3660_v16 = vpop.f32.mrf.mxu3  ;;  %v3673_v23 = vadd.f32 %v3672_v8, %v9041_v22  ;;  %v3726_v52 = vpop.f32.mrf.mxu1  ;;  %v7306_v42 = vld [vmem:[%s10795_s1 + $0x264] sm:$0xf]  ;;  %v6221_v22 = vld [vmem:[%s10795_s1 + $0x268] sm:$0xf0] }
 0x25d   : > { %v6224_v8 = vor.u32 %v7306_v42, %v6221_v22  ;;  %v6093_v21 = vld [vmem:[%s10795_s1 + $0x168] sm:$0xf0]  ;;  %v5331_v42 = vld [vmem:[%s7828_s18 + $0x40] sm:$0xf]  ;;  %v7085_v22 = vld [vmem:[%s7828_s18 + $0x84] sm:$0xf0] }
 0x25e   : > { %v9454_v15 = vadd.f32 %v3660_v16, %v3607_v2  ;;  %v3727_v55 = vadd.f32 %v3726_v52, %v3673_v23  ;;  %3711 = vmatmul.bf16.gmra.mxu0 %v9445_v57  ;;  %v7322_v2 = vld [vmem:[%s10795_s1 + $0x2e4] sm:$0xf]  ;;  %v6096_v23 = vor.u32 %v7274_v33, %v6093_v21 }
 0x25f   : > { %3765 = vmatmul.bf16.gmra.mxu1 %v9447_v36  ;;  %4204 = vmatpush.bf16.msrb.mxu2 %v6224_v8  ;;  %v7290_v52 = vld [vmem:[%s10795_s1 + $0x1e4] sm:$0xf] }
 0x260   : > { %3819 = vmatmul.bf16.gmra.mxu2 %v9449_v18  ;;  %4096 = vmatpush.bf16.msrb.mxu0 %v6096_v23 }
 0x261   : > { %3873 = vmatmul.bf16.gmra.mxu3 %v9452_v26 }
 0x263   : > { %v3780_v60 = vpop.f32.mrf.mxu2  ;;  %v3674_v56 = vpop.f32.mrf.mxu0 }
 0x264   : > { %v3781_v37 = vadd.f32 %v3780_v60, %v3727_v55  ;;  %v3834_v4 = vpop.f32.mrf.mxu3  ;;  %v3675_v14 = vadd.f32 %v3674_v56, %v9078_v10  ;;  %v3728_v51 = vpop.f32.mrf.mxu1  ;;  %v6285_v10 = vld [vmem:[%s10795_s1 + $0x2e8] sm:$0xf0] }
 0x265   : > { %v6157_v55 = vld [vmem:[%s10795_s1 + $0x1e8] sm:$0xf0]  ;;  %v6288_v8 = vor.u32 %v7322_v2, %v6285_v10 }
 0x266   : > { %v9467_v9 = vadd.f32 %v3834_v4, %v3781_v37  ;;  %v3729_v16 = vadd.f32 %v3728_v51, %v3675_v14  ;;  %v6160_v60 = vor.u32 %v7290_v52, %v6157_v55  ;;  %v7076_v37 = vld [vmem:[%s7828_s18 + $0x44] sm:$0xf]  ;;  %v5333_v4 = vld [vmem:[%s7828_s18 + $0x88] sm:$0xf0]  ;;  %v9491_v14 = vor.u32 %v7085_v22, %v5331_v42 }
 0x267   : > { %4258 = vmatpush.bf16.msrb.mxu3 %v6288_v8  ;;  %v9493_v26 = vor.u32 %v7076_v37, %v5333_v4  ;;  %v7304_v8 = vld [vmem:[%s10795_s1 + $0x254] sm:$0xf]  ;;  %v6085_v37 = vld [vmem:[%s10795_s1 + $0x158] sm:$0xf0] }
 0x268   : > { %4150 = vmatpush.bf16.msrb.mxu1 %v6160_v60  ;;  %11033 = vst [vmem:[#allocation120_spill] sm:$0xff] %v9491_v14  ;;  %v7320_v4 = vld [vmem:[%s10795_s1 + $0x2d4] sm:$0xf] }
 0x269   : > { %11034 = vst [vmem:[#allocation121_spill] sm:$0xff] %v9493_v26 }
 0x26b   : > { %v3782_v56 = vpop.f32.mrf.mxu2  ;;  %v3677_v21 = vpop.f32.mrf.mxu0 }
 0x26c   : > { %v3783_v51 = vadd.f32 %v3782_v56, %v3729_v16  ;;  %v3836_v33 = vpop.f32.mrf.mxu3  ;;  %v3678_v18 = vadd.f32 %v3677_v21, %v9085_v11  ;;  %v3731_v36 = vpop.f32.mrf.mxu1  ;;  %v6149_v21 = vld [vmem:[%s10795_s1 + $0x1d8] sm:$0xf0] }
 0x26e   : > { %v9496_v2 = vadd.f32 %v3836_v33, %v3783_v51  ;;  %v3732_v10 = vadd.f32 %v3731_v36, %v3678_v18  ;;  %3887 = vmatmul.bf16.vlgmr.msra.gmra.mxu0 %v9491_v14  ;;  %v5403_v18 = vld [vmem:[%s7828_s18 + $0xd0] sm:$0xf]  ;;  %v7103_v36 = vld [vmem:[%s7828_s18 + $0x114] sm:$0xf0]  ;;  %v6277_v51 = vld [vmem:[%s10795_s1 + $0x2d8] sm:$0xf0] }
 0x26f   : > { %3941 = vmatmul.bf16.vlgmr.msra.gmra.mxu1 %v9493_v26  ;;  %v7288_v33 = vld [vmem:[%s10795_s1 + $0x1d4] sm:$0xf] }
 0x270   : > { %3995 = vmatmul.bf16.vlgmr.msra.gmra.mxu2 %v7842_v49  ;;  %v6213_v49 = vld [vmem:[%s10795_s1 + $0x258] sm:$0xf0] }
 0x271   : > { %4049 = vmatmul.bf16.vlgmr.msra.gmra.mxu3 %v7847_v53  ;;  %v6216_v60 = vor.u32 %v7304_v8, %v6213_v49 }
 0x273   : > { %v3785_v16 = vpop.f32.mrf.mxu2  ;;  %v3679_v55 = vpop.f32.mrf.mxu0  ;;  %4205 = vmatpush.bf16.msrb.mxu2 %v6216_v60 }
 0x274   : > { %v3786_v23 = vadd.f32 %v3785_v16, %v3732_v10  ;;  %v3839_v52 = vpop.f32.mrf.mxu3  ;;  %v3680_v42 = vadd.f32 %v3679_v55, %v9128_v32  ;;  %v3733_v11 = vpop.f32.mrf.mxu1  ;;  %v7272_v32 = vld [vmem:[%s10795_s1 + $0x154] sm:$0xf]  ;;  %v5405_v16 = vld [vmem:[%s7828_s18 + $0x118] sm:$0xf0] }
 0x275   : > { %v6088_v56 = vor.u32 %v7272_v32, %v6085_v37  ;;  %v7094_v10 = vld [vmem:[%s7828_s18 + $0xd4] sm:$0xf] }
 0x276   : > { %v9503_v22 = vadd.f32 %v3839_v52, %v3786_v23  ;;  %v3734_v53 = vadd.f32 %v3733_v11, %v3680_v42  ;;  %v6280_v23 = vor.u32 %v7320_v4, %v6277_v51  ;;  %v6152_v52 = vor.u32 %v7288_v33, %v6149_v21  ;;  %v5475_v33 = vld [vmem:[%s7828_s18 + $0x160] sm:$0xf] }
 0x277   : > { %4097 = vmatpush.bf16.msrb.mxu0 %v6088_v56  ;;  %v9533_v42 = vor.u32 %v7103_v36, %v5403_v18  ;;  %v9535_v32 = vor.u32 %v7094_v10, %v5405_v16  ;;  %v7112_v10 = vld [vmem:[%s7828_s18 + $0x164] sm:$0xf] }
 0x278   : > { %4259 = vmatpush.bf16.msrb.mxu3 %v6280_v23  ;;  %4151 = vmatpush.bf16.msrb.mxu1 %v6152_v52  ;;  %v7270_v16 = vld [vmem:[%s10795_s1 + $0x144] sm:$0xf]  ;;  %v6077_v23 = vld [vmem:[%s10795_s1 + $0x148] sm:$0xf0] }
 0x279   : > { %v7318_v52 = vld [vmem:[%s10795_s1 + $0x2c4] sm:$0xf] }
 0x27b   : > { %v3787_v55 = vpop.f32.mrf.mxu2  ;;  %v3682_v49 = vpop.f32.mrf.mxu0 }
 0x27c   : > { %v3788_v11 = vadd.f32 %v3787_v55, %v3734_v53  ;;  %v3841_v8 = vpop.f32.mrf.mxu3  ;;  %v3683_v37 = vadd.f32 %v3682_v49, %v9135_v35  ;;  %v3736_v26 = vpop.f32.mrf.mxu1  ;;  %v6269_v55 = vld [vmem:[%s10795_s1 + $0x2c8] sm:$0xf0] }
 0x27d   : > { %v6272_v49 = vor.u32 %v7318_v52, %v6269_v55 }
 0x27e   : > { %v9538_v14 = vadd.f32 %v3841_v8, %v3788_v11  ;;  %v3737_v60 = vadd.f32 %v3736_v26, %v3683_v37  ;;  %3892 = vmatmul.bf16.gmra.mxu0 %v9533_v42  ;;  %v7121_v26 = vld [vmem:[%s7828_s18 + $0x1a4] sm:$0xf0]  ;;  %v5477_v11 = vld [vmem:[%s7828_s18 + $0x1a8] sm:$0xf0]  ;;  %v6080_v8 = vor.u32 %v7270_v16, %v6077_v23  ;;  %v7286_v37 = vld [vmem:[%s10795_s1 + $0x1c4] sm:$0xf] }
 0x27f   : > { %3946 = vmatmul.bf16.gmra.mxu1 %v9535_v32  ;;  %4260 = vmatpush.bf16.msrb.mxu3 %v6272_v49 }
 0x280   : > { %4000 = vmatmul.bf16.gmra.mxu2 %v7903_v24  ;;  %v7302_v24 = vld [vmem:[%s10795_s1 + $0x244] sm:$0xf]  ;;  %4098 = vmatpush.bf16.msrb.mxu0 %v6080_v8  ;;  %v7139_v8 = vld [vmem:[%s7828_s18 + $0x234] sm:$0xf0] }
 0x281   : > { %4054 = vmatmul.bf16.gmra.mxu3 %v7905_v25  ;;  %v6205_v25 = vld [vmem:[%s10795_s1 + $0x248] sm:$0xf0] }
 0x283   : > { %v3790_v18 = vpop.f32.mrf.mxu2  ;;  %v3684_v4 = vpop.f32.mrf.mxu0 }
 0x284   : > { %v3791_v36 = vadd.f32 %v3790_v18, %v3737_v60  ;;  %v3844_v53 = vpop.f32.mrf.mxu3  ;;  %v3685_v35 = vadd.f32 %v3684_v4, %v9178_v7  ;;  %v3738_v56 = vpop.f32.mrf.mxu1  ;;  %v6208_v7 = vor.u32 %v7302_v24, %v6205_v25  ;;  %v6141_v60 = vld [vmem:[%s10795_s1 + $0x1c8] sm:$0xf0]  ;;  %v9577_v24 = vor.u32 %v7112_v10, %v5477_v11  ;;  %v5547_v11 = vld [vmem:[%s7828_s18 + $0x1f0] sm:$0xf] }
 0x285   : > { %v6144_v18 = vor.u32 %v7286_v37, %v6141_v60  ;;  %v7268_v37 = vld [vmem:[%s10795_s1 + $0x134] sm:$0xf] }
 0x286   : > { %v9545_v51 = vadd.f32 %v3844_v53, %v3791_v36  ;;  %v3739_v21 = vadd.f32 %v3738_v56, %v3685_v35  ;;  %4206 = vmatpush.bf16.msrb.mxu2 %v6208_v7  ;;  %v9575_v53 = vor.u32 %v7121_v26, %v5475_v33 }
 0x287   : > { %4152 = vmatpush.bf16.msrb.mxu1 %v6144_v18  ;;  %v7316_v18 = vld [vmem:[%s10795_s1 + $0x2b4] sm:$0xf] }
 0x28b   : > { %v3792_v36 = vpop.f32.mrf.mxu2  ;;  %v3687_v56 = vpop.f32.mrf.mxu0 }
 0x28c   : > { %v3793_v4 = vadd.f32 %v3792_v36, %v3739_v21  ;;  %v3846_v35 = vpop.f32.mrf.mxu3  ;;  %v3688_v25 = vadd.f32 %v3687_v56, %v9185_v47  ;;  %v3741_v16 = vpop.f32.mrf.mxu1  ;;  %v6261_v36 = vld [vmem:[%s10795_s1 + $0x2b8] sm:$0xf0] }
 0x28e   : > { %v9580_v23 = vadd.f32 %v3846_v35, %v3793_v4  ;;  %v3742_v7 = vadd.f32 %v3741_v16, %v3688_v25  ;;  %3897 = vmatmul.bf16.gmra.mxu0 %v9575_v53  ;;  %v7130_v4 = vld [vmem:[%s7828_s18 + $0x1f4] sm:$0xf]  ;;  %v5549_v35 = vld [vmem:[%s7828_s18 + $0x238] sm:$0xf0]  ;;  %v6264_v25 = vor.u32 %v7316_v18, %v6261_v36 }
 0x28f   : > { %3951 = vmatmul.bf16.gmra.mxu1 %v9577_v24 }
 0x290   : > { %4005 = vmatmul.bf16.gmra.mxu2 %v7947_v48  ;;  %v7300_v48 = vld [vmem:[%s10795_s1 + $0x234] sm:$0xf]  ;;  %4261 = vmatpush.bf16.msrb.mxu3 %v6264_v25  ;;  %v7157_v25 = vld [vmem:[%s7828_s18 + $0x2c4] sm:$0xf0] }
 0x291   : > { %4059 = vmatmul.bf16.gmra.mxu3 %v7949_v50  ;;  %v6197_v50 = vld [vmem:[%s10795_s1 + $0x238] sm:$0xf0] }
 0x292   : > { %v6200_v60 = vor.u32 %v7300_v48, %v6197_v50  ;;  %v7284_v50 = vld [vmem:[%s10795_s1 + $0x1b4] sm:$0xf] }
 0x293   : > { %v3795_v33 = vpop.f32.mrf.mxu2  ;;  %v3689_v10 = vpop.f32.mrf.mxu0 }
 0x294   : > { %v3796_v26 = vadd.f32 %v3795_v33, %v3742_v7  ;;  %v3849_v21 = vpop.f32.mrf.mxu3  ;;  %v3690_v47 = vadd.f32 %v3689_v10, %v9222_v61  ;;  %v3743_v52 = vpop.f32.mrf.mxu1  ;;  %v6069_v61 = vld [vmem:[%s10795_s1 + $0x138] sm:$0xf0]  ;;  %4207 = vmatpush.bf16.msrb.mxu2 %v6200_v60  ;;  %v9611_v7 = vor.u32 %v7139_v8, %v5547_v11  ;;  %v9613_v10 = vor.u32 %v7130_v4, %v5549_v35 }
 0x295   : > { %v6072_v56 = vor.u32 %v7268_v37, %v6069_v61  ;;  %v6133_v11 = vld [vmem:[%s10795_s1 + $0x1b8] sm:$0xf0] }
 0x296   : > { %v9587_v55 = vadd.f32 %v3849_v21, %v3796_v26  ;;  %v3744_v49 = vadd.f32 %v3743_v52, %v3690_v47 }
 0x297   : > { %4099 = vmatpush.bf16.msrb.mxu0 %v6072_v56  ;;  %v7298_v56 = vld [vmem:[%s10795_s1 + $0x224] sm:$0xf] }
 0x29b   : > { %v3797_v16 = vpop.f32.mrf.mxu2  ;;  %v3692_v21 = vpop.f32.mrf.mxu0 }
 0x29c   : > { %v3798_v33 = vadd.f32 %v3797_v16, %v3744_v49  ;;  %v3851_v26 = vpop.f32.mrf.mxu3  ;;  %v3693_v47 = vadd.f32 %v3692_v21, %v9235_v17  ;;  %v3746_v52 = vpop.f32.mrf.mxu1  ;;  %v6136_v49 = vor.u32 %v7284_v50, %v6133_v11 }
 0x29e   : > { %v9616_v48 = vadd.f32 %v3851_v26, %v3798_v33  ;;  %v3747_v8 = vadd.f32 %v3746_v52, %v3693_v47  ;;  %3902 = vmatmul.bf16.gmra.mxu0 %v9611_v7  ;;  %4153 = vmatpush.bf16.msrb.mxu1 %v6136_v49  ;;  %v7148_v33 = vld [vmem:[%s7828_s18 + $0x284] sm:$0xf]  ;;  %v5621_v26 = vld [vmem:[%s7828_s18 + $0x2c8] sm:$0xf0] }
 0x29f   : > { %3956 = vmatmul.bf16.gmra.mxu1 %v9613_v10  ;;  %v9643_v11 = vor.u32 %v7148_v33, %v5621_v26 }
 0x2a0   : > { %4010 = vmatmul.bf16.gmra.mxu2 %v7991_v12  ;;  %v6189_v12 = vld [vmem:[%s10795_s1 + $0x228] sm:$0xf0] }
 0x2a1   : > { %4064 = vmatmul.bf16.gmra.mxu3 %v7993_v13  ;;  %v5619_v13 = vld [vmem:[%s7828_s18 + $0x280] sm:$0xf]  ;;  %v6192_v16 = vor.u32 %v7298_v56, %v6189_v12  ;;  %v6125_v56 = vld [vmem:[%s10795_s1 + $0x1a8] sm:$0xf0] }
 0x2a3   : > { %v3800_v17 = vpop.f32.mrf.mxu2  ;;  %v3694_v61 = vpop.f32.mrf.mxu0  ;;  %4208 = vmatpush.bf16.msrb.mxu2 %v6192_v16 }
 0x2a4   : > { %v3801_v37 = vadd.f32 %v3800_v17, %v3747_v8  ;;  %v3854_v60 = vpop.f32.mrf.mxu3  ;;  %v3695_v18 = vadd.f32 %v3694_v61, %v9260_v30  ;;  %v3748_v36 = vpop.f32.mrf.mxu1  ;;  %v9641_v30 = vor.u32 %v7157_v25, %v5619_v13  ;;  %v7314_v61 = vld [vmem:[%s10795_s1 + $0x2a4] sm:$0xf] }
 0x2a6   : > { %v9629_v4 = vadd.f32 %v3854_v60, %v3801_v37  ;;  %v3749_v35 = vadd.f32 %v3748_v36, %v3695_v18  ;;  %v7266_v37 = vld [vmem:[%s10795_s1 + $0x124] sm:$0xf]  ;;  %v6061_v60 = vld [vmem:[%s10795_s1 + $0x128] sm:$0xf0] }
 0x2a7   : > { %v6064_v36 = vor.u32 %v7266_v37, %v6061_v60  ;;  %v5693_v37 = vld [vmem:[%s7828_s18 + $0x358] sm:$0xf0] }
 0x2a9   : > { %4100 = vmatpush.bf16.msrb.mxu0 %v6064_v36 }
 0x2ab   : > { %v3802_v21 = vpop.f32.mrf.mxu2  ;;  %v3697_v50 = vpop.f32.mrf.mxu0 }
 0x2ac   : > { %v3803_v47 = vadd.f32 %v3802_v21, %v3749_v35  ;;  %v3856_v52 = vpop.f32.mrf.mxu3  ;;  %v3698_v8 = vadd.f32 %v3697_v50, %v9285_v62  ;;  %v3751_v49 = vpop.f32.mrf.mxu1  ;;  %v6253_v62 = vld [vmem:[%s10795_s1 + $0x2a8] sm:$0xf0]  ;;  %v7282_v35 = vld [vmem:[%s10795_s1 + $0x1a4] sm:$0xf]  ;;  %v5691_v50 = vld [vmem:[%s7828_s18 + $0x310] sm:$0xf] }
 0x2ad   : > { %v6256_v12 = vor.u32 %v7314_v61, %v6253_v62  ;;  %v6128_v13 = vor.u32 %v7282_v35, %v6125_v56 }
 0x2ae   : > { %v9646_v17 = vadd.f32 %v3856_v52, %v3803_v47  ;;  %v3752_v18 = vadd.f32 %v3751_v49, %v3698_v8  ;;  %3907 = vmatmul.bf16.gmra.mxu0 %v9641_v30  ;;  %v7175_v8 = vld [vmem:[%s7828_s18 + $0x354] sm:$0xf0]  ;;  %v7166_v49 = vld [vmem:[%s7828_s18 + $0x314] sm:$0xf] }
 0x2af   : > { %3961 = vmatmul.bf16.gmra.mxu1 %v9643_v11  ;;  %4262 = vmatpush.bf16.msrb.mxu3 %v6256_v12  ;;  %v9677_v61 = vor.u32 %v7175_v8, %v5691_v50  ;;  %v9679_v35 = vor.u32 %v7166_v49, %v5693_v37  ;;  %v7296_v12 = vld [vmem:[%s10795_s1 + $0x214] sm:$0xf] }
 0x2b0   : > { %4015 = vmatmul.bf16.gmra.mxu2 %v8035_v40  ;;  %4154 = vmatpush.bf16.msrb.mxu1 %v6128_v13  ;;  %v6181_v13 = vld [vmem:[%s10795_s1 + $0x218] sm:$0xf0]  ;;  %v7280_v50 = vld [vmem:[%s10795_s1 + $0x194] sm:$0xf] }
 0x2b1   : > { %4069 = vmatmul.bf16.gmra.mxu3 %v8037_v41 }
 0x2b3   : > { %v3805_v25 = vpop.f32.mrf.mxu2  ;;  %v3699_v26 = vpop.f32.mrf.mxu0 }
 0x2b4   : > { %v3806_v16 = vadd.f32 %v3805_v25, %v3752_v18  ;;  %v3859_v33 = vpop.f32.mrf.mxu3  ;;  %v3700_v21 = vadd.f32 %v3699_v26, %v9304_v27  ;;  %v3753_v47 = vpop.f32.mrf.mxu1  ;;  %v7312_v26 = vld [vmem:[%s10795_s1 + $0x294] sm:$0xf] }
 0x2b6   : > { %v9671_v52 = vadd.f32 %v3859_v33, %v3806_v16  ;;  %v3754_v40 = vadd.f32 %v3753_v47, %v3700_v21  ;;  %v6184_v16 = vor.u32 %v7296_v12, %v6181_v13  ;;  %v7264_v33 = vld [vmem:[%s10795_s1 + $0x114] sm:$0xf]  ;;  %v6245_v47 = vld [vmem:[%s10795_s1 + $0x298] sm:$0xf0]  ;;  %v7193_v12 = vld [vmem:[%s7828_s18 + $0x3e4] sm:$0xf0] }
 0x2b7   : > { %v7184_v13 = vld [vmem:[%s7828_s18 + $0x3a4] sm:$0xf] }
 0x2b8   : > { %4209 = vmatpush.bf16.msrb.mxu2 %v6184_v16  ;;  %v5765_v16 = vld [vmem:[%s7828_s18 + $0x3e8] sm:$0xf0] }
 0x2bb   : > { %v3807_v60 = vpop.f32.mrf.mxu2  ;;  %v3702_v62 = vpop.f32.mrf.mxu0 }
 0x2bc   : > { %v3808_v41 = vadd.f32 %v3807_v60, %v3754_v40  ;;  %v3861_v36 = vpop.f32.mrf.mxu3  ;;  %v3703_v18 = vadd.f32 %v3702_v62, %v9335_v38  ;;  %v3756_v56 = vpop.f32.mrf.mxu1  ;;  %v6053_v38 = vld [vmem:[%s10795_s1 + $0x118] sm:$0xf0]  ;;  %v6248_v40 = vor.u32 %v7312_v26, %v6245_v47 }
 0x2bd   : > { %v6056_v21 = vor.u32 %v7264_v33, %v6053_v38 }
 0x2be   : > { %v9682_v27 = vadd.f32 %v3861_v36, %v3808_v41  ;;  %v3757_v25 = vadd.f32 %v3756_v56, %v3703_v18  ;;  %3912 = vmatmul.bf16.gmra.mxu0 %v9677_v61  ;;  %4263 = vmatpush.bf16.msrb.mxu3 %v6248_v40  ;;  %v5763_v56 = vld [vmem:[%s7828_s18 + $0x3a0] sm:$0xf] }
 0x2bf   : > { %3966 = vmatmul.bf16.gmra.mxu1 %v9679_v35  ;;  %4101 = vmatpush.bf16.msrb.mxu0 %v6056_v21  ;;  %v9719_v38 = vor.u32 %v7193_v12, %v5763_v56 }
 0x2c0   : > { %4020 = vmatmul.bf16.gmra.mxu2 %v8073_v5  ;;  %v6117_v5 = vld [vmem:[%s10795_s1 + $0x198] sm:$0xf0] }
 0x2c1   : > { %4074 = vmatmul.bf16.gmra.mxu3 %v8075_v6  ;;  %v6120_v8 = vor.u32 %v7280_v50, %v6117_v5 }
 0x2c3   : > { %v3810_v49 = vpop.f32.mrf.mxu2  ;;  %v3704_v60 = vpop.f32.mrf.mxu0  ;;  %4155 = vmatpush.bf16.msrb.mxu1 %v6120_v8 }
 0x2c4   : > { %v3811_v37 = vadd.f32 %v3810_v49, %v3757_v25  ;;  %v3864_v6 = vpop.f32.mrf.mxu3  ;;  %v3705_v41 = vadd.f32 %v3704_v60, %v9354_v45  ;;  %v3758_v36 = vpop.f32.mrf.mxu1  ;;  %v9721_v25 = vor.u32 %v7184_v13, %v5765_v16  ;;  %v7294_v49 = vld [vmem:[%s10795_s1 + $0x204] sm:$0xf] }
 0x2c6   : > { %v9713_v62 = vadd.f32 %v3864_v6, %v3811_v37  ;;  %v3759_v18 = vadd.f32 %v3758_v36, %v3705_v41  ;;  %v7262_v37 = vld [vmem:[%s10795_s1 + $0x104] sm:$0xf] }
 0x2cb   : > { %v3812_v33 = vpop.f32.mrf.mxu2  ;;  %v3707_v47 = vpop.f32.mrf.mxu0 }
 0x2cc   : > { %v3813_v26 = vadd.f32 %v3812_v33, %v3759_v18  ;;  %v3866_v21 = vpop.f32.mrf.mxu3  ;;  %v3708_v40 = vadd.f32 %v3707_v47, %v9385_v3  ;;  %v3761_v50 = vpop.f32.mrf.mxu1  ;;  %v6173_v3 = vld [vmem:[%s10795_s1 + $0x208] sm:$0xf0]  ;;  %v7278_v33 = vld [vmem:[%s10795_s1 + $0x184] sm:$0xf] }
 0x2cd   : > { %v6176_v36 = vor.u32 %v7294_v49, %v6173_v3  ;;  %v6237_v18 = vld [vmem:[%s10795_s1 + $0x288] sm:$0xf0] }
 0x2ce   : > { %v9724_v45 = vadd.f32 %v3866_v21, %v3813_v26  ;;  %v3762_v5 = vadd.f32 %v3761_v50, %v3708_v40  ;;  %3917 = vmatmul.bf16.gmra.mxu0 %v9719_v38  ;;  %v6109_v26 = vld [vmem:[%s10795_s1 + $0x188] sm:$0xf0]  ;;  %v7211_v50 = vld [vmem:[%s7828_s18 + $0x474] sm:$0xf0] }
 0x2cf   : > { %3971 = vmatmul.bf16.gmra.mxu1 %v9721_v25  ;;  %4210 = vmatpush.bf16.msrb.mxu2 %v6176_v36  ;;  %v6112_v47 = vor.u32 %v7278_v33, %v6109_v26 }
 0x2d0   : > { %4025 = vmatmul.bf16.gmra.mxu2 %v8099_v28  ;;  %v6045_v28 = vld [vmem:[%s10795_s1 + $0x108] sm:$0xf0] }
 0x2d1   : > { %4079 = vmatmul.bf16.gmra.mxu3 %v8101_v29  ;;  %v7310_v29 = vld [vmem:[%s10795_s1 + $0x284] sm:$0xf]  ;;  %v6048_v13 = vor.u32 %v7262_v37, %v6045_v28  ;;  %4156 = vmatpush.bf16.msrb.mxu1 %v6112_v47 }
 0x2d2   : > { %v6240_v16 = vor.u32 %v7310_v29, %v6237_v18 }
 0x2d3   : > { %v3815_v8 = vpop.f32.mrf.mxu2  ;;  %v3709_v41 = vpop.f32.mrf.mxu0  ;;  %4102 = vmatpush.bf16.msrb.mxu0 %v6048_v13  ;;  %v7340_v13 = vld [vmem:[%s10795_s1 + $0x374] sm:$0xf] }
 0x2d4   : > { %v3816_v6 = vadd.f32 %v3815_v8, %v3762_v5  ;;  %v3869_v60 = vpop.f32.mrf.mxu3  ;;  %v3710_v56 = vadd.f32 %v3709_v41, %v9404_v43  ;;  %v3763_v12 = vpop.f32.mrf.mxu1  ;;  %4264 = vmatpush.bf16.msrb.mxu3 %v6240_v16  ;;  %v5835_v43 = vld [vmem:[%s7828_s18 + $0x430] sm:$0xf]  ;;  %v7202_v5 = vld [vmem:[%s7828_s18 + $0x434] sm:$0xf]  ;;  %v5837_v8 = vld [vmem:[%s7828_s18 + $0x478] sm:$0xf0] }
 0x2d5   : > { %v9761_v3 = vor.u32 %v7211_v50, %v5835_v43  ;;  %v9763_v29 = vor.u32 %v7202_v5, %v5837_v8 }
 0x2d6   : > { %v9755_v21 = vadd.f32 %v3869_v60, %v3816_v6  ;;  %v3764_v40 = vadd.f32 %v3763_v12, %v3710_v56  ;;  %v7372_v12 = vld [vmem:[%s10795_s1 + $0x474] sm:$0xf] }
 0x2db   : > { %v3817_v49 = vpop.f32.mrf.mxu2  ;;  %v3712_v28 = vpop.f32.mrf.mxu0 }
 0x2dc   : > { %v3818_v37 = vadd.f32 %v3817_v49, %v3764_v40  ;;  %v3871_v41 = vpop.f32.mrf.mxu3  ;;  %v3713_v6 = vadd.f32 %v3712_v28, %v9429_v31  ;;  %v3766_v60 = vpop.f32.mrf.mxu1  ;;  %v6485_v31 = vld [vmem:[%s10795_s1 + $0x478] sm:$0xf0]  ;;  %v7356_v49 = vld [vmem:[%s10795_s1 + $0x3f4] sm:$0xf] }
 0x2dd   : > { %v6488_v47 = vor.u32 %v7372_v12, %v6485_v31  ;;  %v6549_v40 = vld [vmem:[%s10795_s1 + $0x4f8] sm:$0xf0] }
 0x2de   : > { %v9766_v36 = vadd.f32 %v3871_v41, %v3818_v37  ;;  %v3767_v18 = vadd.f32 %v3766_v60, %v3713_v6  ;;  %3922 = vmatmul.bf16.gmra.mxu0 %v9761_v3  ;;  %v6421_v37 = vld [vmem:[%s10795_s1 + $0x3f8] sm:$0xf0]  ;;  %v7229_v60 = vld [vmem:[%s7828_s18 + $0x504] sm:$0xf0] }
 0x2df   : > { %3976 = vmatmul.bf16.gmra.mxu1 %v9763_v29  ;;  %4419 = vmatpush.bf16.msra.mxu2 %v6488_v47  ;;  %v6424_v28 = vor.u32 %v7356_v49, %v6421_v37 }
 0x2e0   : > { %4030 = vmatmul.bf16.gmra.mxu2 %v8143_v0  ;;  %v6357_v0 = vld [vmem:[%s10795_s1 + $0x378] sm:$0xf0] }
 0x2e1   : > { %4084 = vmatmul.bf16.gmra.mxu3 %v8145_v1  ;;  %v7388_v1 = vld [vmem:[%s10795_s1 + $0x4f4] sm:$0xf]  ;;  %v6360_v5 = vor.u32 %v7340_v13, %v6357_v0  ;;  %4365 = vmatpush.bf16.msra.mxu1 %v6424_v28 }
 0x2e2   : > { %v6552_v8 = vor.u32 %v7388_v1, %v6549_v40 }
 0x2e3   : > { %v3820_v56 = vpop.f32.mrf.mxu2  ;;  %v3714_v26 = vpop.f32.mrf.mxu0  ;;  %4311 = vmatpush.bf16.msra.mxu0 %v6360_v5  ;;  %v6477_v5 = vld [vmem:[%s10795_s1 + $0x468] sm:$0xf0] }
 0x2e4   : > { %v3821_v16 = vadd.f32 %v3820_v56, %v3767_v18  ;;  %v3874_v33 = vpop.f32.mrf.mxu3  ;;  %v3715_v43 = vadd.f32 %v3714_v26, %v9454_v15  ;;  %v3768_v50 = vpop.f32.mrf.mxu1  ;;  %4473 = vmatpush.bf16.msra.mxu3 %v6552_v8  ;;  %v5907_v15 = vld [vmem:[%s7828_s18 + $0x4c0] sm:$0xf]  ;;  %v7220_v18 = vld [vmem:[%s7828_s18 + $0x4c4] sm:$0xf]  ;;  %v5909_v56 = vld [vmem:[%s7828_s18 + $0x508] sm:$0xf0]  ;;  %s9815_s18 = scalar_lea.vmem %s10796_s2, %s7067_s8 }
 0x2e5   : > { %v9803_v31 = vor.u32 %v7229_v60, %v5907_v15  ;;  %v9805_v1 = vor.u32 %v7220_v18, %v5909_v56  ;;  %v6349_v15 = vld [vmem:[%s10795_s1 + $0x368] sm:$0xf0]  ;;  %v7386_v60 = vld [vmem:[%s10795_s1 + $0x4e4] sm:$0xf] }
 0x2e6   : > { %v9797_v41 = vadd.f32 %v3874_v33, %v3821_v16  ;;  %v3769_v6 = vadd.f32 %v3768_v50, %v3715_v43  ;;  %v7370_v50 = vld [vmem:[%s10795_s1 + $0x464] sm:$0xf]  ;;  %v6541_v56 = vld [vmem:[%s10795_s1 + $0x4e8] sm:$0xf0] }
 0x2e7   : > { %v6480_v37 = vor.u32 %v7370_v50, %v6477_v5 }
 0x2e9   : > { %4420 = vmatpush.bf16.msra.mxu2 %v6480_v37 }
 0x2eb   : > { %v3822_v12 = vpop.f32.mrf.mxu2  ;;  %v3888_v0 = vpop.f32.mrf.mxu0 }
 0x2ec   : > { %v3823_v13 = vadd.f32 %v3822_v12, %v3769_v6  ;;  %v3876_v26 = vpop.f32.mrf.mxu3  ;;  %v3889_v16 = vadd.f32 %v3888_v0, %v9467_v9  ;;  %v3942_v33 = vpop.f32.mrf.mxu1  ;;  %v6544_v12 = vor.u32 %v7386_v60, %v6541_v56  ;;  %v7354_v0 = vld [vmem:[%s10795_s1 + $0x3e4] sm:$0xf]  ;;  %v7336_v56 = vld [vmem:[%s10795_s1 + $0x354] sm:$0xf] }
 0x2ee   : > { %v9809_v47 = vadd.f32 %v3876_v26, %v3823_v13  ;;  %v3943_v40 = vadd.f32 %v3942_v33, %v3889_v16  ;;  %3927 = vmatmul.bf16.gmra.mxu0 %v9803_v31  ;;  %4474 = vmatpush.bf16.msra.mxu3 %v6544_v12  ;;  %v6413_v16 = vld [vmem:[%s10795_s1 + $0x3e8] sm:$0xf0] }
 0x2ef   : > { %3981 = vmatmul.bf16.gmra.mxu1 %v9805_v1 }
 0x2f0   : > { %4035 = vmatmul.bf16.gmra.mxu2 %v8187_v44  ;;  %v5070_v43 = vmax.f32 %v3943_v40, 0.0 }
 0x2f1   : > { %4089 = vmatmul.bf16.gmra.mxu3 %v8189_v46  ;;  %v7338_v46 = vld [vmem:[%s10795_s1 + $0x364] sm:$0xf] }
 0x2f2   : > { %5106 = vst [vmem:[%s9815_s18] sm:$0xff] %v5070_v43  ;;  %v6352_v18 = vor.u32 %v7338_v46, %v6349_v15  ;;  %v6416_v43 = vor.u32 %v7354_v0, %v6413_v16  ;;  %v6533_v0 = vld [vmem:[%s10795_s1 + $0x4d8] sm:$0xf0]  ;;  %v7352_v16 = vld [vmem:[%s10795_s1 + $0x3d4] sm:$0xf] }
 0x2f3   : > { %v3996_v9 = vpop.f32.mrf.mxu2  ;;  %v3890_v49 = vpop.f32.mrf.mxu0 }
 0x2f4   : > { %v4050_v8 = vpop.f32.mrf.mxu3  ;;  %v3891_v44 = vadd.f32 %v3890_v49, %v9496_v2  ;;  %v3944_v6 = vpop.f32.mrf.mxu1  ;;  %4312 = vmatpush.bf16.msra.mxu0 %v6352_v18  ;;  %4366 = vmatpush.bf16.msra.mxu1 %v6416_v43 }
 0x2f5   : > { %v9827_v28 = vadd.f32 %v4050_v8, %v3996_v9 }
 0x2f6   : > { %v3945_v2 = vadd.f32 %v3944_v6, %v3891_v44 }
 0x2f8   : > { %v5072_v13 = vmax.f32 %v3945_v2, 0.0 }
 0x2fa   : > { %5108 = vst [vmem:[%s9815_s18 + $0x10] sm:$0xff] %v5072_v13 }
 0x2fb   : > { %v3998_v26 = vpop.f32.mrf.mxu2  ;;  %v3893_v40 = vpop.f32.mrf.mxu0 }
 0x2fc   : > { %v4052_v33 = vpop.f32.mrf.mxu3  ;;  %v3894_v50 = vadd.f32 %v3893_v40, %v9503_v22  ;;  %v3947_v5 = vpop.f32.mrf.mxu1 }
 0x2fd   : > { %v9849_v9 = vadd.f32 %v4052_v33, %v3998_v26  ;;  %v7384_v26 = vld [vmem:[%s10795_s1 + $0x4d4] sm:$0xf] }
 0x2fe   : > { %v3948_v8 = vadd.f32 %v3947_v5, %v3894_v50  ;;  %4103 = vmatmul.bf16.vlgmr.msrb.gmra.mxu0 %v7849_v54  ;;  %v7368_v54 = vld [vmem:[%s10795_s1 + $0x454] sm:$0xf]  ;;  %v6536_v50 = vor.u32 %v7384_v26, %v6533_v0  ;;  %v6405_v5 = vld [vmem:[%s10795_s1 + $0x3d8] sm:$0xf0] }
 0x2ff   : > { %4157 = vmatmul.bf16.vlgmr.msrb.gmra.mxu1 %v7853_v58  ;;  %v6469_v58 = vld [vmem:[%s10795_s1 + $0x458] sm:$0xf0] }
 0x300   : > { %4211 = vmatmul.bf16.vlgmr.msrb.gmra.mxu2 %v8233_v59  ;;  %v5074_v49 = vmax.f32 %v3948_v8, 0.0  ;;  %v6472_v59 = vor.u32 %v7368_v54, %v6469_v58  ;;  %v6408_v8 = vor.u32 %v7352_v16, %v6405_v5  ;;  %4475 = vmatpush.bf16.msra.mxu3 %v6536_v50  ;;  %v6333_v16 = vld [vmem:[%s10795_s1 + $0x348] sm:$0xf0] }
 0x301   : > { %4265 = vmatmul.bf16.vlgmr.msrb.gmra.mxu3 %v8235_v63 }
 0x302   : > { %5110 = vst [vmem:[%s9815_s18 + $0x20] sm:$0xff] %v5074_v49  ;;  %4421 = vmatpush.bf16.msra.mxu2 %v6472_v59  ;;  %4367 = vmatpush.bf16.msra.mxu1 %v6408_v8 }
 0x303   : > { %v4001_v37 = vpop.f32.mrf.mxu2  ;;  %v3895_v6 = vpop.f32.mrf.mxu0 }
 0x304   : > { %v4055_v44 = vpop.f32.mrf.mxu3  ;;  %v3896_v22 = vadd.f32 %v3895_v6, %v9538_v14  ;;  %v3949_v15 = vpop.f32.mrf.mxu1  ;;  %v6341_v14 = vld [vmem:[%s10795_s1 + $0x358] sm:$0xf0]  ;;  %v11037_v6 = vld [vmem:[#allocation21_spill] sm:$0xff] }
 0x305   : > { %v9857_v46 = vadd.f32 %v4055_v44, %v4001_v37  ;;  %v6344_v13 = vor.u32 %v7336_v56, %v6341_v14  ;;  %v11035_v37 = vld [vmem:[#allocation3_spill] sm:$0xff]  ;;  %v11036_v44 = vld [vmem:[#allocation4_spill] sm:$0xff] }
 0x306   : > { %v3950_v60 = vadd.f32 %v3949_v15, %v3896_v22  ;;  %v11038_v15 = vld [vmem:[#allocation22_spill] sm:$0xff] }
 0x307   : > { %4313 = vmatpush.bf16.msra.mxu0 %v6344_v13 }
 0x308   : > { %v5076_v63 = vmax.f32 %v3950_v60, 0.0 }
 0x30a   : > { %5112 = vst [vmem:[%s9815_s18 + $0x30] sm:$0xff] %v5076_v63 }
 0x30b   : > { %v4003_v18 = vpop.f32.mrf.mxu2  ;;  %v3898_v12 = vpop.f32.mrf.mxu0 }
 0x30c   : > { %v4057_v2 = vpop.f32.mrf.mxu3  ;;  %v3899_v40 = vadd.f32 %v3898_v12, %v9545_v51  ;;  %v3952_v43 = vpop.f32.mrf.mxu1  ;;  %v6461_v12 = vld [vmem:[%s10795_s1 + $0x448] sm:$0xf0] }
 0x30d   : > { %v9882_v33 = vadd.f32 %v4057_v2, %v4003_v18  ;;  %v7366_v2 = vld [vmem:[%s10795_s1 + $0x444] sm:$0xf] }
 0x30e   : > { %v3953_v49 = vadd.f32 %v3952_v43, %v3899_v40  ;;  %4108 = vmatmul.bf16.gmra.mxu0 %v11035_v37  ;;  %v6464_v0 = vor.u32 %v7366_v2, %v6461_v12  ;;  %v7382_v40 = vld [vmem:[%s10795_s1 + $0x4c4] sm:$0xf] }
 0x30f   : > { %4162 = vmatmul.bf16.gmra.mxu1 %v11036_v44  ;;  %v7350_v37 = vld [vmem:[%s10795_s1 + $0x3c4] sm:$0xf]  ;;  %v6397_v44 = vld [vmem:[%s10795_s1 + $0x3c8] sm:$0xf0] }
 0x310   : > { %4216 = vmatmul.bf16.gmra.mxu2 %v11037_v6  ;;  %v5078_v22 = vmax.f32 %v3953_v49, 0.0  ;;  %v6525_v49 = vld [vmem:[%s10795_s1 + $0x4c8] sm:$0xf0] }
 0x311   : > { %4270 = vmatmul.bf16.gmra.mxu3 %v11038_v15  ;;  %4422 = vmatpush.bf16.msra.mxu2 %v6464_v0  ;;  %v6528_v6 = vor.u32 %v7382_v40, %v6525_v49  ;;  %v7380_v49 = vld [vmem:[%s10795_s1 + $0x4b4] sm:$0xf] }
 0x312   : > { %5114 = vst [vmem:[%s9815_s18 + $0x40] sm:$0xff] %v5078_v22  ;;  %v6400_v22 = vor.u32 %v7350_v37, %v6397_v44 }
 0x313   : > { %v4006_v51 = vpop.f32.mrf.mxu2  ;;  %v3900_v58 = vpop.f32.mrf.mxu0  ;;  %4476 = vmatpush.bf16.msra.mxu3 %v6528_v6 }
 0x314   : > { %v4060_v54 = vpop.f32.mrf.mxu3  ;;  %v3901_v60 = vadd.f32 %v3900_v58, %v9580_v23  ;;  %v3954_v63 = vpop.f32.mrf.mxu1  ;;  %v7334_v23 = vld [vmem:[%s10795_s1 + $0x344] sm:$0xf]  ;;  %4368 = vmatpush.bf16.msra.mxu1 %v6400_v22 }
 0x315   : > { %v9893_v59 = vadd.f32 %v4060_v54, %v4006_v51  ;;  %v6336_v8 = vor.u32 %v7334_v23, %v6333_v16  ;;  %v11040_v51 = vld [vmem:[#allocation6_spill] sm:$0xff]  ;;  %v11041_v54 = vld [vmem:[#allocation25_spill] sm:$0xff] }
 0x316   : > { %v3955_v18 = vadd.f32 %v3954_v63, %v3901_v60  ;;  %v11042_v60 = vld [vmem:[#allocation26_spill] sm:$0xff]  ;;  %v7364_v23 = vld [vmem:[%s10795_s1 + $0x434] sm:$0xf] }
 0x317   : > { %4314 = vmatpush.bf16.msra.mxu0 %v6336_v8  ;;  %v6453_v16 = vld [vmem:[%s10795_s1 + $0x438] sm:$0xf0] }
 0x318   : > { %v5080_v56 = vmax.f32 %v3955_v18, 0.0  ;;  %v6325_v8 = vld [vmem:[%s10795_s1 + $0x338] sm:$0xf0] }
 0x31a   : > { %5116 = vst [vmem:[%s9815_s18 + $0x50] sm:$0xff] %v5080_v56 }
 0x31b   : > { %v4008_v14 = vpop.f32.mrf.mxu2  ;;  %v3903_v26 = vpop.f32.mrf.mxu0 }
 0x31c   : > { %v4062_v13 = vpop.f32.mrf.mxu3  ;;  %v3904_v50 = vadd.f32 %v3903_v26, %v9587_v55  ;;  %v3957_v5 = vpop.f32.mrf.mxu1  ;;  %v11039_v55 = vld [vmem:[#allocation5_spill] sm:$0xff] }
 0x31d   : > { %v9912_v43 = vadd.f32 %v4062_v13, %v4008_v14 }
 0x31e   : > { %v3958_v15 = vadd.f32 %v3957_v5, %v3904_v50  ;;  %4113 = vmatmul.bf16.gmra.mxu0 %v11039_v55  ;;  %v6456_v5 = vor.u32 %v7364_v23, %v6453_v16  ;;  %v7348_v55 = vld [vmem:[%s10795_s1 + $0x3b4] sm:$0xf] }
 0x31f   : > { %4167 = vmatmul.bf16.gmra.mxu1 %v11040_v51  ;;  %v6389_v51 = vld [vmem:[%s10795_s1 + $0x3b8] sm:$0xf0] }
 0x320   : > { %4221 = vmatmul.bf16.gmra.mxu2 %v11041_v54  ;;  %v5082_v58 = vmax.f32 %v3958_v15, 0.0  ;;  %v6517_v15 = vld [vmem:[%s10795_s1 + $0x4b8] sm:$0xf0] }
 0x321   : > { %4275 = vmatmul.bf16.gmra.mxu3 %v11042_v60  ;;  %4423 = vmatpush.bf16.msra.mxu2 %v6456_v5  ;;  %v6520_v54 = vor.u32 %v7380_v49, %v6517_v15 }
 0x322   : > { %5118 = vst [vmem:[%s9815_s18 + $0x60] sm:$0xff] %v5082_v58  ;;  %v6392_v58 = vor.u32 %v7348_v55, %v6389_v51  ;;  %v7330_v55 = vld [vmem:[%s10795_s1 + $0x324] sm:$0xf]  ;;  %v6317_v51 = vld [vmem:[%s10795_s1 + $0x328] sm:$0xf0] }
 0x323   : > { %v4011_v63 = vpop.f32.mrf.mxu2  ;;  %v3905_v56 = vpop.f32.mrf.mxu0  ;;  %4477 = vmatpush.bf16.msra.mxu3 %v6520_v54  ;;  %v7378_v54 = vld [vmem:[%s10795_s1 + $0x4a4] sm:$0xf] }
 0x324   : > { %v4065_v18 = vpop.f32.mrf.mxu3  ;;  %v3906_v2 = vadd.f32 %v3905_v56, %v9616_v48  ;;  %v3959_v12 = vpop.f32.mrf.mxu1  ;;  %v7332_v48 = vld [vmem:[%s10795_s1 + $0x334] sm:$0xf]  ;;  %4369 = vmatpush.bf16.msra.mxu1 %v6392_v58  ;;  %v6320_v58 = vor.u32 %v7330_v55, %v6317_v51 }
 0x325   : > { %v9929_v14 = vadd.f32 %v4065_v18, %v4011_v63  ;;  %v6328_v22 = vor.u32 %v7332_v48, %v6325_v8  ;;  %v11044_v63 = vld [vmem:[#allocation8_spill] sm:$0xff]  ;;  %v11045_v18 = vld [vmem:[#allocation29_spill] sm:$0xff]  ;;  %v7362_v48 = vld [vmem:[%s10795_s1 + $0x424] sm:$0xf] }
 0x326   : > { %v3960_v13 = vadd.f32 %v3959_v12, %v3906_v2  ;;  %v11046_v2 = vld [vmem:[#allocation30_spill] sm:$0xff]  ;;  %v6445_v8 = vld [vmem:[%s10795_s1 + $0x428] sm:$0xf0] }
 0x327   : > { %4315 = vmatpush.bf16.msra.mxu0 %v6328_v22 }
 0x328   : > { %v5084_v26 = vmax.f32 %v3960_v13, 0.0 }
 0x32a   : > { %5120 = vst [vmem:[%s9815_s18 + $0x70] sm:$0xff] %v5084_v26 }
 0x32b   : > { %v4013_v0 = vpop.f32.mrf.mxu2  ;;  %v3908_v50 = vpop.f32.mrf.mxu0  ;;  %4316 = vmatpush.bf16.msra.mxu0 %v6320_v58  ;;  %v7360_v58 = vld [vmem:[%s10795_s1 + $0x414] sm:$0xf] }
 0x32c   : > { %v4067_v40 = vpop.f32.mrf.mxu3  ;;  %v3909_v44 = vadd.f32 %v3908_v50, %v9629_v4  ;;  %v3962_v6 = vpop.f32.mrf.mxu1  ;;  %v11043_v4 = vld [vmem:[#allocation7_spill] sm:$0xff] }
 0x32d   : > { %v9948_v37 = vadd.f32 %v4067_v40, %v4013_v0 }
 0x32e   : > { %v3963_v60 = vadd.f32 %v3962_v6, %v3909_v44  ;;  %4118 = vmatmul.bf16.gmra.mxu0 %v11043_v4  ;;  %v6448_v6 = vor.u32 %v7362_v48, %v6445_v8  ;;  %v11047_v4 = vld [vmem:[#allocation9_spill] sm:$0xff] }
 0x32f   : > { %4172 = vmatmul.bf16.gmra.mxu1 %v11044_v63 }
 0x330   : > { %4226 = vmatmul.bf16.gmra.mxu2 %v11045_v18  ;;  %v5086_v56 = vmax.f32 %v3963_v60, 0.0  ;;  %v11048_v18 = vld [vmem:[#allocation10_spill] sm:$0xff] }
 0x331   : > { %4280 = vmatmul.bf16.gmra.mxu3 %v11046_v2  ;;  %4424 = vmatpush.bf16.msra.mxu2 %v6448_v6 }
 0x332   : > { %5122 = vst [vmem:[%s9815_s18 + $0x80] sm:$0xff] %v5086_v56  ;;  %v11049_v56 = vld [vmem:[#allocation33_spill] sm:$0xff] }
 0x333   : > { %v4016_v12 = vpop.f32.mrf.mxu2  ;;  %v3910_v26 = vpop.f32.mrf.mxu0 }
 0x334   : > { %v4070_v13 = vpop.f32.mrf.mxu3  ;;  %v3911_v23 = vadd.f32 %v3910_v26, %v9646_v17  ;;  %v3964_v16 = vpop.f32.mrf.mxu1  ;;  %v7346_v26 = vld [vmem:[%s10795_s1 + $0x3a4] sm:$0xf] }
 0x335   : > { %v9965_v0 = vadd.f32 %v4070_v13, %v4016_v12  ;;  %v11050_v12 = vld [vmem:[#allocation34_spill] sm:$0xff] }
 0x336   : > { %v3965_v40 = vadd.f32 %v3964_v16, %v3911_v23  ;;  %v6381_v23 = vld [vmem:[%s10795_s1 + $0x3a8] sm:$0xf0] }
 0x338   : > { %v5088_v50 = vmax.f32 %v3965_v40, 0.0 }
 0x33a   : > { %5124 = vst [vmem:[%s9815_s18 + $0x90] sm:$0xff] %v5088_v50  ;;  %v6384_v50 = vor.u32 %v7346_v26, %v6381_v23 }
 0x33b   : > { %v4018_v5 = vpop.f32.mrf.mxu2  ;;  %v3913_v44 = vpop.f32.mrf.mxu0 }
 0x33c   : > { %v4072_v49 = vpop.f32.mrf.mxu3  ;;  %v3914_v17 = vadd.f32 %v3913_v44, %v9671_v52  ;;  %v3967_v15 = vpop.f32.mrf.mxu1  ;;  %v6509_v52 = vld [vmem:[%s10795_s1 + $0x4a8] sm:$0xf0]  ;;  %4370 = vmatpush.bf16.msra.mxu1 %v6384_v50  ;;  %v6501_v50 = vld [vmem:[%s10795_s1 + $0x498] sm:$0xf0] }
 0x33d   : > { %v9975_v22 = vadd.f32 %v4072_v49, %v4018_v5  ;;  %v6512_v63 = vor.u32 %v7378_v54, %v6509_v52 }
 0x33e   : > { %v3968_v60 = vadd.f32 %v3967_v15, %v3914_v17  ;;  %4123 = vmatmul.bf16.gmra.mxu0 %v11047_v4  ;;  %v11051_v4 = vld [vmem:[#allocation11_spill] sm:$0xff] }
 0x33f   : > { %4177 = vmatmul.bf16.gmra.mxu1 %v11048_v18  ;;  %4478 = vmatpush.bf16.msra.mxu3 %v6512_v63  ;;  %v11052_v63 = vld [vmem:[#allocation12_spill] sm:$0xff]  ;;  %v11053_v18 = vld [vmem:[#allocation37_spill] sm:$0xff] }
 0x340   : > { %4231 = vmatmul.bf16.gmra.mxu2 %v11049_v56  ;;  %v5090_v2 = vmax.f32 %v3968_v60, 0.0 }
 0x341   : > { %4285 = vmatmul.bf16.gmra.mxu3 %v11050_v12  ;;  %v7328_v12 = vld [vmem:[%s10795_s1 + $0x314] sm:$0xf] }
 0x342   : > { %5126 = vst [vmem:[%s9815_s18 + $0xa0] sm:$0xff] %v5090_v2  ;;  %v11054_v2 = vld [vmem:[#allocation38_spill] sm:$0xff] }
 0x343   : > { %v4021_v13 = vpop.f32.mrf.mxu2  ;;  %v3915_v40 = vpop.f32.mrf.mxu0 }
 0x344   : > { %v4075_v16 = vpop.f32.mrf.mxu3  ;;  %v3916_v48 = vadd.f32 %v3915_v40, %v9682_v27  ;;  %v3969_v8 = vpop.f32.mrf.mxu1  ;;  %v6437_v27 = vld [vmem:[%s10795_s1 + $0x418] sm:$0xf0]  ;;  %v7376_v40 = vld [vmem:[%s10795_s1 + $0x494] sm:$0xf] }
 0x345   : > { %v10001_v5 = vadd.f32 %v4075_v16, %v4021_v13  ;;  %v6440_v52 = vor.u32 %v7360_v58, %v6437_v27  ;;  %v6309_v13 = vld [vmem:[%s10795_s1 + $0x318] sm:$0xf0] }
 0x346   : > { %v3970_v49 = vadd.f32 %v3969_v8, %v3916_v48  ;;  %v6312_v16 = vor.u32 %v7328_v12, %v6309_v13  ;;  %v7344_v48 = vld [vmem:[%s10795_s1 + $0x394] sm:$0xf] }
 0x347   : > { %4425 = vmatpush.bf16.msra.mxu2 %v6440_v52  ;;  %v11057_v12 = vld [vmem:[#allocation41_spill] sm:$0xff] }
 0x348   : > { %v5092_v44 = vmax.f32 %v3970_v49, 0.0  ;;  %4317 = vmatpush.bf16.msra.mxu0 %v6312_v16  ;;  %v6301_v16 = vld [vmem:[%s10795_s1 + $0x308] sm:$0xf0] }
 0x34a   : > { %5128 = vst [vmem:[%s9815_s18 + $0xb0] sm:$0xff] %v5092_v44 }
 0x34b   : > { %v4023_v6 = vpop.f32.mrf.mxu2  ;;  %v3918_v15 = vpop.f32.mrf.mxu0 }
 0x34c   : > { %v4077_v17 = vpop.f32.mrf.mxu3  ;;  %v3919_v51 = vadd.f32 %v3918_v15, %v9713_v62  ;;  %v3972_v54 = vpop.f32.mrf.mxu1 }
 0x34d   : > { %v10005_v55 = vadd.f32 %v4077_v17, %v4023_v6  ;;  %v6504_v6 = vor.u32 %v7376_v40, %v6501_v50  ;;  %v6373_v17 = vld [vmem:[%s10795_s1 + $0x398] sm:$0xf0]  ;;  %v7374_v50 = vld [vmem:[%s10795_s1 + $0x484] sm:$0xf] }
 0x34e   : > { %v3973_v60 = vadd.f32 %v3972_v54, %v3919_v51  ;;  %4128 = vmatmul.bf16.gmra.mxu0 %v11051_v4  ;;  %v6376_v15 = vor.u32 %v7344_v48, %v6373_v17  ;;  %v6493_v48 = vld [vmem:[%s10795_s1 + $0x488] sm:$0xf0] }
 0x34f   : > { %4182 = vmatmul.bf16.gmra.mxu1 %v11052_v63  ;;  %4479 = vmatpush.bf16.msra.mxu3 %v6504_v6  ;;  %v6496_v6 = vor.u32 %v7374_v50, %v6493_v48  ;;  %v6365_v17 = vld [vmem:[%s10795_s1 + $0x388] sm:$0xf0]  ;;  %v6741_v50 = vld [vmem:[%s10795_s1 + $0x678] sm:$0xf0]  ;;  %v7404_v48 = vld [vmem:[%s10795_s1 + $0x574] sm:$0xf] }
 0x350   : > { %4236 = vmatmul.bf16.gmra.mxu2 %v11053_v18  ;;  %v5094_v56 = vmax.f32 %v3973_v60, 0.0  ;;  %4371 = vmatpush.bf16.msra.mxu1 %v6376_v15  ;;  %v11055_v18 = vld [vmem:[#allocation13_spill] sm:$0xff] }
 0x351   : > { %4290 = vmatmul.bf16.gmra.mxu3 %v11054_v2  ;;  %v6429_v2 = vld [vmem:[%s10795_s1 + $0x408] sm:$0xf0] }
 0x352   : > { %5130 = vst [vmem:[%s9815_s18 + $0xc0] sm:$0xff] %v5094_v56  ;;  %v7358_v56 = vld [vmem:[%s10795_s1 + $0x404] sm:$0xf] }
 0x353   : > { %v4026_v62 = vpop.f32.mrf.mxu2  ;;  %v3920_v23 = vpop.f32.mrf.mxu0  ;;  %v6432_v13 = vor.u32 %v7358_v56, %v6429_v2  ;;  %4480 = vmatpush.bf16.msra.mxu3 %v6496_v6 }
 0x354   : > { %v4080_v26 = vpop.f32.mrf.mxu3  ;;  %v3921_v49 = vadd.f32 %v3920_v23, %v9724_v45  ;;  %v3974_v44 = vpop.f32.mrf.mxu1  ;;  %v7326_v23 = vld [vmem:[%s10795_s1 + $0x304] sm:$0xf] }
 0x355   : > { %v10034_v8 = vadd.f32 %v4080_v26, %v4026_v62  ;;  %v11056_v62 = vld [vmem:[#allocation14_spill] sm:$0xff]  ;;  %4426 = vmatpush.bf16.msra.mxu2 %v6432_v13  ;;  %v6304_v40 = vor.u32 %v7326_v23, %v6301_v16 }
 0x356   : > { %v3975_v51 = vadd.f32 %v3974_v44, %v3921_v49  ;;  %v7342_v49 = vld [vmem:[%s10795_s1 + $0x384] sm:$0xf]  ;;  %v11062_v16 = vld [vmem:[#allocation46_spill] sm:$0xff] }
 0x357   : > { %4318 = vmatpush.bf16.msra.mxu0 %v6304_v40  ;;  %v7436_v40 = vld [vmem:[%s10795_s1 + $0x674] sm:$0xf] }
 0x358   : > { %v5096_v54 = vmax.f32 %v3975_v51, 0.0 }
 0x35a   : > { %5132 = vst [vmem:[%s9815_s18 + $0xd0] sm:$0xff] %v5096_v54  ;;  %v6368_v54 = vor.u32 %v7342_v49, %v6365_v17  ;;  %v6613_v49 = vld [vmem:[%s10795_s1 + $0x578] sm:$0xf0] }
 0x35b   : > { %v4028_v58 = vpop.f32.mrf.mxu2  ;;  %v3923_v52 = vpop.f32.mrf.mxu0  ;;  %v6616_v17 = vor.u32 %v7404_v48, %v6613_v49  ;;  %v11066_v48 = vld [vmem:[#allocation50_spill] sm:$0xff]  ;;  %v7434_v49 = vld [vmem:[%s10795_s1 + $0x664] sm:$0xf] }
 0x35c   : > { %v4082_v27 = vpop.f32.mrf.mxu3  ;;  %v3924_v45 = vadd.f32 %v3923_v52, %v9755_v21  ;;  %v3977_v4 = vpop.f32.mrf.mxu1  ;;  %v11058_v21 = vld [vmem:[#allocation42_spill] sm:$0xff]  ;;  %4372 = vmatpush.bf16.msra.mxu1 %v6368_v54 }
 0x35d   : > { %v10041_v60 = vadd.f32 %v4082_v27, %v4028_v58  ;;  %4527 = vmatpush.bf16.msrb.mxu0 %v6616_v17 }
 0x35e   : > { %v3978_v63 = vadd.f32 %v3977_v4, %v3924_v45  ;;  %4133 = vmatmul.bf16.gmra.mxu0 %v11055_v18 }
 0x35f   : > { %4187 = vmatmul.bf16.gmra.mxu1 %v11056_v62 }
 0x360   : > { %4241 = vmatmul.bf16.gmra.mxu2 %v11057_v12  ;;  %v5098_v26 = vmax.f32 %v3978_v63, 0.0 }
 0x361   : > { %4295 = vmatmul.bf16.gmra.mxu3 %v11058_v21  ;;  %v11060_v21 = vld [vmem:[#allocation16_spill] sm:$0xff] }
 0x362   : > { %5134 = vst [vmem:[%s9815_s18 + $0xe0] sm:$0xff] %v5098_v26  ;;  %v11059_v26 = vld [vmem:[#allocation15_spill] sm:$0xff] }
 0x363   : > { %v4031_v44 = vpop.f32.mrf.mxu2  ;;  %v3925_v51 = vpop.f32.mrf.mxu0 }
 0x364   : > { %v4085_v15 = vpop.f32.mrf.mxu3  ;;  %v3926_v27 = vadd.f32 %v3925_v51, %v9766_v36  ;;  %v3979_v52 = vpop.f32.mrf.mxu1  ;;  %v11061_v36 = vld [vmem:[#allocation45_spill] sm:$0xff] }
 0x365   : > { %v10073_v58 = vadd.f32 %v4085_v15, %v4031_v44  ;;  %v7452_v44 = vld [vmem:[%s10795_s1 + $0x6f4] sm:$0xf]  ;;  %v6805_v15 = vld [vmem:[%s10795_s1 + $0x6f8] sm:$0xf0] }
 0x366   : > { %v3980_v45 = vadd.f32 %v3979_v52, %v3926_v27  ;;  %v6808_v27 = vor.u32 %v7452_v44, %v6805_v15  ;;  %v6733_v44 = vld [vmem:[%s10795_s1 + $0x668] sm:$0xf0] }
 0x368   : > { %v5100_v4 = vmax.f32 %v3980_v45, 0.0  ;;  %4689 = vmatpush.bf16.msrb.mxu3 %v6808_v27 }
 0x36a   : > { %5136 = vst [vmem:[%s9815_s18 + $0xf0] sm:$0xff] %v5100_v4 }
 0x36b   : > { %v4033_v63 = vpop.f32.mrf.mxu2  ;;  %v3928_v56 = vpop.f32.mrf.mxu0 }
 0x36c   : > { %v4087_v18 = vpop.f32.mrf.mxu3  ;;  %v3929_v62 = vadd.f32 %v3928_v56, %v9797_v41  ;;  %v3982_v12 = vpop.f32.mrf.mxu1  ;;  %v6744_v41 = vor.u32 %v7436_v40, %v6741_v50  ;;  %v11063_v40 = vld [vmem:[#allocation17_spill] sm:$0xff]  ;;  %v11064_v50 = vld [vmem:[#allocation18_spill] sm:$0xff] }
 0x36d   : > { %v10077_v2 = vadd.f32 %v4087_v18, %v4033_v63  ;;  %v7420_v63 = vld [vmem:[%s10795_s1 + $0x5f4] sm:$0xf]  ;;  %v6677_v18 = vld [vmem:[%s10795_s1 + $0x5f8] sm:$0xf0] }
 0x36e   : > { %v3983_v13 = vadd.f32 %v3982_v12, %v3929_v62  ;;  %4138 = vmatmul.bf16.gmra.mxu0 %v11059_v26  ;;  %4635 = vmatpush.bf16.msrb.mxu2 %v6744_v41  ;;  %v6680_v62 = vor.u32 %v7420_v63, %v6677_v18  ;;  %v11065_v41 = vld [vmem:[#allocation49_spill] sm:$0xff]  ;;  %v6605_v63 = vld [vmem:[%s10795_s1 + $0x568] sm:$0xf0]  ;;  %v7450_v18 = vld [vmem:[%s10795_s1 + $0x6e4] sm:$0xf] }
 0x36f   : > { %4192 = vmatmul.bf16.gmra.mxu1 %v11060_v21 }
 0x370   : > { %4246 = vmatmul.bf16.gmra.mxu2 %v11061_v36  ;;  %v5102_v23 = vmax.f32 %v3983_v13, 0.0  ;;  %4581 = vmatpush.bf16.msrb.mxu1 %v6680_v62 }
 0x371   : > { %4300 = vmatmul.bf16.gmra.mxu3 %v11062_v16 }
 0x372   : > { %5138 = vst [vmem:[%s9815_s18 + $0x100] sm:$0xff] %v5102_v23 }
 0x373   : > { %v4036_v6 = vpop.f32.mrf.mxu2  ;;  %v3930_v54 = vpop.f32.mrf.mxu0 }
 0x374   : > { %v4090_v51 = vpop.f32.mrf.mxu3  ;;  %v3931_v45 = vadd.f32 %v3930_v54, %v9809_v47  ;;  %v3984_v4 = vpop.f32.mrf.mxu1 }
 0x375   : > { %v10103_v52 = vadd.f32 %v4090_v51, %v4036_v6  ;;  %v6736_v6 = vor.u32 %v7434_v49, %v6733_v44  ;;  %v11067_v44 = vld [vmem:[#allocation19_spill] sm:$0xff] }
 0x376   : > { %v3985_v56 = vadd.f32 %v3984_v4, %v3931_v45  ;;  %v7402_v4 = vld [vmem:[%s10795_s1 + $0x564] sm:$0xf] }
 0x377   : > { %4636 = vmatpush.bf16.msrb.mxu2 %v6736_v6  ;;  %v6608_v62 = vor.u32 %v7402_v4, %v6605_v63  ;;  %v11068_v6 = vld [vmem:[#allocation20_spill] sm:$0xff] }
 0x378   : > { %v5104_v12 = vmax.f32 %v3985_v56, 0.0 }
 0x379   : > { %4528 = vmatpush.bf16.msrb.mxu0 %v6608_v62 }
 0x37a   : > { %5140 = vst [vmem:[%s9815_s18 + $0x110] sm:$0xff] %v5104_v12  ;;  %v7418_v12 = vld [vmem:[%s10795_s1 + $0x5e4] sm:$0xf] }
 0x37b   : > { %v4038_v13 = vpop.f32.mrf.mxu2  ;;  %v4104_v21 = vpop.f32.mrf.mxu0 }
 0x37c   : > { %v4092_v26 = vpop.f32.mrf.mxu3  ;;  %v4105_v36 = vadd.f32 %v4104_v21, %v9827_v28  ;;  %v4158_v23 = vpop.f32.mrf.mxu1 }
 0x37d   : > { %v10113_v47 = vadd.f32 %v4092_v26, %v4038_v13  ;;  %v6669_v13 = vld [vmem:[%s10795_s1 + $0x5e8] sm:$0xf0] }
 0x37e   : > { %v4159_v16 = vadd.f32 %v4158_v23, %v4105_v36  ;;  %4143 = vmatmul.bf16.gmra.mxu0 %v11063_v40  ;;  %v6672_v21 = vor.u32 %v7418_v12, %v6669_v13  ;;  %v7400_v12 = vld [vmem:[%s10795_s1 + $0x554] sm:$0xf] }
 0x37f   : > { %4197 = vmatmul.bf16.gmra.mxu1 %v11064_v50  ;;  %v7448_v13 = vld [vmem:[%s10795_s1 + $0x6d4] sm:$0xf] }
 0x380   : > { %4251 = vmatmul.bf16.gmra.mxu2 %v11065_v41  ;;  %4582 = vmatpush.bf16.msrb.mxu1 %v6672_v21  ;;  %v6789_v21 = vld [vmem:[%s10795_s1 + $0x6d8] sm:$0xf0] }
 0x381   : > { %4305 = vmatmul.bf16.gmra.mxu3 %v11066_v48 }
 0x383   : > { %v4212_v28 = vpop.f32.mrf.mxu2  ;;  %v4106_v51 = vpop.f32.mrf.mxu0 }
 0x384   : > { %v4213_v17 = vadd.f32 %v4212_v28, %v4159_v16  ;;  %v4266_v15 = vpop.f32.mrf.mxu3  ;;  %v4107_v54 = vadd.f32 %v4106_v51, %v9849_v9  ;;  %v4160_v27 = vpop.f32.mrf.mxu1  ;;  %v6797_v9 = vld [vmem:[%s10795_s1 + $0x6e8] sm:$0xf0]  ;;  %v11069_v28 = vld [vmem:[#allocation53_spill] sm:$0xff] }
 0x385   : > { %v6800_v26 = vor.u32 %v7450_v18, %v6797_v9  ;;  %v7432_v18 = vld [vmem:[%s10795_s1 + $0x654] sm:$0xf] }
 0x386   : > { %v10127_v45 = vadd.f32 %v4266_v15, %v4213_v17  ;;  %v4161_v56 = vadd.f32 %v4160_v27, %v4107_v54  ;;  %v11070_v17 = vld [vmem:[#allocation54_spill] sm:$0xff] }
 0x387   : > { %4690 = vmatpush.bf16.msrb.mxu3 %v6800_v26 }
 0x38b   : > { %v4214_v36 = vpop.f32.mrf.mxu2  ;;  %v4109_v40 = vpop.f32.mrf.mxu0 }
 0x38c   : > { %v4215_v23 = vadd.f32 %v4214_v36, %v4161_v56  ;;  %v4268_v16 = vpop.f32.mrf.mxu3  ;;  %v4110_v50 = vadd.f32 %v4109_v40, %v9857_v46  ;;  %v4163_v41 = vpop.f32.mrf.mxu1  ;;  %v6725_v56 = vld [vmem:[%s10795_s1 + $0x658] sm:$0xf0]  ;;  %v7416_v36 = vld [vmem:[%s10795_s1 + $0x5d4] sm:$0xf] }
 0x38d   : > { %v6728_v9 = vor.u32 %v7432_v18, %v6725_v56 }
 0x38e   : > { %v10148_v48 = vadd.f32 %v4268_v16, %v4215_v23  ;;  %v4164_v49 = vadd.f32 %v4163_v41, %v4110_v50  ;;  %4319 = vmatmul.bf16.vlgmr.msra.gmra.mxu0 %v11067_v44  ;;  %v6661_v23 = vld [vmem:[%s10795_s1 + $0x5d8] sm:$0xf0]  ;;  %v6792_v16 = vor.u32 %v7448_v13, %v6789_v21  ;;  %v7430_v13 = vld [vmem:[%s10795_s1 + $0x644] sm:$0xf] }
 0x38f   : > { %4373 = vmatmul.bf16.vlgmr.msra.gmra.mxu1 %v11068_v6  ;;  %4637 = vmatpush.bf16.msrb.mxu2 %v6728_v9  ;;  %v6664_v40 = vor.u32 %v7416_v36, %v6661_v23  ;;  %v7398_v21 = vld [vmem:[%s10795_s1 + $0x544] sm:$0xf] }
 0x390   : > { %4427 = vmatmul.bf16.vlgmr.msra.gmra.mxu2 %v11069_v28  ;;  %4691 = vmatpush.bf16.msrb.mxu3 %v6792_v16  ;;  %v7446_v23 = vld [vmem:[%s10795_s1 + $0x6c4] sm:$0xf]  ;;  %v6781_v16 = vld [vmem:[%s10795_s1 + $0x6c8] sm:$0xf0] }
 0x391   : > { %4481 = vmatmul.bf16.vlgmr.msra.gmra.mxu3 %v11070_v17  ;;  %4583 = vmatpush.bf16.msrb.mxu1 %v6664_v40 }
 0x393   : > { %v4217_v15 = vpop.f32.mrf.mxu2  ;;  %v4111_v27 = vpop.f32.mrf.mxu0 }
 0x394   : > { %v4218_v51 = vadd.f32 %v4217_v15, %v4164_v49  ;;  %v4271_v54 = vpop.f32.mrf.mxu3  ;;  %v4112_v4 = vadd.f32 %v4111_v27, %v9882_v33  ;;  %v4165_v63 = vpop.f32.mrf.mxu1  ;;  %v6597_v33 = vld [vmem:[%s10795_s1 + $0x558] sm:$0xf0]  ;;  %v11073_v27 = vld [vmem:[#allocation57_spill] sm:$0xff] }
 0x395   : > { %v6600_v26 = vor.u32 %v7400_v12, %v6597_v33 }
 0x396   : > { %v10155_v46 = vadd.f32 %v4271_v54, %v4218_v51  ;;  %v4166_v62 = vadd.f32 %v4165_v63, %v4112_v4  ;;  %v11071_v51 = vld [vmem:[#allocation23_spill] sm:$0xff]  ;;  %v11072_v54 = vld [vmem:[#allocation24_spill] sm:$0xff]  ;;  %v11074_v4 = vld [vmem:[#allocation58_spill] sm:$0xff] }
 0x397   : > { %4529 = vmatpush.bf16.msrb.mxu0 %v6600_v26  ;;  %v6717_v26 = vld [vmem:[%s10795_s1 + $0x648] sm:$0xf0] }
 0x398   : > { %v6720_v36 = vor.u32 %v7430_v13, %v6717_v26 }
 0x39a   : > { %4638 = vmatpush.bf16.msrb.mxu2 %v6720_v36 }
 0x39b   : > { %v4219_v50 = vpop.f32.mrf.mxu2  ;;  %v4114_v44 = vpop.f32.mrf.mxu0 }
 0x39c   : > { %v4220_v41 = vadd.f32 %v4219_v50, %v4166_v62  ;;  %v4273_v49 = vpop.f32.mrf.mxu3  ;;  %v4115_v6 = vadd.f32 %v4114_v44, %v9893_v59  ;;  %v4168_v28 = vpop.f32.mrf.mxu1  ;;  %v6784_v50 = vor.u32 %v7446_v23, %v6781_v16  ;;  %v7428_v23 = vld [vmem:[%s10795_s1 + $0x634] sm:$0xf]  ;;  %v6709_v16 = vld [vmem:[%s10795_s1 + $0x638] sm:$0xf0] }
 0x39e   : > { %v10182_v17 = vadd.f32 %v4273_v49, %v4220_v41  ;;  %v4169_v15 = vadd.f32 %v4168_v28, %v4115_v6  ;;  %4324 = vmatmul.bf16.gmra.mxu0 %v11071_v51  ;;  %v7414_v41 = vld [vmem:[%s10795_s1 + $0x5c4] sm:$0xf]  ;;  %v6653_v49 = vld [vmem:[%s10795_s1 + $0x5c8] sm:$0xf0]  ;;  %4692 = vmatpush.bf16.msrb.mxu3 %v6784_v50  ;;  %v6712_v50 = vor.u32 %v7428_v23, %v6709_v16 }
 0x39f   : > { %4378 = vmatmul.bf16.gmra.mxu1 %v11072_v54  ;;  %v6656_v44 = vor.u32 %v7414_v41, %v6653_v49  ;;  %v7444_v41 = vld [vmem:[%s10795_s1 + $0x6b4] sm:$0xf]  ;;  %v6773_v49 = vld [vmem:[%s10795_s1 + $0x6b8] sm:$0xf0] }
 0x3a0   : > { %4432 = vmatmul.bf16.gmra.mxu2 %v11073_v27 }
 0x3a1   : > { %4486 = vmatmul.bf16.gmra.mxu3 %v11074_v4  ;;  %4584 = vmatpush.bf16.msrb.mxu1 %v6656_v44 }
 0x3a2   : > { %4639 = vmatpush.bf16.msrb.mxu2 %v6712_v50 }
 0x3a3   : > { %v4222_v63 = vpop.f32.mrf.mxu2  ;;  %v4116_v62 = vpop.f32.mrf.mxu0 }
 0x3a4   : > { %v4223_v18 = vadd.f32 %v4222_v63, %v4169_v15  ;;  %v4276_v56 = vpop.f32.mrf.mxu3  ;;  %v4117_v9 = vadd.f32 %v4116_v62, %v9912_v43  ;;  %v4170_v12 = vpop.f32.mrf.mxu1  ;;  %v6589_v43 = vld [vmem:[%s10795_s1 + $0x548] sm:$0xf0]  ;;  %v11077_v62 = vld [vmem:[#allocation61_spill] sm:$0xff] }
 0x3a5   : > { %v6592_v40 = vor.u32 %v7398_v21, %v6589_v43 }
 0x3a6   : > { %v10189_v59 = vadd.f32 %v4276_v56, %v4223_v18  ;;  %v4171_v33 = vadd.f32 %v4170_v12, %v4117_v9  ;;  %v11075_v18 = vld [vmem:[#allocation27_spill] sm:$0xff]  ;;  %v11076_v56 = vld [vmem:[#allocation28_spill] sm:$0xff]  ;;  %v11078_v9 = vld [vmem:[#allocation62_spill] sm:$0xff] }
 0x3a7   : > { %4530 = vmatpush.bf16.msrb.mxu0 %v6592_v40  ;;  %v7396_v40 = vld [vmem:[%s10795_s1 + $0x534] sm:$0xf] }
 0x3ab   : > { %v4224_v6 = vpop.f32.mrf.mxu2  ;;  %v4119_v51 = vpop.f32.mrf.mxu0 }
 0x3ac   : > { %v4225_v28 = vadd.f32 %v4224_v6, %v4171_v33  ;;  %v4278_v15 = vpop.f32.mrf.mxu3  ;;  %v4120_v54 = vadd.f32 %v4119_v51, %v9929_v14  ;;  %v4173_v27 = vpop.f32.mrf.mxu1  ;;  %v6776_v6 = vor.u32 %v7444_v41, %v6773_v49  ;;  %v7426_v41 = vld [vmem:[%s10795_s1 + $0x624] sm:$0xf]  ;;  %v6701_v49 = vld [vmem:[%s10795_s1 + $0x628] sm:$0xf0] }
 0x3ae   : > { %v10216_v4 = vadd.f32 %v4278_v15, %v4225_v28  ;;  %v4174_v63 = vadd.f32 %v4173_v27, %v4120_v54  ;;  %4329 = vmatmul.bf16.gmra.mxu0 %v11075_v18  ;;  %4693 = vmatpush.bf16.msrb.mxu3 %v6776_v6 }
 0x3af   : > { %4383 = vmatmul.bf16.gmra.mxu1 %v11076_v56  ;;  %v7412_v56 = vld [vmem:[%s10795_s1 + $0x5b4] sm:$0xf] }
 0x3b0   : > { %4437 = vmatmul.bf16.gmra.mxu2 %v11077_v62  ;;  %v6645_v62 = vld [vmem:[%s10795_s1 + $0x5b8] sm:$0xf0] }
 0x3b1   : > { %4491 = vmatmul.bf16.gmra.mxu3 %v11078_v9 }
 0x3b3   : > { %v4227_v12 = vpop.f32.mrf.mxu2  ;;  %v4121_v26 = vpop.f32.mrf.mxu0 }
 0x3b4   : > { %v4228_v13 = vadd.f32 %v4227_v12, %v4174_v63  ;;  %v4281_v33 = vpop.f32.mrf.mxu3  ;;  %v4122_v21 = vadd.f32 %v4121_v26, %v9948_v37  ;;  %v4175_v36 = vpop.f32.mrf.mxu1  ;;  %v6581_v37 = vld [vmem:[%s10795_s1 + $0x538] sm:$0xf0]  ;;  %v11079_v12 = vld [vmem:[#allocation31_spill] sm:$0xff]  ;;  %v11081_v26 = vld [vmem:[#allocation65_spill] sm:$0xff] }
 0x3b5   : > { %v6584_v44 = vor.u32 %v7396_v40, %v6581_v37 }
 0x3b6   : > { %v10223_v14 = vadd.f32 %v4281_v33, %v4228_v13  ;;  %v4176_v43 = vadd.f32 %v4175_v36, %v4122_v21  ;;  %v6648_v13 = vor.u32 %v7412_v56, %v6645_v62  ;;  %v11080_v33 = vld [vmem:[#allocation32_spill] sm:$0xff]  ;;  %v7442_v62 = vld [vmem:[%s10795_s1 + $0x6a4] sm:$0xf] }
 0x3b7   : > { %4531 = vmatpush.bf16.msrb.mxu0 %v6584_v44  ;;  %v6704_v44 = vor.u32 %v7426_v41, %v6701_v49  ;;  %v6573_v56 = vld [vmem:[%s10795_s1 + $0x528] sm:$0xf0] }
 0x3b8   : > { %4585 = vmatpush.bf16.msrb.mxu1 %v6648_v13 }
 0x3b9   : > { %4640 = vmatpush.bf16.msrb.mxu2 %v6704_v44 }
 0x3bb   : > { %v4229_v28 = vpop.f32.mrf.mxu2  ;;  %v4124_v54 = vpop.f32.mrf.mxu0 }
 0x3bc   : > { %v4230_v15 = vadd.f32 %v4229_v28, %v4176_v43  ;;  %v4283_v51 = vpop.f32.mrf.mxu3  ;;  %v4125_v27 = vadd.f32 %v4124_v54, %v9965_v0  ;;  %v4178_v63 = vpop.f32.mrf.mxu1  ;;  %v11082_v0 = vld [vmem:[#allocation66_spill] sm:$0xff] }
 0x3be   : > { %v10244_v18 = vadd.f32 %v4283_v51, %v4230_v15  ;;  %v4179_v9 = vadd.f32 %v4178_v63, %v4125_v27  ;;  %4334 = vmatmul.bf16.gmra.mxu0 %v11079_v12  ;;  %v7394_v63 = vld [vmem:[%s10795_s1 + $0x524] sm:$0xf] }
 0x3bf   : > { %4388 = vmatmul.bf16.gmra.mxu1 %v11080_v33  ;;  %v11083_v12 = vld [vmem:[#allocation35_spill] sm:$0xff]  ;;  %v6576_v13 = vor.u32 %v7394_v63, %v6573_v56 }
 0x3c0   : > { %4442 = vmatmul.bf16.gmra.mxu2 %v11081_v26  ;;  %v7410_v33 = vld [vmem:[%s10795_s1 + $0x5a4] sm:$0xf]  ;;  %v6637_v26 = vld [vmem:[%s10795_s1 + $0x5a8] sm:$0xf0] }
 0x3c1   : > { %4496 = vmatmul.bf16.gmra.mxu3 %v11082_v0  ;;  %v11084_v0 = vld [vmem:[#allocation36_spill] sm:$0xff]  ;;  %4532 = vmatpush.bf16.msrb.mxu0 %v6576_v13  ;;  %v11087_v13 = vld [vmem:[#allocation39_spill] sm:$0xff] }
 0x3c3   : > { %v4232_v21 = vpop.f32.mrf.mxu2  ;;  %v4126_v23 = vpop.f32.mrf.mxu0 }
 0x3c4   : > { %v4233_v36 = vadd.f32 %v4232_v21, %v4179_v9  ;;  %v4286_v43 = vpop.f32.mrf.mxu3  ;;  %v4127_v16 = vadd.f32 %v4126_v23, %v9975_v22  ;;  %v4180_v40 = vpop.f32.mrf.mxu1  ;;  %v11085_v21 = vld [vmem:[#allocation69_spill] sm:$0xff]  ;;  %v11086_v23 = vld [vmem:[#allocation70_spill] sm:$0xff] }
 0x3c6   : > { %v10257_v50 = vadd.f32 %v4286_v43, %v4233_v36  ;;  %v4181_v37 = vadd.f32 %v4180_v40, %v4127_v16  ;;  %v6640_v43 = vor.u32 %v7410_v33, %v6637_v26  ;;  %v7392_v33 = vld [vmem:[%s10795_s1 + $0x514] sm:$0xf] }
 0x3c7   : > { %v7440_v26 = vld [vmem:[%s10795_s1 + $0x694] sm:$0xf] }
 0x3c8   : > { %4586 = vmatpush.bf16.msrb.mxu1 %v6640_v43  ;;  %v6757_v43 = vld [vmem:[%s10795_s1 + $0x698] sm:$0xf0] }
 0x3cb   : > { %v4234_v6 = vpop.f32.mrf.mxu2  ;;  %v4129_v51 = vpop.f32.mrf.mxu0 }
 0x3cc   : > { %v4235_v28 = vadd.f32 %v4234_v6, %v4181_v37  ;;  %v4288_v15 = vpop.f32.mrf.mxu3  ;;  %v4130_v22 = vadd.f32 %v4129_v51, %v10001_v5  ;;  %v4183_v54 = vpop.f32.mrf.mxu1  ;;  %v6765_v5 = vld [vmem:[%s10795_s1 + $0x6a8] sm:$0xf0] }
 0x3cd   : > { %v6768_v36 = vor.u32 %v7442_v62, %v6765_v5 }
 0x3ce   : > { %v10266_v27 = vadd.f32 %v4288_v15, %v4235_v28  ;;  %v4184_v9 = vadd.f32 %v4183_v54, %v4130_v22  ;;  %4339 = vmatmul.bf16.gmra.mxu0 %v11083_v12 }
 0x3cf   : > { %4393 = vmatmul.bf16.gmra.mxu1 %v11084_v0  ;;  %4694 = vmatpush.bf16.msrb.mxu3 %v6768_v36  ;;  %v11088_v0 = vld [vmem:[#allocation40_spill] sm:$0xff] }
 0x3d0   : > { %4447 = vmatmul.bf16.gmra.mxu2 %v11085_v21  ;;  %v11089_v21 = vld [vmem:[#allocation73_spill] sm:$0xff] }
 0x3d1   : > { %4501 = vmatmul.bf16.gmra.mxu3 %v11086_v23  ;;  %v11090_v23 = vld [vmem:[#allocation74_spill] sm:$0xff] }
 0x3d3   : > { %v4237_v16 = vpop.f32.mrf.mxu2  ;;  %v4131_v41 = vpop.f32.mrf.mxu0 }
 0x3d4   : > { %v4238_v40 = vadd.f32 %v4237_v16, %v4184_v9  ;;  %v4291_v37 = vpop.f32.mrf.mxu3  ;;  %v4132_v49 = vadd.f32 %v4131_v41, %v10005_v55  ;;  %v4185_v44 = vpop.f32.mrf.mxu1  ;;  %v7424_v9 = vld [vmem:[%s10795_s1 + $0x614] sm:$0xf]  ;;  %v6693_v55 = vld [vmem:[%s10795_s1 + $0x618] sm:$0xf0]  ;;  %v6760_v16 = vor.u32 %v7440_v26, %v6757_v43 }
 0x3d5   : > { %v6696_v5 = vor.u32 %v7424_v9, %v6693_v55 }
 0x3d6   : > { %v10291_v6 = vadd.f32 %v4291_v37, %v4238_v40  ;;  %v4186_v28 = vadd.f32 %v4185_v44, %v4132_v49  ;;  %v7408_v40 = vld [vmem:[%s10795_s1 + $0x594] sm:$0xf]  ;;  %v6629_v37 = vld [vmem:[%s10795_s1 + $0x598] sm:$0xf0]  ;;  %4695 = vmatpush.bf16.msrb.mxu3 %v6760_v16  ;;  %v6557_v16 = vld [vmem:[%s10795_s1 + $0x508] sm:$0xf0] }
 0x3d7   : > { %4641 = vmatpush.bf16.msrb.mxu2 %v6696_v5  ;;  %v6632_v41 = vor.u32 %v7408_v40, %v6629_v37  ;;  %v7438_v40 = vld [vmem:[%s10795_s1 + $0x684] sm:$0xf] }
 0x3d9   : > { %4587 = vmatpush.bf16.msrb.mxu1 %v6632_v41  ;;  %v6749_v41 = vld [vmem:[%s10795_s1 + $0x688] sm:$0xf0] }
 0x3db   : > { %v4239_v15 = vpop.f32.mrf.mxu2  ;;  %v4134_v54 = vpop.f32.mrf.mxu0 }
 0x3dc   : > { %v4240_v51 = vadd.f32 %v4239_v15, %v4186_v28  ;;  %v4293_v22 = vpop.f32.mrf.mxu3  ;;  %v4135_v63 = vadd.f32 %v4134_v54, %v10034_v8  ;;  %v4188_v56 = vpop.f32.mrf.mxu1  ;;  %v6565_v8 = vld [vmem:[%s10795_s1 + $0x518] sm:$0xf0] }
 0x3dd   : > { %v6568_v36 = vor.u32 %v7392_v33, %v6565_v8 }
 0x3de   : > { %v10294_v62 = vadd.f32 %v4293_v22, %v4240_v51  ;;  %v4189_v12 = vadd.f32 %v4188_v56, %v4135_v63  ;;  %4344 = vmatmul.bf16.gmra.mxu0 %v11087_v13 }
 0x3df   : > { %4398 = vmatmul.bf16.gmra.mxu1 %v11088_v0  ;;  %4533 = vmatpush.bf16.msrb.mxu0 %v6568_v36  ;;  %v6685_v0 = vld [vmem:[%s10795_s1 + $0x608] sm:$0xf0]  ;;  %v11093_v36 = vld [vmem:[#allocation77_spill] sm:$0xff] }
 0x3e0   : > { %4452 = vmatmul.bf16.gmra.mxu2 %v11089_v21  ;;  %v11092_v21 = vld [vmem:[#allocation44_spill] sm:$0xff] }
 0x3e1   : > { %4506 = vmatmul.bf16.gmra.mxu3 %v11090_v23  ;;  %v7390_v23 = vld [vmem:[%s10795_s1 + $0x504] sm:$0xf] }
 0x3e2   : > { %v6560_v37 = vor.u32 %v7390_v23, %v6557_v16  ;;  %v11096_v23 = vld [vmem:[#allocation48_spill] sm:$0xff]  ;;  %v11098_v16 = vld [vmem:[#allocation82_spill] sm:$0xff] }
 0x3e3   : > { %v4242_v49 = vpop.f32.mrf.mxu2  ;;  %v4136_v15 = vpop.f32.mrf.mxu0 }
 0x3e4   : > { %v4243_v44 = vadd.f32 %v4242_v49, %v4189_v12  ;;  %v4296_v28 = vpop.f32.mrf.mxu3  ;;  %v4137_v51 = vadd.f32 %v4136_v15, %v10041_v60  ;;  %v4190_v22 = vpop.f32.mrf.mxu1  ;;  %v11091_v12 = vld [vmem:[#allocation43_spill] sm:$0xff]  ;;  %v6752_v15 = vor.u32 %v7438_v40, %v6749_v41  ;;  %4534 = vmatpush.bf16.msrb.mxu0 %v6560_v37  ;;  %v7500_v40 = vld [vmem:[%s10795_s1 + $0x874] sm:$0xf] }
 0x3e5   : > { %v7422_v60 = vld [vmem:[%s10795_s1 + $0x604] sm:$0xf]  ;;  %v7468_v37 = vld [vmem:[%s10795_s1 + $0x774] sm:$0xf] }
 0x3e6   : > { %v10325_v54 = vadd.f32 %v4296_v28, %v4243_v44  ;;  %v4191_v63 = vadd.f32 %v4190_v22, %v4137_v51  ;;  %v6688_v43 = vor.u32 %v7422_v60, %v6685_v0  ;;  %v7406_v49 = vld [vmem:[%s10795_s1 + $0x584] sm:$0xf]  ;;  %v6621_v44 = vld [vmem:[%s10795_s1 + $0x588] sm:$0xf0]  ;;  %4696 = vmatpush.bf16.msrb.mxu3 %v6752_v15 }
 0x3e7   : > { %v6624_v51 = vor.u32 %v7406_v49, %v6621_v44  ;;  %v6869_v49 = vld [vmem:[%s10795_s1 + $0x778] sm:$0xf0]  ;;  %v7516_v44 = vld [vmem:[%s10795_s1 + $0x8f4] sm:$0xf] }
 0x3e8   : > { %4642 = vmatpush.bf16.msrb.mxu2 %v6688_v43 }
 0x3e9   : > { %4588 = vmatpush.bf16.msrb.mxu1 %v6624_v51  ;;  %v6872_v51 = vor.u32 %v7468_v37, %v6869_v49  ;;  %v11100_v37 = vld [vmem:[#allocation52_spill] sm:$0xff]  ;;  %v11102_v49 = vld [vmem:[#allocation86_spill] sm:$0xff] }
 0x3eb   : > { %v4244_v56 = vpop.f32.mrf.mxu2  ;;  %v4139_v13 = vpop.f32.mrf.mxu0  ;;  %4743 = vmatpush.bf16.msra.mxu0 %v6872_v51 }
 0x3ec   : > { %v4245_v9 = vadd.f32 %v4244_v56, %v4191_v63  ;;  %v4298_v55 = vpop.f32.mrf.mxu3  ;;  %v4140_v5 = vadd.f32 %v4139_v13, %v10073_v58  ;;  %v4193_v33 = vpop.f32.mrf.mxu1  ;;  %v11094_v58 = vld [vmem:[#allocation78_spill] sm:$0xff] }
 0x3ee   : > { %v10328_v8 = vadd.f32 %v4298_v55, %v4245_v9  ;;  %v4194_v26 = vadd.f32 %v4193_v33, %v4140_v5  ;;  %4349 = vmatmul.bf16.gmra.mxu0 %v11091_v12 }
 0x3ef   : > { %4403 = vmatmul.bf16.gmra.mxu1 %v11092_v21 }
 0x3f0   : > { %4457 = vmatmul.bf16.gmra.mxu2 %v11093_v36 }
 0x3f1   : > { %4511 = vmatmul.bf16.gmra.mxu3 %v11094_v58  ;;  %v11095_v58 = vld [vmem:[#allocation47_spill] sm:$0xff] }
 0x3f3   : > { %v4247_v28 = vpop.f32.mrf.mxu2  ;;  %v4141_v56 = vpop.f32.mrf.mxu0 }
 0x3f4   : > { %v4248_v22 = vadd.f32 %v4247_v28, %v4194_v26  ;;  %v4301_v63 = vpop.f32.mrf.mxu3  ;;  %v4142_v9 = vadd.f32 %v4141_v56, %v10077_v2  ;;  %v4195_v55 = vpop.f32.mrf.mxu1  ;;  %v11097_v2 = vld [vmem:[#allocation81_spill] sm:$0xff]  ;;  %v7061_v28 = vld [vmem:[%s10795_s1 + $0x8f8] sm:$0xf0] }
 0x3f6   : > { %v10359_v13 = vadd.f32 %v4301_v63, %v4248_v22  ;;  %v4196_v5 = vadd.f32 %v4195_v55, %v4142_v9  ;;  %v7064_v22 = vor.u32 %v7516_v44, %v7061_v28  ;;  %v7498_v44 = vld [vmem:[%s10795_s1 + $0x864] sm:$0xf] }
 0x3f8   : > { %4905 = vmatpush.bf16.msra.mxu3 %v7064_v22 }
 0x3fb   : > { %v4249_v33 = vpop.f32.mrf.mxu2  ;;  %v4144_v0 = vpop.f32.mrf.mxu0 }
 0x3fc   : > { %v4250_v12 = vadd.f32 %v4249_v33, %v4196_v5  ;;  %v4303_v60 = vpop.f32.mrf.mxu3  ;;  %v4145_v21 = vadd.f32 %v4144_v0, %v10103_v52  ;;  %v4198_v36 = vpop.f32.mrf.mxu1  ;;  %v6997_v52 = vld [vmem:[%s10795_s1 + $0x878] sm:$0xf0] }
 0x3fd   : > { %v7000_v41 = vor.u32 %v7500_v40, %v6997_v52  ;;  %v11099_v52 = vld [vmem:[#allocation51_spill] sm:$0xff] }
 0x3fe   : > { %v10362_v43 = vadd.f32 %v4303_v60, %v4250_v12  ;;  %v4199_v26 = vadd.f32 %v4198_v36, %v4145_v21  ;;  %4354 = vmatmul.bf16.gmra.mxu0 %v11095_v58  ;;  %v7484_v12 = vld [vmem:[%s10795_s1 + $0x7f4] sm:$0xf]  ;;  %v6933_v60 = vld [vmem:[%s10795_s1 + $0x7f8] sm:$0xf0] }
 0x3ff   : > { %4408 = vmatmul.bf16.gmra.mxu1 %v11096_v23  ;;  %4851 = vmatpush.bf16.msra.mxu2 %v7000_v41  ;;  %v6936_v21 = vor.u32 %v7484_v12, %v6933_v60  ;;  %v11101_v41 = vld [vmem:[#allocation85_spill] sm:$0xff]  ;;  %v6861_v12 = vld [vmem:[%s10795_s1 + $0x768] sm:$0xf0]  ;;  %v7514_v60 = vld [vmem:[%s10795_s1 + $0x8e4] sm:$0xf] }
 0x400   : > { %4462 = vmatmul.bf16.gmra.mxu2 %v11097_v2 }
 0x401   : > { %4516 = vmatmul.bf16.gmra.mxu3 %v11098_v16  ;;  %4797 = vmatpush.bf16.msra.mxu1 %v6936_v21 }
 0x403   : > { %v4252_v15 = vpop.f32.mrf.mxu2  ;;  %v4146_v9 = vpop.f32.mrf.mxu0 }
 0x404   : > { %v4253_v63 = vadd.f32 %v4252_v15, %v4199_v26  ;;  %v4306_v56 = vpop.f32.mrf.mxu3  ;;  %v4147_v55 = vadd.f32 %v4146_v9, %v10113_v47  ;;  %v4200_v5 = vpop.f32.mrf.mxu1 }
 0x406   : > { %v10387_v33 = vadd.f32 %v4306_v56, %v4253_v63  ;;  %v4201_v0 = vadd.f32 %v4200_v5, %v4147_v55  ;;  %v7466_v5 = vld [vmem:[%s10795_s1 + $0x764] sm:$0xf] }
 0x407   : > { %v6864_v21 = vor.u32 %v7466_v5, %v6861_v12 }
 0x409   : > { %4744 = vmatpush.bf16.msra.mxu0 %v6864_v21 }
 0x40b   : > { %v4254_v36 = vpop.f32.mrf.mxu2  ;;  %v4320_v47 = vpop.f32.mrf.mxu0 }
 0x40c   : > { %v4255_v26 = vadd.f32 %v4254_v36, %v4201_v0  ;;  %v4308_v58 = vpop.f32.mrf.mxu3  ;;  %v4321_v23 = vadd.f32 %v4320_v47, %v10127_v45  ;;  %v4374_v2 = vpop.f32.mrf.mxu1  ;;  %v6989_v45 = vld [vmem:[%s10795_s1 + $0x868] sm:$0xf0]  ;;  %v7482_v36 = vld [vmem:[%s10795_s1 + $0x7e4] sm:$0xf] }
 0x40d   : > { %v6992_v28 = vor.u32 %v7498_v44, %v6989_v45  ;;  %v11103_v45 = vld [vmem:[#allocation55_spill] sm:$0xff] }
 0x40e   : > { %v10396_v16 = vadd.f32 %v4308_v58, %v4255_v26  ;;  %v4375_v40 = vadd.f32 %v4374_v2, %v4321_v23  ;;  %4359 = vmatmul.bf16.gmra.mxu0 %v11099_v52  ;;  %v6925_v26 = vld [vmem:[%s10795_s1 + $0x7e8] sm:$0xf0] }
 0x40f   : > { %4413 = vmatmul.bf16.gmra.mxu1 %v11100_v37  ;;  %4852 = vmatpush.bf16.msra.mxu2 %v6992_v28  ;;  %v6928_v47 = vor.u32 %v7482_v36, %v6925_v26  ;;  %v11104_v28 = vld [vmem:[#allocation56_spill] sm:$0xff]  ;;  %v7464_v36 = vld [vmem:[%s10795_s1 + $0x754] sm:$0xf] }
 0x410   : > { %4467 = vmatmul.bf16.gmra.mxu2 %v11101_v41  ;;  %v7512_v26 = vld [vmem:[%s10795_s1 + $0x8d4] sm:$0xf] }
 0x411   : > { %4521 = vmatmul.bf16.gmra.mxu3 %v11102_v49  ;;  %4798 = vmatpush.bf16.msra.mxu1 %v6928_v47  ;;  %v7045_v47 = vld [vmem:[%s10795_s1 + $0x8d8] sm:$0xf0] }
 0x413   : > { %v4428_v15 = vpop.f32.mrf.mxu2  ;;  %v4322_v63 = vpop.f32.mrf.mxu0 }
 0x414   : > { %v4429_v51 = vadd.f32 %v4428_v15, %v4375_v40  ;;  %v4482_v22 = vpop.f32.mrf.mxu3  ;;  %v4323_v56 = vadd.f32 %v4322_v63, %v10148_v48  ;;  %v4376_v9 = vpop.f32.mrf.mxu1  ;;  %v7053_v48 = vld [vmem:[%s10795_s1 + $0x8e8] sm:$0xf0]  ;;  %v11105_v15 = vld [vmem:[#allocation89_spill] sm:$0xff] }
 0x415   : > { %v7056_v58 = vor.u32 %v7514_v60, %v7053_v48  ;;  %v7496_v60 = vld [vmem:[%s10795_s1 + $0x854] sm:$0xf] }
 0x416   : > { %v10409_v55 = vadd.f32 %v4482_v22, %v4429_v51  ;;  %v4377_v0 = vadd.f32 %v4376_v9, %v4323_v56  ;;  %v11106_v51 = vld [vmem:[#allocation90_spill] sm:$0xff] }
 0x417   : > { %4906 = vmatpush.bf16.msra.mxu3 %v7056_v58 }
 0x41b   : > { %v4430_v23 = vpop.f32.mrf.mxu2  ;;  %v4325_v52 = vpop.f32.mrf.mxu0 }
 0x41c   : > { %v4431_v2 = vadd.f32 %v4430_v23, %v4377_v0  ;;  %v4484_v40 = vpop.f32.mrf.mxu3  ;;  %v4326_v37 = vadd.f32 %v4325_v52, %v10155_v46  ;;  %v4379_v41 = vpop.f32.mrf.mxu1  ;;  %v6981_v0 = vld [vmem:[%s10795_s1 + $0x858] sm:$0xf0]  ;;  %v7480_v23 = vld [vmem:[%s10795_s1 + $0x7d4] sm:$0xf] }
 0x41d   : > { %v6984_v48 = vor.u32 %v7496_v60, %v6981_v0 }
 0x41e   : > { %v10430_v49 = vadd.f32 %v4484_v40, %v4431_v2  ;;  %v4380_v44 = vadd.f32 %v4379_v41, %v4326_v37  ;;  %4535 = vmatmul.bf16.vlgmr.msrb.gmra.mxu0 %v11103_v45  ;;  %v6917_v2 = vld [vmem:[%s10795_s1 + $0x7d8] sm:$0xf0]  ;;  %v7048_v40 = vor.u32 %v7512_v26, %v7045_v47  ;;  %v7494_v26 = vld [vmem:[%s10795_s1 + $0x844] sm:$0xf] }
 0x41f   : > { %4589 = vmatmul.bf16.vlgmr.msrb.gmra.mxu1 %v11104_v28  ;;  %4853 = vmatpush.bf16.msra.mxu2 %v6984_v48  ;;  %v6920_v52 = vor.u32 %v7480_v23, %v6917_v2  ;;  %v7462_v47 = vld [vmem:[%s10795_s1 + $0x744] sm:$0xf] }
 0x420   : > { %4643 = vmatmul.bf16.vlgmr.msrb.gmra.mxu2 %v11105_v15  ;;  %4907 = vmatpush.bf16.msra.mxu3 %v7048_v40  ;;  %v7510_v2 = vld [vmem:[%s10795_s1 + $0x8c4] sm:$0xf]  ;;  %v7037_v40 = vld [vmem:[%s10795_s1 + $0x8c8] sm:$0xf0] }
 0x421   : > { %4697 = vmatmul.bf16.vlgmr.msrb.gmra.mxu3 %v11106_v51  ;;  %4799 = vmatpush.bf16.msra.mxu1 %v6920_v52 }
 0x423   : > { %v4433_v22 = vpop.f32.mrf.mxu2  ;;  %v4327_v9 = vpop.f32.mrf.mxu0 }
 0x424   : > { %v4434_v63 = vadd.f32 %v4433_v22, %v4380_v44  ;;  %v4487_v56 = vpop.f32.mrf.mxu3  ;;  %v4328_v5 = vadd.f32 %v4327_v9, %v10182_v17  ;;  %v4381_v12 = vpop.f32.mrf.mxu1  ;;  %v6853_v17 = vld [vmem:[%s10795_s1 + $0x758] sm:$0xf0]  ;;  %v11109_v9 = vld [vmem:[#allocation93_spill] sm:$0xff] }
 0x425   : > { %v6856_v58 = vor.u32 %v7464_v36, %v6853_v17 }
 0x426   : > { %v10437_v46 = vadd.f32 %v4487_v56, %v4434_v63  ;;  %v4382_v21 = vadd.f32 %v4381_v12, %v4328_v5  ;;  %v11107_v63 = vld [vmem:[#allocation59_spill] sm:$0xff]  ;;  %v11108_v56 = vld [vmem:[#allocation60_spill] sm:$0xff]  ;;  %v11110_v5 = vld [vmem:[#allocation94_spill] sm:$0xff] }
 0x427   : > { %4745 = vmatpush.bf16.msra.mxu0 %v6856_v58  ;;  %v6973_v58 = vld [vmem:[%s10795_s1 + $0x848] sm:$0xf0] }
 0x428   : > { %v6976_v23 = vor.u32 %v7494_v26, %v6973_v58 }
 0x42a   : > { %4854 = vmatpush.bf16.msra.mxu2 %v6976_v23 }
 0x42b   : > { %v4435_v37 = vpop.f32.mrf.mxu2  ;;  %v4330_v45 = vpop.f32.mrf.mxu0 }
 0x42c   : > { %v4436_v41 = vadd.f32 %v4435_v37, %v4382_v21  ;;  %v4489_v44 = vpop.f32.mrf.mxu3  ;;  %v4331_v28 = vadd.f32 %v4330_v45, %v10189_v59  ;;  %v4384_v15 = vpop.f32.mrf.mxu1  ;;  %v7040_v37 = vor.u32 %v7510_v2, %v7037_v40  ;;  %v7492_v2 = vld [vmem:[%s10795_s1 + $0x834] sm:$0xf]  ;;  %v6965_v40 = vld [vmem:[%s10795_s1 + $0x838] sm:$0xf0] }
 0x42e   : > { %v10464_v51 = vadd.f32 %v4489_v44, %v4436_v41  ;;  %v4385_v22 = vadd.f32 %v4384_v15, %v4331_v28  ;;  %4540 = vmatmul.bf16.gmra.mxu0 %v11107_v63  ;;  %v7478_v41 = vld [vmem:[%s10795_s1 + $0x7c4] sm:$0xf]  ;;  %v6909_v44 = vld [vmem:[%s10795_s1 + $0x7c8] sm:$0xf0]  ;;  %4908 = vmatpush.bf16.msra.mxu3 %v7040_v37  ;;  %v6968_v37 = vor.u32 %v7492_v2, %v6965_v40 }
 0x42f   : > { %4594 = vmatmul.bf16.gmra.mxu1 %v11108_v56  ;;  %v6912_v45 = vor.u32 %v7478_v41, %v6909_v44  ;;  %v7508_v41 = vld [vmem:[%s10795_s1 + $0x8b4] sm:$0xf]  ;;  %v7029_v44 = vld [vmem:[%s10795_s1 + $0x8b8] sm:$0xf0] }
 0x430   : > { %4648 = vmatmul.bf16.gmra.mxu2 %v11109_v9 }
 0x431   : > { %4702 = vmatmul.bf16.gmra.mxu3 %v11110_v5  ;;  %4800 = vmatpush.bf16.msra.mxu1 %v6912_v45 }
 0x432   : > { %4855 = vmatpush.bf16.msra.mxu2 %v6968_v37  ;;  %v7490_v37 = vld [vmem:[%s10795_s1 + $0x824] sm:$0xf] }
 0x433   : > { %v4438_v12 = vpop.f32.mrf.mxu2  ;;  %v4332_v21 = vpop.f32.mrf.mxu0 }
 0x434   : > { %v4439_v60 = vadd.f32 %v4438_v12, %v4385_v22  ;;  %v4492_v0 = vpop.f32.mrf.mxu3  ;;  %v4333_v48 = vadd.f32 %v4332_v21, %v10216_v4  ;;  %v4386_v36 = vpop.f32.mrf.mxu1  ;;  %v6845_v4 = vld [vmem:[%s10795_s1 + $0x748] sm:$0xf0]  ;;  %v11113_v21 = vld [vmem:[#allocation97_spill] sm:$0xff] }
 0x435   : > { %v6848_v52 = vor.u32 %v7462_v47, %v6845_v4 }
 0x436   : > { %v10471_v59 = vadd.f32 %v4492_v0, %v4439_v60  ;;  %v4387_v17 = vadd.f32 %v4386_v36, %v4333_v48  ;;  %v11111_v60 = vld [vmem:[#allocation63_spill] sm:$0xff]  ;;  %v11112_v0 = vld [vmem:[#allocation64_spill] sm:$0xff]  ;;  %v11114_v48 = vld [vmem:[#allocation98_spill] sm:$0xff] }
 0x437   : > { %4746 = vmatpush.bf16.msra.mxu0 %v6848_v52  ;;  %v7460_v52 = vld [vmem:[%s10795_s1 + $0x734] sm:$0xf] }
 0x43b   : > { %v4440_v28 = vpop.f32.mrf.mxu2  ;;  %v4335_v63 = vpop.f32.mrf.mxu0 }
 0x43c   : > { %v4441_v15 = vadd.f32 %v4440_v28, %v4387_v17  ;;  %v4494_v22 = vpop.f32.mrf.mxu3  ;;  %v4336_v56 = vadd.f32 %v4335_v63, %v10223_v14  ;;  %v4389_v9 = vpop.f32.mrf.mxu1  ;;  %v7032_v28 = vor.u32 %v7508_v41, %v7029_v44 }
 0x43e   : > { %v10498_v5 = vadd.f32 %v4494_v22, %v4441_v15  ;;  %v4390_v12 = vadd.f32 %v4389_v9, %v4336_v56  ;;  %4545 = vmatmul.bf16.gmra.mxu0 %v11111_v60  ;;  %4909 = vmatpush.bf16.msra.mxu3 %v7032_v28 }
 0x43f   : > { %4599 = vmatmul.bf16.gmra.mxu1 %v11112_v0  ;;  %v7476_v0 = vld [vmem:[%s10795_s1 + $0x7b4] sm:$0xf] }
 0x440   : > { %4653 = vmatmul.bf16.gmra.mxu2 %v11113_v21  ;;  %v6901_v21 = vld [vmem:[%s10795_s1 + $0x7b8] sm:$0xf0] }
 0x441   : > { %4707 = vmatmul.bf16.gmra.mxu3 %v11114_v48 }
 0x443   : > { %v4443_v36 = vpop.f32.mrf.mxu2  ;;  %v4337_v58 = vpop.f32.mrf.mxu0 }
 0x444   : > { %v4444_v26 = vadd.f32 %v4443_v36, %v4390_v12  ;;  %v4497_v17 = vpop.f32.mrf.mxu3  ;;  %v4338_v47 = vadd.f32 %v4337_v58, %v10244_v18  ;;  %v4391_v23 = vpop.f32.mrf.mxu1  ;;  %v6837_v18 = vld [vmem:[%s10795_s1 + $0x738] sm:$0xf0]  ;;  %v11115_v36 = vld [vmem:[#allocation67_spill] sm:$0xff] }
 0x445   : > { %v6840_v45 = vor.u32 %v7460_v52, %v6837_v18 }
 0x446   : > { %v10505_v14 = vadd.f32 %v4497_v17, %v4444_v26  ;;  %v4392_v4 = vadd.f32 %v4391_v23, %v4338_v47  ;;  %v6904_v26 = vor.u32 %v7476_v0, %v6901_v21  ;;  %v11116_v17 = vld [vmem:[#allocation68_spill] sm:$0xff]  ;;  %v7474_v21 = vld [vmem:[%s10795_s1 + $0x7a4] sm:$0xf] }
 0x447   : > { %4747 = vmatpush.bf16.msra.mxu0 %v6840_v45 }
 0x448   : > { %4801 = vmatpush.bf16.msra.mxu1 %v6904_v26 }
 0x44b   : > { %v4445_v15 = vpop.f32.mrf.mxu2  ;;  %v4340_v56 = vpop.f32.mrf.mxu0 }
 0x44c   : > { %v4446_v22 = vadd.f32 %v4445_v15, %v4392_v4  ;;  %v4499_v63 = vpop.f32.mrf.mxu3  ;;  %v4341_v9 = vadd.f32 %v4340_v56, %v10257_v50  ;;  %v4394_v12 = vpop.f32.mrf.mxu1  ;;  %v7506_v56 = vld [vmem:[%s10795_s1 + $0x8a4] sm:$0xf] }
 0x44e   : > { %v10526_v60 = vadd.f32 %v4499_v63, %v4446_v22  ;;  %v4395_v48 = vadd.f32 %v4394_v12, %v4341_v9  ;;  %4550 = vmatmul.bf16.gmra.mxu0 %v11115_v36  ;;  %v7458_v22 = vld [vmem:[%s10795_s1 + $0x724] sm:$0xf]  ;;  %v6829_v63 = vld [vmem:[%s10795_s1 + $0x728] sm:$0xf0] }
 0x44f   : > { %4604 = vmatmul.bf16.gmra.mxu1 %v11116_v17  ;;  %v11117_v12 = vld [vmem:[#allocation71_spill] sm:$0xff]  ;;  %v6832_v0 = vor.u32 %v7458_v22, %v6829_v63  ;;  %v11118_v36 = vld [vmem:[#allocation72_spill] sm:$0xff] }
 0x450   : > { %4658 = vmatmul.bf16.gmra.mxu2 %v9213_v34  ;;  %v6957_v34 = vld [vmem:[%s10795_s1 + $0x828] sm:$0xf0]  ;;  %v11120_v63 = vld [vmem:[#allocation75_spill] sm:$0xff] }
 0x451   : > { %4712 = vmatmul.bf16.gmra.mxu3 %v9215_v19  ;;  %v6960_v19 = vor.u32 %v7490_v37, %v6957_v34  ;;  %4748 = vmatpush.bf16.msra.mxu0 %v6832_v0  ;;  %v11121_v0 = vld [vmem:[#allocation76_spill] sm:$0xff] }
 0x453   : > { %v4448_v50 = vpop.f32.mrf.mxu2  ;;  %v4342_v23 = vpop.f32.mrf.mxu0  ;;  %4856 = vmatpush.bf16.msra.mxu2 %v6960_v19 }
 0x454   : > { %v4449_v58 = vadd.f32 %v4448_v50, %v4395_v48  ;;  %v4502_v47 = vpop.f32.mrf.mxu3  ;;  %v4343_v4 = vadd.f32 %v4342_v23, %v10266_v27  ;;  %v4396_v2 = vpop.f32.mrf.mxu1  ;;  %v6893_v48 = vld [vmem:[%s10795_s1 + $0x7a8] sm:$0xf0]  ;;  %v11119_v50 = vld [vmem:[#allocation103_spill] sm:$0xff] }
 0x455   : > { %v6896_v17 = vor.u32 %v7474_v21, %v6893_v48  ;;  %v7013_v48 = vld [vmem:[%s10795_s1 + $0x898] sm:$0xf0] }
 0x456   : > { %v10539_v40 = vadd.f32 %v4502_v47, %v4449_v58  ;;  %v4397_v52 = vadd.f32 %v4396_v2, %v4343_v4 }
 0x457   : > { %4802 = vmatpush.bf16.msra.mxu1 %v6896_v17  ;;  %v7472_v17 = vld [vmem:[%s10795_s1 + $0x794] sm:$0xf] }
 0x45b   : > { %v4450_v18 = vpop.f32.mrf.mxu2  ;;  %v4345_v45 = vpop.f32.mrf.mxu0 }
 0x45c   : > { %v4451_v41 = vadd.f32 %v4450_v18, %v4397_v52  ;;  %v4504_v44 = vpop.f32.mrf.mxu3  ;;  %v4346_v27 = vadd.f32 %v4345_v45, %v10291_v6  ;;  %v4399_v28 = vpop.f32.mrf.mxu1  ;;  %v7021_v6 = vld [vmem:[%s10795_s1 + $0x8a8] sm:$0xf0] }
 0x45d   : > { %v7024_v26 = vor.u32 %v7506_v56, %v7021_v6  ;;  %v11122_v6 = vld [vmem:[#allocation106_spill] sm:$0xff] }
 0x45e   : > { %v10548_v15 = vadd.f32 %v4504_v44, %v4451_v41  ;;  %v4400_v9 = vadd.f32 %v4399_v28, %v4346_v27  ;;  %4555 = vmatmul.bf16.gmra.mxu0 %v11117_v12  ;;  %v7488_v28 = vld [vmem:[%s10795_s1 + $0x814] sm:$0xf] }
 0x45f   : > { %4609 = vmatmul.bf16.gmra.mxu1 %v11118_v36  ;;  %4910 = vmatpush.bf16.msra.mxu3 %v7024_v26  ;;  %v7504_v12 = vld [vmem:[%s10795_s1 + $0x894] sm:$0xf]  ;;  %v11123_v36 = vld [vmem:[#allocation107_spill] sm:$0xff] }
 0x460   : > { %4663 = vmatmul.bf16.gmra.mxu2 %v9251_v20  ;;  %v7016_v26 = vor.u32 %v7504_v12, %v7013_v48  ;;  %v11126_v12 = vld [vmem:[#allocation110_spill] sm:$0xff]  ;;  %v7502_v48 = vld [vmem:[%s10795_s1 + $0x884] sm:$0xf] }
 0x461   : > { %4717 = vmatmul.bf16.gmra.mxu3 %v11119_v50  ;;  %v6885_v50 = vld [vmem:[%s10795_s1 + $0x798] sm:$0xf0] }
 0x463   : > { %v4453_v58 = vpop.f32.mrf.mxu2  ;;  %v4347_v4 = vpop.f32.mrf.mxu0  ;;  %4911 = vmatpush.bf16.msra.mxu3 %v7016_v26  ;;  %v7005_v26 = vld [vmem:[%s10795_s1 + $0x888] sm:$0xf0] }
 0x464   : > { %v4454_v47 = vadd.f32 %v4453_v58, %v4400_v9  ;;  %v4507_v23 = vpop.f32.mrf.mxu3  ;;  %v4348_v2 = vadd.f32 %v4347_v4, %v10294_v62  ;;  %v4401_v52 = vpop.f32.mrf.mxu1  ;;  %v6949_v62 = vld [vmem:[%s10795_s1 + $0x818] sm:$0xf0]  ;;  %v7456_v9 = vld [vmem:[%s10795_s1 + $0x714] sm:$0xf]  ;;  %v6888_v58 = vor.u32 %v7472_v17, %v6885_v50  ;;  %v7470_v17 = vld [vmem:[%s10795_s1 + $0x784] sm:$0xf] }
 0x465   : > { %v6952_v56 = vor.u32 %v7488_v28, %v6949_v62  ;;  %v6877_v50 = vld [vmem:[%s10795_s1 + $0x788] sm:$0xf0] }
 0x466   : > { %v10573_v37 = vadd.f32 %v4507_v23, %v4454_v47  ;;  %v4402_v34 = vadd.f32 %v4401_v52, %v4348_v2  ;;  %4803 = vmatpush.bf16.msra.mxu1 %v6888_v58 }
 0x467   : > { %4857 = vmatpush.bf16.msra.mxu2 %v6952_v56 }
 0x46b   : > { %v4455_v19 = vpop.f32.mrf.mxu2  ;;  %v4350_v41 = vpop.f32.mrf.mxu0 }
 0x46c   : > { %v4456_v18 = vadd.f32 %v4455_v19, %v4402_v34  ;;  %v4509_v20 = vpop.f32.mrf.mxu3  ;;  %v4351_v44 = vadd.f32 %v4350_v41, %v10325_v54  ;;  %v4404_v45 = vpop.f32.mrf.mxu1  ;;  %v6821_v54 = vld [vmem:[%s10795_s1 + $0x718] sm:$0xf0] }
 0x46d   : > { %v6824_v21 = vor.u32 %v7456_v9, %v6821_v54  ;;  %v6941_v9 = vld [vmem:[%s10795_s1 + $0x808] sm:$0xf0] }
 0x46e   : > { %v10576_v27 = vadd.f32 %v4509_v20, %v4456_v18  ;;  %v4405_v22 = vadd.f32 %v4404_v45, %v4351_v44  ;;  %4560 = vmatmul.bf16.gmra.mxu0 %v11120_v63  ;;  %v11125_v54 = vld [vmem:[#allocation80_spill] sm:$0xff] }
 0x46f   : > { %4614 = vmatmul.bf16.gmra.mxu1 %v11121_v0  ;;  %4749 = vmatpush.bf16.msra.mxu0 %v6824_v21  ;;  %v6813_v21 = vld [vmem:[%s10795_s1 + $0x708] sm:$0xf0] }
 0x470   : > { %4668 = vmatmul.bf16.gmra.mxu2 %v11122_v6  ;;  %v7454_v6 = vld [vmem:[%s10795_s1 + $0x704] sm:$0xf] }
 0x471   : > { %4722 = vmatmul.bf16.gmra.mxu3 %v11123_v36  ;;  %v6816_v36 = vor.u32 %v7454_v6, %v6813_v21 }
 0x473   : > { %v4458_v47 = vpop.f32.mrf.mxu2  ;;  %v4352_v2 = vpop.f32.mrf.mxu0  ;;  %4750 = vmatpush.bf16.msra.mxu0 %v6816_v36 }
 0x474   : > { %v4459_v23 = vadd.f32 %v4458_v47, %v4405_v22  ;;  %v4512_v4 = vpop.f32.mrf.mxu3  ;;  %v4353_v52 = vadd.f32 %v4352_v2, %v10328_v8  ;;  %v4406_v34 = vpop.f32.mrf.mxu1  ;;  %v11124_v22 = vld [vmem:[#allocation79_spill] sm:$0xff]  ;;  %v7008_v47 = vor.u32 %v7502_v48, %v7005_v26 }
 0x475   : > { %v7486_v8 = vld [vmem:[%s10795_s1 + $0x804] sm:$0xf] }
 0x476   : > { %v10607_v19 = vadd.f32 %v4512_v4, %v4459_v23  ;;  %v4407_v18 = vadd.f32 %v4406_v34, %v4353_v52  ;;  %v6944_v0 = vor.u32 %v7486_v8, %v6941_v9  ;;  %v6880_v23 = vor.u32 %v7470_v17, %v6877_v50  ;;  %4912 = vmatpush.bf16.msra.mxu3 %v7008_v47 }
 0x478   : > { %4858 = vmatpush.bf16.msra.mxu2 %v6944_v0  ;;  %4804 = vmatpush.bf16.msra.mxu1 %v6880_v23 }
 0x47b   : > { %v4460_v20 = vpop.f32.mrf.mxu2  ;;  %v4355_v45 = vpop.f32.mrf.mxu0 }
 0x47c   : > { %v4461_v41 = vadd.f32 %v4460_v20, %v4407_v18  ;;  %v4514_v44 = vpop.f32.mrf.mxu3  ;;  %v4356_v28 = vadd.f32 %v4355_v45, %v10359_v13  ;;  %v4409_v62 = vpop.f32.mrf.mxu1  ;;  %v11127_v13 = vld [vmem:[#allocation111_spill] sm:$0xff] }
 0x47e   : > { %v10610_v63 = vadd.f32 %v4514_v44, %v4461_v41  ;;  %v4410_v56 = vadd.f32 %v4409_v62, %v4356_v28  ;;  %4565 = vmatmul.bf16.gmra.mxu0 %v11124_v22 }
 0x47f   : > { %4619 = vmatmul.bf16.gmra.mxu1 %v11125_v54  ;;  %v11128_v54 = vld [vmem:[#allocation83_spill] sm:$0xff] }
 0x480   : > { %4673 = vmatmul.bf16.gmra.mxu2 %v11126_v12  ;;  %v11129_v12 = vld [vmem:[#allocation84_spill] sm:$0xff] }
 0x481   : > { %4727 = vmatmul.bf16.gmra.mxu3 %v11127_v13 }
 0x483   : > { %v4463_v58 = vpop.f32.mrf.mxu2  ;;  %v4357_v52 = vpop.f32.mrf.mxu0 }
 0x484   : > { %v4464_v4 = vadd.f32 %v4463_v58, %v4410_v56  ;;  %v4517_v2 = vpop.f32.mrf.mxu3  ;;  %v4358_v34 = vadd.f32 %v4357_v52, %v10362_v43  ;;  %v4411_v18 = vpop.f32.mrf.mxu1  ;;  %v11130_v43 = vld [vmem:[#allocation114_spill] sm:$0xff]  ;;  %v11131_v52 = vld [vmem:[#allocation87_spill] sm:$0xff] }
 0x486   : > { %v10641_v20 = vadd.f32 %v4517_v2, %v4464_v4  ;;  %v4412_v41 = vadd.f32 %v4411_v18, %v4358_v34  ;;  %v11132_v34 = vld [vmem:[#allocation88_spill] sm:$0xff] }
 0x48b   : > { %v4465_v44 = vpop.f32.mrf.mxu2  ;;  %v4360_v62 = vpop.f32.mrf.mxu0 }
 0x48c   : > { %v4466_v45 = vadd.f32 %v4465_v44, %v4412_v41  ;;  %v4519_v28 = vpop.f32.mrf.mxu3  ;;  %v4361_v22 = vadd.f32 %v4360_v62, %v10387_v33  ;;  %v4414_v8 = vpop.f32.mrf.mxu1 }
 0x48e   : > { %v10644_v9 = vadd.f32 %v4519_v28, %v4466_v45  ;;  %v4415_v56 = vadd.f32 %v4414_v8, %v4361_v22  ;;  %4570 = vmatmul.bf16.gmra.mxu0 %v11128_v54 }
 0x48f   : > { %4624 = vmatmul.bf16.gmra.mxu1 %v11129_v12 }
 0x490   : > { %4678 = vmatmul.bf16.gmra.mxu2 %v9395_v39 }
 0x491   : > { %4732 = vmatmul.bf16.gmra.mxu3 %v11130_v43 }
 0x493   : > { %v4468_v0 = vpop.f32.mrf.mxu2  ;;  %v4362_v21 = vpop.f32.mrf.mxu0 }
 0x494   : > { %v4469_v13 = vadd.f32 %v4468_v0, %v4415_v56  ;;  %v4522_v6 = vpop.f32.mrf.mxu3  ;;  %v4363_v48 = vadd.f32 %v4362_v21, %v10396_v16  ;;  %v4416_v36 = vpop.f32.mrf.mxu1  ;;  %v11133_v16 = vld [vmem:[#allocation117_spill] sm:$0xff]  ;;  %v11135_v21 = vld [vmem:[#allocation92_spill] sm:$0xff] }
 0x496   : > { %v10651_v33 = vadd.f32 %v4522_v6, %v4469_v13  ;;  %v4417_v26 = vadd.f32 %v4416_v36, %v4363_v48  ;;  %v11134_v6 = vld [vmem:[#allocation91_spill] sm:$0xff]  ;;  %v11136_v48 = vld [vmem:[#allocation120_spill] sm:$0xff] }
 0x49b   : > { %v4470_v17 = vpop.f32.mrf.mxu2  ;;  %v4536_v47 = vpop.f32.mrf.mxu0 }
 0x49c   : > { %v4471_v50 = vadd.f32 %v4470_v17, %v4417_v26  ;;  %v4524_v58 = vpop.f32.mrf.mxu3  ;;  %v4537_v23 = vadd.f32 %v4536_v47, %v10409_v55  ;;  %v4590_v4 = vpop.f32.mrf.mxu1 }
 0x49e   : > { %v10654_v39 = vadd.f32 %v4524_v58, %v4471_v50  ;;  %v4591_v2 = vadd.f32 %v4590_v4, %v4537_v23  ;;  %4575 = vmatmul.bf16.gmra.mxu0 %v11131_v52 }
 0x49f   : > { %4629 = vmatmul.bf16.gmra.mxu1 %v11132_v34 }
 0x4a0   : > { %4683 = vmatmul.bf16.gmra.mxu2 %v9445_v57 }
 0x4a1   : > { %4737 = vmatmul.bf16.gmra.mxu3 %v11133_v16 }
 0x4a3   : > { %v4644_v18 = vpop.f32.mrf.mxu2  ;;  %v4538_v45 = vpop.f32.mrf.mxu0 }
 0x4a4   : > { %v4645_v41 = vadd.f32 %v4644_v18, %v4591_v2  ;;  %v4698_v44 = vpop.f32.mrf.mxu3  ;;  %v4539_v28 = vadd.f32 %v4538_v45, %v10430_v49  ;;  %v4592_v62 = vpop.f32.mrf.mxu1  ;;  %v11137_v49 = vld [vmem:[#allocation121_spill] sm:$0xff]  ;;  %v11138_v45 = vld [vmem:[#allocation95_spill] sm:$0xff] }
 0x4a6   : > { %v10661_v55 = vadd.f32 %v4698_v44, %v4645_v41  ;;  %v4593_v22 = vadd.f32 %v4592_v62, %v4539_v28  ;;  %v11139_v28 = vld [vmem:[#allocation96_spill] sm:$0xff] }
 0x4ab   : > { %v4646_v8 = vpop.f32.mrf.mxu2  ;;  %v4541_v12 = vpop.f32.mrf.mxu0 }
 0x4ac   : > { %v4647_v56 = vadd.f32 %v4646_v8, %v4593_v22  ;;  %v4700_v54 = vpop.f32.mrf.mxu3  ;;  %v4542_v43 = vadd.f32 %v4541_v12, %v10437_v46  ;;  %v4595_v0 = vpop.f32.mrf.mxu1 }
 0x4ae   : > { %v10664_v57 = vadd.f32 %v4700_v54, %v4647_v56  ;;  %v4596_v13 = vadd.f32 %v4595_v0, %v4542_v43  ;;  %4751 = vmatmul.bf16.vlgmr.msra.gmra.mxu0 %v11134_v6 }
 0x4af   : > { %4805 = vmatmul.bf16.vlgmr.msra.gmra.mxu1 %v11135_v21 }
 0x4b0   : > { %4859 = vmatmul.bf16.vlgmr.msra.gmra.mxu2 %v11136_v48 }
 0x4b1   : > { %4913 = vmatmul.bf16.vlgmr.msra.gmra.mxu3 %v11137_v49  ;;  %v11140_v49 = vld [vmem:[#allocation99_spill] sm:$0xff] }
 0x4b3   : > { %v4649_v36 = vpop.f32.mrf.mxu2  ;;  %v4543_v50 = vpop.f32.mrf.mxu0 }
 0x4b4   : > { %v4650_v26 = vadd.f32 %v4649_v36, %v4596_v13  ;;  %v4703_v17 = vpop.f32.mrf.mxu3  ;;  %v4544_v58 = vadd.f32 %v4543_v50, %v10464_v51  ;;  %v4597_v47 = vpop.f32.mrf.mxu1  ;;  %v11141_v36 = vld [vmem:[#allocation100_spill] sm:$0xff] }
 0x4b6   : > { %v10671_v46 = vadd.f32 %v4703_v17, %v4650_v26  ;;  %v4598_v23 = vadd.f32 %v4597_v47, %v4544_v58 }
 0x4bb   : > { %v4651_v4 = vpop.f32.mrf.mxu2  ;;  %v4546_v34 = vpop.f32.mrf.mxu0 }
 0x4bc   : > { %v4652_v2 = vadd.f32 %v4651_v4, %v4598_v23  ;;  %v4705_v52 = vpop.f32.mrf.mxu3  ;;  %v4547_v16 = vadd.f32 %v4546_v34, %v10471_v59  ;;  %v4600_v18 = vpop.f32.mrf.mxu1 }
 0x4be   : > { %v10674_v41 = vadd.f32 %v4705_v52, %v4652_v2  ;;  %v4601_v44 = vadd.f32 %v4600_v18, %v4547_v16  ;;  %4756 = vmatmul.bf16.gmra.mxu0 %v11138_v45  ;;  %v11143_v45 = vld [vmem:[#allocation102_spill] sm:$0xff] }
 0x4bf   : > { %4810 = vmatmul.bf16.gmra.mxu1 %v11139_v28 }
 0x4c0   : > { %4864 = vmatmul.bf16.gmra.mxu2 %v9533_v42 }
 0x4c1   : > { %4918 = vmatmul.bf16.gmra.mxu3 %v9535_v32 }
 0x4c3   : > { %v4654_v51 = vpop.f32.mrf.mxu2  ;;  %v4548_v8 = vpop.f32.mrf.mxu0 }
 0x4c4   : > { %v4655_v62 = vadd.f32 %v4654_v51, %v4601_v44  ;;  %v4708_v22 = vpop.f32.mrf.mxu3  ;;  %v4549_v56 = vadd.f32 %v4548_v8, %v10498_v5  ;;  %v4602_v54 = vpop.f32.mrf.mxu1  ;;  %v11142_v44 = vld [vmem:[#allocation101_spill] sm:$0xff] }
 0x4c6   : > { %v10681_v59 = vadd.f32 %v4708_v22, %v4655_v62  ;;  %v4603_v12 = vadd.f32 %v4602_v54, %v4549_v56 }
 0x4cb   : > { %v4656_v43 = vpop.f32.mrf.mxu2  ;;  %v4551_v6 = vpop.f32.mrf.mxu0 }
 0x4cc   : > { %v4657_v0 = vadd.f32 %v4656_v43, %v4603_v12  ;;  %v4710_v13 = vpop.f32.mrf.mxu3  ;;  %v4552_v21 = vadd.f32 %v4551_v6, %v10505_v14  ;;  %v4605_v48 = vpop.f32.mrf.mxu1 }
 0x4ce   : > { %v10684_v42 = vadd.f32 %v4710_v13, %v4657_v0  ;;  %v4606_v32 = vadd.f32 %v4605_v48, %v4552_v21  ;;  %4761 = vmatmul.bf16.gmra.mxu0 %v11140_v49  ;;  %v11144_v21 = vld [vmem:[#allocation104_spill] sm:$0xff]  ;;  %v11145_v48 = vld [vmem:[#allocation105_spill] sm:$0xff] }
 0x4cf   : > { %4815 = vmatmul.bf16.gmra.mxu1 %v11141_v36 }
 0x4d0   : > { %4869 = vmatmul.bf16.gmra.mxu2 %v9575_v53 }
 0x4d1   : > { %4923 = vmatmul.bf16.gmra.mxu3 %v9577_v24 }
 0x4d3   : > { %v4659_v5 = vpop.f32.mrf.mxu2  ;;  %v4553_v50 = vpop.f32.mrf.mxu0 }
 0x4d4   : > { %v4660_v26 = vadd.f32 %v4659_v5, %v4606_v32  ;;  %v4713_v17 = vpop.f32.mrf.mxu3  ;;  %v4554_v58 = vadd.f32 %v4553_v50, %v10526_v60  ;;  %v4607_v47 = vpop.f32.mrf.mxu1 }
 0x4d6   : > { %v10691_v14 = vadd.f32 %v4713_v17, %v4660_v26  ;;  %v4608_v23 = vadd.f32 %v4607_v47, %v4554_v58 }
 0x4db   : > { %v4661_v4 = vpop.f32.mrf.mxu2  ;;  %v4556_v34 = vpop.f32.mrf.mxu0 }
 0x4dc   : > { %v4662_v2 = vadd.f32 %v4661_v4, %v4608_v23  ;;  %v4715_v52 = vpop.f32.mrf.mxu3  ;;  %v4557_v16 = vadd.f32 %v4556_v34, %v10539_v40  ;;  %v4610_v18 = vpop.f32.mrf.mxu1  ;;  %v11147_v34 = vld [vmem:[#allocation109_spill] sm:$0xff] }
 0x4de   : > { %v10694_v53 = vadd.f32 %v4715_v52, %v4662_v2  ;;  %v4611_v24 = vadd.f32 %v4610_v18, %v4557_v16  ;;  %4766 = vmatmul.bf16.gmra.mxu0 %v11142_v44  ;;  %v11146_v52 = vld [vmem:[#allocation108_spill] sm:$0xff] }
 0x4df   : > { %4820 = vmatmul.bf16.gmra.mxu1 %v11143_v45 }
 0x4e0   : > { %4874 = vmatmul.bf16.gmra.mxu2 %v9611_v7 }
 0x4e1   : > { %4928 = vmatmul.bf16.gmra.mxu3 %v9613_v10 }
 0x4e3   : > { %v4664_v60 = vpop.f32.mrf.mxu2  ;;  %v4558_v62 = vpop.f32.mrf.mxu0 }
 0x4e4   : > { %v4665_v28 = vadd.f32 %v4664_v60, %v4611_v24  ;;  %v4718_v51 = vpop.f32.mrf.mxu3  ;;  %v4559_v22 = vadd.f32 %v4558_v62, %v10548_v15  ;;  %v4612_v8 = vpop.f32.mrf.mxu1 }
 0x4e6   : > { %v10701_v40 = vadd.f32 %v4718_v51, %v4665_v28  ;;  %v4613_v56 = vadd.f32 %v4612_v8, %v4559_v22 }
 0x4eb   : > { %v4666_v54 = vpop.f32.mrf.mxu2  ;;  %v4561_v0 = vpop.f32.mrf.mxu0 }
 0x4ec   : > { %v4667_v12 = vadd.f32 %v4666_v54, %v4613_v56  ;;  %v4720_v43 = vpop.f32.mrf.mxu3  ;;  %v4562_v13 = vadd.f32 %v4561_v0, %v10573_v37  ;;  %v4615_v6 = vpop.f32.mrf.mxu1  ;;  %v11148_v54 = vld [vmem:[#allocation112_spill] sm:$0xff] }
 0x4ee   : > { %v10704_v7 = vadd.f32 %v4720_v43, %v4667_v12  ;;  %v4616_v10 = vadd.f32 %v4615_v6, %v4562_v13  ;;  %4771 = vmatmul.bf16.gmra.mxu0 %v11144_v21  ;;  %v11149_v12 = vld [vmem:[#allocation113_spill] sm:$0xff] }
 0x4ef   : > { %4825 = vmatmul.bf16.gmra.mxu1 %v11145_v48 }
 0x4f0   : > { %4879 = vmatmul.bf16.gmra.mxu2 %v9641_v30 }
 0x4f1   : > { %4933 = vmatmul.bf16.gmra.mxu3 %v9643_v11 }
 0x4f3   : > { %v4669_v15 = vpop.f32.mrf.mxu2  ;;  %v4563_v36 = vpop.f32.mrf.mxu0 }
 0x4f4   : > { %v4670_v32 = vadd.f32 %v4669_v15, %v4616_v10  ;;  %v4723_v49 = vpop.f32.mrf.mxu3  ;;  %v4564_v5 = vadd.f32 %v4563_v36, %v10576_v27  ;;  %v4617_v26 = vpop.f32.mrf.mxu1 }
 0x4f6   : > { %v10711_v37 = vadd.f32 %v4723_v49, %v4670_v32  ;;  %v4618_v17 = vadd.f32 %v4617_v26, %v4564_v5  ;;  %v11150_v26 = vld [vmem:[#allocation115_spill] sm:$0xff] }
 0x4fb   : > { %v4671_v50 = vpop.f32.mrf.mxu2  ;;  %v4566_v23 = vpop.f32.mrf.mxu0 }
 0x4fc   : > { %v4672_v58 = vadd.f32 %v4671_v50, %v4618_v17  ;;  %v4725_v47 = vpop.f32.mrf.mxu3  ;;  %v4567_v4 = vadd.f32 %v4566_v23, %v10607_v19  ;;  %v4620_v2 = vpop.f32.mrf.mxu1  ;;  %v11151_v17 = vld [vmem:[#allocation116_spill] sm:$0xff] }
 0x4fe   : > { %v10714_v30 = vadd.f32 %v4725_v47, %v4672_v58  ;;  %v4621_v11 = vadd.f32 %v4620_v2, %v4567_v4  ;;  %4776 = vmatmul.bf16.gmra.mxu0 %v11146_v52 }
 0x4ff   : > { %4830 = vmatmul.bf16.gmra.mxu1 %v11147_v34 }
 0x500   : > { %4884 = vmatmul.bf16.gmra.mxu2 %v9677_v61 }
 0x501   : > { %4938 = vmatmul.bf16.gmra.mxu3 %v9679_v35 }
 0x503   : > { %v4674_v27 = vpop.f32.mrf.mxu2  ;;  %v4568_v24 = vpop.f32.mrf.mxu0 }
 0x504   : > { %v4675_v16 = vadd.f32 %v4674_v27, %v4621_v11  ;;  %v4728_v18 = vpop.f32.mrf.mxu3  ;;  %v4569_v44 = vadd.f32 %v4568_v24, %v10610_v63  ;;  %v4622_v45 = vpop.f32.mrf.mxu1  ;;  %v11153_v24 = vld [vmem:[#allocation119_spill] sm:$0xff] }
 0x506   : > { %v10721_v19 = vadd.f32 %v4728_v18, %v4675_v16  ;;  %v4623_v60 = vadd.f32 %v4622_v45, %v4569_v44 }
 0x50b   : > { %v4676_v28 = vpop.f32.mrf.mxu2  ;;  %v4571_v22 = vpop.f32.mrf.mxu0 }
 0x50c   : > { %v4677_v51 = vadd.f32 %v4676_v28, %v4623_v60  ;;  %v4730_v62 = vpop.f32.mrf.mxu3  ;;  %v4572_v8 = vadd.f32 %v4571_v22, %v10641_v20  ;;  %v4625_v56 = vpop.f32.mrf.mxu1 }
 0x50e   : > { %v10724_v61 = vadd.f32 %v4730_v62, %v4677_v51  ;;  %v4626_v35 = vadd.f32 %v4625_v56, %v4572_v8  ;;  %4781 = vmatmul.bf16.gmra.mxu0 %v11148_v54 }
 0x50f   : > { %4835 = vmatmul.bf16.gmra.mxu1 %v11149_v12 }
 0x510   : > { %4889 = vmatmul.bf16.gmra.mxu2 %v9719_v38 }
 0x511   : > { %4943 = vmatmul.bf16.gmra.mxu3 %v9721_v25 }
 0x513   : > { %v4679_v63 = vpop.f32.mrf.mxu2  ;;  %v4573_v13 = vpop.f32.mrf.mxu0 }
 0x514   : > { %v4680_v43 = vadd.f32 %v4679_v63, %v4626_v35  ;;  %v4733_v0 = vpop.f32.mrf.mxu3  ;;  %v4574_v6 = vadd.f32 %v4573_v13, %v10644_v9  ;;  %v4627_v10 = vpop.f32.mrf.mxu1 }
 0x516   : > { %v10731_v20 = vadd.f32 %v4733_v0, %v4680_v43  ;;  %v4628_v21 = vadd.f32 %v4627_v10, %v4574_v6 }
 0x51b   : > { %v4681_v48 = vpop.f32.mrf.mxu2  ;;  %v4576_v49 = vpop.f32.mrf.mxu0 }
 0x51c   : > { %v4682_v15 = vadd.f32 %v4681_v48, %v4628_v21  ;;  %v4735_v32 = vpop.f32.mrf.mxu3  ;;  %v4577_v36 = vadd.f32 %v4576_v49, %v10651_v33  ;;  %v4630_v5 = vpop.f32.mrf.mxu1 }
 0x51e   : > { %v10734_v38 = vadd.f32 %v4735_v32, %v4682_v15  ;;  %v4631_v25 = vadd.f32 %v4630_v5, %v4577_v36  ;;  %4786 = vmatmul.bf16.gmra.mxu0 %v11150_v26 }
 0x51f   : > { %4840 = vmatmul.bf16.gmra.mxu1 %v11151_v17 }
 0x520   : > { %4894 = vmatmul.bf16.gmra.mxu2 %v9761_v3 }
 0x521   : > { %4948 = vmatmul.bf16.gmra.mxu3 %v9763_v29  ;;  %v11152_v29 = vld [vmem:[#allocation118_spill] sm:$0xff] }
 0x523   : > { %v4684_v9 = vpop.f32.mrf.mxu2  ;;  %v4578_v47 = vpop.f32.mrf.mxu0 }
 0x524   : > { %v4685_v50 = vadd.f32 %v4684_v9, %v4631_v25  ;;  %v4738_v58 = vpop.f32.mrf.mxu3  ;;  %v4579_v23 = vadd.f32 %v4578_v47, %v10654_v39  ;;  %v4632_v4 = vpop.f32.mrf.mxu1 }
 0x526   : > { %v10741_v33 = vadd.f32 %v4738_v58, %v4685_v50  ;;  %v4633_v2 = vadd.f32 %v4632_v4, %v4579_v23 }
 0x52b   : > { %v4686_v11 = vpop.f32.mrf.mxu2  ;;  %v4752_v27 = vpop.f32.mrf.mxu0 }
 0x52c   : > { %v4687_v52 = vadd.f32 %v4686_v11, %v4633_v2  ;;  %v4740_v34 = vpop.f32.mrf.mxu3  ;;  %v4806_v16 = vpop.f32.mrf.mxu1  ;;  %v4753_v3 = vadd.f32 %v4752_v27, %v10661_v55 }
 0x52e   : > { %v10743_v18 = vadd.f32 %v4740_v34, %v4687_v52  ;;  %4791 = vmatmul.bf16.gmra.mxu0 %v11152_v29  ;;  %v4807_v39 = vadd.f32 %v4806_v16, %v4753_v3 }
 0x52f   : > { %4845 = vmatmul.bf16.gmra.mxu1 %v11153_v24 }
 0x530   : > { %4899 = vmatmul.bf16.gmra.mxu2 %v9803_v31 }
 0x531   : > { %4953 = vmatmul.bf16.gmra.mxu3 %v9805_v1 }
 0x533   : > { %v4860_v44 = vpop.f32.mrf.mxu2  ;;  %v4754_v28 = vpop.f32.mrf.mxu0 }
 0x534   : > { %v4861_v45 = vadd.f32 %v4860_v44, %v4807_v39  ;;  %v4914_v60 = vpop.f32.mrf.mxu3  ;;  %v4808_v51 = vpop.f32.mrf.mxu1  ;;  %v4755_v22 = vadd.f32 %v4754_v28, %v10664_v57 }
 0x536   : > { %v4915_v62 = vadd.f32 %v4914_v60, %v4861_v45  ;;  %v4809_v55 = vadd.f32 %v4808_v51, %v4755_v22 }
 0x538   : > { %v5071_v8 = vmax.f32 %v4915_v62, 0.0 }
 0x53a   : > { %5107 = vst [vmem:[%s9815_s18 + $0x8] sm:$0xff] %v5071_v8 }
 0x53b   : > { %v4862_v56 = vpop.f32.mrf.mxu2  ;;  %v4757_v31 = vpop.f32.mrf.mxu0 }
 0x53c   : > { %v4863_v35 = vadd.f32 %v4862_v56, %v4809_v55  ;;  %v4916_v54 = vpop.f32.mrf.mxu3  ;;  %v4811_v12 = vpop.f32.mrf.mxu1  ;;  %v4758_v63 = vadd.f32 %v4757_v31, %v10671_v46 }
 0x53e   : > { %v4917_v1 = vadd.f32 %v4916_v54, %v4863_v35  ;;  %v4812_v0 = vadd.f32 %v4811_v12, %v4758_v63 }
 0x540   : > { %v5073_v43 = vmax.f32 %v4917_v1, 0.0 }
 0x542   : > { %5109 = vst [vmem:[%s9815_s18 + $0x18] sm:$0xff] %v5073_v43 }
 0x543   : > { %v4865_v13 = vpop.f32.mrf.mxu2  ;;  %v4759_v57 = vpop.f32.mrf.mxu0 }
 0x544   : > { %v4866_v6 = vadd.f32 %v4865_v13, %v4812_v0  ;;  %v4919_v10 = vpop.f32.mrf.mxu3  ;;  %v4813_v21 = vpop.f32.mrf.mxu1  ;;  %v4760_v15 = vadd.f32 %v4759_v57, %v10674_v41 }
 0x546   : > { %v4920_v48 = vadd.f32 %v4919_v10, %v4866_v6  ;;  %v4814_v49 = vadd.f32 %v4813_v21, %v4760_v15 }
 0x548   : > { %v5075_v32 = vmax.f32 %v4920_v48, 0.0 }
 0x54a   : > { %5111 = vst [vmem:[%s9815_s18 + $0x28] sm:$0xff] %v5075_v32 }
 0x54b   : > { %v4867_v36 = vpop.f32.mrf.mxu2  ;;  %v4762_v46 = vpop.f32.mrf.mxu0 }
 0x54c   : > { %v4868_v5 = vadd.f32 %v4867_v36, %v4814_v49  ;;  %v4921_v25 = vpop.f32.mrf.mxu3  ;;  %v4816_v26 = vpop.f32.mrf.mxu1  ;;  %v4763_v9 = vadd.f32 %v4762_v46, %v10681_v59 }
 0x54e   : > { %v4922_v17 = vadd.f32 %v4921_v25, %v4868_v5  ;;  %v4817_v58 = vadd.f32 %v4816_v26, %v4763_v9 }
 0x550   : > { %v5077_v50 = vmax.f32 %v4922_v17, 0.0 }
 0x552   : > { %5113 = vst [vmem:[%s9815_s18 + $0x38] sm:$0xff] %v5077_v50 }
 0x553   : > { %v4870_v47 = vpop.f32.mrf.mxu2  ;;  %v4764_v41 = vpop.f32.mrf.mxu0 }
 0x554   : > { %v4871_v23 = vadd.f32 %v4870_v47, %v4817_v58  ;;  %v4924_v4 = vpop.f32.mrf.mxu3  ;;  %v4818_v2 = vpop.f32.mrf.mxu1  ;;  %v4765_v52 = vadd.f32 %v4764_v41, %v10684_v42 }
 0x556   : > { %v4925_v11 = vadd.f32 %v4924_v4, %v4871_v23  ;;  %v4819_v27 = vadd.f32 %v4818_v2, %v4765_v52 }
 0x558   : > { %v5079_v34 = vmax.f32 %v4925_v11, 0.0 }
 0x55a   : > { %5115 = vst [vmem:[%s9815_s18 + $0x48] sm:$0xff] %v5079_v34 }
 0x55b   : > { %v4872_v16 = vpop.f32.mrf.mxu2  ;;  %v4767_v59 = vpop.f32.mrf.mxu0 }
 0x55c   : > { %v4873_v3 = vadd.f32 %v4872_v16, %v4819_v27  ;;  %v4926_v29 = vpop.f32.mrf.mxu3  ;;  %v4821_v24 = vpop.f32.mrf.mxu1  ;;  %v4768_v44 = vadd.f32 %v4767_v59, %v10691_v14 }
 0x55e   : > { %v4927_v39 = vadd.f32 %v4926_v29, %v4873_v3  ;;  %v4822_v60 = vadd.f32 %v4821_v24, %v4768_v44 }
 0x560   : > { %v5081_v45 = vmax.f32 %v4927_v39, 0.0 }
 0x562   : > { %5117 = vst [vmem:[%s9815_s18 + $0x58] sm:$0xff] %v5081_v45 }
 0x563   : > { %v4875_v28 = vpop.f32.mrf.mxu2  ;;  %v4769_v42 = vpop.f32.mrf.mxu0 }
 0x564   : > { %v4876_v51 = vadd.f32 %v4875_v28, %v4822_v60  ;;  %v4929_v62 = vpop.f32.mrf.mxu3  ;;  %v4823_v22 = vpop.f32.mrf.mxu1  ;;  %v4770_v55 = vadd.f32 %v4769_v42, %v10694_v53 }
 0x566   : > { %v4930_v8 = vadd.f32 %v4929_v62, %v4876_v51  ;;  %v4824_v35 = vadd.f32 %v4823_v22, %v4770_v55 }
 0x568   : > { %v5083_v56 = vmax.f32 %v4930_v8, 0.0 }
 0x56a   : > { %5119 = vst [vmem:[%s9815_s18 + $0x68] sm:$0xff] %v5083_v56 }
 0x56b   : > { %v4877_v54 = vpop.f32.mrf.mxu2  ;;  %v4772_v14 = vpop.f32.mrf.mxu0 }
 0x56c   : > { %v4878_v31 = vadd.f32 %v4877_v54, %v4824_v35  ;;  %v4931_v12 = vpop.f32.mrf.mxu3  ;;  %v4826_v1 = vpop.f32.mrf.mxu1  ;;  %v4773_v43 = vadd.f32 %v4772_v14, %v10701_v40 }
 0x56e   : > { %v4932_v63 = vadd.f32 %v4931_v12, %v4878_v31  ;;  %v4827_v13 = vadd.f32 %v4826_v1, %v4773_v43 }
 0x570   : > { %v5085_v0 = vmax.f32 %v4932_v63, 0.0 }
 0x572   : > { %5121 = vst [vmem:[%s9815_s18 + $0x78] sm:$0xff] %v5085_v0 }
 0x573   : > { %v4880_v6 = vpop.f32.mrf.mxu2  ;;  %v4774_v53 = vpop.f32.mrf.mxu0 }
 0x574   : > { %v4881_v10 = vadd.f32 %v4880_v6, %v4827_v13  ;;  %v4934_v57 = vpop.f32.mrf.mxu3  ;;  %v4828_v21 = vpop.f32.mrf.mxu1  ;;  %v4775_v15 = vadd.f32 %v4774_v53, %v10704_v7 }
 0x576   : > { %v4935_v48 = vadd.f32 %v4934_v57, %v4881_v10  ;;  %v4829_v49 = vadd.f32 %v4828_v21, %v4775_v15 }
 0x578   : > { %v5087_v32 = vmax.f32 %v4935_v48, 0.0 }
 0x57a   : > { %5123 = vst [vmem:[%s9815_s18 + $0x88] sm:$0xff] %v5087_v32 }
 0x57b   : > { %v4882_v36 = vpop.f32.mrf.mxu2  ;;  %v4777_v40 = vpop.f32.mrf.mxu0 }
 0x57c   : > { %v4883_v5 = vadd.f32 %v4882_v36, %v4829_v49  ;;  %v4936_v25 = vpop.f32.mrf.mxu3  ;;  %v4831_v46 = vpop.f32.mrf.mxu1  ;;  %v4778_v17 = vadd.f32 %v4777_v40, %v10711_v37 }
 0x57e   : > { %v4937_v26 = vadd.f32 %v4936_v25, %v4883_v5  ;;  %v4832_v50 = vadd.f32 %v4831_v46, %v4778_v17 }
 0x580   : > { %v5089_v9 = vmax.f32 %v4937_v26, 0.0 }
 0x582   : > { %5125 = vst [vmem:[%s9815_s18 + $0x98] sm:$0xff] %v5089_v9 }
 0x583   : > { %v4885_v58 = vpop.f32.mrf.mxu2  ;;  %v4779_v7 = vpop.f32.mrf.mxu0 }
 0x584   : > { %v4886_v47 = vadd.f32 %v4885_v58, %v4832_v50  ;;  %v4939_v23 = vpop.f32.mrf.mxu3  ;;  %v4833_v4 = vpop.f32.mrf.mxu1  ;;  %v4780_v2 = vadd.f32 %v4779_v7, %v10714_v30 }
 0x586   : > { %v4940_v41 = vadd.f32 %v4939_v23, %v4886_v47  ;;  %v4834_v52 = vadd.f32 %v4833_v4, %v4780_v2 }
 0x588   : > { %v5091_v11 = vmax.f32 %v4940_v41, 0.0 }
 0x58a   : > { %5127 = vst [vmem:[%s9815_s18 + $0xa8] sm:$0xff] %v5091_v11 }
 0x58b   : > { %v4887_v34 = vpop.f32.mrf.mxu2  ;;  %v4782_v37 = vpop.f32.mrf.mxu0 }
 0x58c   : > { %v4888_v27 = vadd.f32 %v4887_v34, %v4834_v52  ;;  %v4941_v16 = vpop.f32.mrf.mxu3  ;;  %v4836_v3 = vpop.f32.mrf.mxu1  ;;  %v4783_v59 = vadd.f32 %v4782_v37, %v10721_v19 }
 0x58e   : > { %v4942_v29 = vadd.f32 %v4941_v16, %v4888_v27  ;;  %v4837_v39 = vadd.f32 %v4836_v3, %v4783_v59 }
 0x590   : > { %v5093_v24 = vmax.f32 %v4942_v29, 0.0 }
 0x592   : > { %5129 = vst [vmem:[%s9815_s18 + $0xb8] sm:$0xff] %v5093_v24 }
 0x593   : > { %v4890_v44 = vpop.f32.mrf.mxu2  ;;  %v4784_v30 = vpop.f32.mrf.mxu0 }
 0x594   : > { %v4891_v45 = vadd.f32 %v4890_v44, %v4837_v39  ;;  %v4944_v60 = vpop.f32.mrf.mxu3  ;;  %v4838_v28 = vpop.f32.mrf.mxu1  ;;  %v4785_v62 = vadd.f32 %v4784_v30, %v10724_v61 }
 0x596   : > { %v4945_v51 = vadd.f32 %v4944_v60, %v4891_v45  ;;  %v4839_v22 = vadd.f32 %v4838_v28, %v4785_v62 }
 0x598   : > { %v5095_v42 = vmax.f32 %v4945_v51, 0.0 }
 0x59a   : > { %5131 = vst [vmem:[%s9815_s18 + $0xc8] sm:$0xff] %v5095_v42 }
 0x59b   : > { %v4892_v8 = vpop.f32.mrf.mxu2  ;;  %v4787_v19 = vpop.f32.mrf.mxu0 }
 0x59c   : > { %v4893_v55 = vadd.f32 %v4892_v8, %v4839_v22  ;;  %v4946_v56 = vpop.f32.mrf.mxu3  ;;  %v4841_v35 = vpop.f32.mrf.mxu1  ;;  %v4788_v31 = vadd.f32 %v4787_v19, %v10731_v20 }
 0x59e   : > { %v4947_v54 = vadd.f32 %v4946_v56, %v4893_v55  ;;  %v4842_v14 = vadd.f32 %v4841_v35, %v4788_v31 }
 0x5a0   : > { %v5097_v12 = vmax.f32 %v4947_v54, 0.0 }
 0x5a2   : > { %5133 = vst [vmem:[%s9815_s18 + $0xd8] sm:$0xff] %v5097_v12 }
 0x5a3   : > { %v4895_v1 = vpop.f32.mrf.mxu2  ;;  %v4789_v61 = vpop.f32.mrf.mxu0 }
 0x5a4   : > { %v4896_v63 = vadd.f32 %v4895_v1, %v4842_v14  ;;  %v4949_v43 = vpop.f32.mrf.mxu3  ;;  %v4843_v0 = vpop.f32.mrf.mxu1  ;;  %v4790_v6 = vadd.f32 %v4789_v61, %v10734_v38 }
 0x5a6   : > { %v4950_v13 = vadd.f32 %v4949_v43, %v4896_v63  ;;  %v4844_v57 = vadd.f32 %v4843_v0, %v4790_v6 }
 0x5a8   : > { %v5099_v10 = vmax.f32 %v4950_v13, 0.0 }
 0x5aa   : > { %5135 = vst [vmem:[%s9815_s18 + $0xe8] sm:$0xff] %v5099_v10 }
 0x5ab   : > { %v4897_v53 = vpop.f32.mrf.mxu2  ;;  %v4792_v20 = vpop.f32.mrf.mxu0 }
 0x5ac   : > { %v4898_v21 = vadd.f32 %v4897_v53, %v4844_v57  ;;  %v4951_v48 = vpop.f32.mrf.mxu3  ;;  %v4793_v32 = vadd.f32 %v4792_v20, %v10741_v33  ;;  %v4846_v49 = vpop.f32.mrf.mxu1 }
 0x5ae   : > { %v4952_v15 = vadd.f32 %v4951_v48, %v4898_v21  ;;  %v4847_v5 = vadd.f32 %v4846_v49, %v4793_v32 }
 0x5b0   : > { %v5101_v36 = vmax.f32 %v4952_v15, 0.0 }
 0x5b2   : > { %5137 = vst [vmem:[%s9815_s18 + $0xf8] sm:$0xff] %v5101_v36 }
 0x5b3   : > { %v4900_v25 = vpop.f32.mrf.mxu2  ;;  %v4794_v38 = vpop.f32.mrf.mxu0 }
 0x5b4   : > { %v4901_v40 = vadd.f32 %v4900_v25, %v4847_v5  ;;  %v4954_v46 = vpop.f32.mrf.mxu3  ;;  %v4795_v17 = vadd.f32 %v4794_v38, %v10743_v18  ;;  %v4848_v50 = vpop.f32.mrf.mxu1 }
 0x5b6   : > { %v4955_v26 = vadd.f32 %v4954_v46, %v4901_v40  ;;  %v4849_v58 = vadd.f32 %v4848_v50, %v4795_v17 }
 0x5b8   : > { %v5103_v9 = vmax.f32 %v4955_v26, 0.0 }
 0x5ba   : > { %5139 = vst [vmem:[%s9815_s18 + $0x108] sm:$0xff] %v5103_v9 }
 0x5bb   : > { %v4902_v47 = vpop.f32.mrf.mxu2 }
 0x5bc   : > { %v4903_v23 = vadd.f32 %v4902_v47, %v4849_v58  ;;  %v4956_v7 = vpop.f32.mrf.mxu3 }
 0x5be   : > { %v4957_v33 = vadd.f32 %v4956_v7, %v4903_v23 }
 0x5c0   : > { %v5105_v4 = vmax.f32 %v4957_v33, 0.0 }
 0x5c2   : > { %5141 = vst [vmem:[%s9815_s18 + $0x118] sm:$0xff] %v5105_v4 }
 0x5c3 PF: > { %s12_s11 = sadd.s32 1, %s7565_s11   ;;  %s11154_s9 = smov %s7561_s10 }
 0x5c4   : > { %p9_p5 = scmp.ge.s32.totalorder %s12_s11, 4   ;;  %s11155_s10 = smov %s11157_s12 }
 0x5c6   :  { %11 = sbr.rel (!%p9_p5) target bundleno = 2 (0x2), region = 69 }

// kernel: network_forward.7
= control target key start
LH: loop header
LB: loop body
LE: loop exit
PB: predicated region body
PF: predicated region fallthrough
CT: control target
= control target key end

     0   :  { %s1248_s1 = inlined_call_operand.vmem [shape: bf16[1024,128], index: 1, kind: input, shape index: {}]   ;;  %s1249_s2 = inlined_call_operand.vmem [shape: f32[1,128], index: 2, kind: input, shape index: {}]   ;;  %s1250_s0 = inlined_call_operand.vmem [shape: bf16[8,1024], index: 0, kind: input, shape index: {}]   ;;  %s1251_s3 = inlined_call_operand.vmem [shape: f32[8,128], index: 3, kind: output, shape index: {}]  }
   0x1   :  { %v956_v0 = vld [vmem:[%s1248_s1 + $0x38] sm:$0xff]  ;;  %v955_v4 = vld [vmem:[%s1248_s1 + $0x30] sm:$0xff]  ;;  %v954_v8 = vld [vmem:[%s1248_s1 + $0x28] sm:$0xff] }
   0x2   :  { %v964_v1 = vld [vmem:[%s1248_s1 + $0x78] sm:$0xff]  ;;  %562 = vmatpush.bf16.msra.mxu0 %v956_v0  ;;  %v963_v5 = vld [vmem:[%s1248_s1 + $0x70] sm:$0xff]  ;;  %v962_v9 = vld [vmem:[%s1248_s1 + $0x68] sm:$0xff] }
   0x3   :  { %v972_v2 = vld [vmem:[%s1248_s1 + $0xb8] sm:$0xff]  ;;  %575 = vmatpush.bf16.msra.mxu1 %v964_v1  ;;  %v971_v6 = vld [vmem:[%s1248_s1 + $0xb0] sm:$0xff]  ;;  %v970_v10 = vld [vmem:[%s1248_s1 + $0xa8] sm:$0xff] }
   0x4   :  { %v980_v3 = vld [vmem:[%s1248_s1 + $0xf8] sm:$0xff]  ;;  %588 = vmatpush.bf16.msra.mxu2 %v972_v2  ;;  %v979_v7 = vld [vmem:[%s1248_s1 + $0xf0] sm:$0xff]  ;;  %v978_v11 = vld [vmem:[%s1248_s1 + $0xe8] sm:$0xff] }
   0x5   :  { %601 = vmatpush.bf16.msra.mxu3 %v980_v3  ;;  %v953_v12 = vld [vmem:[%s1248_s1 + $0x20] sm:$0xff]  ;;  %v952_v16 = vld [vmem:[%s1248_s1 + $0x18] sm:$0xff]  ;;  %v951_v20 = vld [vmem:[%s1248_s1 + $0x10] sm:$0xff] }
   0x6   :  { %563 = vmatpush.bf16.msra.mxu0 %v955_v4  ;;  %v961_v13 = vld [vmem:[%s1248_s1 + $0x60] sm:$0xff]  ;;  %v960_v17 = vld [vmem:[%s1248_s1 + $0x58] sm:$0xff]  ;;  %v959_v21 = vld [vmem:[%s1248_s1 + $0x50] sm:$0xff] }
   0x7   :  { %576 = vmatpush.bf16.msra.mxu1 %v963_v5  ;;  %v969_v14 = vld [vmem:[%s1248_s1 + $0xa0] sm:$0xff]  ;;  %v968_v18 = vld [vmem:[%s1248_s1 + $0x98] sm:$0xff]  ;;  %v967_v22 = vld [vmem:[%s1248_s1 + $0x90] sm:$0xff] }
   0x8   :  { %589 = vmatpush.bf16.msra.mxu2 %v971_v6  ;;  %v977_v15 = vld [vmem:[%s1248_s1 + $0xe0] sm:$0xff]  ;;  %v976_v19 = vld [vmem:[%s1248_s1 + $0xd8] sm:$0xff]  ;;  %v975_v23 = vld [vmem:[%s1248_s1 + $0xd0] sm:$0xff] }
   0x9   :  { %602 = vmatpush.bf16.msra.mxu3 %v979_v7  ;;  %v950_v24 = vld [vmem:[%s1248_s1 + $0x8] sm:$0xff]  ;;  %v14_v29 = vld [vmem:[%s1250_s0] sm:$0xff]  ;;  %v988_v38 = vld [vmem:[%s1248_s1 + $0x138] sm:$0xff] }
   0xa   :  { %564 = vmatpush.bf16.msra.mxu0 %v954_v8  ;;  %v958_v25 = vld [vmem:[%s1248_s1 + $0x48] sm:$0xff]  ;;  %v949_v30 = vld [vmem:[%s1248_s1] sm:$0xff]  ;;  %v154_v33 = vunpack.c.l.b16 %v14_v29  ;;  %v155_v37 = vunpack.c.h.b16 %v14_v29  ;;  %v996_v39 = vld [vmem:[%s1248_s1 + $0x178] sm:$0xff] }
   0xb   :  { %577 = vmatpush.bf16.msra.mxu1 %v962_v9  ;;  %v966_v26 = vld [vmem:[%s1248_s1 + $0x88] sm:$0xff]  ;;  %v957_v31 = vld [vmem:[%s1248_s1 + $0x40] sm:$0xff]  ;;  %v1004_v40 = vld [vmem:[%s1248_s1 + $0x1b8] sm:$0xff] }
   0xc   :  { %590 = vmatpush.bf16.msra.mxu2 %v970_v10  ;;  %v974_v27 = vld [vmem:[%s1248_s1 + $0xc8] sm:$0xff]  ;;  %v965_v34 = vld [vmem:[%s1248_s1 + $0x80] sm:$0xff]  ;;  %v1012_v41 = vld [vmem:[%s1248_s1 + $0x1f8] sm:$0xff]  ;;  %v162_v43 = vpack.c.b16 %v154_v33, %v154_v33  ;;  %v163_v45 = vpack.c.b16 %v155_v37, %v155_v37 }
   0xd   :  { %603 = vmatpush.bf16.msra.mxu3 %v978_v11  ;;  %v15_v28 = vld [vmem:[%s1250_s0 + $0x8] sm:$0xff]  ;;  %v973_v35 = vld [vmem:[%s1248_s1 + $0xc0] sm:$0xff]  ;;  %v987_v46 = vld [vmem:[%s1248_s1 + $0x130] sm:$0xff] }
   0xe   :  { %565 = vmatpush.bf16.msra.mxu0 %v953_v12  ;;  %v156_v32 = vunpack.c.l.b16 %v15_v28  ;;  %v157_v36 = vunpack.c.h.b16 %v15_v28  ;;  %v995_v47 = vld [vmem:[%s1248_s1 + $0x170] sm:$0xff]  ;;  %v986_v50 = vld [vmem:[%s1248_s1 + $0x128] sm:$0xff]  ;;  %v985_v54 = vld [vmem:[%s1248_s1 + $0x120] sm:$0xff] }
   0xf   :  { %578 = vmatpush.bf16.msra.mxu1 %v961_v13  ;;  %v1003_v48 = vld [vmem:[%s1248_s1 + $0x1b0] sm:$0xff]  ;;  %v994_v51 = vld [vmem:[%s1248_s1 + $0x168] sm:$0xff]  ;;  %v993_v55 = vld [vmem:[%s1248_s1 + $0x160] sm:$0xff] }
  0x10   :  { %591 = vmatpush.bf16.msra.mxu2 %v969_v14  ;;  %v164_v42 = vpack.c.b16 %v156_v32, %v156_v32  ;;  %v165_v44 = vpack.c.b16 %v157_v36, %v157_v36  ;;  %v1011_v49 = vld [vmem:[%s1248_s1 + $0x1f0] sm:$0xff]  ;;  %v1002_v52 = vld [vmem:[%s1248_s1 + $0x1a8] sm:$0xff]  ;;  %v1001_v56 = vld [vmem:[%s1248_s1 + $0x1a0] sm:$0xff] }
  0x11   :  { %604 = vmatpush.bf16.msra.mxu3 %v977_v15  ;;  %v1010_v53 = vld [vmem:[%s1248_s1 + $0x1e8] sm:$0xff]  ;;  %v1009_v57 = vld [vmem:[%s1248_s1 + $0x1e0] sm:$0xff]  ;;  %v984_v58 = vld [vmem:[%s1248_s1 + $0x118] sm:$0xff] }
  0x12   :  { %566 = vmatpush.bf16.msra.mxu0 %v952_v16  ;;  %v992_v59 = vld [vmem:[%s1248_s1 + $0x158] sm:$0xff]  ;;  %v983_v62 = vld [vmem:[%s1248_s1 + $0x110] sm:$0xff]  ;;  %v982_v2 = vld [vmem:[%s1248_s1 + $0x108] sm:$0xff] }
  0x13   :  { %579 = vmatpush.bf16.msra.mxu1 %v960_v17  ;;  %v1000_v60 = vld [vmem:[%s1248_s1 + $0x198] sm:$0xff]  ;;  %v991_v63 = vld [vmem:[%s1248_s1 + $0x150] sm:$0xff]  ;;  %v990_v3 = vld [vmem:[%s1248_s1 + $0x148] sm:$0xff] }
  0x14   :  { %592 = vmatpush.bf16.msra.mxu2 %v968_v18  ;;  %v1008_v61 = vld [vmem:[%s1248_s1 + $0x1d8] sm:$0xff]  ;;  %v999_v0 = vld [vmem:[%s1248_s1 + $0x190] sm:$0xff]  ;;  %v998_v5 = vld [vmem:[%s1248_s1 + $0x188] sm:$0xff] }
  0x15   :  { %605 = vmatpush.bf16.msra.mxu3 %v976_v19  ;;  %v1007_v1 = vld [vmem:[%s1248_s1 + $0x1d0] sm:$0xff]  ;;  %v1006_v6 = vld [vmem:[%s1248_s1 + $0x1c8] sm:$0xff]  ;;  %v17_v7 = vld [vmem:[%s1250_s0 + $0x18] sm:$0xff] }
  0x16   :  { %567 = vmatpush.bf16.msra.mxu0 %v951_v20  ;;  %v16_v4 = vld [vmem:[%s1250_s0 + $0x10] sm:$0xff]  ;;  %v981_v10 = vld [vmem:[%s1248_s1 + $0x100] sm:$0xff]  ;;  %v160_v12 = vunpack.c.l.b16 %v17_v7  ;;  %v161_v13 = vunpack.c.h.b16 %v17_v7 }
  0x17   :  { %580 = vmatpush.bf16.msra.mxu1 %v959_v21  ;;  %v158_v8 = vunpack.c.l.b16 %v16_v4  ;;  %v159_v9 = vunpack.c.h.b16 %v16_v4  ;;  %v989_v11 = vld [vmem:[%s1248_s1 + $0x140] sm:$0xff] }
  0x18   :  { %593 = vmatpush.bf16.msra.mxu2 %v967_v22  ;;  %v997_v14 = vld [vmem:[%s1248_s1 + $0x180] sm:$0xff]  ;;  %v168_v18 = vpack.c.b16 %v160_v12, %v160_v12  ;;  %v169_v19 = vpack.c.b16 %v161_v13, %v161_v13 }
  0x19   :  { %606 = vmatpush.bf16.msra.mxu3 %v975_v23  ;;  %v1005_v15 = vld [vmem:[%s1248_s1 + $0x1c0] sm:$0xff]  ;;  %v166_v16 = vpack.c.b16 %v158_v8, %v158_v8  ;;  %v167_v17 = vpack.c.b16 %v159_v9, %v159_v9 }
  0x1a   :  { %568 = vmatpush.bf16.msra.mxu0 %v950_v24 }
  0x1b   :  { %581 = vmatpush.bf16.msra.mxu1 %v958_v25 }
  0x1c   :  { %594 = vmatpush.bf16.msra.mxu2 %v966_v26  ;;  %v1013_v26 = vld [vmem:[%s1249_s2] ss:$0 sm:$0xff] }
  0x1d   :  { %607 = vmatpush.bf16.msra.mxu3 %v974_v27 }
  0x1e   :  { %569 = vmatpush.bf16.msra.mxu0 %v949_v30 }
  0x1f   :  { %582 = vmatpush.bf16.msra.mxu1 %v957_v31 }
  0x20   :  { %595 = vmatpush.bf16.msra.mxu2 %v965_v34 }
  0x21   :  { %608 = vmatpush.bf16.msra.mxu3 %v973_v35  ;;  %570 = vmatmul.bf16.vlgmr.msra.gmra.mxu0 %v162_v43 }
  0x22   :  { %614 = vmatpush.bf16.msrb.mxu0 %v988_v38  ;;  %583 = vmatmul.bf16.vlgmr.msra.gmra.mxu1 %v163_v45 }
  0x23   :  { %627 = vmatpush.bf16.msrb.mxu1 %v996_v39  ;;  %596 = vmatmul.bf16.vlgmr.msra.gmra.mxu2 %v164_v42 }
  0x24   :  { %640 = vmatpush.bf16.msrb.mxu2 %v1004_v40  ;;  %609 = vmatmul.bf16.vlgmr.msra.gmra.mxu3 %v165_v44 }
  0x25   :  { %653 = vmatpush.bf16.msrb.mxu3 %v1012_v41 }
  0x26   :  { %615 = vmatpush.bf16.msrb.mxu0 %v987_v46 }
  0x27   :  { %628 = vmatpush.bf16.msrb.mxu1 %v995_v47 }
  0x28   :  { %641 = vmatpush.bf16.msrb.mxu2 %v1003_v48 }
  0x29   :  { %654 = vmatpush.bf16.msrb.mxu3 %v1011_v49 }
  0x2a   :  { %616 = vmatpush.bf16.msrb.mxu0 %v986_v50 }
  0x2b   :  { %629 = vmatpush.bf16.msrb.mxu1 %v994_v51 }
  0x2c   :  { %642 = vmatpush.bf16.msrb.mxu2 %v1002_v52 }
  0x2d   :  { %655 = vmatpush.bf16.msrb.mxu3 %v1010_v53 }
  0x2e   :  { %617 = vmatpush.bf16.msrb.mxu0 %v985_v54 }
  0x2f   :  { %630 = vmatpush.bf16.msrb.mxu1 %v993_v55 }
  0x30   :  { %643 = vmatpush.bf16.msrb.mxu2 %v1001_v56 }
  0x31   :  { %656 = vmatpush.bf16.msrb.mxu3 %v1009_v57 }
  0x32   :  { %618 = vmatpush.bf16.msrb.mxu0 %v984_v58 }
  0x33   :  { %631 = vmatpush.bf16.msrb.mxu1 %v992_v59 }
  0x34   :  { %644 = vmatpush.bf16.msrb.mxu2 %v1000_v60 }
  0x35   :  { %657 = vmatpush.bf16.msrb.mxu3 %v1008_v61 }
  0x36   :  { %619 = vmatpush.bf16.msrb.mxu0 %v983_v62 }
  0x37   :  { %632 = vmatpush.bf16.msrb.mxu1 %v991_v63 }
  0x38   :  { %645 = vmatpush.bf16.msrb.mxu2 %v999_v0 }
  0x39   :  { %658 = vmatpush.bf16.msrb.mxu3 %v1007_v1 }
  0x3a   :  { %620 = vmatpush.bf16.msrb.mxu0 %v982_v2 }
  0x3b   :  { %633 = vmatpush.bf16.msrb.mxu1 %v990_v3 }
  0x3c   :  { %646 = vmatpush.bf16.msrb.mxu2 %v998_v5 }
  0x3d   :  { %659 = vmatpush.bf16.msrb.mxu3 %v1006_v6 }
  0x3e   :  { %621 = vmatpush.bf16.msrb.mxu0 %v981_v10 }
  0x3f   :  { %634 = vmatpush.bf16.msrb.mxu1 %v989_v11 }
  0x40   :  { %647 = vmatpush.bf16.msrb.mxu2 %v997_v14 }
  0x41   :  { %660 = vmatpush.bf16.msrb.mxu3 %v1005_v15  ;;  %622 = vmatmul.bf16.vlgmr.msrb.gmra.mxu0 %v166_v16 }
  0x42   :  { %635 = vmatmul.bf16.vlgmr.msrb.gmra.mxu1 %v167_v17 }
  0x43   :  { %648 = vmatmul.bf16.vlgmr.msrb.gmra.mxu2 %v168_v18 }
  0x44   :  { %661 = vmatmul.bf16.vlgmr.msrb.gmra.mxu3 %v169_v19 }
  0x9e   :  { %v571_v20 = vpop.f32.mrf.mxu0 }
  0x9f   :  { %v584_v21 = vpop.f32.mrf.mxu1  ;;  %v572_v29 = vadd.f32 %v1013_v26, %v571_v20 }
  0xa1   :  { %v585_v30 = vadd.f32 %v584_v21, %v572_v29 }
  0xa6   :  { %v597_v22 = vpop.f32.mrf.mxu2  ;;  %v573_v24 = vpop.f32.mrf.mxu0 }
  0xa7   :  { %v610_v23 = vpop.f32.mrf.mxu3  ;;  %v586_v25 = vpop.f32.mrf.mxu1  ;;  %v598_v31 = vadd.f32 %v597_v22, %v585_v30 }
  0xa9   :  { %v611_v32 = vadd.f32 %v610_v23, %v598_v31 }
  0xae   :  { %v599_v27 = vpop.f32.mrf.mxu2 }
  0xaf   :  { %v612_v28 = vpop.f32.mrf.mxu3 }
  0xbe   :  { %v623_v33 = vpop.f32.mrf.mxu0 }
  0xbf   :  { %v636_v34 = vpop.f32.mrf.mxu1  ;;  %v624_v35 = vadd.f32 %v623_v33, %v611_v32 }
  0xc1   :  { %v637_v36 = vadd.f32 %v636_v34, %v624_v35 }
  0xc6   :  { %v649_v37 = vpop.f32.mrf.mxu2  ;;  %v625_v40 = vpop.f32.mrf.mxu0 }
  0xc7   :  { %v662_v38 = vpop.f32.mrf.mxu3  ;;  %v650_v39 = vadd.f32 %v649_v37, %v637_v36  ;;  %v638_v41 = vpop.f32.mrf.mxu1 }
  0xc9   :  { %v663_v42 = vadd.f32 %v662_v38, %v650_v39 }
  0xcb   :  { %666 = vmax.xlane.f32.xlu0 %v663_v42 }
  0xce   :  { %v651_v43 = vpop.f32.mrf.mxu2 }
  0xcf   :  { %v664_v44 = vpop.f32.mrf.mxu3 }
 0x13e   :  { %v667_v45 = vpop.xlane.xlu0 %666 }
 0x13f   :  { %v668_v46 = vsub.f32 %v663_v42, %v667_v45 }
 0x141   :  { %v669_v47 = vmul.f32 1.442695, %v668_v46 }
 0x143   :  { %1014 = vpow2.f32 %v669_v47 }
 0x149   :  { %v1015_v48 = vpop.eup %1014 }
 0x14a   :  { %671 = vadd.xlane.f32.xlu0 %v1015_v48 }
 0x1bd   :  { %v672_v49 = vpop.xlane.xlu0 %671 }
 0x1be   :  { %1016 = vrcp.f32 %v672_v49  ;;  %v684_v53 = vand.u32 2147483648, %v672_v49  ;;  %v682_v55 = vand.u32 2147483647, %v672_v49  ;;  %vm678_vm1 = vweird.f32 %v672_v49 }
 0x1c0   :  { %v685_v57 = vor.u32 1.1754944e-38, %v684_v53  ;;  %vm683_vm3 = vcmp.eq.f32.partialorder %v682_v55, 8.507059e+37 }
 0x1c4   :  { %v1017_v50 = vpop.eup %1016 }
 0x1c5   :  { %v674_v51 = vmul.f32 %v1017_v50, %v672_v49  ;;  %vm679_vm0 = vweird.f32 %v1017_v50 }
 0x1c6   :  { %vm680_vm2 = vmor %vm678_vm1, %vm679_vm0 }
 0x1c7   :  { %v675_v52 = vsub.f32 1.0, %v674_v51 }
 0x1c9   :  { %v676_v54 = vmul.f32 %v1017_v50, %v675_v52 }
 0x1cb   :  { %v677_v56 = vadd.f32 %v1017_v50, %v676_v54 }
 0x1cd   :  { %v681_v58 = vsel %vm680_vm2, %v1017_v50, %v677_v56 }
 0x1ce   :  { %v686_v59 = vsel %vm683_vm3, %v685_v57, %v681_v58 }
 0x1cf   :  { %v687_v60 = vmul.f32 %v1015_v48, %v686_v59 }
 0x1d1   :  { %688 = vst [vmem:[%s1251_s3] sm:$0xff] %v687_v60 }

// kernel: network_forward.6
= control target key start
LH: loop header
LB: loop body
LE: loop exit
PB: predicated region body
PF: predicated region fallthrough
CT: control target
= control target key end

     0   :  { %8 = vsyncpa [#allocation4], 0  ;;  %s9508_s0 = inlined_call_operand.vmem [shape: bf16[8,9216], index: 0, kind: input, shape index: {}]   ;;  %s9509_s1 = inlined_call_operand.hbm [shape: bf16[9216,1024], index: 1, kind: input, shape index: {}]   ;;  %s9510_s2 = inlined_call_operand.vmem [shape: f32[1,1024], index: 2, kind: input, shape index: {}]   ;;  %s9511_s3 = inlined_call_operand.vmem [shape: bf16[8,1024], index: 3, kind: output, shape index: {}]  }
   0x1   :  { %10 = vsyncpa [#allocation4 + $0x1], 0  ;;  %s8019_s12 = smov 0   ;;  %s8021_s13 = smov 0  }
   0x2   :  { %s8023_s14 = smov 0   ;;  %s8025_s15 = smov 0  }
   0x3   :  { %s8027_s16 = smov 0   ;;  %s8029_s17 = smov 0  }
   0x4   :  { %s8031_s18 = smov 0   ;;  %s8033_s19 = smov 0  }
   0x5 LB: > { %s4923_s20 = sadd.s32 4294967295, %s7993_s19   ;;  %s28_s21 = sadd.s32 1, %s7985_s17  ;;  %s7993_s19 = sphi %s8033_s19, %s16_s19   ;;  %s7989_s18 = sphi %s8031_s18, %s9523_s18   ;;  %s7985_s17 = sphi %s8029_s17, %s9522_s17   ;;  %s7981_s16 = sphi %s8027_s16, %s9521_s16   ;;  %s7977_s15 = sphi %s8025_s15, %s9520_s15   ;;  %s7973_s14 = sphi %s8023_s14, %s9519_s14   ;;  %s7969_s13 = sphi %s8021_s13, %s9518_s13   ;;  %s7965_s12 = sphi %s8019_s12, %s9517_s12  }
   0x6   : > { %p29_p0 = scmp.ge.s32.totalorder %s28_s21, 4  ;;  %s31_s22 = sadd.s32 1, %s7989_s18 }
   0x7   : > { %s72_s23 = sadd.s32 1, %s7973_s14  ;;  %p79_p1 = scmp.ne.s32.totalorder %s7973_s14, %s7969_s13 }
   0x8   : > { %s9525_s21 = smov (%p29_p0, %s28_s21), 0  ;;  %s9527_s22 = smov (!%p29_p0, %s31_s22), %s7989_s18 }
   0x9   : > { %s67_s24 = ssub.s32 %s7985_s17, %s9525_s21  ;;  %p80_p2 = scmp.eq.s32.totalorder %s7993_s19, 0 }
   0xa   : > { %p33_p3 = scmp.ge.s32.totalorder %s9527_s22, 2  ;;  %p85_p4 = scmp.ne.s32.totalorder %s7969_s13, %s7965_s12 }
   0xb   : > { %p8070_p5 = por %p80_p2, %p79_p1  ;;  %p86_p6 = scmp.eq.s32.totalorder %s4923_s20, 0 }
   0xc   : > { %s9529_s22 = smov (%p33_p3, %s9527_s22), 0  ;;  %p7828_p8 = scmp.lt.s32.totalorder %s7993_s19, 8 }
   0xd   : > { %9514 = sst [smem:[#allocation6_spill]] %s9529_s22  ;;  %p8076_p7 = por %p86_p6, %p85_p4 }
   0xe   : > { %s68_s27 = ssub.s32 %s7989_s18, %s9529_s22  ;;  %s176_s29 = sand.u32 1, %s7973_s14  }
   0xf   : > { %s69_s28 = sor.u32 %s68_s27, %s67_s24  ;;  %s7820_s30 = smul.u32 4608, %s176_s29 }
  0x10   : > { %p70_p9 = scmp.eq.s32.totalorder %s69_s28, 0  ;;  %s4927_s4 = sshll.u32 %s7989_s18, 2 }
  0x11   : > { %s7243_s6 = smul.u32 2304, %s7985_s17  ;;  %s180_s7 = scalar_lea.vmem [#allocation3], %s7820_s30 }
  0x12   : > { %s8086_s5 = scalar_select %p70_p9, %s7973_s14, %s72_s23  }
  0x13   : > { %s191_s8 = sshll.u32 %s180_s7, 4  ;;  %p7825_p10 = pnand %p7828_p8, %p8070_p5  ;;  %s192_s8 = int_to_ptr.vmem [resolvable:$true] %s191_s8 }
  0x14   : > { %s186_s9 = sadd.s32 %s7243_s6, %s4927_s4  ;;  %s177_s27 = scalar_lea.sflag [#allocation4], %s176_s29 }
  0x15   : > { %s4929_s10 = sshll.u32 %s186_s9, 2  ;;  %s7995_s28 = smov 512  }
  0x16   : > { %s188_s20 = scalar_lea.hbm %s9509_s1, %s4929_s10  ;;  %s7996_s23 = smov 256  }
  0x17   : > { %s189_s24 = sshll.u32 %s188_s20, 4  ;;  %s7997_s22 = smov 16   ;;  %s190_s24 = int_to_ptr.hbm [resolvable:$true] %s189_s24 }
  0x18   : > { %7827 = dma.hbm_to_vmem [thread:$0]  (!%p7825_p10), %s190_s24, 73728, %s192_s8, %s177_s27, %s7995_s28, %s7996_s23, %s7997_s22  }
  0x19   : > { %p4930_p11 = scmp.ge.s32.totalorder %s7993_s19, 1  ;;  %p207_p12 = scmp.lt.s32.totalorder %s7993_s19, 9 }
  0x1b   : > { %p208_p13 = pnand %p4930_p11, %p207_p12 }
  0x1c   : > { %s213_s25 = sand.u32 (!%p208_p13), 1, %s7969_s13  }
  0x1d   : > { %211 = sbr.rel (%p208_p13) target bundleno = 781 (0x30d), region = 32  ;;  %s214_s4 = scalar_lea.sflag (!%p208_p13), [#allocation4], %s213_s25 }
  0x1e   : > { %s7821_s30 = smul.u32 (!%p208_p13), 4608, %s213_s25 }
  0x20   : > { %s8097_s6 = scalar_lea.vmem (!%p208_p13), [#allocation3], %s7821_s30 }
  0x22   : > { %7960 = dma.done.wait (%p8076_p7), %s214_s4, 73728  }
  0x23   : > { %7962 = vsyncadd (%p8076_p7), %s214_s4, 4294893568  ;;  %s258_s29 = smul.u32 18, %s7977_s15  ;;  %s4932_s22 = sshll.u32 %s7981_s16, 2 }
  0x24   : > { %p271_p0 = scmp.lt.s32.totalorder %s4932_s22, 7  ;;  %p4935_p2 = scmp.ne.s32.totalorder %s7977_s15, 0 }
  0x25   : > { %p261_p1 = scmp.lt.s32.totalorder %s258_s29, 71 }
  0x26   : > { %s9531_s22 = smov (!%p271_p0, %s4932_s22), 7  ;;  %288 = sbr.rel (%p4935_p2) target bundleno = 48 (0x30), region = 40 }
  0x27   : > { %s9533_s29 = smov (!%p261_p1, %s258_s29), 71  ;;  %s273_s9 = scalar_lea.vmem %s9510_s2, %s9531_s22 }
  0x28   : > { %s4934_s10 = sshll.u32 %s9531_s22, 2  ;;  %s4931_s11 = sshll.u32 %s9533_s29, 2 }
  0x29   : > { %s8115_s20 = scalar_lea.vmem %s9511_s3, %s4934_s10  ;;  %s8120_s27 = scalar_lea.vmem %s9508_s0, %s4931_s11 }
  0x2b   : > { %v7998_v0 = vmov 0.0  }
  0x2c   : > { %289 = vst [vmem:[#allocation2 + $0x10] sm:$0xff] %v7998_v0 }
  0x2d   : > { %290 = vst [vmem:[#allocation2] sm:$0xff] %v7998_v0 }
  0x2e   : > { %291 = vst [vmem:[#allocation2 + $0x18] sm:$0xff] %v7998_v0 }
  0x2f   : > { %292 = vst [vmem:[#allocation2 + $0x8] sm:$0xff] %v7998_v0 }
  0x30 PF: > { %v5050_v1 = vld [vmem:[%s8097_s6 + $0xe0] sm:$0xf]  ;;  %v7274_v2 = vld [vmem:[%s8097_s6 + $0xec] sm:$0xf0]  ;;  %p7240_p3 = scmp.ne.s32.totalorder %s7977_s15, 3 }
  0x31   : > { %v5178_v3 = vld [vmem:[%s8097_s6 + $0x1e0] sm:$0xf]  ;;  %v5051_v4 = vor.u32 %v7274_v2, %v5050_v1  ;;  %v7306_v5 = vld [vmem:[%s8097_s6 + $0x1ec] sm:$0xf0] }
  0x32   : > { %v5306_v6 = vld [vmem:[%s8097_s6 + $0x2e0] sm:$0xf]  ;;  %v7338_v7 = vld [vmem:[%s8097_s6 + $0x2ec] sm:$0xf0]  ;;  %v5179_v8 = vor.u32 %v7306_v5, %v5178_v3 }
  0x33   : > { %v5307_v9 = vor.u32 %v7338_v7, %v5306_v6  ;;  %v5434_v10 = vld [vmem:[%s8097_s6 + $0x3e0] sm:$0xf]  ;;  %v7370_v11 = vld [vmem:[%s8097_s6 + $0x3ec] sm:$0xf0]  ;;  %3825 = vmatpush.bf16.msra.mxu0 %v5051_v4 }
  0x34   : > { %v5034_v12 = vld [vmem:[%s8097_s6 + $0xc0] sm:$0xf]  ;;  %v5435_v13 = vor.u32 %v7370_v11, %v5434_v10  ;;  %v7270_v14 = vld [vmem:[%s8097_s6 + $0xcc] sm:$0xf0]  ;;  %3838 = vmatpush.bf16.msra.mxu1 %v5179_v8 }
  0x35   : > { %v5162_v15 = vld [vmem:[%s8097_s6 + $0x1c0] sm:$0xf]  ;;  %v7302_v16 = vld [vmem:[%s8097_s6 + $0x1cc] sm:$0xf0]  ;;  %3851 = vmatpush.bf16.msra.mxu2 %v5307_v9  ;;  %v5035_v17 = vor.u32 %v7270_v14, %v5034_v12 }
  0x36   : > { %v5163_v18 = vor.u32 %v7302_v16, %v5162_v15  ;;  %v5290_v19 = vld [vmem:[%s8097_s6 + $0x2c0] sm:$0xf]  ;;  %v7334_v20 = vld [vmem:[%s8097_s6 + $0x2cc] sm:$0xf0]  ;;  %3864 = vmatpush.bf16.msra.mxu3 %v5435_v13 }
  0x37   : > { %v5418_v21 = vld [vmem:[%s8097_s6 + $0x3c0] sm:$0xf]  ;;  %v5291_v22 = vor.u32 %v7334_v20, %v5290_v19  ;;  %v7366_v23 = vld [vmem:[%s8097_s6 + $0x3cc] sm:$0xf0]  ;;  %3826 = vmatpush.bf16.msra.mxu0 %v5035_v17 }
  0x38   : > { %v5018_v24 = vld [vmem:[%s8097_s6 + $0xa0] sm:$0xf]  ;;  %v7266_v25 = vld [vmem:[%s8097_s6 + $0xac] sm:$0xf0]  ;;  %v5419_v26 = vor.u32 %v7366_v23, %v5418_v21  ;;  %3839 = vmatpush.bf16.msra.mxu1 %v5163_v18 }
  0x39   : > { %v5146_v27 = vld [vmem:[%s8097_s6 + $0x1a0] sm:$0xf]  ;;  %v7298_v28 = vld [vmem:[%s8097_s6 + $0x1ac] sm:$0xf0]  ;;  %v5019_v30 = vor.u32 %v7266_v25, %v5018_v24  ;;  %3852 = vmatpush.bf16.msra.mxu2 %v5291_v22 }
  0x3a   : > { %v5274_v29 = vld [vmem:[%s8097_s6 + $0x2a0] sm:$0xf]  ;;  %v7330_v31 = vld [vmem:[%s8097_s6 + $0x2ac] sm:$0xf0]  ;;  %v5147_v34 = vor.u32 %v7298_v28, %v5146_v27  ;;  %3865 = vmatpush.bf16.msra.mxu3 %v5419_v26 }
  0x3b   : > { %v5402_v32 = vld [vmem:[%s8097_s6 + $0x3a0] sm:$0xf]  ;;  %v7362_v33 = vld [vmem:[%s8097_s6 + $0x3ac] sm:$0xf0]  ;;  %v5275_v35 = vor.u32 %v7330_v31, %v5274_v29  ;;  %3827 = vmatpush.bf16.msra.mxu0 %v5019_v30 }
  0x3c   : > { %v5002_v36 = vld [vmem:[%s8097_s6 + $0x80] sm:$0xf]  ;;  %v7262_v37 = vld [vmem:[%s8097_s6 + $0x8c] sm:$0xf0]  ;;  %v5403_v39 = vor.u32 %v7362_v33, %v5402_v32  ;;  %3840 = vmatpush.bf16.msra.mxu1 %v5147_v34 }
  0x3d   : > { %v5130_v38 = vld [vmem:[%s8097_s6 + $0x180] sm:$0xf]  ;;  %v7294_v40 = vld [vmem:[%s8097_s6 + $0x18c] sm:$0xf0]  ;;  %v5003_v45 = vor.u32 %v7262_v37, %v5002_v36  ;;  %3853 = vmatpush.bf16.msra.mxu2 %v5275_v35 }
  0x3e   : > { %v5258_v41 = vld [vmem:[%s8097_s6 + $0x280] sm:$0xf]  ;;  %v7326_v42 = vld [vmem:[%s8097_s6 + $0x28c] sm:$0xf0]  ;;  %v5131_v46 = vor.u32 %v7294_v40, %v5130_v38  ;;  %3866 = vmatpush.bf16.msra.mxu3 %v5403_v39 }
  0x3f   : > { %v5386_v43 = vld [vmem:[%s8097_s6 + $0x380] sm:$0xf]  ;;  %v7358_v44 = vld [vmem:[%s8097_s6 + $0x38c] sm:$0xf0]  ;;  %v5259_v47 = vor.u32 %v7326_v42, %v5258_v41  ;;  %3828 = vmatpush.bf16.msra.mxu0 %v5003_v45 }
  0x40   : > { %v4986_v48 = vld [vmem:[%s8097_s6 + $0x60] sm:$0xf]  ;;  %v7258_v49 = vld [vmem:[%s8097_s6 + $0x6c] sm:$0xf0]  ;;  %v5387_v51 = vor.u32 %v7358_v44, %v5386_v43  ;;  %3841 = vmatpush.bf16.msra.mxu1 %v5131_v46 }
  0x41   : > { %v5114_v50 = vld [vmem:[%s8097_s6 + $0x160] sm:$0xf]  ;;  %v7290_v52 = vld [vmem:[%s8097_s6 + $0x16c] sm:$0xf0]  ;;  %v4987_v57 = vor.u32 %v7258_v49, %v4986_v48  ;;  %3854 = vmatpush.bf16.msra.mxu2 %v5259_v47 }
  0x42   : > { %v5242_v53 = vld [vmem:[%s8097_s6 + $0x260] sm:$0xf]  ;;  %v7322_v54 = vld [vmem:[%s8097_s6 + $0x26c] sm:$0xf0]  ;;  %v5115_v58 = vor.u32 %v7290_v52, %v5114_v50  ;;  %3867 = vmatpush.bf16.msra.mxu3 %v5387_v51 }
  0x43   : > { %v5370_v55 = vld [vmem:[%s8097_s6 + $0x360] sm:$0xf]  ;;  %v7354_v56 = vld [vmem:[%s8097_s6 + $0x36c] sm:$0xf0]  ;;  %v5243_v59 = vor.u32 %v7322_v54, %v5242_v53  ;;  %3829 = vmatpush.bf16.msra.mxu0 %v4987_v57 }
  0x44   : > { %v4970_v60 = vld [vmem:[%s8097_s6 + $0x40] sm:$0xf]  ;;  %v7254_v61 = vld [vmem:[%s8097_s6 + $0x4c] sm:$0xf0]  ;;  %v5371_v63 = vor.u32 %v7354_v56, %v5370_v55  ;;  %3842 = vmatpush.bf16.msra.mxu1 %v5115_v58 }
  0x45   : > { %v5098_v62 = vld [vmem:[%s8097_s6 + $0x140] sm:$0xf]  ;;  %v7286_v0 = vld [vmem:[%s8097_s6 + $0x14c] sm:$0xf0]  ;;  %v4971_v5 = vor.u32 %v7254_v61, %v4970_v60  ;;  %3855 = vmatpush.bf16.msra.mxu2 %v5243_v59  ;;  %v298_v59 = vld [vmem:[%s8120_s27 + $0x8] sm:$0xff] }
  0x46   : > { %v5226_v1 = vld [vmem:[%s8097_s6 + $0x240] sm:$0xf]  ;;  %v7318_v2 = vld [vmem:[%s8097_s6 + $0x24c] sm:$0xf0]  ;;  %v5099_v6 = vor.u32 %v7286_v0, %v5098_v62  ;;  %3868 = vmatpush.bf16.msra.mxu3 %v5371_v63  ;;  %v893_v0 = vunpack.c.l.b16 %v298_v59 }
  0x47   : > { %v5354_v3 = vld [vmem:[%s8097_s6 + $0x340] sm:$0xf]  ;;  %v7350_v4 = vld [vmem:[%s8097_s6 + $0x34c] sm:$0xf0]  ;;  %v5227_v7 = vor.u32 %v7318_v2, %v5226_v1  ;;  %3830 = vmatpush.bf16.msra.mxu0 %v4971_v5  ;;  %v894_v1 = vunpack.c.h.b16 %v298_v59 }
  0x48   : > { %v4954_v8 = vld [vmem:[%s8097_s6 + $0x20] sm:$0xf]  ;;  %v7250_v9 = vld [vmem:[%s8097_s6 + $0x2c] sm:$0xf0]  ;;  %v5355_v11 = vor.u32 %v7350_v4, %v5354_v3  ;;  %3843 = vmatpush.bf16.msra.mxu1 %v5099_v6  ;;  %v8212_v5 = vpack.c.b16 %v893_v0, %v893_v0 }
  0x49   : > { %v5082_v10 = vld [vmem:[%s8097_s6 + $0x120] sm:$0xf]  ;;  %v7282_v12 = vld [vmem:[%s8097_s6 + $0x12c] sm:$0xf0]  ;;  %v4955_v17 = vor.u32 %v7250_v9, %v4954_v8  ;;  %3856 = vmatpush.bf16.msra.mxu2 %v5227_v7  ;;  %v8215_v7 = vpack.c.b16 %v894_v1, %v894_v1 }
  0x4a   : > { %v5210_v13 = vld [vmem:[%s8097_s6 + $0x220] sm:$0xf]  ;;  %v7314_v14 = vld [vmem:[%s8097_s6 + $0x22c] sm:$0xf0]  ;;  %v5083_v20 = vor.u32 %v7282_v12, %v5082_v10  ;;  %3869 = vmatpush.bf16.msra.mxu3 %v5355_v11 }
  0x4b   : > { %v5338_v15 = vld [vmem:[%s8097_s6 + $0x320] sm:$0xf]  ;;  %v7346_v16 = vld [vmem:[%s8097_s6 + $0x32c] sm:$0xf0]  ;;  %v5211_v21 = vor.u32 %v7314_v14, %v5210_v13  ;;  %3831 = vmatpush.bf16.msra.mxu0 %v4955_v17 }
  0x4c   : > { %v4938_v18 = vld [vmem:[%s8097_s6] sm:$0xf]  ;;  %v7246_v19 = vld [vmem:[%s8097_s6 + $0xc] sm:$0xf0]  ;;  %v5339_v25 = vor.u32 %v7346_v16, %v5338_v15  ;;  %3844 = vmatpush.bf16.msra.mxu1 %v5083_v20 }
  0x4d   : > { %v5066_v22 = vld [vmem:[%s8097_s6 + $0x100] sm:$0xf]  ;;  %v7278_v23 = vld [vmem:[%s8097_s6 + $0x10c] sm:$0xf0]  ;;  %v4939_v32 = vor.u32 %v7246_v19, %v4938_v18  ;;  %3857 = vmatpush.bf16.msra.mxu2 %v5211_v21 }
  0x4e   : > { %v5194_v24 = vld [vmem:[%s8097_s6 + $0x200] sm:$0xf]  ;;  %v7310_v26 = vld [vmem:[%s8097_s6 + $0x20c] sm:$0xf0]  ;;  %v5067_v36 = vor.u32 %v7278_v23, %v5066_v22  ;;  %3870 = vmatpush.bf16.msra.mxu3 %v5339_v25 }
  0x4f   : > { %v5322_v27 = vld [vmem:[%s8097_s6 + $0x300] sm:$0xf]  ;;  %v7342_v28 = vld [vmem:[%s8097_s6 + $0x30c] sm:$0xf0]  ;;  %v5195_v37 = vor.u32 %v7310_v26, %v5194_v24  ;;  %3832 = vmatpush.bf16.msra.mxu0 %v4939_v32 }
  0x50   : > { %v5562_v29 = vld [vmem:[%s8097_s6 + $0x4e0] sm:$0xf]  ;;  %v7402_v30 = vld [vmem:[%s8097_s6 + $0x4ec] sm:$0xf0]  ;;  %v5323_v40 = vor.u32 %v7342_v28, %v5322_v27  ;;  %3845 = vmatpush.bf16.msra.mxu1 %v5067_v36 }
  0x51   : > { %v5690_v31 = vld [vmem:[%s8097_s6 + $0x5e0] sm:$0xf]  ;;  %v7434_v33 = vld [vmem:[%s8097_s6 + $0x5ec] sm:$0xf0]  ;;  %v5563_v41 = vor.u32 %v7402_v30, %v5562_v29  ;;  %3858 = vmatpush.bf16.msra.mxu2 %v5195_v37 }
  0x52   : > { %v5818_v34 = vld [vmem:[%s8097_s6 + $0x6e0] sm:$0xf]  ;;  %v7466_v35 = vld [vmem:[%s8097_s6 + $0x6ec] sm:$0xf0]  ;;  %v5691_v42 = vor.u32 %v7434_v33, %v5690_v31  ;;  %3871 = vmatpush.bf16.msra.mxu3 %v5323_v40 }
  0x53   : > { %v5946_v38 = vld [vmem:[%s8097_s6 + $0x7e0] sm:$0xf]  ;;  %v7498_v39 = vld [vmem:[%s8097_s6 + $0x7ec] sm:$0xf0]  ;;  %v5819_v43 = vor.u32 %v7466_v35, %v5818_v34  ;;  %3877 = vmatpush.bf16.msrb.mxu0 %v5563_v41 }
  0x54   : > { %v5546_v44 = vld [vmem:[%s8097_s6 + $0x4c0] sm:$0xf]  ;;  %v7398_v45 = vld [vmem:[%s8097_s6 + $0x4cc] sm:$0xf0]  ;;  %v5947_v47 = vor.u32 %v7498_v39, %v5946_v38  ;;  %3890 = vmatpush.bf16.msrb.mxu1 %v5691_v42  ;;  %3859 = vmatmul.bf16.vlgmr.msra.gmra.mxu2 %v8212_v5 }
  0x55   : > { %v5674_v46 = vld [vmem:[%s8097_s6 + $0x5c0] sm:$0xf]  ;;  %v7430_v48 = vld [vmem:[%s8097_s6 + $0x5cc] sm:$0xf0]  ;;  %v5547_v53 = vor.u32 %v7398_v45, %v5546_v44  ;;  %3903 = vmatpush.bf16.msrb.mxu2 %v5819_v43  ;;  %3872 = vmatmul.bf16.vlgmr.msra.gmra.mxu3 %v8215_v7 }
  0x56   : > { %v5802_v49 = vld [vmem:[%s8097_s6 + $0x6c0] sm:$0xf]  ;;  %v7462_v50 = vld [vmem:[%s8097_s6 + $0x6cc] sm:$0xf0]  ;;  %v5675_v55 = vor.u32 %v7430_v48, %v5674_v46  ;;  %3916 = vmatpush.bf16.msrb.mxu3 %v5947_v47 }
  0x57   : > { %v5930_v51 = vld [vmem:[%s8097_s6 + $0x7c0] sm:$0xf]  ;;  %v7494_v52 = vld [vmem:[%s8097_s6 + $0x7cc] sm:$0xf0]  ;;  %v5803_v56 = vor.u32 %v7462_v50, %v5802_v49  ;;  %3878 = vmatpush.bf16.msrb.mxu0 %v5547_v53 }
  0x58   : > { %v5530_v54 = vld [vmem:[%s8097_s6 + $0x4a0] sm:$0xf]  ;;  %v7394_v57 = vld [vmem:[%s8097_s6 + $0x4ac] sm:$0xf0]  ;;  %v5931_v60 = vor.u32 %v7494_v52, %v5930_v51  ;;  %3891 = vmatpush.bf16.msrb.mxu1 %v5675_v55 }
  0x59   : > { %v5658_v58 = vld [vmem:[%s8097_s6 + $0x5a0] sm:$0xf]  ;;  %v7426_v61 = vld [vmem:[%s8097_s6 + $0x5ac] sm:$0xf0]  ;;  %v5531_v4 = vor.u32 %v7394_v57, %v5530_v54  ;;  %3904 = vmatpush.bf16.msrb.mxu2 %v5803_v56 }
  0x5a   : > { %v5786_v62 = vld [vmem:[%s8097_s6 + $0x6a0] sm:$0xf]  ;;  %v7458_v63 = vld [vmem:[%s8097_s6 + $0x6ac] sm:$0xf0]  ;;  %v5659_v8 = vor.u32 %v7426_v61, %v5658_v58  ;;  %3917 = vmatpush.bf16.msrb.mxu3 %v5931_v60 }
  0x5b   : > { %v5914_v2 = vld [vmem:[%s8097_s6 + $0x7a0] sm:$0xf]  ;;  %v7490_v3 = vld [vmem:[%s8097_s6 + $0x7ac] sm:$0xf0]  ;;  %v5787_v9 = vor.u32 %v7458_v63, %v5786_v62  ;;  %3879 = vmatpush.bf16.msrb.mxu0 %v5531_v4  ;;  %v300_v4 = vld [vmem:[%s8120_s27 + $0x18] sm:$0xff] }
  0x5c   : > { %v297_v6 = vld [vmem:[%s8120_s27] sm:$0xff]  ;;  %v7390_v11 = vld [vmem:[%s8097_s6 + $0x48c] sm:$0xf0]  ;;  %v5915_v15 = vor.u32 %v7490_v3, %v5914_v2  ;;  %3892 = vmatpush.bf16.msrb.mxu1 %v5659_v8 }
  0x5d   : > { %v5514_v10 = vld [vmem:[%s8097_s6 + $0x480] sm:$0xf]  ;;  %v891_v13 = vunpack.c.l.b16 %v297_v6  ;;  %v892_v14 = vunpack.c.h.b16 %v297_v6  ;;  %v7422_v16 = vld [vmem:[%s8097_s6 + $0x58c] sm:$0xf0]  ;;  %3905 = vmatpush.bf16.msrb.mxu2 %v5787_v9 }
  0x5e   : > { %v5642_v12 = vld [vmem:[%s8097_s6 + $0x580] sm:$0xf]  ;;  %v7454_v18 = vld [vmem:[%s8097_s6 + $0x68c] sm:$0xf0]  ;;  %v5515_v23 = vor.u32 %v7390_v11, %v5514_v10  ;;  %3918 = vmatpush.bf16.msrb.mxu3 %v5915_v15 }
  0x5f   : > { %v5770_v17 = vld [vmem:[%s8097_s6 + $0x680] sm:$0xf]  ;;  %v7486_v20 = vld [vmem:[%s8097_s6 + $0x78c] sm:$0xf0]  ;;  %v8226_v21 = vpack.c.b16 %v891_v13, %v891_v13  ;;  %v8229_v22 = vpack.c.b16 %v892_v14, %v892_v14  ;;  %v5643_v24 = vor.u32 %v7422_v16, %v5642_v12 }
  0x60   : > { %v5898_v19 = vld [vmem:[%s8097_s6 + $0x780] sm:$0xf]  ;;  %v5771_v25 = vor.u32 %v7454_v18, %v5770_v17  ;;  %v7386_v27 = vld [vmem:[%s8097_s6 + $0x46c] sm:$0xf0]  ;;  %3880 = vmatpush.bf16.msrb.mxu0 %v5515_v23  ;;  %v897_v18 = vunpack.c.l.b16 %v300_v4 }
  0x61   : > { %v5498_v26 = vld [vmem:[%s8097_s6 + $0x460] sm:$0xf]  ;;  %v5899_v29 = vor.u32 %v7486_v20, %v5898_v19  ;;  %v7418_v30 = vld [vmem:[%s8097_s6 + $0x56c] sm:$0xf0]  ;;  %3833 = vmatmul.bf16.vlgmr.msra.gmra.mxu0 %v8226_v21  ;;  %3846 = vmatmul.bf16.vlgmr.msra.gmra.mxu1 %v8229_v22 }
  0x62   : > { %v5626_v28 = vld [vmem:[%s8097_s6 + $0x560] sm:$0xf]  ;;  %v7450_v32 = vld [vmem:[%s8097_s6 + $0x66c] sm:$0xf0]  ;;  %v5499_v35 = vor.u32 %v7386_v27, %v5498_v26  ;;  %3893 = vmatpush.bf16.msrb.mxu1 %v5643_v24  ;;  %3906 = vmatpush.bf16.msrb.mxu2 %v5771_v25  ;;  %v898_v26 = vunpack.c.h.b16 %v300_v4 }
  0x63   : > { %v5754_v31 = vld [vmem:[%s8097_s6 + $0x660] sm:$0xf]  ;;  %v7482_v34 = vld [vmem:[%s8097_s6 + $0x76c] sm:$0xf0]  ;;  %v5627_v36 = vor.u32 %v7418_v30, %v5626_v28  ;;  %3919 = vmatpush.bf16.msrb.mxu3 %v5899_v29 }
  0x64   : > { %v5882_v33 = vld [vmem:[%s8097_s6 + $0x760] sm:$0xf]  ;;  %v5755_v37 = vor.u32 %v7450_v32, %v5754_v31  ;;  %v7382_v39 = vld [vmem:[%s8097_s6 + $0x44c] sm:$0xf0]  ;;  %3881 = vmatpush.bf16.msrb.mxu0 %v5499_v35 }
  0x65   : > { %v5482_v38 = vld [vmem:[%s8097_s6 + $0x440] sm:$0xf]  ;;  %v5883_v41 = vor.u32 %v7482_v34, %v5882_v33  ;;  %v7414_v42 = vld [vmem:[%s8097_s6 + $0x54c] sm:$0xf0] }
  0x66   : > { %v5610_v40 = vld [vmem:[%s8097_s6 + $0x540] sm:$0xf]  ;;  %v7446_v44 = vld [vmem:[%s8097_s6 + $0x64c] sm:$0xf0]  ;;  %v5483_v47 = vor.u32 %v7382_v39, %v5482_v38  ;;  %3894 = vmatpush.bf16.msrb.mxu1 %v5627_v36  ;;  %3907 = vmatpush.bf16.msrb.mxu2 %v5755_v37  ;;  %v8281_v39 = vpack.c.b16 %v897_v18, %v897_v18 }
  0x67   : > { %v5738_v43 = vld [vmem:[%s8097_s6 + $0x640] sm:$0xf]  ;;  %v7478_v46 = vld [vmem:[%s8097_s6 + $0x74c] sm:$0xf0]  ;;  %v5611_v48 = vor.u32 %v7414_v42, %v5610_v40  ;;  %3920 = vmatpush.bf16.msrb.mxu3 %v5883_v41 }
  0x68   : > { %v5866_v45 = vld [vmem:[%s8097_s6 + $0x740] sm:$0xf]  ;;  %v5739_v49 = vor.u32 %v7446_v44, %v5738_v43  ;;  %v7378_v51 = vld [vmem:[%s8097_s6 + $0x42c] sm:$0xf0]  ;;  %3882 = vmatpush.bf16.msrb.mxu0 %v5483_v47  ;;  %v8287_v43 = vpack.c.b16 %v898_v26, %v898_v26 }
  0x69   : > { %v5466_v50 = vld [vmem:[%s8097_s6 + $0x420] sm:$0xf]  ;;  %v5867_v53 = vor.u32 %v7478_v46, %v5866_v45  ;;  %v7410_v54 = vld [vmem:[%s8097_s6 + $0x52c] sm:$0xf0] }
  0x6a   : > { %v5594_v52 = vld [vmem:[%s8097_s6 + $0x520] sm:$0xf]  ;;  %v7442_v56 = vld [vmem:[%s8097_s6 + $0x62c] sm:$0xf0]  ;;  %v5467_v60 = vor.u32 %v7378_v51, %v5466_v50  ;;  %3895 = vmatpush.bf16.msrb.mxu1 %v5611_v48  ;;  %3908 = vmatpush.bf16.msrb.mxu2 %v5739_v49 }
  0x6b   : > { %v5722_v55 = vld [vmem:[%s8097_s6 + $0x620] sm:$0xf]  ;;  %v7474_v58 = vld [vmem:[%s8097_s6 + $0x72c] sm:$0xf0]  ;;  %v5595_v0 = vor.u32 %v7410_v54, %v5594_v52  ;;  %3921 = vmatpush.bf16.msrb.mxu3 %v5867_v53 }
  0x6c   : > { %v5850_v57 = vld [vmem:[%s8097_s6 + $0x720] sm:$0xf]  ;;  %v7374_v61 = vld [vmem:[%s8097_s6 + $0x40c] sm:$0xf0]  ;;  %v5723_v1 = vor.u32 %v7442_v56, %v5722_v55  ;;  %3883 = vmatpush.bf16.msrb.mxu0 %v5467_v60 }
  0x6d   : > { %v5450_v59 = vld [vmem:[%s8097_s6 + $0x400] sm:$0xf]  ;;  %v7406_v63 = vld [vmem:[%s8097_s6 + $0x50c] sm:$0xf0]  ;;  %v5851_v6 = vor.u32 %v7474_v58, %v5850_v57 }
  0x6e   : > { %v5578_v62 = vld [vmem:[%s8097_s6 + $0x500] sm:$0xf]  ;;  %v7438_v3 = vld [vmem:[%s8097_s6 + $0x60c] sm:$0xf0]  ;;  %v5451_v14 = vor.u32 %v7374_v61, %v5450_v59  ;;  %3896 = vmatpush.bf16.msrb.mxu1 %v5595_v0  ;;  %3909 = vmatpush.bf16.msrb.mxu2 %v5723_v1 }
  0x6f   : > { %v5706_v2 = vld [vmem:[%s8097_s6 + $0x600] sm:$0xf]  ;;  %v7470_v9 = vld [vmem:[%s8097_s6 + $0x70c] sm:$0xf0]  ;;  %v5579_v19 = vor.u32 %v7406_v63, %v5578_v62  ;;  %3922 = vmatpush.bf16.msrb.mxu3 %v5851_v6 }
  0x70   : > { %v5834_v8 = vld [vmem:[%s8097_s6 + $0x700] sm:$0xf]  ;;  %v299_v10 = vld [vmem:[%s8120_s27 + $0x10] sm:$0xff]  ;;  %v5707_v20 = vor.u32 %v7438_v3, %v5706_v2  ;;  %3884 = vmatpush.bf16.msrb.mxu0 %v5451_v14 }
  0x71   : > { %v6074_v11 = vld [vmem:[%s8097_s6 + $0x8e0] sm:$0xf]  ;;  %v7530_v12 = vld [vmem:[%s8097_s6 + $0x8ec] sm:$0xf0]  ;;  %v895_v25 = vunpack.c.l.b16 %v299_v10  ;;  %v5835_v27 = vor.u32 %v7470_v9, %v5834_v8  ;;  %v896_v29 = vunpack.c.h.b16 %v299_v10 }
  0x72   : > { %v6202_v13 = vld [vmem:[%s8097_s6 + $0x9e0] sm:$0xf]  ;;  %v7562_v15 = vld [vmem:[%s8097_s6 + $0x9ec] sm:$0xf0]  ;;  %v6075_v28 = vor.u32 %v7530_v12, %v6074_v11  ;;  %3897 = vmatpush.bf16.msrb.mxu1 %v5579_v19  ;;  %3910 = vmatpush.bf16.msrb.mxu2 %v5707_v20 }
  0x73   : > { %v6330_v16 = vld [vmem:[%s8097_s6 + $0xae0] sm:$0xf]  ;;  %v7594_v17 = vld [vmem:[%s8097_s6 + $0xaec] sm:$0xf0]  ;;  %v6203_v30 = vor.u32 %v7562_v15, %v6202_v13  ;;  %v8285_v42 = vpack.c.b16 %v895_v25, %v895_v25  ;;  %3923 = vmatpush.bf16.msrb.mxu3 %v5835_v27  ;;  %v8289_v45 = vpack.c.b16 %v896_v29, %v896_v29 }
  0x74   : > { %v6458_v23 = vld [vmem:[%s8097_s6 + $0xbe0] sm:$0xf]  ;;  %v7626_v24 = vld [vmem:[%s8097_s6 + $0xbec] sm:$0xf0]  ;;  %v6331_v31 = vor.u32 %v7594_v17, %v6330_v16  ;;  %3929 = vmatpush.bf16.msra.mxu0 %v6075_v28 }
  0x75   : > { %v6058_v32 = vld [vmem:[%s8097_s6 + $0x8c0] sm:$0xf]  ;;  %v7526_v33 = vld [vmem:[%s8097_s6 + $0x8cc] sm:$0xf0]  ;;  %v6459_v35 = vor.u32 %v7626_v24, %v6458_v23  ;;  %3911 = vmatmul.bf16.vlgmr.msrb.gmra.mxu2 %v8281_v39  ;;  %3885 = vmatmul.bf16.vlgmr.msrb.gmra.mxu0 %v8285_v42 }
  0x76   : > { %v6186_v34 = vld [vmem:[%s8097_s6 + $0x9c0] sm:$0xf]  ;;  %v7558_v36 = vld [vmem:[%s8097_s6 + $0x9cc] sm:$0xf0]  ;;  %v6059_v44 = vor.u32 %v7526_v33, %v6058_v32  ;;  %3942 = vmatpush.bf16.msra.mxu1 %v6203_v30  ;;  %3955 = vmatpush.bf16.msra.mxu2 %v6331_v31 }
  0x77   : > { %v6314_v37 = vld [vmem:[%s8097_s6 + $0xac0] sm:$0xf]  ;;  %v7590_v38 = vld [vmem:[%s8097_s6 + $0xacc] sm:$0xf0]  ;;  %v6187_v46 = vor.u32 %v7558_v36, %v6186_v34  ;;  %3968 = vmatpush.bf16.msra.mxu3 %v6459_v35  ;;  %3898 = vmatmul.bf16.vlgmr.msrb.gmra.mxu1 %v8289_v45 }
  0x78   : > { %v6442_v40 = vld [vmem:[%s8097_s6 + $0xbc0] sm:$0xf]  ;;  %v7622_v41 = vld [vmem:[%s8097_s6 + $0xbcc] sm:$0xf0]  ;;  %v6315_v47 = vor.u32 %v7590_v38, %v6314_v37  ;;  %3924 = vmatmul.bf16.vlgmr.msrb.gmra.mxu3 %v8287_v43  ;;  %3930 = vmatpush.bf16.msra.mxu0 %v6059_v44 }
  0x79   : > { %v6042_v48 = vld [vmem:[%s8097_s6 + $0x8a0] sm:$0xf]  ;;  %v7522_v49 = vld [vmem:[%s8097_s6 + $0x8ac] sm:$0xf0]  ;;  %v6443_v51 = vor.u32 %v7622_v41, %v6442_v40 }
  0x7a   : > { %v6170_v50 = vld [vmem:[%s8097_s6 + $0x9a0] sm:$0xf]  ;;  %v7554_v52 = vld [vmem:[%s8097_s6 + $0x9ac] sm:$0xf0]  ;;  %v6043_v57 = vor.u32 %v7522_v49, %v6042_v48  ;;  %3943 = vmatpush.bf16.msra.mxu1 %v6187_v46  ;;  %3956 = vmatpush.bf16.msra.mxu2 %v6315_v47 }
  0x7b   : > { %v6298_v53 = vld [vmem:[%s8097_s6 + $0xaa0] sm:$0xf]  ;;  %v7586_v54 = vld [vmem:[%s8097_s6 + $0xaac] sm:$0xf0]  ;;  %v6171_v58 = vor.u32 %v7554_v52, %v6170_v50  ;;  %3969 = vmatpush.bf16.msra.mxu3 %v6443_v51 }
  0x7c   : > { %v6426_v55 = vld [vmem:[%s8097_s6 + $0xba0] sm:$0xf]  ;;  %v7618_v56 = vld [vmem:[%s8097_s6 + $0xbac] sm:$0xf0]  ;;  %v6299_v59 = vor.u32 %v7586_v54, %v6298_v53  ;;  %3931 = vmatpush.bf16.msra.mxu0 %v6043_v57 }
  0x7d   : > { %v6026_v60 = vld [vmem:[%s8097_s6 + $0x880] sm:$0xf]  ;;  %v7518_v61 = vld [vmem:[%s8097_s6 + $0x88c] sm:$0xf0]  ;;  %v6427_v63 = vor.u32 %v7618_v56, %v6426_v55 }
  0x7e   : > { %v6154_v62 = vld [vmem:[%s8097_s6 + $0x980] sm:$0xf]  ;;  %v7550_v0 = vld [vmem:[%s8097_s6 + $0x98c] sm:$0xf0]  ;;  %v6027_v6 = vor.u32 %v7518_v61, %v6026_v60  ;;  %3944 = vmatpush.bf16.msra.mxu1 %v6171_v58  ;;  %3957 = vmatpush.bf16.msra.mxu2 %v6299_v59 }
  0x7f   : > { %v6282_v1 = vld [vmem:[%s8097_s6 + $0xa80] sm:$0xf]  ;;  %v7582_v2 = vld [vmem:[%s8097_s6 + $0xa8c] sm:$0xf0]  ;;  %v6155_v8 = vor.u32 %v7550_v0, %v6154_v62  ;;  %3970 = vmatpush.bf16.msra.mxu3 %v6427_v63  ;;  %v302_v62 = vld [vmem:[%s8120_s27 + $0x28] sm:$0xff] }
  0x80   : > { %v6410_v3 = vld [vmem:[%s8097_s6 + $0xb80] sm:$0xf]  ;;  %v7614_v4 = vld [vmem:[%s8097_s6 + $0xb8c] sm:$0xf0]  ;;  %v6283_v9 = vor.u32 %v7582_v2, %v6282_v1  ;;  %3932 = vmatpush.bf16.msra.mxu0 %v6027_v6 }
  0x81   : > { %v6010_v10 = vld [vmem:[%s8097_s6 + $0x860] sm:$0xf]  ;;  %v7514_v11 = vld [vmem:[%s8097_s6 + $0x86c] sm:$0xf0]  ;;  %v6411_v13 = vor.u32 %v7614_v4, %v6410_v3 }
  0x82   : > { %v6138_v12 = vld [vmem:[%s8097_s6 + $0x960] sm:$0xf]  ;;  %v7546_v14 = vld [vmem:[%s8097_s6 + $0x96c] sm:$0xf0]  ;;  %v6011_v19 = vor.u32 %v7514_v11, %v6010_v10  ;;  %3945 = vmatpush.bf16.msra.mxu1 %v6155_v8  ;;  %3958 = vmatpush.bf16.msra.mxu2 %v6283_v9 }
  0x83   : > { %v6266_v15 = vld [vmem:[%s8097_s6 + $0xa60] sm:$0xf]  ;;  %v7578_v16 = vld [vmem:[%s8097_s6 + $0xa6c] sm:$0xf0]  ;;  %v6139_v20 = vor.u32 %v7546_v14, %v6138_v12  ;;  %3971 = vmatpush.bf16.msra.mxu3 %v6411_v13  ;;  %v901_v13 = vunpack.c.l.b16 %v302_v62 }
  0x84   : > { %v6394_v17 = vld [vmem:[%s8097_s6 + $0xb60] sm:$0xf]  ;;  %v7610_v18 = vld [vmem:[%s8097_s6 + $0xb6c] sm:$0xf0]  ;;  %v6267_v23 = vor.u32 %v7578_v16, %v6266_v15  ;;  %3933 = vmatpush.bf16.msra.mxu0 %v6011_v19 }
  0x85   : > { %v5994_v24 = vld [vmem:[%s8097_s6 + $0x840] sm:$0xf]  ;;  %v7510_v25 = vld [vmem:[%s8097_s6 + $0x84c] sm:$0xf0]  ;;  %v6395_v27 = vor.u32 %v7610_v18, %v6394_v17  ;;  %v902_v17 = vunpack.c.h.b16 %v302_v62 }
  0x86   : > { %v6122_v26 = vld [vmem:[%s8097_s6 + $0x940] sm:$0xf]  ;;  %v7542_v28 = vld [vmem:[%s8097_s6 + $0x94c] sm:$0xf0]  ;;  %v5995_v33 = vor.u32 %v7510_v25, %v5994_v24  ;;  %3946 = vmatpush.bf16.msra.mxu1 %v6139_v20  ;;  %3959 = vmatpush.bf16.msra.mxu2 %v6267_v23 }
  0x87   : > { %v6250_v29 = vld [vmem:[%s8097_s6 + $0xa40] sm:$0xf]  ;;  %v7574_v30 = vld [vmem:[%s8097_s6 + $0xa4c] sm:$0xf0]  ;;  %v6123_v34 = vor.u32 %v7542_v28, %v6122_v26  ;;  %3972 = vmatpush.bf16.msra.mxu3 %v6395_v27 }
  0x88   : > { %v6378_v31 = vld [vmem:[%s8097_s6 + $0xb40] sm:$0xf]  ;;  %v7606_v32 = vld [vmem:[%s8097_s6 + $0xb4c] sm:$0xf0]  ;;  %v6251_v35 = vor.u32 %v7574_v30, %v6250_v29  ;;  %3934 = vmatpush.bf16.msra.mxu0 %v5995_v33  ;;  %v8361_v30 = vpack.c.b16 %v901_v13, %v901_v13 }
  0x89   : > { %v5978_v36 = vld [vmem:[%s8097_s6 + $0x820] sm:$0xf]  ;;  %v7506_v37 = vld [vmem:[%s8097_s6 + $0x82c] sm:$0xf0]  ;;  %v6379_v40 = vor.u32 %v7606_v32, %v6378_v31 }
  0x8a   : > { %v6106_v38 = vld [vmem:[%s8097_s6 + $0x920] sm:$0xf]  ;;  %v7538_v41 = vld [vmem:[%s8097_s6 + $0x92c] sm:$0xf0]  ;;  %v5979_v50 = vor.u32 %v7506_v37, %v5978_v36  ;;  %3947 = vmatpush.bf16.msra.mxu1 %v6123_v34  ;;  %3960 = vmatpush.bf16.msra.mxu2 %v6251_v35  ;;  %v8367_v34 = vpack.c.b16 %v902_v17, %v902_v17 }
  0x8b   : > { %v6234_v44 = vld [vmem:[%s8097_s6 + $0xa20] sm:$0xf]  ;;  %v7570_v46 = vld [vmem:[%s8097_s6 + $0xa2c] sm:$0xf0]  ;;  %v6107_v54 = vor.u32 %v7538_v41, %v6106_v38  ;;  %3973 = vmatpush.bf16.msra.mxu3 %v6379_v40 }
  0x8c   : > { %v6362_v47 = vld [vmem:[%s8097_s6 + $0xb20] sm:$0xf]  ;;  %v7602_v48 = vld [vmem:[%s8097_s6 + $0xb2c] sm:$0xf0]  ;;  %v6235_v55 = vor.u32 %v7570_v46, %v6234_v44  ;;  %3935 = vmatpush.bf16.msra.mxu0 %v5979_v50 }
  0x8d   : > { %v5962_v49 = vld [vmem:[%s8097_s6 + $0x800] sm:$0xf]  ;;  %v7502_v51 = vld [vmem:[%s8097_s6 + $0x80c] sm:$0xf0]  ;;  %v6363_v59 = vor.u32 %v7602_v48, %v6362_v47 }
  0x8e   : > { %v6090_v52 = vld [vmem:[%s8097_s6 + $0x900] sm:$0xf]  ;;  %v7534_v53 = vld [vmem:[%s8097_s6 + $0x90c] sm:$0xf0]  ;;  %v5963_v2 = vor.u32 %v7502_v51, %v5962_v49  ;;  %3948 = vmatpush.bf16.msra.mxu1 %v6107_v54  ;;  %3961 = vmatpush.bf16.msra.mxu2 %v6235_v55 }
  0x8f   : > { %v6218_v56 = vld [vmem:[%s8097_s6 + $0xa00] sm:$0xf]  ;;  %v7566_v57 = vld [vmem:[%s8097_s6 + $0xa0c] sm:$0xf0]  ;;  %v6091_v9 = vor.u32 %v7534_v53, %v6090_v52  ;;  %3974 = vmatpush.bf16.msra.mxu3 %v6363_v59 }
  0x90   : > { %v301_v58 = vld [vmem:[%s8120_s27 + $0x20] sm:$0xff]  ;;  %v7598_v61 = vld [vmem:[%s8097_s6 + $0xb0c] sm:$0xf0]  ;;  %v6219_v10 = vor.u32 %v7566_v57, %v6218_v56  ;;  %3936 = vmatpush.bf16.msra.mxu0 %v5963_v2 }
  0x91   : > { %v6346_v60 = vld [vmem:[%s8097_s6 + $0xb00] sm:$0xf]  ;;  %v7658_v0 = vld [vmem:[%s8097_s6 + $0xcec] sm:$0xf0]  ;;  %v899_v8 = vunpack.c.l.b16 %v301_v58  ;;  %v900_v14 = vunpack.c.h.b16 %v301_v58 }
  0x92   : > { %v6586_v63 = vld [vmem:[%s8097_s6 + $0xce0] sm:$0xf]  ;;  %v7690_v3 = vld [vmem:[%s8097_s6 + $0xdec] sm:$0xf0]  ;;  %v6347_v15 = vor.u32 %v7598_v61, %v6346_v60  ;;  %3949 = vmatpush.bf16.msra.mxu1 %v6091_v9  ;;  %3962 = vmatpush.bf16.msra.mxu2 %v6219_v10 }
  0x93   : > { %v6714_v1 = vld [vmem:[%s8097_s6 + $0xde0] sm:$0xf]  ;;  %v7722_v6 = vld [vmem:[%s8097_s6 + $0xeec] sm:$0xf0]  ;;  %v6587_v16 = vor.u32 %v7658_v0, %v6586_v63  ;;  %v8356_v26 = vpack.c.b16 %v899_v8, %v899_v8  ;;  %v8363_v31 = vpack.c.b16 %v900_v14, %v900_v14 }
  0x94   : > { %v6842_v4 = vld [vmem:[%s8097_s6 + $0xee0] sm:$0xf]  ;;  %v7754_v12 = vld [vmem:[%s8097_s6 + $0xfec] sm:$0xf0]  ;;  %v6715_v18 = vor.u32 %v7690_v3, %v6714_v1  ;;  %3975 = vmatpush.bf16.msra.mxu3 %v6347_v15 }
  0x95   : > { %v6970_v11 = vld [vmem:[%s8097_s6 + $0xfe0] sm:$0xf]  ;;  %v6843_v19 = vor.u32 %v7722_v6, %v6842_v4  ;;  %v7654_v23 = vld [vmem:[%s8097_s6 + $0xccc] sm:$0xf0]  ;;  %3981 = vmatpush.bf16.msrb.mxu0 %v6587_v16  ;;  %3963 = vmatmul.bf16.vlgmr.msra.gmra.mxu2 %v8361_v30 }
  0x96   : > { %v6570_v20 = vld [vmem:[%s8097_s6 + $0xcc0] sm:$0xf]  ;;  %v6971_v25 = vor.u32 %v7754_v12, %v6970_v11  ;;  %v7686_v27 = vld [vmem:[%s8097_s6 + $0xdcc] sm:$0xf0]  ;;  %3994 = vmatpush.bf16.msrb.mxu1 %v6715_v18  ;;  %3937 = vmatmul.bf16.vlgmr.msra.gmra.mxu0 %v8356_v26 }
  0x97   : > { %v6698_v24 = vld [vmem:[%s8097_s6 + $0xdc0] sm:$0xf]  ;;  %v7718_v29 = vld [vmem:[%s8097_s6 + $0xecc] sm:$0xf0]  ;;  %v6571_v35 = vor.u32 %v7654_v23, %v6570_v20  ;;  %4007 = vmatpush.bf16.msrb.mxu2 %v6843_v19  ;;  %3950 = vmatmul.bf16.vlgmr.msra.gmra.mxu1 %v8363_v31 }
  0x98   : > { %v6826_v28 = vld [vmem:[%s8097_s6 + $0xec0] sm:$0xf]  ;;  %v7750_v33 = vld [vmem:[%s8097_s6 + $0xfcc] sm:$0xf0]  ;;  %v6699_v36 = vor.u32 %v7686_v27, %v6698_v24  ;;  %4020 = vmatpush.bf16.msrb.mxu3 %v6971_v25 }
  0x99   : > { %v6954_v32 = vld [vmem:[%s8097_s6 + $0xfc0] sm:$0xf]  ;;  %v6827_v37 = vor.u32 %v7718_v29, %v6826_v28  ;;  %v7650_v40 = vld [vmem:[%s8097_s6 + $0xcac] sm:$0xf0]  ;;  %3976 = vmatmul.bf16.vlgmr.msra.gmra.mxu3 %v8367_v34  ;;  %3982 = vmatpush.bf16.msrb.mxu0 %v6571_v35 }
  0x9a   : > { %v6554_v38 = vld [vmem:[%s8097_s6 + $0xca0] sm:$0xf]  ;;  %v6955_v44 = vor.u32 %v7750_v33, %v6954_v32  ;;  %v7682_v46 = vld [vmem:[%s8097_s6 + $0xdac] sm:$0xf0]  ;;  %3995 = vmatpush.bf16.msrb.mxu1 %v6699_v36 }
  0x9b   : > { %v6682_v41 = vld [vmem:[%s8097_s6 + $0xda0] sm:$0xf]  ;;  %v7714_v48 = vld [vmem:[%s8097_s6 + $0xeac] sm:$0xf0]  ;;  %v6555_v51 = vor.u32 %v7650_v40, %v6554_v38  ;;  %4008 = vmatpush.bf16.msrb.mxu2 %v6827_v37 }
  0x9c   : > { %v6810_v47 = vld [vmem:[%s8097_s6 + $0xea0] sm:$0xf]  ;;  %v7746_v50 = vld [vmem:[%s8097_s6 + $0xfac] sm:$0xf0]  ;;  %v6683_v52 = vor.u32 %v7682_v46, %v6682_v41  ;;  %4021 = vmatpush.bf16.msrb.mxu3 %v6955_v44 }
  0x9d   : > { %v6938_v49 = vld [vmem:[%s8097_s6 + $0xfa0] sm:$0xf]  ;;  %v6811_v53 = vor.u32 %v7714_v48, %v6810_v47  ;;  %v7646_v55 = vld [vmem:[%s8097_s6 + $0xc8c] sm:$0xf0]  ;;  %3983 = vmatpush.bf16.msrb.mxu0 %v6555_v51 }
  0x9e   : > { %v6538_v54 = vld [vmem:[%s8097_s6 + $0xc80] sm:$0xf]  ;;  %v6939_v57 = vor.u32 %v7746_v50, %v6938_v49  ;;  %v7678_v58 = vld [vmem:[%s8097_s6 + $0xd8c] sm:$0xf0]  ;;  %3996 = vmatpush.bf16.msrb.mxu1 %v6683_v52 }
  0x9f   : > { %v6666_v56 = vld [vmem:[%s8097_s6 + $0xd80] sm:$0xf]  ;;  %v7710_v60 = vld [vmem:[%s8097_s6 + $0xe8c] sm:$0xf0]  ;;  %v6539_v63 = vor.u32 %v7646_v55, %v6538_v54  ;;  %4009 = vmatpush.bf16.msrb.mxu2 %v6811_v53 }
  0xa0   : > { %v6794_v59 = vld [vmem:[%s8097_s6 + $0xe80] sm:$0xf]  ;;  %v7742_v62 = vld [vmem:[%s8097_s6 + $0xf8c] sm:$0xf0]  ;;  %v6667_v0 = vor.u32 %v7678_v58, %v6666_v56  ;;  %4022 = vmatpush.bf16.msrb.mxu3 %v6939_v57 }
  0xa1   : > { %v6922_v61 = vld [vmem:[%s8097_s6 + $0xf80] sm:$0xf]  ;;  %v6795_v1 = vor.u32 %v7710_v60, %v6794_v59  ;;  %v7642_v3 = vld [vmem:[%s8097_s6 + $0xc6c] sm:$0xf0]  ;;  %3984 = vmatpush.bf16.msrb.mxu0 %v6539_v63  ;;  %v304_v60 = vld [vmem:[%s8120_s27 + $0x38] sm:$0xff] }
  0xa2   : > { %v6522_v2 = vld [vmem:[%s8097_s6 + $0xc60] sm:$0xf]  ;;  %v6923_v6 = vor.u32 %v7742_v62, %v6922_v61  ;;  %v7674_v8 = vld [vmem:[%s8097_s6 + $0xd6c] sm:$0xf0]  ;;  %3997 = vmatpush.bf16.msrb.mxu1 %v6667_v0 }
  0xa3   : > { %v6650_v4 = vld [vmem:[%s8097_s6 + $0xd60] sm:$0xf]  ;;  %v7706_v10 = vld [vmem:[%s8097_s6 + $0xe6c] sm:$0xf0]  ;;  %v6523_v13 = vor.u32 %v7642_v3, %v6522_v2  ;;  %4010 = vmatpush.bf16.msrb.mxu2 %v6795_v1  ;;  %v7272_v2 = vld [vmem:[%s8097_s6 + $0xe4] sm:$0xf] }
  0xa4   : > { %v6778_v9 = vld [vmem:[%s8097_s6 + $0xe60] sm:$0xf]  ;;  %v7738_v12 = vld [vmem:[%s8097_s6 + $0xf6c] sm:$0xf0]  ;;  %v6651_v14 = vor.u32 %v7674_v8, %v6650_v4  ;;  %4023 = vmatpush.bf16.msrb.mxu3 %v6923_v6  ;;  %v5052_v3 = vld [vmem:[%s8097_s6 + $0xf0] sm:$0xf0] }
  0xa5   : > { %v6906_v11 = vld [vmem:[%s8097_s6 + $0xf60] sm:$0xf]  ;;  %v6779_v15 = vor.u32 %v7706_v10, %v6778_v9  ;;  %v7638_v17 = vld [vmem:[%s8097_s6 + $0xc4c] sm:$0xf0]  ;;  %3985 = vmatpush.bf16.msrb.mxu0 %v6523_v13  ;;  %v7304_v9 = vld [vmem:[%s8097_s6 + $0x1e4] sm:$0xf] }
  0xa6   : > { %v6506_v16 = vld [vmem:[%s8097_s6 + $0xc40] sm:$0xf]  ;;  %v6907_v19 = vor.u32 %v7738_v12, %v6906_v11  ;;  %v7670_v20 = vld [vmem:[%s8097_s6 + $0xd4c] sm:$0xf0]  ;;  %3998 = vmatpush.bf16.msrb.mxu1 %v6651_v14  ;;  %v5180_v10 = vld [vmem:[%s8097_s6 + $0x1f0] sm:$0xf0]  ;;  %v905_v11 = vunpack.c.l.b16 %v304_v60 }
  0xa7   : > { %v6634_v18 = vld [vmem:[%s8097_s6 + $0xd40] sm:$0xf]  ;;  %v7702_v24 = vld [vmem:[%s8097_s6 + $0xe4c] sm:$0xf0]  ;;  %v6507_v28 = vor.u32 %v7638_v17, %v6506_v16  ;;  %4011 = vmatpush.bf16.msrb.mxu2 %v6779_v15  ;;  %v906_v15 = vunpack.c.h.b16 %v304_v60  ;;  %v5055_v17 = vor.u32 %v7272_v2, %v5052_v3 }
  0xa8   : > { %v6762_v23 = vld [vmem:[%s8097_s6 + $0xe40] sm:$0xf]  ;;  %v7734_v27 = vld [vmem:[%s8097_s6 + $0xf4c] sm:$0xf0]  ;;  %v6635_v29 = vor.u32 %v7670_v20, %v6634_v18  ;;  %4024 = vmatpush.bf16.msrb.mxu3 %v6907_v19 }
  0xa9   : > { %v6890_v25 = vld [vmem:[%s8097_s6 + $0xf40] sm:$0xf]  ;;  %v6763_v32 = vor.u32 %v7702_v24, %v6762_v23  ;;  %v7634_v35 = vld [vmem:[%s8097_s6 + $0xc2c] sm:$0xf0]  ;;  %3986 = vmatpush.bf16.msrb.mxu0 %v6507_v28  ;;  %v5183_v23 = vor.u32 %v7304_v9, %v5180_v10  ;;  %v5036_v28 = vld [vmem:[%s8097_s6 + $0xd0] sm:$0xf0] }
  0xaa   : > { %v6490_v33 = vld [vmem:[%s8097_s6 + $0xc20] sm:$0xf]  ;;  %v6891_v37 = vor.u32 %v7734_v27, %v6890_v25  ;;  %v7666_v38 = vld [vmem:[%s8097_s6 + $0xd2c] sm:$0xf0]  ;;  %3999 = vmatpush.bf16.msrb.mxu1 %v6635_v29  ;;  %v7268_v27 = vld [vmem:[%s8097_s6 + $0xc4] sm:$0xf]  ;;  %v8439_v29 = vpack.c.b16 %v905_v11, %v905_v11 }
  0xab   : > { %v6618_v36 = vld [vmem:[%s8097_s6 + $0xd20] sm:$0xf]  ;;  %v7698_v41 = vld [vmem:[%s8097_s6 + $0xe2c] sm:$0xf0]  ;;  %v6491_v48 = vor.u32 %v7634_v35, %v6490_v33  ;;  %4012 = vmatpush.bf16.msrb.mxu2 %v6763_v32  ;;  %v7300_v33 = vld [vmem:[%s8097_s6 + $0x1c4] sm:$0xf] }
  0xac   : > { %v6746_v40 = vld [vmem:[%s8097_s6 + $0xe20] sm:$0xf]  ;;  %v7730_v46 = vld [vmem:[%s8097_s6 + $0xf2c] sm:$0xf0]  ;;  %v6619_v52 = vor.u32 %v7666_v38, %v6618_v36  ;;  %4025 = vmatpush.bf16.msrb.mxu3 %v6891_v37  ;;  %v5164_v35 = vld [vmem:[%s8097_s6 + $0x1d0] sm:$0xf0]  ;;  %v8445_v36 = vpack.c.b16 %v906_v15, %v906_v15 }
  0xad   : > { %v6874_v44 = vld [vmem:[%s8097_s6 + $0xf20] sm:$0xf]  ;;  %v7630_v49 = vld [vmem:[%s8097_s6 + $0xc0c] sm:$0xf0]  ;;  %v6747_v53 = vor.u32 %v7698_v41, %v6746_v40  ;;  %3987 = vmatpush.bf16.msrb.mxu0 %v6491_v48  ;;  %v5039_v40 = vor.u32 %v7268_v27, %v5036_v28  ;;  %v7256_v11 = vld [vmem:[%s8097_s6 + $0x64] sm:$0xf] }
  0xae   : > { %v6474_v47 = vld [vmem:[%s8097_s6 + $0xc00] sm:$0xf]  ;;  %v7662_v51 = vld [vmem:[%s8097_s6 + $0xd0c] sm:$0xf0]  ;;  %v6875_v57 = vor.u32 %v7730_v46, %v6874_v44  ;;  %4000 = vmatpush.bf16.msrb.mxu1 %v6619_v52  ;;  %v5148_v52 = vld [vmem:[%s8097_s6 + $0x1b0] sm:$0xf0] }
  0xaf   : > { %v6602_v50 = vld [vmem:[%s8097_s6 + $0xd00] sm:$0xf]  ;;  %v7694_v55 = vld [vmem:[%s8097_s6 + $0xe0c] sm:$0xf0]  ;;  %v6475_v0 = vor.u32 %v7630_v49, %v6474_v47  ;;  %4013 = vmatpush.bf16.msrb.mxu2 %v6747_v53  ;;  %v5167_v47 = vor.u32 %v7300_v33, %v5164_v35  ;;  %v7264_v49 = vld [vmem:[%s8097_s6 + $0xa4] sm:$0xf] }
  0xb0   : > { %v6730_v54 = vld [vmem:[%s8097_s6 + $0xe00] sm:$0xf]  ;;  %v303_v56 = vld [vmem:[%s8120_s27 + $0x30] sm:$0xff]  ;;  %v6603_v6 = vor.u32 %v7662_v51, %v6602_v50  ;;  %4026 = vmatpush.bf16.msrb.mxu3 %v6875_v57  ;;  %v7296_v51 = vld [vmem:[%s8097_s6 + $0x1a4] sm:$0xf] }
  0xb1   : > { %v6858_v58 = vld [vmem:[%s8097_s6 + $0xf00] sm:$0xf]  ;;  %v7726_v59 = vld [vmem:[%s8097_s6 + $0xf0c] sm:$0xf0]  ;;  %v903_v4 = vunpack.c.l.b16 %v303_v56  ;;  %v6731_v8 = vor.u32 %v7694_v55, %v6730_v54  ;;  %v904_v12 = vunpack.c.h.b16 %v303_v56  ;;  %3988 = vmatpush.bf16.msrb.mxu0 %v6475_v0  ;;  %v5020_v50 = vld [vmem:[%s8097_s6 + $0xb0] sm:$0xf0] }
  0xb2   : > { %v7098_v61 = vld [vmem:[%s8097_s6 + $0x10e0] sm:$0xf]  ;;  %v7786_v62 = vld [vmem:[%s8097_s6 + $0x10ec] sm:$0xf0]  ;;  %v6859_v13 = vor.u32 %v7726_v59, %v6858_v58  ;;  %4001 = vmatpush.bf16.msrb.mxu1 %v6603_v6  ;;  %v5023_v55 = vor.u32 %v7264_v49, %v5020_v50  ;;  %v5151_v59 = vor.u32 %v7296_v51, %v5148_v52  ;;  %v5132_v0 = vld [vmem:[%s8097_s6 + $0x190] sm:$0xf0] }
  0xb3   : > { %v7226_v63 = vld [vmem:[%s8097_s6 + $0x11e0] sm:$0xf]  ;;  %v7818_v1 = vld [vmem:[%s8097_s6 + $0x11ec] sm:$0xf0]  ;;  %v7099_v14 = vor.u32 %v7786_v62, %v7098_v61  ;;  %v8434_v24 = vpack.c.b16 %v903_v4, %v903_v4  ;;  %4014 = vmatpush.bf16.msrb.mxu2 %v6731_v8  ;;  %v8441_v32 = vpack.c.b16 %v904_v12, %v904_v12  ;;  %v7260_v61 = vld [vmem:[%s8097_s6 + $0x84] sm:$0xf] }
  0xb4   : > { %v7227_v16 = vor.u32 %v7818_v1, %v7226_v63  ;;  %v7082_v18 = vld [vmem:[%s8097_s6 + $0x10c0] sm:$0xf]  ;;  %v7782_v19 = vld [vmem:[%s8097_s6 + $0x10cc] sm:$0xf0]  ;;  %4027 = vmatpush.bf16.msrb.mxu3 %v6859_v13  ;;  %v5004_v62 = vld [vmem:[%s8097_s6 + $0x90] sm:$0xf0] }
  0xb5   : > { %v7210_v20 = vld [vmem:[%s8097_s6 + $0x11c0] sm:$0xf]  ;;  %v7814_v25 = vld [vmem:[%s8097_s6 + $0x11cc] sm:$0xf0]  ;;  %4033 = vmatpush.bf16.msra.mxu0 %v7099_v14  ;;  %v7083_v37 = vor.u32 %v7782_v19, %v7082_v18  ;;  %4002 = vmatmul.bf16.vlgmr.msrb.gmra.mxu1 %v8441_v32  ;;  %v7292_v63 = vld [vmem:[%s8097_s6 + $0x184] sm:$0xf]  ;;  %v5007_v3 = vor.u32 %v7260_v61, %v5004_v62 }
  0xb6   : > { %4046 = vmatpush.bf16.msra.mxu1 %v7227_v16  ;;  %v7211_v38 = vor.u32 %v7814_v25, %v7210_v20  ;;  %v7066_v41 = vld [vmem:[%s8097_s6 + $0x10a0] sm:$0xf]  ;;  %v7778_v44 = vld [vmem:[%s8097_s6 + $0x10ac] sm:$0xf0]  ;;  %3989 = vmatmul.bf16.vlgmr.msrb.gmra.mxu0 %v8434_v24  ;;  %v5135_v9 = vor.u32 %v7292_v63, %v5132_v0  ;;  %v4988_v12 = vld [vmem:[%s8097_s6 + $0x70] sm:$0xf0] }
  0xb7   : > { %4059 = vmatpush.bf16.msra.mxu2 %v5055_v17  ;;  %v7194_v46 = vld [vmem:[%s8097_s6 + $0x11a0] sm:$0xf]  ;;  %v7810_v48 = vld [vmem:[%s8097_s6 + $0x11ac] sm:$0xf0]  ;;  %4028 = vmatmul.bf16.vlgmr.msrb.gmra.mxu3 %v8445_v36  ;;  %v7067_v53 = vor.u32 %v7778_v44, %v7066_v41  ;;  %v7288_v13 = vld [vmem:[%s8097_s6 + $0x164] sm:$0xf]  ;;  %v4991_v17 = vor.u32 %v7256_v11, %v4988_v12 }
  0xb8   : > { %4072 = vmatpush.bf16.msra.mxu3 %v5183_v23  ;;  %4015 = vmatmul.bf16.vlgmr.msrb.gmra.mxu2 %v8439_v29  ;;  %v7195_v54 = vor.u32 %v7810_v48, %v7194_v46  ;;  %v7050_v56 = vld [vmem:[%s8097_s6 + $0x1080] sm:$0xf]  ;;  %v7774_v57 = vld [vmem:[%s8097_s6 + $0x108c] sm:$0xf0]  ;;  %v5116_v14 = vld [vmem:[%s8097_s6 + $0x170] sm:$0xf0] }
  0xb9   : > { %4034 = vmatpush.bf16.msra.mxu0 %v7083_v37  ;;  %v7178_v58 = vld [vmem:[%s8097_s6 + $0x1180] sm:$0xf]  ;;  %v7806_v60 = vld [vmem:[%s8097_s6 + $0x118c] sm:$0xf0]  ;;  %v7051_v1 = vor.u32 %v7774_v57, %v7050_v56  ;;  %v5119_v23 = vor.u32 %v7288_v13, %v5116_v14  ;;  %v7252_v27 = vld [vmem:[%s8097_s6 + $0x44] sm:$0xf] }
  0xba   : > { %4047 = vmatpush.bf16.msra.mxu1 %v7211_v38  ;;  %v7179_v2 = vor.u32 %v7806_v60, %v7178_v58  ;;  %v7034_v4 = vld [vmem:[%s8097_s6 + $0x1060] sm:$0xf]  ;;  %v7770_v6 = vld [vmem:[%s8097_s6 + $0x106c] sm:$0xf0]  ;;  %v4972_v28 = vld [vmem:[%s8097_s6 + $0x50] sm:$0xf0] }
  0xbb   : > { %4060 = vmatpush.bf16.msra.mxu2 %v5039_v40  ;;  %v7162_v8 = vld [vmem:[%s8097_s6 + $0x1160] sm:$0xf]  ;;  %v7802_v10 = vld [vmem:[%s8097_s6 + $0x116c] sm:$0xf0]  ;;  %v7035_v15 = vor.u32 %v7770_v6, %v7034_v4  ;;  %v7284_v33 = vld [vmem:[%s8097_s6 + $0x144] sm:$0xf]  ;;  %v4975_v40 = vor.u32 %v7252_v27, %v4972_v28 }
  0xbc   : > { %4073 = vmatpush.bf16.msra.mxu3 %v5167_v47  ;;  %v7163_v16 = vor.u32 %v7802_v10, %v7162_v8  ;;  %v7018_v18 = vld [vmem:[%s8097_s6 + $0x1040] sm:$0xf]  ;;  %v7766_v19 = vld [vmem:[%s8097_s6 + $0x104c] sm:$0xf0]  ;;  %v5100_v35 = vld [vmem:[%s8097_s6 + $0x150] sm:$0xf0] }
  0xbd   : > { %4035 = vmatpush.bf16.msra.mxu0 %v7067_v53  ;;  %v7146_v20 = vld [vmem:[%s8097_s6 + $0x1140] sm:$0xf]  ;;  %v7798_v25 = vld [vmem:[%s8097_s6 + $0x114c] sm:$0xf0]  ;;  %v7019_v37 = vor.u32 %v7766_v19, %v7018_v18  ;;  %v5103_v47 = vor.u32 %v7284_v33, %v5100_v35  ;;  %v7248_v49 = vld [vmem:[%s8097_s6 + $0x24] sm:$0xf] }
  0xbe   : > { %4048 = vmatpush.bf16.msra.mxu1 %v7195_v54  ;;  %v7147_v38 = vor.u32 %v7798_v25, %v7146_v20  ;;  %v7002_v41 = vld [vmem:[%s8097_s6 + $0x1020] sm:$0xf]  ;;  %v7762_v44 = vld [vmem:[%s8097_s6 + $0x102c] sm:$0xf0]  ;;  %v4956_v50 = vld [vmem:[%s8097_s6 + $0x30] sm:$0xf0] }
  0xbf   : > { %4061 = vmatpush.bf16.msra.mxu2 %v5023_v55  ;;  %v7130_v46 = vld [vmem:[%s8097_s6 + $0x1120] sm:$0xf]  ;;  %v7794_v48 = vld [vmem:[%s8097_s6 + $0x112c] sm:$0xf0]  ;;  %v7280_v51 = vld [vmem:[%s8097_s6 + $0x124] sm:$0xf]  ;;  %v7003_v53 = vor.u32 %v7762_v44, %v7002_v41  ;;  %v4959_v58 = vor.u32 %v7248_v49, %v4956_v50 }
  0xc0   : > { %4074 = vmatpush.bf16.msra.mxu3 %v5151_v59  ;;  %v5084_v52 = vld [vmem:[%s8097_s6 + $0x130] sm:$0xf0]  ;;  %v6986_v54 = vld [vmem:[%s8097_s6 + $0x1000] sm:$0xf]  ;;  %v7758_v55 = vld [vmem:[%s8097_s6 + $0x100c] sm:$0xf0]  ;;  %v7131_v57 = vor.u32 %v7794_v48, %v7130_v46 }
  0xc1   : > { %4036 = vmatpush.bf16.msra.mxu0 %v7051_v1  ;;  %v7114_v56 = vld [vmem:[%s8097_s6 + $0x1100] sm:$0xf]  ;;  %v7790_v59 = vld [vmem:[%s8097_s6 + $0x110c] sm:$0xf0]  ;;  %v7244_v60 = vld [vmem:[%s8097_s6 + $0x4] sm:$0xf]  ;;  %v5087_v62 = vor.u32 %v7280_v51, %v5084_v52  ;;  %v6987_v6 = vor.u32 %v7758_v55, %v6986_v54 }
  0xc2   : > { %4049 = vmatpush.bf16.msra.mxu1 %v7179_v2  ;;  %v305_v61 = vld [vmem:[%s8120_s27 + $0x40] sm:$0xff]  ;;  %v4940_v63 = vld [vmem:[%s8097_s6 + $0x10] sm:$0xf0]  ;;  %v7115_v12 = vor.u32 %v7790_v59, %v7114_v56 }
  0xc3   : > { %4062 = vmatpush.bf16.msra.mxu2 %v5007_v3  ;;  %v7276_v0 = vld [vmem:[%s8097_s6 + $0x104] sm:$0xf]  ;;  %v5068_v1 = vld [vmem:[%s8097_s6 + $0x110] sm:$0xf0]  ;;  %v907_v11 = vunpack.c.l.b16 %v305_v61  ;;  %v4943_v13 = vor.u32 %v7244_v60, %v4940_v63 }
  0xc4   : > { %4075 = vmatpush.bf16.msra.mxu3 %v5135_v9  ;;  %v7336_v2 = vld [vmem:[%s8097_s6 + $0x2e4] sm:$0xf]  ;;  %v5308_v3 = vld [vmem:[%s8097_s6 + $0x2f0] sm:$0xf0] }
  0xc5   : > { %4037 = vmatpush.bf16.msra.mxu0 %v7035_v15  ;;  %v7368_v4 = vld [vmem:[%s8097_s6 + $0x3e4] sm:$0xf]  ;;  %v5436_v8 = vld [vmem:[%s8097_s6 + $0x3f0] sm:$0xf0]  ;;  %v5311_v18 = vor.u32 %v7336_v2, %v5308_v3  ;;  %v8511_v33 = vpack.c.b16 %v907_v11, %v907_v11 }
  0xc6   : > { %4050 = vmatpush.bf16.msra.mxu1 %v7163_v16  ;;  %v7400_v9 = vld [vmem:[%s8097_s6 + $0x4e4] sm:$0xf]  ;;  %v5564_v10 = vld [vmem:[%s8097_s6 + $0x4f0] sm:$0xf0]  ;;  %v908_v16 = vunpack.c.h.b16 %v305_v61  ;;  %v5439_v19 = vor.u32 %v7368_v4, %v5436_v8 }
  0xc7   : > { %4063 = vmatpush.bf16.msra.mxu2 %v4991_v17  ;;  %v7432_v14 = vld [vmem:[%s8097_s6 + $0x5e4] sm:$0xf]  ;;  %v5692_v15 = vld [vmem:[%s8097_s6 + $0x5f0] sm:$0xf0]  ;;  %v5071_v17 = vor.u32 %v7276_v0, %v5068_v1  ;;  %v5567_v20 = vor.u32 %v7400_v9, %v5564_v10 }
  0xc8   : > { %4076 = vmatpush.bf16.msra.mxu3 %v5119_v23  ;;  %v7332_v23 = vld [vmem:[%s8097_s6 + $0x2c4] sm:$0xf]  ;;  %v5292_v25 = vld [vmem:[%s8097_s6 + $0x2d0] sm:$0xf0]  ;;  %v5695_v28 = vor.u32 %v7432_v14, %v5692_v15 }
  0xc9   : > { %4038 = vmatpush.bf16.msra.mxu0 %v7019_v37  ;;  %v7364_v27 = vld [vmem:[%s8097_s6 + $0x3c4] sm:$0xf]  ;;  %v5420_v35 = vld [vmem:[%s8097_s6 + $0x3d0] sm:$0xf0]  ;;  %v5295_v46 = vor.u32 %v7332_v23, %v5292_v25 }
  0xca   : > { %4051 = vmatpush.bf16.msra.mxu1 %v7147_v38  ;;  %v7396_v37 = vld [vmem:[%s8097_s6 + $0x4c4] sm:$0xf]  ;;  %v5548_v38 = vld [vmem:[%s8097_s6 + $0x4d0] sm:$0xf0] }
  0xcb   : > { %4064 = vmatpush.bf16.msra.mxu2 %v4975_v40  ;;  %v8516_v40 = vpack.c.b16 %v908_v16, %v908_v16  ;;  %v7428_v41 = vld [vmem:[%s8097_s6 + $0x5c4] sm:$0xf]  ;;  %v5676_v44 = vld [vmem:[%s8097_s6 + $0x5d0] sm:$0xf0]  ;;  %v5551_v48 = vor.u32 %v7396_v37, %v5548_v38 }
  0xcc   : > { %4077 = vmatpush.bf16.msra.mxu3 %v5103_v47  ;;  %v5423_v47 = vor.u32 %v7364_v27, %v5420_v35  ;;  %v7328_v49 = vld [vmem:[%s8097_s6 + $0x2a4] sm:$0xf]  ;;  %v5276_v50 = vld [vmem:[%s8097_s6 + $0x2b0] sm:$0xf0]  ;;  %v5679_v52 = vor.u32 %v7428_v41, %v5676_v44 }
  0xcd   : > { %4039 = vmatpush.bf16.msra.mxu0 %v7003_v53  ;;  %v7360_v51 = vld [vmem:[%s8097_s6 + $0x3a4] sm:$0xf]  ;;  %v5404_v53 = vld [vmem:[%s8097_s6 + $0x3b0] sm:$0xf0] }
  0xce   : > { %4052 = vmatpush.bf16.msra.mxu1 %v7131_v57  ;;  %v7392_v54 = vld [vmem:[%s8097_s6 + $0x4a4] sm:$0xf]  ;;  %v5532_v55 = vld [vmem:[%s8097_s6 + $0x4b0] sm:$0xf0]  ;;  %v5407_v59 = vor.u32 %v7360_v51, %v5404_v53 }
  0xcf   : > { %4065 = vmatpush.bf16.msra.mxu2 %v4959_v58  ;;  %v7424_v56 = vld [vmem:[%s8097_s6 + $0x5a4] sm:$0xf]  ;;  %v5660_v57 = vld [vmem:[%s8097_s6 + $0x5b0] sm:$0xf0]  ;;  %v5279_v58 = vor.u32 %v7328_v49, %v5276_v50  ;;  %v5535_v60 = vor.u32 %v7392_v54, %v5532_v55 }
  0xd0   : > { %4078 = vmatpush.bf16.msra.mxu3 %v5087_v62  ;;  %v7324_v61 = vld [vmem:[%s8097_s6 + $0x284] sm:$0xf]  ;;  %v5260_v62 = vld [vmem:[%s8097_s6 + $0x290] sm:$0xf0]  ;;  %v5663_v0 = vor.u32 %v7424_v56, %v5660_v57 }
  0xd1   : > { %4040 = vmatpush.bf16.msra.mxu0 %v6987_v6  ;;  %v7356_v63 = vld [vmem:[%s8097_s6 + $0x384] sm:$0xf]  ;;  %v5388_v1 = vld [vmem:[%s8097_s6 + $0x390] sm:$0xf0]  ;;  %v5263_v8 = vor.u32 %v7324_v61, %v5260_v62 }
  0xd2   : > { %4053 = vmatpush.bf16.msra.mxu1 %v7115_v12  ;;  %v7388_v2 = vld [vmem:[%s8097_s6 + $0x484] sm:$0xf]  ;;  %v5516_v3 = vld [vmem:[%s8097_s6 + $0x490] sm:$0xf0]  ;;  %v5391_v9 = vor.u32 %v7356_v63, %v5388_v1 }
  0xd3   : > { %4066 = vmatpush.bf16.msra.mxu2 %v4943_v13  ;;  %v7420_v4 = vld [vmem:[%s8097_s6 + $0x584] sm:$0xf]  ;;  %v5644_v6 = vld [vmem:[%s8097_s6 + $0x590] sm:$0xf0]  ;;  %v5519_v10 = vor.u32 %v7388_v2, %v5516_v3 }
  0xd4   : > { %4079 = vmatpush.bf16.msra.mxu3 %v5071_v17  ;;  %4041 = vmatmul.bf16.vlgmr.msra.gmra.mxu0 %v8511_v33  ;;  %v7320_v11 = vld [vmem:[%s8097_s6 + $0x264] sm:$0xf]  ;;  %v5244_v12 = vld [vmem:[%s8097_s6 + $0x270] sm:$0xf0]  ;;  %v5647_v14 = vor.u32 %v7420_v4, %v5644_v6 }
  0xd5   : > { %4085 = vmatpush.bf16.msrb.mxu0 %v5311_v18  ;;  %4054 = vmatmul.bf16.vlgmr.msra.gmra.mxu1 %v8516_v40  ;;  %v7352_v13 = vld [vmem:[%s8097_s6 + $0x364] sm:$0xf]  ;;  %v5372_v15 = vld [vmem:[%s8097_s6 + $0x370] sm:$0xf0] }
  0xd6   : > { %4098 = vmatpush.bf16.msrb.mxu1 %v5439_v19  ;;  %4067 = vmatmul.bf16.vlgmr.msra.gmra.mxu2 %v8226_v21  ;;  %v7384_v16 = vld [vmem:[%s8097_s6 + $0x464] sm:$0xf]  ;;  %v5500_v17 = vld [vmem:[%s8097_s6 + $0x470] sm:$0xf0]  ;;  %v5375_v23 = vor.u32 %v7352_v13, %v5372_v15 }
  0xd7   : > { %4111 = vmatpush.bf16.msrb.mxu2 %v5567_v20  ;;  %4080 = vmatmul.bf16.vlgmr.msra.gmra.mxu3 %v8229_v22  ;;  %v7416_v18 = vld [vmem:[%s8097_s6 + $0x564] sm:$0xf]  ;;  %v5628_v19 = vld [vmem:[%s8097_s6 + $0x570] sm:$0xf0]  ;;  %v5247_v20 = vor.u32 %v7320_v11, %v5244_v12  ;;  %v5503_v25 = vor.u32 %v7384_v16, %v5500_v17  ;;  %v3860_v57 = vpop.f32.mrf.mxu2 }
  0xd8   : > { %4124 = vmatpush.bf16.msrb.mxu3 %v5695_v28  ;;  %v7316_v27 = vld [vmem:[%s8097_s6 + $0x244] sm:$0xf]  ;;  %v5228_v28 = vld [vmem:[%s8097_s6 + $0x250] sm:$0xf0]  ;;  %v5631_v37 = vor.u32 %v7416_v18, %v5628_v19  ;;  %v3873_v62 = vpop.f32.mrf.mxu3 }
  0xd9   : > { %4086 = vmatpush.bf16.msrb.mxu0 %v5295_v46  ;;  %v7348_v35 = vld [vmem:[%s8097_s6 + $0x344] sm:$0xf]  ;;  %v5356_v38 = vld [vmem:[%s8097_s6 + $0x350] sm:$0xf0]  ;;  %v5231_v49 = vor.u32 %v7316_v27, %v5228_v28 }
  0xda   : > { %4099 = vmatpush.bf16.msrb.mxu1 %v5423_v47  ;;  %v7380_v41 = vld [vmem:[%s8097_s6 + $0x444] sm:$0xf]  ;;  %v5484_v44 = vld [vmem:[%s8097_s6 + $0x450] sm:$0xf0]  ;;  %v5359_v51 = vor.u32 %v7348_v35, %v5356_v38 }
  0xdb   : > { %4112 = vmatpush.bf16.msrb.mxu2 %v5551_v48  ;;  %v7412_v46 = vld [vmem:[%s8097_s6 + $0x544] sm:$0xf]  ;;  %v5612_v47 = vld [vmem:[%s8097_s6 + $0x550] sm:$0xf0] }
  0xdc   : > { %4125 = vmatpush.bf16.msrb.mxu3 %v5679_v52  ;;  %v5487_v52 = vor.u32 %v7380_v41, %v5484_v44  ;;  %v7312_v53 = vld [vmem:[%s8097_s6 + $0x224] sm:$0xf]  ;;  %v5212_v54 = vld [vmem:[%s8097_s6 + $0x230] sm:$0xf0] }
  0xdd   : > { %4087 = vmatpush.bf16.msrb.mxu0 %v5279_v58  ;;  %v7344_v55 = vld [vmem:[%s8097_s6 + $0x324] sm:$0xf]  ;;  %v5615_v58 = vor.u32 %v7412_v46, %v5612_v47  ;;  %v5468_v61 = vld [vmem:[%s8097_s6 + $0x430] sm:$0xf0]  ;;  %v5215_v2 = vor.u32 %v7312_v53, %v5212_v54 }
  0xde   : > { %4100 = vmatpush.bf16.msrb.mxu1 %v5407_v59  ;;  %v3834_v48 = vpop.f32.mrf.mxu0  ;;  %v3847_v50 = vpop.f32.mrf.mxu1  ;;  %v5340_v59 = vld [vmem:[%s8097_s6 + $0x330] sm:$0xf0]  ;;  %v7408_v63 = vld [vmem:[%s8097_s6 + $0x524] sm:$0xf] }
  0xdf   : > { %4113 = vmatpush.bf16.msrb.mxu2 %v5535_v60  ;;  %v3848_v56 = vadd.f32 %v3847_v50, %v3834_v48  ;;  %v7376_v60 = vld [vmem:[%s8097_s6 + $0x424] sm:$0xf]  ;;  %v5196_v4 = vld [vmem:[%s8097_s6 + $0x210] sm:$0xf0]  ;;  %v5343_v6 = vor.u32 %v7344_v55, %v5340_v59  ;;  %v3862_v46 = vpop.f32.mrf.mxu2 }
  0xe0   : > { %4126 = vmatpush.bf16.msrb.mxu3 %v5663_v0  ;;  %v5596_v0 = vld [vmem:[%s8097_s6 + $0x530] sm:$0xf0]  ;;  %v7308_v3 = vld [vmem:[%s8097_s6 + $0x204] sm:$0xf] }
  0xe1   : > { %4088 = vmatpush.bf16.msrb.mxu0 %v5263_v8  ;;  %v3861_v1 = vadd.f32 %v3860_v57, %v3848_v56  ;;  %v5471_v8 = vor.u32 %v7376_v60, %v5468_v61  ;;  %v7372_v11 = vld [vmem:[%s8097_s6 + $0x404] sm:$0xf]  ;;  %v5599_v13 = vor.u32 %v7408_v63, %v5596_v0  ;;  %v5580_v16 = vld [vmem:[%s8097_s6 + $0x510] sm:$0xf0] }
  0xe2   : > { %4101 = vmatpush.bf16.msrb.mxu1 %v5391_v9  ;;  %v7340_v9 = vld [vmem:[%s8097_s6 + $0x304] sm:$0xf]  ;;  %v5820_v18 = vld [vmem:[%s8097_s6 + $0x6f0] sm:$0xf0] }
  0xe3   : > { %4114 = vmatpush.bf16.msrb.mxu2 %v5519_v10  ;;  %v5324_v10 = vld [vmem:[%s8097_s6 + $0x310] sm:$0xf0]  ;;  %v8569_v12 = vadd.f32 %v3873_v62, %v3861_v1  ;;  %v7404_v15 = vld [vmem:[%s8097_s6 + $0x504] sm:$0xf] }
  0xe4   : > { %4127 = vmatpush.bf16.msrb.mxu3 %v5647_v14  ;;  %v5452_v14 = vld [vmem:[%s8097_s6 + $0x410] sm:$0xf0]  ;;  %v7464_v17 = vld [vmem:[%s8097_s6 + $0x6e4] sm:$0xf]  ;;  %v5583_v47 = vor.u32 %v7404_v15, %v5580_v16 }
  0xe5   : > { %4089 = vmatpush.bf16.msrb.mxu0 %v5247_v20  ;;  %v7496_v19 = vld [vmem:[%s8097_s6 + $0x7e4] sm:$0xf]  ;;  %v6076_v28 = vld [vmem:[%s8097_s6 + $0x8f0] sm:$0xf0]  ;;  %v5455_v38 = vor.u32 %v7372_v11, %v5452_v14  ;;  %v5823_v48 = vor.u32 %v7464_v17, %v5820_v18 }
  0xe6   : > { %4102 = vmatpush.bf16.msrb.mxu1 %v5375_v23  ;;  %v3836_v20 = vpop.f32.mrf.mxu0  ;;  %v5199_v23 = vor.u32 %v7308_v3, %v5196_v4  ;;  %v7528_v27 = vld [vmem:[%s8097_s6 + $0x8e4] sm:$0xf]  ;;  %v3849_v35 = vpop.f32.mrf.mxu1  ;;  %v6204_v44 = vld [vmem:[%s8097_s6 + $0x9f0] sm:$0xf0] }
  0xe7   : > { %4115 = vmatpush.bf16.msrb.mxu2 %v5503_v25  ;;  %v5948_v25 = vld [vmem:[%s8097_s6 + $0x7f0] sm:$0xf0]  ;;  %v7560_v41 = vld [vmem:[%s8097_s6 + $0x9e4] sm:$0xf] }
  0xe8   : > { %4128 = vmatpush.bf16.msrb.mxu3 %v5631_v37  ;;  %v5327_v37 = vor.u32 %v7340_v9, %v5324_v10  ;;  %v5951_v50 = vor.u32 %v7496_v19, %v5948_v25  ;;  %v5804_v53 = vld [vmem:[%s8097_s6 + $0x6d0] sm:$0xf0]  ;;  %v7492_v54 = vld [vmem:[%s8097_s6 + $0x7c4] sm:$0xf]  ;;  %v6207_v55 = vor.u32 %v7560_v41, %v6204_v44 }
  0xe9   : > { %4090 = vmatpush.bf16.msrb.mxu0 %v5231_v49  ;;  %v3875_v49 = vpop.f32.mrf.mxu3  ;;  %v5932_v56 = vld [vmem:[%s8097_s6 + $0x7d0] sm:$0xf0]  ;;  %v7524_v57 = vld [vmem:[%s8097_s6 + $0x8c4] sm:$0xf] }
  0xea   : > { %4103 = vmatpush.bf16.msrb.mxu1 %v5359_v51  ;;  %v6079_v51 = vor.u32 %v7528_v27, %v6076_v28  ;;  %v7556_v59 = vld [vmem:[%s8097_s6 + $0x9c4] sm:$0xf]  ;;  %v6188_v60 = vld [vmem:[%s8097_s6 + $0x9d0] sm:$0xf0]  ;;  %v5935_v62 = vor.u32 %v7492_v54, %v5932_v56 }
  0xeb   : > { %4116 = vmatpush.bf16.msrb.mxu2 %v5487_v52  ;;  %v7460_v52 = vld [vmem:[%s8097_s6 + $0x6c4] sm:$0xf]  ;;  %v5788_v1 = vld [vmem:[%s8097_s6 + $0x6b0] sm:$0xf0]  ;;  %v6191_v3 = vor.u32 %v7556_v59, %v6188_v60 }
  0xec   : > { %4129 = vmatpush.bf16.msrb.mxu3 %v5615_v58  ;;  %v6060_v58 = vld [vmem:[%s8097_s6 + $0x8d0] sm:$0xf0]  ;;  %v5807_v61 = vor.u32 %v7460_v52, %v5804_v53  ;;  %v7456_v0 = vld [vmem:[%s8097_s6 + $0x6a4] sm:$0xf] }
  0xed   : > { %4091 = vmatpush.bf16.msrb.mxu0 %v5215_v2  ;;  %v6063_v63 = vor.u32 %v7524_v57, %v6060_v58  ;;  %v7488_v2 = vld [vmem:[%s8097_s6 + $0x7a4] sm:$0xf]  ;;  %v5916_v4 = vld [vmem:[%s8097_s6 + $0x7b0] sm:$0xf0]  ;;  %v5791_v11 = vor.u32 %v7456_v0, %v5788_v1 }
  0xee   : > { %4104 = vmatpush.bf16.msrb.mxu1 %v5343_v6  ;;  %v7520_v6 = vld [vmem:[%s8097_s6 + $0x8a4] sm:$0xf]  ;;  %v6172_v10 = vld [vmem:[%s8097_s6 + $0x9b0] sm:$0xf0] }
  0xef   : > { %4117 = vmatpush.bf16.msrb.mxu2 %v5471_v8  ;;  %v6044_v8 = vld [vmem:[%s8097_s6 + $0x8b0] sm:$0xf0]  ;;  %v7552_v9 = vld [vmem:[%s8097_s6 + $0x9a4] sm:$0xf] }
  0xf0   : > { %4130 = vmatpush.bf16.msrb.mxu3 %v5599_v13  ;;  %v5919_v13 = vor.u32 %v7488_v2, %v5916_v4  ;;  %v6047_v14 = vor.u32 %v7520_v6, %v6044_v8  ;;  %v7452_v15 = vld [vmem:[%s8097_s6 + $0x684] sm:$0xf]  ;;  %v5772_v16 = vld [vmem:[%s8097_s6 + $0x690] sm:$0xf0]  ;;  %v6175_v18 = vor.u32 %v7552_v9, %v6172_v10 }
  0xf1   : > { %4092 = vmatpush.bf16.msrb.mxu0 %v5199_v23  ;;  %v7484_v17 = vld [vmem:[%s8097_s6 + $0x784] sm:$0xf]  ;;  %v5900_v19 = vld [vmem:[%s8097_s6 + $0x790] sm:$0xf0]  ;;  %v5775_v28 = vor.u32 %v7452_v15, %v5772_v16 }
  0xf2   : > { %4105 = vmatpush.bf16.msrb.mxu1 %v5327_v37  ;;  %v7516_v20 = vld [vmem:[%s8097_s6 + $0x884] sm:$0xf]  ;;  %v6028_v23 = vld [vmem:[%s8097_s6 + $0x890] sm:$0xf0]  ;;  %v3886_v35 = vpop.f32.mrf.mxu0  ;;  %v5903_v37 = vor.u32 %v7484_v17, %v5900_v19 }
  0xf3   : > { %4118 = vmatpush.bf16.msrb.mxu2 %v5455_v38  ;;  %v7548_v25 = vld [vmem:[%s8097_s6 + $0x984] sm:$0xf]  ;;  %v6156_v27 = vld [vmem:[%s8097_s6 + $0x990] sm:$0xf0]  ;;  %v6031_v38 = vor.u32 %v7516_v20, %v6028_v23 }
  0xf4   : > { %4131 = vmatpush.bf16.msrb.mxu3 %v5583_v47  ;;  %4093 = vmatmul.bf16.vlgmr.msrb.gmra.mxu0 %v8212_v5  ;;  %v7448_v41 = vld [vmem:[%s8097_s6 + $0x664] sm:$0xf]  ;;  %v5756_v44 = vld [vmem:[%s8097_s6 + $0x670] sm:$0xf0]  ;;  %v3887_v47 = vadd.f32 %v3886_v35, %v8569_v12  ;;  %v6159_v49 = vor.u32 %v7548_v25, %v6156_v27 }
  0xf5   : > { %4137 = vmatpush.bf16.msra.mxu0 %v5823_v48  ;;  %4106 = vmatmul.bf16.vlgmr.msrb.gmra.mxu1 %v8215_v7  ;;  %v7480_v46 = vld [vmem:[%s8097_s6 + $0x764] sm:$0xf]  ;;  %v3899_v48 = vpop.f32.mrf.mxu1  ;;  %v6012_v52 = vld [vmem:[%s8097_s6 + $0x870] sm:$0xf0]  ;;  %v5759_v56 = vor.u32 %v7448_v41, %v5756_v44 }
  0xf6   : > { %4150 = vmatpush.bf16.msra.mxu1 %v5951_v50  ;;  %4119 = vmatmul.bf16.vlgmr.msrb.gmra.mxu2 %v8285_v42  ;;  %v5884_v50 = vld [vmem:[%s8097_s6 + $0x770] sm:$0xf0]  ;;  %v7544_v53 = vld [vmem:[%s8097_s6 + $0x964] sm:$0xf] }
  0xf7   : > { %4163 = vmatpush.bf16.msra.mxu2 %v6079_v51  ;;  %4132 = vmatmul.bf16.vlgmr.msrb.gmra.mxu3 %v8289_v45  ;;  %v7512_v51 = vld [vmem:[%s8097_s6 + $0x864] sm:$0xf]  ;;  %v6140_v54 = vld [vmem:[%s8097_s6 + $0x970] sm:$0xf0]  ;;  %v5887_v12 = vor.u32 %v7480_v46, %v5884_v50 }
  0xf8   : > { %4176 = vmatpush.bf16.msra.mxu3 %v6207_v55  ;;  %v3900_v55 = vadd.f32 %v3899_v48, %v3887_v47  ;;  %v6015_v57 = vor.u32 %v7512_v51, %v6012_v52  ;;  %v7444_v58 = vld [vmem:[%s8097_s6 + $0x644] sm:$0xf]  ;;  %v5740_v59 = vld [vmem:[%s8097_s6 + $0x650] sm:$0xf0] }
  0xf9   : > { %4138 = vmatpush.bf16.msra.mxu0 %v5807_v61  ;;  %v7476_v60 = vld [vmem:[%s8097_s6 + $0x744] sm:$0xf]  ;;  %v3912_v61 = vpop.f32.mrf.mxu2  ;;  %v5996_v1 = vld [vmem:[%s8097_s6 + $0x850] sm:$0xf0]  ;;  %v5743_v8 = vor.u32 %v7444_v58, %v5740_v59 }
  0xfa   : > { %4151 = vmatpush.bf16.msra.mxu1 %v5935_v62  ;;  %v6143_v62 = vor.u32 %v7544_v53, %v6140_v54  ;;  %v7508_v0 = vld [vmem:[%s8097_s6 + $0x844] sm:$0xf]  ;;  %v3913_v2 = vadd.f32 %v3912_v61, %v3900_v55  ;;  %v6124_v6 = vld [vmem:[%s8097_s6 + $0x950] sm:$0xf0]  ;;  %v3888_v10 = vpop.f32.mrf.mxu0 }
  0xfb   : > { %4164 = vmatpush.bf16.msra.mxu2 %v6063_v63  ;;  %v5868_v63 = vld [vmem:[%s8097_s6 + $0x750] sm:$0xf0]  ;;  %v7540_v4 = vld [vmem:[%s8097_s6 + $0x944] sm:$0xf] }
  0xfc   : > { %4177 = vmatpush.bf16.msra.mxu3 %v6191_v3  ;;  %v3925_v3 = vpop.f32.mrf.mxu3  ;;  %v5724_v15 = vld [vmem:[%s8097_s6 + $0x630] sm:$0xf0]  ;;  %v7472_v16 = vld [vmem:[%s8097_s6 + $0x724] sm:$0xf] }
  0xfd   : > { %4139 = vmatpush.bf16.msra.mxu0 %v5791_v11  ;;  %v8627_v9 = vadd.f32 %v3925_v3, %v3913_v2  ;;  %v5871_v11 = vor.u32 %v7476_v60, %v5868_v63  ;;  %v3901_v17 = vpop.f32.mrf.mxu1  ;;  %v5852_v19 = vld [vmem:[%s8097_s6 + $0x730] sm:$0xf0]  ;;  %v7504_v20 = vld [vmem:[%s8097_s6 + $0x824] sm:$0xf] }
  0xfe   : > { %4152 = vmatpush.bf16.msra.mxu1 %v5919_v13  ;;  %v5999_v13 = vor.u32 %v7508_v0, %v5996_v1  ;;  %v5980_v23 = vld [vmem:[%s8097_s6 + $0x830] sm:$0xf0]  ;;  %v7536_v25 = vld [vmem:[%s8097_s6 + $0x924] sm:$0xf] }
  0xff   : > { %4165 = vmatpush.bf16.msra.mxu2 %v6047_v14  ;;  %v7440_v14 = vld [vmem:[%s8097_s6 + $0x624] sm:$0xf]  ;;  %v6108_v27 = vld [vmem:[%s8097_s6 + $0x930] sm:$0xf0]  ;;  %v5983_v41 = vor.u32 %v7504_v20, %v5980_v23 }
 0x100   : > { %4178 = vmatpush.bf16.msra.mxu3 %v6175_v18  ;;  %v6127_v18 = vor.u32 %v7540_v4, %v6124_v6  ;;  %v7436_v35 = vld [vmem:[%s8097_s6 + $0x604] sm:$0xf]  ;;  %v5836_v46 = vld [vmem:[%s8097_s6 + $0x710] sm:$0xf0] }
 0x101   : > { %4140 = vmatpush.bf16.msra.mxu0 %v5775_v28  ;;  %v5727_v28 = vor.u32 %v7440_v14, %v5724_v15  ;;  %v7468_v44 = vld [vmem:[%s8097_s6 + $0x704] sm:$0xf]  ;;  %v3914_v48 = vpop.f32.mrf.mxu2  ;;  %v5964_v50 = vld [vmem:[%s8097_s6 + $0x810] sm:$0xf0] }
 0x102   : > { %4153 = vmatpush.bf16.msra.mxu1 %v5903_v37  ;;  %v5708_v37 = vld [vmem:[%s8097_s6 + $0x610] sm:$0xf0]  ;;  %v7500_v47 = vld [vmem:[%s8097_s6 + $0x804] sm:$0xf]  ;;  %v5839_v60 = vor.u32 %v7468_v44, %v5836_v46 }
 0x103   : > { %4166 = vmatpush.bf16.msra.mxu2 %v6031_v38  ;;  %v5855_v38 = vor.u32 %v7472_v16, %v5852_v19  ;;  %v7532_v51 = vld [vmem:[%s8097_s6 + $0x904] sm:$0xf]  ;;  %v6092_v52 = vld [vmem:[%s8097_s6 + $0x910] sm:$0xf0]  ;;  %v5967_v61 = vor.u32 %v7500_v47, %v5964_v50 }
 0x104   : > { %4179 = vmatpush.bf16.msra.mxu3 %v6159_v49  ;;  %v6111_v49 = vor.u32 %v7536_v25, %v6108_v27  ;;  %v3927_v53 = vpop.f32.mrf.mxu3  ;;  %v7592_v54 = vld [vmem:[%s8097_s6 + $0xae4] sm:$0xf]  ;;  %v6332_v55 = vld [vmem:[%s8097_s6 + $0xaf0] sm:$0xf0]  ;;  %v6095_v0 = vor.u32 %v7532_v51, %v6092_v52 }
 0x105   : > { %4141 = vmatpush.bf16.msra.mxu0 %v5759_v56  ;;  %v7624_v56 = vld [vmem:[%s8097_s6 + $0xbe4] sm:$0xf]  ;;  %v6588_v59 = vld [vmem:[%s8097_s6 + $0xcf0] sm:$0xf0]  ;;  %v6335_v1 = vor.u32 %v7592_v54, %v6332_v55 }
 0x106   : > { %4154 = vmatpush.bf16.msra.mxu1 %v5887_v12  ;;  %v5711_v12 = vor.u32 %v7436_v35, %v5708_v37  ;;  %v7656_v58 = vld [vmem:[%s8097_s6 + $0xce4] sm:$0xf]  ;;  %v6716_v63 = vld [vmem:[%s8097_s6 + $0xdf0] sm:$0xf0] }
 0x107   : > { %4167 = vmatpush.bf16.msra.mxu2 %v6015_v57  ;;  %v6460_v57 = vld [vmem:[%s8097_s6 + $0xbf0] sm:$0xf0]  ;;  %v6591_v3 = vor.u32 %v7656_v58, %v6588_v59  ;;  %v7588_v4 = vld [vmem:[%s8097_s6 + $0xac4] sm:$0xf] }
 0x108   : > { %4180 = vmatpush.bf16.msra.mxu3 %v6143_v62  ;;  %v7688_v62 = vld [vmem:[%s8097_s6 + $0xde4] sm:$0xf]  ;;  %v6463_v2 = vor.u32 %v7624_v56, %v6460_v57  ;;  %v6316_v6 = vld [vmem:[%s8097_s6 + $0xad0] sm:$0xf0] }
 0x109   : > { %4142 = vmatpush.bf16.msra.mxu0 %v5743_v8  ;;  %v7620_v8 = vld [vmem:[%s8097_s6 + $0xbc4] sm:$0xf]  ;;  %v6719_v10 = vor.u32 %v7688_v62, %v6716_v63  ;;  %v6572_v14 = vld [vmem:[%s8097_s6 + $0xcd0] sm:$0xf0]  ;;  %v6319_v17 = vor.u32 %v7588_v4, %v6316_v6 }
 0x10a   : > { %4155 = vmatpush.bf16.msra.mxu1 %v5871_v11  ;;  %v6444_v11 = vld [vmem:[%s8097_s6 + $0xbd0] sm:$0xf0]  ;;  %v7684_v15 = vld [vmem:[%s8097_s6 + $0xdc4] sm:$0xf] }
 0x10b   : > { %4168 = vmatpush.bf16.msra.mxu2 %v5999_v13  ;;  %v7652_v13 = vld [vmem:[%s8097_s6 + $0xcc4] sm:$0xf]  ;;  %v6700_v16 = vld [vmem:[%s8097_s6 + $0xdd0] sm:$0xf0] }
 0x10c   : > { %4181 = vmatpush.bf16.msra.mxu3 %v6127_v18  ;;  %v6447_v18 = vor.u32 %v7620_v8, %v6444_v11  ;;  %v6575_v19 = vor.u32 %v7652_v13, %v6572_v14  ;;  %v7584_v20 = vld [vmem:[%s8097_s6 + $0xaa4] sm:$0xf]  ;;  %v6300_v23 = vld [vmem:[%s8097_s6 + $0xab0] sm:$0xf0]  ;;  %v6703_v27 = vor.u32 %v7684_v15, %v6700_v16 }
 0x10d   : > { %4143 = vmatpush.bf16.msra.mxu0 %v5727_v28  ;;  %v7616_v25 = vld [vmem:[%s8097_s6 + $0xba4] sm:$0xf]  ;;  %v6428_v28 = vld [vmem:[%s8097_s6 + $0xbb0] sm:$0xf0]  ;;  %v6303_v44 = vor.u32 %v7584_v20, %v6300_v23 }
 0x10e   : > { %4156 = vmatpush.bf16.msra.mxu1 %v5855_v38  ;;  %v7648_v35 = vld [vmem:[%s8097_s6 + $0xca4] sm:$0xf]  ;;  %v6556_v37 = vld [vmem:[%s8097_s6 + $0xcb0] sm:$0xf0]  ;;  %v6431_v46 = vor.u32 %v7616_v25, %v6428_v28 }
 0x10f   : > { %4169 = vmatpush.bf16.msra.mxu2 %v5983_v41  ;;  %v7680_v38 = vld [vmem:[%s8097_s6 + $0xda4] sm:$0xf]  ;;  %v6684_v41 = vld [vmem:[%s8097_s6 + $0xdb0] sm:$0xf0]  ;;  %v6559_v47 = vor.u32 %v7648_v35, %v6556_v37 }
 0x110   : > { %4182 = vmatpush.bf16.msra.mxu3 %v6111_v49  ;;  %v7580_v48 = vld [vmem:[%s8097_s6 + $0xa84] sm:$0xf]  ;;  %v6284_v49 = vld [vmem:[%s8097_s6 + $0xa90] sm:$0xf0]  ;;  %v6687_v51 = vor.u32 %v7680_v38, %v6684_v41 }
 0x111   : > { %4144 = vmatpush.bf16.msra.mxu0 %v5711_v12  ;;  %v7612_v50 = vld [vmem:[%s8097_s6 + $0xb84] sm:$0xf]  ;;  %v6412_v52 = vld [vmem:[%s8097_s6 + $0xb90] sm:$0xf0]  ;;  %v6287_v57 = vor.u32 %v7580_v48, %v6284_v49 }
 0x112   : > { %4157 = vmatpush.bf16.msra.mxu1 %v5839_v60  ;;  %v7644_v53 = vld [vmem:[%s8097_s6 + $0xc84] sm:$0xf]  ;;  %v6540_v54 = vld [vmem:[%s8097_s6 + $0xc90] sm:$0xf0]  ;;  %v6415_v59 = vor.u32 %v7612_v50, %v6412_v52 }
 0x113   : > { %4170 = vmatpush.bf16.msra.mxu2 %v5967_v61  ;;  %v8679_v55 = vpop.f32.mrf.mxu0  ;;  %v7676_v56 = vld [vmem:[%s8097_s6 + $0xd84] sm:$0xf]  ;;  %v6668_v12 = vld [vmem:[%s8097_s6 + $0xd90] sm:$0xf0]  ;;  %v6543_v60 = vor.u32 %v7644_v53, %v6540_v54 }
 0x114   : > { %4183 = vmatpush.bf16.msra.mxu3 %v6095_v0  ;;  %4145 = vmatmul.bf16.vlgmr.msra.gmra.mxu0 %v8281_v39  ;;  %v8683_v58 = vpop.f32.mrf.mxu1  ;;  %v7576_v61 = vld [vmem:[%s8097_s6 + $0xa64] sm:$0xf]  ;;  %v6268_v62 = vld [vmem:[%s8097_s6 + $0xa70] sm:$0xf0]  ;;  %v6671_v0 = vor.u32 %v7676_v56, %v6668_v12 }
 0x115   : > { %4189 = vmatpush.bf16.msrb.mxu0 %v6335_v1  ;;  %4158 = vmatmul.bf16.vlgmr.msra.gmra.mxu1 %v8287_v43  ;;  %v7608_v63 = vld [vmem:[%s8097_s6 + $0xb64] sm:$0xf]  ;;  %v6396_v1 = vld [vmem:[%s8097_s6 + $0xb70] sm:$0xf0]  ;;  %v6271_v8 = vor.u32 %v7576_v61, %v6268_v62 }
 0x116   : > { %4202 = vmatpush.bf16.msrb.mxu1 %v6463_v2  ;;  %4171 = vmatmul.bf16.vlgmr.msra.gmra.mxu2 %v8356_v26  ;;  %v7640_v2 = vld [vmem:[%s8097_s6 + $0xc64] sm:$0xf]  ;;  %v6652_v6 = vld [vmem:[%s8097_s6 + $0xd70] sm:$0xf0] }
 0x117   : > { %4215 = vmatpush.bf16.msrb.mxu2 %v6591_v3  ;;  %4184 = vmatmul.bf16.vlgmr.msra.gmra.mxu3 %v8363_v31  ;;  %v6524_v3 = vld [vmem:[%s8097_s6 + $0xc70] sm:$0xf0]  ;;  %v7672_v4 = vld [vmem:[%s8097_s6 + $0xd64] sm:$0xf] }
 0x118   : > { %4228 = vmatpush.bf16.msrb.mxu3 %v6719_v10  ;;  %v6399_v10 = vor.u32 %v7608_v63, %v6396_v1  ;;  %v6527_v11 = vor.u32 %v7640_v2, %v6524_v3  ;;  %v7572_v13 = vld [vmem:[%s8097_s6 + $0xa44] sm:$0xf]  ;;  %v6252_v14 = vld [vmem:[%s8097_s6 + $0xa50] sm:$0xf0]  ;;  %v6655_v16 = vor.u32 %v7672_v4, %v6652_v6 }
 0x119   : > { %4190 = vmatpush.bf16.msrb.mxu0 %v6319_v17  ;;  %v7604_v15 = vld [vmem:[%s8097_s6 + $0xb44] sm:$0xf]  ;;  %v8696_v17 = vpop.f32.mrf.mxu2  ;;  %v6508_v20 = vld [vmem:[%s8097_s6 + $0xc50] sm:$0xf0]  ;;  %v6255_v35 = vor.u32 %v7572_v13, %v6252_v14 }
 0x11a   : > { %4203 = vmatpush.bf16.msrb.mxu1 %v6447_v18  ;;  %v6380_v18 = vld [vmem:[%s8097_s6 + $0xb50] sm:$0xf0]  ;;  %v7668_v25 = vld [vmem:[%s8097_s6 + $0xd44] sm:$0xf] }
 0x11b   : > { %4216 = vmatpush.bf16.msrb.mxu2 %v6575_v19  ;;  %v7636_v19 = vld [vmem:[%s8097_s6 + $0xc44] sm:$0xf]  ;;  %v3940_v28 = vpop.f32.mrf.mxu0  ;;  %v6383_v38 = vor.u32 %v7604_v15, %v6380_v18  ;;  %v6364_v49 = vld [vmem:[%s8097_s6 + $0xb30] sm:$0xf0] }
 0x11c   : > { %4229 = vmatpush.bf16.msrb.mxu3 %v6703_v27  ;;  %v8701_v23 = vpop.f32.mrf.mxu3  ;;  %v6636_v27 = vld [vmem:[%s8097_s6 + $0xd50] sm:$0xf0]  ;;  %v3953_v37 = vpop.f32.mrf.mxu1  ;;  %v6511_v41 = vor.u32 %v7636_v19, %v6508_v20  ;;  %v7632_v50 = vld [vmem:[%s8097_s6 + $0xc24] sm:$0xf] }
 0x11d   : > { %4191 = vmatpush.bf16.msrb.mxu0 %v6303_v44  ;;  %v7568_v44 = vld [vmem:[%s8097_s6 + $0xa24] sm:$0xf]  ;;  %v6639_v48 = vor.u32 %v7668_v25, %v6636_v27  ;;  %v6620_v53 = vld [vmem:[%s8097_s6 + $0xd30] sm:$0xf0] }
 0x11e   : > { %4204 = vmatpush.bf16.msrb.mxu1 %v6431_v46  ;;  %v6236_v46 = vld [vmem:[%s8097_s6 + $0xa30] sm:$0xf0]  ;;  %v7664_v52 = vld [vmem:[%s8097_s6 + $0xd24] sm:$0xf] }
 0x11f   : > { %4217 = vmatpush.bf16.msrb.mxu2 %v6559_v47  ;;  %v7600_v47 = vld [vmem:[%s8097_s6 + $0xb24] sm:$0xf]  ;;  %v6239_v54 = vor.u32 %v7568_v44, %v6236_v46  ;;  %v6220_v12 = vld [vmem:[%s8097_s6 + $0xa10] sm:$0xf0]  ;;  %v6623_v63 = vor.u32 %v7664_v52, %v6620_v53 }
 0x120   : > { %4230 = vmatpush.bf16.msrb.mxu3 %v6687_v51  ;;  %v6492_v51 = vld [vmem:[%s8097_s6 + $0xc30] sm:$0xf0]  ;;  %v7564_v56 = vld [vmem:[%s8097_s6 + $0xa04] sm:$0xf] }
 0x121   : > { %4192 = vmatpush.bf16.msrb.mxu0 %v6287_v57  ;;  %v6367_v57 = vor.u32 %v7600_v47, %v6364_v49  ;;  %v6348_v61 = vld [vmem:[%s8097_s6 + $0xb10] sm:$0xf0]  ;;  %v7628_v62 = vld [vmem:[%s8097_s6 + $0xc04] sm:$0xf]  ;;  %v3966_v3 = vpop.f32.mrf.mxu2 }
 0x122   : > { %4205 = vmatpush.bf16.msrb.mxu1 %v6415_v59  ;;  %v6495_v59 = vor.u32 %v7632_v50, %v6492_v51  ;;  %v7660_v1 = vld [vmem:[%s8097_s6 + $0xd04] sm:$0xf]  ;;  %v6604_v2 = vld [vmem:[%s8097_s6 + $0xd10] sm:$0xf0] }
 0x123   : > { %4218 = vmatpush.bf16.msrb.mxu2 %v6543_v60  ;;  %v7596_v60 = vld [vmem:[%s8097_s6 + $0xb04] sm:$0xf]  ;;  %v6844_v6 = vld [vmem:[%s8097_s6 + $0xef0] sm:$0xf0]  ;;  %v6607_v25 = vor.u32 %v7660_v1, %v6604_v2 }
 0x124   : > { %4231 = vmatpush.bf16.msrb.mxu3 %v6671_v0  ;;  %v6476_v0 = vld [vmem:[%s8097_s6 + $0xc10] sm:$0xf0]  ;;  %v7720_v4 = vld [vmem:[%s8097_s6 + $0xee4] sm:$0xf] }
 0x125   : > { %4193 = vmatpush.bf16.msrb.mxu0 %v6271_v8  ;;  %v7752_v8 = vld [vmem:[%s8097_s6 + $0xfe4] sm:$0xf]  ;;  %v6972_v13 = vld [vmem:[%s8097_s6 + $0xff0] sm:$0xf0]  ;;  %v6479_v18 = vor.u32 %v7628_v62, %v6476_v0  ;;  %v6847_v27 = vor.u32 %v7720_v4, %v6844_v6 }
 0x126   : > { %4206 = vmatpush.bf16.msrb.mxu1 %v6399_v10  ;;  %v3979_v10 = vpop.f32.mrf.mxu3  ;;  %v7784_v14 = vld [vmem:[%s8097_s6 + $0x10e4] sm:$0xf]  ;;  %v7100_v15 = vld [vmem:[%s8097_s6 + $0x10f0] sm:$0xf0]  ;;  %v6975_v28 = vor.u32 %v7752_v8, %v6972_v13 }
 0x127   : > { %4219 = vmatpush.bf16.msrb.mxu2 %v6527_v11  ;;  %v6223_v11 = vor.u32 %v7564_v56, %v6220_v12  ;;  %v7816_v19 = vld [vmem:[%s8097_s6 + $0x11e4] sm:$0xf]  ;;  %v7228_v20 = vld [vmem:[%s8097_s6 + $0x11f0] sm:$0xf0] }
 0x128   : > { %4232 = vmatpush.bf16.msrb.mxu3 %v6655_v16  ;;  %v6351_v16 = vor.u32 %v7596_v60, %v6348_v61  ;;  %v7716_v37 = vld [vmem:[%s8097_s6 + $0xec4] sm:$0xf]  ;;  %v7231_v44 = vor.u32 %v7816_v19, %v7228_v20  ;;  %v6956_v46 = vld [vmem:[%s8097_s6 + $0xfd0] sm:$0xf0] }
 0x129   : > { %4194 = vmatpush.bf16.msrb.mxu0 %v6255_v35  ;;  %v7103_v35 = vor.u32 %v7784_v14, %v7100_v15  ;;  %v7780_v47 = vld [vmem:[%s8097_s6 + $0x10c4] sm:$0xf]  ;;  %v7212_v50 = vld [vmem:[%s8097_s6 + $0x11d0] sm:$0xf0] }
 0x12a   : > { %4207 = vmatpush.bf16.msrb.mxu1 %v6383_v38  ;;  %v6828_v38 = vld [vmem:[%s8097_s6 + $0xed0] sm:$0xf0]  ;;  %v7812_v49 = vld [vmem:[%s8097_s6 + $0x11c4] sm:$0xf] }
 0x12b   : > { %4220 = vmatpush.bf16.msrb.mxu2 %v6511_v41  ;;  %v7748_v41 = vld [vmem:[%s8097_s6 + $0xfc4] sm:$0xf]  ;;  %v6831_v51 = vor.u32 %v7716_v37, %v6828_v38  ;;  %v6812_v56 = vld [vmem:[%s8097_s6 + $0xeb0] sm:$0xf0] }
 0x12c   : > { %4233 = vmatpush.bf16.msrb.mxu3 %v6639_v48  ;;  %v7084_v48 = vld [vmem:[%s8097_s6 + $0x10d0] sm:$0xf0]  ;;  %v6959_v52 = vor.u32 %v7748_v41, %v6956_v46  ;;  %v7744_v12 = vld [vmem:[%s8097_s6 + $0xfa4] sm:$0xf] }
 0x12d   : > { %4195 = vmatpush.bf16.msrb.mxu0 %v6239_v54  ;;  %v7087_v53 = vor.u32 %v7780_v47, %v7084_v48  ;;  %v7712_v54 = vld [vmem:[%s8097_s6 + $0xea4] sm:$0xf]  ;;  %v7068_v61 = vld [vmem:[%s8097_s6 + $0x10b0] sm:$0xf0] }
 0x12e   : > { %4208 = vmatpush.bf16.msrb.mxu1 %v6367_v57  ;;  %v7215_v57 = vor.u32 %v7812_v49, %v7212_v50  ;;  %v7776_v60 = vld [vmem:[%s8097_s6 + $0x10a4] sm:$0xf]  ;;  %v6815_v0 = vor.u32 %v7712_v54, %v6812_v56  ;;  %v6796_v4 = vld [vmem:[%s8097_s6 + $0xe90] sm:$0xf0]  ;;  %v3939_v54 = vadd.f32 %v8679_v55, %v8627_v9 }
 0x12f   : > { %4221 = vmatpush.bf16.msrb.mxu2 %v6495_v59  ;;  %v6940_v59 = vld [vmem:[%s8097_s6 + $0xfb0] sm:$0xf0]  ;;  %v7808_v62 = vld [vmem:[%s8097_s6 + $0x11a4] sm:$0xf]  ;;  %v7071_v2 = vor.u32 %v7776_v60, %v7068_v61 }
 0x130   : > { %4234 = vmatpush.bf16.msrb.mxu3 %v6623_v63  ;;  %v7196_v63 = vld [vmem:[%s8097_s6 + $0x11b0] sm:$0xf0]  ;;  %v6943_v1 = vor.u32 %v7744_v12, %v6940_v59  ;;  %v7708_v3 = vld [vmem:[%s8097_s6 + $0xe84] sm:$0xf] }
 0x131   : > { %4196 = vmatpush.bf16.msrb.mxu0 %v6223_v11  ;;  %v7740_v6 = vld [vmem:[%s8097_s6 + $0xf84] sm:$0xf]  ;;  %v7199_v8 = vor.u32 %v7808_v62, %v7196_v63  ;;  %v6924_v10 = vld [vmem:[%s8097_s6 + $0xf90] sm:$0xf0] }
 0x132   : > { %4209 = vmatpush.bf16.msrb.mxu1 %v6351_v16  ;;  %v7772_v11 = vld [vmem:[%s8097_s6 + $0x1084] sm:$0xf]  ;;  %v7052_v13 = vld [vmem:[%s8097_s6 + $0x1090] sm:$0xf0]  ;;  %v8759_v19 = vpop.f32.mrf.mxu1  ;;  %v6927_v20 = vor.u32 %v7740_v6, %v6924_v10 }
 0x133   : > { %4222 = vmatpush.bf16.msrb.mxu2 %v6479_v18  ;;  %v8755_v14 = vpop.f32.mrf.mxu0  ;;  %v7804_v15 = vld [vmem:[%s8097_s6 + $0x1184] sm:$0xf]  ;;  %v7180_v16 = vld [vmem:[%s8097_s6 + $0x1190] sm:$0xf0]  ;;  %v6799_v18 = vor.u32 %v7708_v3, %v6796_v4 }
 0x134   : > { %4235 = vmatpush.bf16.msrb.mxu3 %v6607_v25  ;;  %4197 = vmatmul.bf16.vlgmr.msrb.gmra.mxu0 %v8361_v30  ;;  %v7055_v25 = vor.u32 %v7772_v11, %v7052_v13  ;;  %v7183_v37 = vor.u32 %v7804_v15, %v7180_v16  ;;  %v6908_v38 = vld [vmem:[%s8097_s6 + $0xf70] sm:$0xf0]  ;;  %v7768_v41 = vld [vmem:[%s8097_s6 + $0x1064] sm:$0xf] }
 0x135   : > { %4241 = vmatpush.bf16.msra.mxu0 %v6847_v27  ;;  %4210 = vmatmul.bf16.vlgmr.msrb.gmra.mxu1 %v8367_v34  ;;  %v7704_v27 = vld [vmem:[%s8097_s6 + $0xe64] sm:$0xf]  ;;  %v7164_v47 = vld [vmem:[%s8097_s6 + $0x1170] sm:$0xf0] }
 0x136   : > { %4254 = vmatpush.bf16.msra.mxu1 %v6975_v28  ;;  %4223 = vmatmul.bf16.vlgmr.msrb.gmra.mxu2 %v8434_v24  ;;  %v6780_v28 = vld [vmem:[%s8097_s6 + $0xe70] sm:$0xf0]  ;;  %v7800_v46 = vld [vmem:[%s8097_s6 + $0x1164] sm:$0xf] }
 0x137   : > { %4267 = vmatpush.bf16.msra.mxu2 %v7103_v35  ;;  %4236 = vmatmul.bf16.vlgmr.msrb.gmra.mxu3 %v8441_v32  ;;  %v7736_v35 = vld [vmem:[%s8097_s6 + $0xf64] sm:$0xf]  ;;  %v6783_v48 = vor.u32 %v7704_v27, %v6780_v28  ;;  %v7167_v56 = vor.u32 %v7800_v46, %v7164_v47  ;;  %v7020_v60 = vld [vmem:[%s8097_s6 + $0x1050] sm:$0xf0] }
 0x138   : > { %4280 = vmatpush.bf16.msra.mxu3 %v7231_v44  ;;  %v7036_v44 = vld [vmem:[%s8097_s6 + $0x1070] sm:$0xf0]  ;;  %v6911_v49 = vor.u32 %v7736_v35, %v6908_v38  ;;  %v7764_v59 = vld [vmem:[%s8097_s6 + $0x1044] sm:$0xf] }
 0x139   : > { %4242 = vmatpush.bf16.msra.mxu0 %v6831_v51  ;;  %v7039_v50 = vor.u32 %v7768_v41, %v7036_v44  ;;  %v7700_v51 = vld [vmem:[%s8097_s6 + $0xe44] sm:$0xf]  ;;  %v7148_v63 = vld [vmem:[%s8097_s6 + $0x1150] sm:$0xf0] }
 0x13a   : > { %4255 = vmatpush.bf16.msra.mxu1 %v6959_v52  ;;  %v6764_v52 = vld [vmem:[%s8097_s6 + $0xe50] sm:$0xf0]  ;;  %v8779_v61 = vpop.f32.mrf.mxu3  ;;  %v7796_v62 = vld [vmem:[%s8097_s6 + $0x1144] sm:$0xf]  ;;  %v4005_v55 = vpop.f32.mrf.mxu1 }
 0x13b   : > { %4268 = vmatpush.bf16.msra.mxu2 %v7087_v53  ;;  %v7732_v53 = vld [vmem:[%s8097_s6 + $0xf44] sm:$0xf]  ;;  %v8774_v12 = vpop.f32.mrf.mxu2  ;;  %v6767_v9 = vor.u32 %v7700_v51, %v6764_v52  ;;  %v6748_v4 = vld [vmem:[%s8097_s6 + $0xe30] sm:$0xf0]  ;;  %v7151_v10 = vor.u32 %v7796_v62, %v7148_v63  ;;  %v5186_v51 = vld [vmem:[%s8097_s6 + $0x1e8] sm:$0xf] }
 0x13c   : > { %4281 = vmatpush.bf16.msra.mxu3 %v7215_v57  ;;  %v6892_v57 = vld [vmem:[%s8097_s6 + $0xf50] sm:$0xf0]  ;;  %v7696_v3 = vld [vmem:[%s8097_s6 + $0xe24] sm:$0xf]  ;;  %v5442_v63 = vld [vmem:[%s8097_s6 + $0x3e8] sm:$0xf] }
 0x13d   : > { %4243 = vmatpush.bf16.msra.mxu0 %v6815_v0  ;;  %v3992_v0 = vpop.f32.mrf.mxu0  ;;  %v7728_v6 = vld [vmem:[%s8097_s6 + $0xf24] sm:$0xf]  ;;  %v6876_v11 = vld [vmem:[%s8097_s6 + $0xf30] sm:$0xf0] }
 0x13e   : > { %4256 = vmatpush.bf16.msra.mxu1 %v6943_v1  ;;  %v6895_v1 = vor.u32 %v7732_v53, %v6892_v57  ;;  %v7760_v13 = vld [vmem:[%s8097_s6 + $0x1024] sm:$0xf]  ;;  %v7004_v15 = vld [vmem:[%s8097_s6 + $0x1030] sm:$0xf0]  ;;  %v6879_v28 = vor.u32 %v7728_v6, %v6876_v11  ;;  %v5314_v57 = vld [vmem:[%s8097_s6 + $0x2e8] sm:$0xf] }
 0x13f   : > { %4269 = vmatpush.bf16.msra.mxu2 %v7071_v2  ;;  %v7023_v2 = vor.u32 %v7764_v59, %v7020_v60  ;;  %v7792_v16 = vld [vmem:[%s8097_s6 + $0x1124] sm:$0xf]  ;;  %v7007_v35 = vor.u32 %v7760_v13, %v7004_v15  ;;  %v6860_v38 = vld [vmem:[%s8097_s6 + $0xf10] sm:$0xf0]  ;;  %v7339_v59 = vld [vmem:[%s8097_s6 + $0x2f4] sm:$0xf0] }
 0x140   : > { %4282 = vmatpush.bf16.msra.mxu3 %v7199_v8  ;;  %v3952_v8 = vadd.f32 %v8683_v58, %v3939_v54  ;;  %v7692_v27 = vld [vmem:[%s8097_s6 + $0xe04] sm:$0xf]  ;;  %v6732_v58 = vld [vmem:[%s8097_s6 + $0xe10] sm:$0xf0]  ;;  %v7371_v0 = vld [vmem:[%s8097_s6 + $0x3f4] sm:$0xf0] }
 0x141   : > { %4244 = vmatpush.bf16.msra.mxu0 %v6799_v18  ;;  %v7132_v18 = vld [vmem:[%s8097_s6 + $0x1130] sm:$0xf0]  ;;  %v7756_v41 = vld [vmem:[%s8097_s6 + $0x1004] sm:$0xf]  ;;  %v6735_v54 = vor.u32 %v7692_v27, %v6732_v58  ;;  %v5170_v6 = vld [vmem:[%s8097_s6 + $0x1c8] sm:$0xf] }
 0x142   : > { %4257 = vmatpush.bf16.msra.mxu1 %v6927_v20  ;;  %v3965_v20 = vadd.f32 %v8696_v17, %v3952_v8  ;;  %v7135_v17 = vor.u32 %v7792_v16, %v7132_v18  ;;  %v6988_v44 = vld [vmem:[%s8097_s6 + $0x1010] sm:$0xf0]  ;;  %v7788_v46 = vld [vmem:[%s8097_s6 + $0x1104] sm:$0xf]  ;;  %v4031_v52 = vpop.f32.mrf.mxu3  ;;  %v5443_v8 = vor.u32 %v7371_v0, %v5442_v63  ;;  %v5298_v11 = vld [vmem:[%s8097_s6 + $0x2c8] sm:$0xf] }
 0x143   : > { %4270 = vmatpush.bf16.msra.mxu2 %v7055_v25  ;;  %v6751_v25 = vor.u32 %v7696_v3, %v6748_v4  ;;  %v7116_v47 = vld [vmem:[%s8097_s6 + $0x1110] sm:$0xf0]  ;;  %v6991_v62 = vor.u32 %v7756_v41, %v6988_v44  ;;  %v5042_v3 = vld [vmem:[%s8097_s6 + $0xc8] sm:$0xf]  ;;  %v7271_v4 = vld [vmem:[%s8097_s6 + $0xd4] sm:$0xf0] }
 0x144   : > { %4283 = vmatpush.bf16.msra.mxu3 %v7183_v37  ;;  %v7724_v37 = vld [vmem:[%s8097_s6 + $0xf04] sm:$0xf]  ;;  %v3978_v53 = vadd.f32 %v8701_v23, %v3965_v20  ;;  %v7119_v23 = vor.u32 %v7788_v46, %v7116_v47  ;;  %v7335_v13 = vld [vmem:[%s8097_s6 + $0x2d4] sm:$0xf0]  ;;  %v5043_v18 = vor.u32 %v7271_v4, %v5042_v3  ;;  %v5026_v27 = vld [vmem:[%s8097_s6 + $0xa8] sm:$0xf] }
 0x145   : > { %4245 = vmatpush.bf16.msra.mxu0 %v6783_v48  ;;  %v4018_v48 = vpop.f32.mrf.mxu2  ;;  %v6863_v60 = vor.u32 %v7724_v37, %v6860_v38  ;;  %v7367_v15 = vld [vmem:[%s8097_s6 + $0x3d4] sm:$0xf0]  ;;  %v5282_v38 = vld [vmem:[%s8097_s6 + $0x2a8] sm:$0xf]  ;;  %v293_v0 = vld [vmem:[#allocation2 + $0x10] sm:$0xff] }
 0x146   : > { %4258 = vmatpush.bf16.msra.mxu1 %v6911_v49  ;;  %v5058_v49 = vld [vmem:[%s8097_s6 + $0xe8] sm:$0xf]  ;;  %v7267_v58 = vld [vmem:[%s8097_s6 + $0xb4] sm:$0xf0] }
 0x147   : > { %4271 = vmatpush.bf16.msra.mxu2 %v7039_v50  ;;  %v7275_v50 = vld [vmem:[%s8097_s6 + $0xf4] sm:$0xf0]  ;;  %v5010_v48 = vld [vmem:[%s8097_s6 + $0x88] sm:$0xf] }
 0x148   : > { %4284 = vmatpush.bf16.msra.mxu3 %v7167_v56  ;;  %v7307_v56 = vld [vmem:[%s8097_s6 + $0x1f4] sm:$0xf0]  ;;  %v5059_v55 = vor.u32 %v7275_v50, %v5058_v49  ;;  %v5138_v50 = vld [vmem:[%s8097_s6 + $0x188] sm:$0xf] }
 0x149   : > { %4246 = vmatpush.bf16.msra.mxu0 %v6767_v9  ;;  %v3991_v9 = vadd.f32 %v8755_v14, %v3978_v53  ;;  %v5426_v14 = vld [vmem:[%s8097_s6 + $0x3c8] sm:$0xf]  ;;  %v7299_v37 = vld [vmem:[%s8097_s6 + $0x1b4] sm:$0xf0] }
 0x14a   : > { %4259 = vmatpush.bf16.msra.mxu1 %v6895_v1  ;;  %v5187_v1 = vor.u32 %v7307_v56, %v5186_v51  ;;  %v7331_v41 = vld [vmem:[%s8097_s6 + $0x2b4] sm:$0xf0] }
 0x14b   : > { %4272 = vmatpush.bf16.msra.mxu2 %v7023_v2  ;;  %v5315_v2 = vor.u32 %v7339_v59, %v5314_v57  ;;  %v4004_v16 = vadd.f32 %v8759_v19, %v3991_v9  ;;  %v5427_v19 = vor.u32 %v7367_v15, %v5426_v14  ;;  %v7363_v44 = vld [vmem:[%s8097_s6 + $0x3b4] sm:$0xf0]  ;;  %v5283_v47 = vor.u32 %v7331_v41, %v5282_v38  ;;  %v5394_v59 = vld [vmem:[%s8097_s6 + $0x388] sm:$0xf] }
 0x14c   : > { %4285 = vmatpush.bf16.msra.mxu3 %v7151_v10  ;;  %v7303_v10 = vld [vmem:[%s8097_s6 + $0x1d4] sm:$0xf0]  ;;  %v5362_v38 = vld [vmem:[%s8097_s6 + $0x348] sm:$0xf] }
 0x14d   : > { %4247 = vmatpush.bf16.msra.mxu0 %v6751_v25  ;;  %v5171_v20 = vor.u32 %v7303_v10, %v5170_v6  ;;  %v5299_v25 = vor.u32 %v7335_v13, %v5298_v11  ;;  %v7263_v49 = vld [vmem:[%s8097_s6 + $0x94] sm:$0xf0]  ;;  %v5378_v11 = vld [vmem:[%s8097_s6 + $0x368] sm:$0xf] }
 0x14e   : > { %4260 = vmatpush.bf16.msra.mxu1 %v6879_v28  ;;  %v5154_v28 = vld [vmem:[%s8097_s6 + $0x1a8] sm:$0xf]  ;;  %v7295_v53 = vld [vmem:[%s8097_s6 + $0x194] sm:$0xf0]  ;;  %v5011_v63 = vor.u32 %v7263_v49, %v5010_v48 }
 0x14f   : > { %4273 = vmatpush.bf16.msra.mxu2 %v7007_v35  ;;  %v4017_v35 = vadd.f32 %v8774_v12, %v4004_v16  ;;  %v5027_v12 = vor.u32 %v7267_v58, %v5026_v27  ;;  %v5155_v46 = vor.u32 %v7299_v37, %v5154_v28  ;;  %v7327_v56 = vld [vmem:[%s8097_s6 + $0x294] sm:$0xf0]  ;;  %v5139_v9 = vor.u32 %v7295_v53, %v5138_v50  ;;  %v4978_v16 = vld [vmem:[%s8097_s6 + $0x48] sm:$0xf] }
 0x150   : > { %4286 = vmatpush.bf16.msra.mxu3 %v7135_v17  ;;  %v5410_v17 = vld [vmem:[%s8097_s6 + $0x3a8] sm:$0xf]  ;;  %v7291_v6 = vld [vmem:[%s8097_s6 + $0x174] sm:$0xf0] }
 0x151   : > { %4248 = vmatpush.bf16.msra.mxu0 %v6735_v54  ;;  %v4030_v51 = vadd.f32 %v8779_v61, %v4017_v35  ;;  %v5411_v52 = vor.u32 %v7363_v44, %v5410_v17  ;;  %v5266_v54 = vld [vmem:[%s8097_s6 + $0x288] sm:$0xf]  ;;  %v4042_v57 = vpop.f32.mrf.mxu0  ;;  %v7323_v10 = vld [vmem:[%s8097_s6 + $0x274] sm:$0xf0] }
 0x152   : > { %4261 = vmatpush.bf16.msra.mxu1 %v6863_v60  ;;  %v7359_v60 = vld [vmem:[%s8097_s6 + $0x394] sm:$0xf0]  ;;  %v4055_v61 = vpop.f32.mrf.mxu1  ;;  %v5106_v27 = vld [vmem:[%s8097_s6 + $0x148] sm:$0xf] }
 0x153   : > { %4274 = vmatpush.bf16.msra.mxu2 %v6991_v62  ;;  %v4043_v62 = vadd.f32 %v4042_v57, %v4030_v51  ;;  %v5395_v3 = vor.u32 %v7359_v60, %v5394_v59  ;;  %v7355_v13 = vld [vmem:[%s8097_s6 + $0x374] sm:$0xf0]  ;;  %v5234_v35 = vld [vmem:[%s8097_s6 + $0x248] sm:$0xf] }
 0x154   : > { %4287 = vmatpush.bf16.msra.mxu3 %v7119_v23  ;;  %4249 = vmatmul.bf16.vlgmr.msra.gmra.mxu0 %v8439_v29  ;;  %v5267_v23 = vor.u32 %v7327_v56, %v5266_v54  ;;  %v7287_v58 = vld [vmem:[%s8097_s6 + $0x154] sm:$0xf0]  ;;  %v5379_v28 = vor.u32 %v7355_v13, %v5378_v11  ;;  %v4962_v50 = vld [vmem:[%s8097_s6 + $0x28] sm:$0xf] }
 0x155   : > { %4293 = vmatpush.bf16.msrb.mxu0 %v5059_v55  ;;  %4262 = vmatmul.bf16.vlgmr.msra.gmra.mxu1 %v8445_v36  ;;  %v4994_v55 = vld [vmem:[%s8097_s6 + $0x68] sm:$0xf]  ;;  %v4056_v4 = vadd.f32 %v4055_v61, %v4043_v62  ;;  %v7351_v41 = vld [vmem:[%s8097_s6 + $0x354] sm:$0xf0]  ;;  %v5107_v48 = vor.u32 %v7287_v58, %v5106_v27 }
 0x156   : > { %4306 = vmatpush.bf16.msrb.mxu1 %v5187_v1  ;;  %4275 = vmatmul.bf16.vlgmr.msra.gmra.mxu2 %v8511_v33  ;;  %v7259_v1 = vld [vmem:[%s8097_s6 + $0x74] sm:$0xf0]  ;;  %v5363_v53 = vor.u32 %v7351_v41, %v5362_v38  ;;  %v5218_v56 = vld [vmem:[%s8097_s6 + $0x228] sm:$0xf] }
 0x157   : > { %4319 = vmatpush.bf16.msrb.mxu2 %v5315_v2  ;;  %4288 = vmatmul.bf16.vlgmr.msra.gmra.mxu3 %v8516_v40  ;;  %v5122_v2 = vld [vmem:[%s8097_s6 + $0x168] sm:$0xf]  ;;  %v4761_v14 = vadd.f32 %v4056_v4, %v293_v0  ;;  %v4995_v15 = vor.u32 %v7259_v1, %v4994_v55  ;;  %v7251_v51 = vld [vmem:[%s8097_s6 + $0x34] sm:$0xf0] }
 0x158   : > { %4332 = vmatpush.bf16.msrb.mxu3 %v5443_v8  ;;  %v5250_v8 = vld [vmem:[%s8097_s6 + $0x268] sm:$0xf]  ;;  %v7283_v54 = vld [vmem:[%s8097_s6 + $0x134] sm:$0xf0]  ;;  %v4963_v62 = vor.u32 %v7251_v51, %v4962_v50 }
 0x159   : > { %4294 = vmatpush.bf16.msrb.mxu0 %v5043_v18  ;;  %v5123_v18 = vor.u32 %v7291_v6, %v5122_v2  ;;  %4765 = vst [vmem:[#allocation2 + $0x10] sm:$0xff] %v4761_v14  ;;  %v4068_v37 = vpop.f32.mrf.mxu2  ;;  %v4044_v44 = vpop.f32.mrf.mxu0  ;;  %v7315_v57 = vld [vmem:[%s8097_s6 + $0x234] sm:$0xf0]  ;;  %v5346_v59 = vld [vmem:[%s8097_s6 + $0x328] sm:$0xf] }
 0x15a   : > { %4307 = vmatpush.bf16.msrb.mxu1 %v5171_v20  ;;  %v5251_v20 = vor.u32 %v7323_v10, %v5250_v8  ;;  %v4081_v17 = vpop.f32.mrf.mxu3  ;;  %v7347_v60 = vld [vmem:[%s8097_s6 + $0x334] sm:$0xf0]  ;;  %v5202_v1 = vld [vmem:[%s8097_s6 + $0x208] sm:$0xf] }
 0x15b   : > { %4320 = vmatpush.bf16.msrb.mxu2 %v5299_v25  ;;  %v7255_v25 = vld [vmem:[%s8097_s6 + $0x54] sm:$0xf0]  ;;  %v5347_v2 = vor.u32 %v7347_v60, %v5346_v59  ;;  %v5330_v4 = vld [vmem:[%s8097_s6 + $0x308] sm:$0xf] }
 0x15c   : > { %4333 = vmatpush.bf16.msrb.mxu3 %v5427_v19  ;;  %v7319_v19 = vld [vmem:[%s8097_s6 + $0x254] sm:$0xf0]  ;;  %v5570_v10 = vld [vmem:[%s8097_s6 + $0x4e8] sm:$0xf] }
 0x15d   : > { %4295 = vmatpush.bf16.msrb.mxu0 %v5027_v12  ;;  %v4979_v12 = vor.u32 %v7255_v25, %v4978_v16  ;;  %v5235_v49 = vor.u32 %v7319_v19, %v5234_v35  ;;  %v7247_v0 = vld [vmem:[%s8097_s6 + $0x14] sm:$0xf0]  ;;  %v5698_v13 = vld [vmem:[%s8097_s6 + $0x5e8] sm:$0xf] }
 0x15e   : > { %4308 = vmatpush.bf16.msrb.mxu1 %v5155_v46  ;;  %v8858_v46 = vadd.f32 %v4081_v17, %v4068_v37  ;;  %v7279_v55 = vld [vmem:[%s8097_s6 + $0x114] sm:$0xf0]  ;;  %v5954_v58 = vld [vmem:[%s8097_s6 + $0x7e8] sm:$0xf] }
 0x15f   : > { %4321 = vmatpush.bf16.msrb.mxu2 %v5283_v47  ;;  %v4057_v47 = vpop.f32.mrf.mxu1  ;;  %v7343_v6 = vld [vmem:[%s8097_s6 + $0x314] sm:$0xf0]  ;;  %v5554_v41 = vld [vmem:[%s8097_s6 + $0x4c8] sm:$0xf] }
 0x160   : > { %4334 = vmatpush.bf16.msrb.mxu3 %v5411_v52  ;;  %v5090_v52 = vld [vmem:[%s8097_s6 + $0x128] sm:$0xf]  ;;  %v7403_v11 = vld [vmem:[%s8097_s6 + $0x4f4] sm:$0xf0]  ;;  %v5331_v35 = vor.u32 %v7343_v6, %v5330_v4 }
 0x161   : > { %4296 = vmatpush.bf16.msrb.mxu0 %v5011_v63  ;;  %v4946_v63 = vld [vmem:[%s8097_s6 + $0x8] sm:$0xf]  ;;  %v5091_v61 = vor.u32 %v7283_v54, %v5090_v52  ;;  %v4070_v8 = vpop.f32.mrf.mxu2  ;;  %v7435_v16 = vld [vmem:[%s8097_s6 + $0x5f4] sm:$0xf0]  ;;  %v5571_v19 = vor.u32 %v7403_v11, %v5570_v10 }
 0x162   : > { %4309 = vmatpush.bf16.msrb.mxu1 %v5139_v9  ;;  %v5219_v9 = vor.u32 %v7315_v57, %v5218_v56  ;;  %v4083_v14 = vpop.f32.mrf.mxu3  ;;  %v5699_v37 = vor.u32 %v7435_v16, %v5698_v13  ;;  %v7399_v17 = vld [vmem:[%s8097_s6 + $0x4d4] sm:$0xf0]  ;;  %v5682_v44 = vld [vmem:[%s8097_s6 + $0x5c8] sm:$0xf] }
 0x163   : > { %4322 = vmatpush.bf16.msrb.mxu2 %v5267_v23  ;;  %v5074_v23 = vld [vmem:[%s8097_s6 + $0x108] sm:$0xf]  ;;  %v7431_v47 = vld [vmem:[%s8097_s6 + $0x5d4] sm:$0xf0]  ;;  %v5555_v52 = vor.u32 %v7399_v17, %v5554_v41 }
 0x164   : > { %4335 = vmatpush.bf16.msrb.mxu3 %v5395_v3  ;;  %v7311_v3 = vld [vmem:[%s8097_s6 + $0x214] sm:$0xf0]  ;;  %v5075_v25 = vor.u32 %v7279_v55, %v5074_v23  ;;  %v5938_v50 = vld [vmem:[%s8097_s6 + $0x7c8] sm:$0xf] }
 0x165   : > { %4297 = vmatpush.bf16.msrb.mxu0 %v4995_v15  ;;  %v4947_v15 = vor.u32 %v7247_v0, %v4946_v63  ;;  %v5203_v27 = vor.u32 %v7311_v3, %v5202_v1  ;;  %v7495_v51 = vld [vmem:[%s8097_s6 + $0x7d4] sm:$0xf0]  ;;  %v5538_v56 = vld [vmem:[%s8097_s6 + $0x4a8] sm:$0xf] }
 0x166   : > { %4310 = vmatpush.bf16.msrb.mxu1 %v5123_v18  ;;  %v5826_v18 = vld [vmem:[%s8097_s6 + $0x6e8] sm:$0xf]  ;;  %v7395_v57 = vld [vmem:[%s8097_s6 + $0x4b4] sm:$0xf0]  ;;  %v5939_v60 = vor.u32 %v7495_v51, %v5938_v50 }
 0x167   : > { %4323 = vmatpush.bf16.msrb.mxu2 %v5251_v20  ;;  %v7467_v20 = vld [vmem:[%s8097_s6 + $0x6f4] sm:$0xf0]  ;;  %v5666_v59 = vld [vmem:[%s8097_s6 + $0x5a8] sm:$0xf]  ;;  %v5539_v23 = vor.u32 %v7395_v57, %v5538_v56 }
 0x168   : > { %4336 = vmatpush.bf16.msrb.mxu3 %v5379_v28  ;;  %v7499_v28 = vld [vmem:[%s8097_s6 + $0x7f4] sm:$0xf0]  ;;  %v5827_v38 = vor.u32 %v7467_v20, %v5826_v18  ;;  %v5794_v63 = vld [vmem:[%s8097_s6 + $0x6a8] sm:$0xf] }
 0x169   : > { %4298 = vmatpush.bf16.msrb.mxu0 %v4979_v12  ;;  %v5955_v12 = vor.u32 %v7499_v28, %v5954_v58  ;;  %v7459_v0 = vld [vmem:[%s8097_s6 + $0x6b4] sm:$0xf0]  ;;  %v5650_v4 = vld [vmem:[%s8097_s6 + $0x588] sm:$0xf] }
 0x16a   : > { %4311 = vmatpush.bf16.msrb.mxu1 %v5107_v48  ;;  %v5810_v48 = vld [vmem:[%s8097_s6 + $0x6c8] sm:$0xf]  ;;  %v5795_v1 = vor.u32 %v7459_v0, %v5794_v63  ;;  %v7391_v3 = vld [vmem:[%s8097_s6 + $0x494] sm:$0xf0] }
 0x16b   : > { %4324 = vmatpush.bf16.msrb.mxu2 %v5235_v49  ;;  %v7463_v49 = vld [vmem:[%s8097_s6 + $0x6d4] sm:$0xf0]  ;;  %v5778_v10 = vld [vmem:[%s8097_s6 + $0x688] sm:$0xf] }
 0x16c   : > { %4337 = vmatpush.bf16.msrb.mxu3 %v5363_v53  ;;  %v5683_v53 = vor.u32 %v7431_v47, %v5682_v44  ;;  %v5811_v54 = vor.u32 %v7463_v49, %v5810_v48  ;;  %v7423_v8 = vld [vmem:[%s8097_s6 + $0x594] sm:$0xf0]  ;;  %v5906_v13 = vld [vmem:[%s8097_s6 + $0x788] sm:$0xf] }
 0x16d   : > { %4299 = vmatpush.bf16.msrb.mxu0 %v4963_v62  ;;  %v7427_v62 = vld [vmem:[%s8097_s6 + $0x5b4] sm:$0xf0]  ;;  %v5651_v18 = vor.u32 %v7423_v8, %v5650_v4  ;;  %v5634_v58 = vld [vmem:[%s8097_s6 + $0x568] sm:$0xf] }
 0x16e   : > { %4312 = vmatpush.bf16.msrb.mxu1 %v5091_v61  ;;  %v5922_v61 = vld [vmem:[%s8097_s6 + $0x7a8] sm:$0xf]  ;;  %v5667_v55 = vor.u32 %v7427_v62, %v5666_v59  ;;  %v7455_v11 = vld [vmem:[%s8097_s6 + $0x694] sm:$0xf0] }
 0x16f   : > { %4325 = vmatpush.bf16.msrb.mxu2 %v5219_v9  ;;  %v7491_v9 = vld [vmem:[%s8097_s6 + $0x7b4] sm:$0xf0]  ;;  %v5779_v20 = vor.u32 %v7455_v11, %v5778_v10  ;;  %v5890_v17 = vld [vmem:[%s8097_s6 + $0x768] sm:$0xf] }
 0x170   : > { %4338 = vmatpush.bf16.msrb.mxu3 %v5347_v2  ;;  %v5522_v2 = vld [vmem:[%s8097_s6 + $0x488] sm:$0xf]  ;;  %v5923_v6 = vor.u32 %v7491_v9, %v5922_v61  ;;  %v7487_v14 = vld [vmem:[%s8097_s6 + $0x794] sm:$0xf0] }
 0x171   : > { %4300 = vmatpush.bf16.msrb.mxu0 %v4947_v15  ;;  %v5523_v15 = vor.u32 %v7391_v3, %v5522_v2  ;;  %v4094_v16 = vpop.f32.mrf.mxu0  ;;  %v7451_v41 = vld [vmem:[%s8097_s6 + $0x674] sm:$0xf0]  ;;  %v5490_v49 = vld [vmem:[%s8097_s6 + $0x448] sm:$0xf] }
 0x172   : > { %4313 = vmatpush.bf16.msrb.mxu1 %v5075_v25  ;;  %v5506_v25 = vld [vmem:[%s8097_s6 + $0x468] sm:$0xf]  ;;  %v4095_v28 = vadd.f32 %v4094_v16, %v8858_v46  ;;  %v7483_v44 = vld [vmem:[%s8097_s6 + $0x774] sm:$0xf0] }
 0x173   : > { %4326 = vmatpush.bf16.msrb.mxu2 %v5203_v27  ;;  %v7387_v27 = vld [vmem:[%s8097_s6 + $0x474] sm:$0xf0]  ;;  %v5618_v51 = vld [vmem:[%s8097_s6 + $0x548] sm:$0xf] }
 0x174   : > { %4339 = vmatpush.bf16.msrb.mxu3 %v5331_v35  ;;  %4301 = vmatmul.bf16.vlgmr.msrb.gmra.mxu0 %v8226_v21  ;;  %v4107_v35 = vpop.f32.mrf.mxu1  ;;  %v5507_v47 = vor.u32 %v7387_v27, %v5506_v25  ;;  %v7383_v50 = vld [vmem:[%s8097_s6 + $0x454] sm:$0xf0]  ;;  %v5746_v56 = vld [vmem:[%s8097_s6 + $0x648] sm:$0xf] }
 0x175   : > { %4345 = vmatpush.bf16.msra.mxu0 %v5571_v19  ;;  %4314 = vmatmul.bf16.vlgmr.msrb.gmra.mxu1 %v8229_v22  ;;  %v5907_v19 = vor.u32 %v7487_v14, %v5906_v13  ;;  %v7447_v57 = vld [vmem:[%s8097_s6 + $0x654] sm:$0xf0]  ;;  %v5874_v62 = vld [vmem:[%s8097_s6 + $0x748] sm:$0xf]  ;;  %v5491_v0 = vor.u32 %v7383_v50, %v5490_v49 }
 0x176   : > { %4358 = vmatpush.bf16.msra.mxu1 %v5699_v37  ;;  %4327 = vmatmul.bf16.vlgmr.msrb.gmra.mxu2 %v8212_v5  ;;  %v7419_v37 = vld [vmem:[%s8097_s6 + $0x574] sm:$0xf0]  ;;  %v5602_v3 = vld [vmem:[%s8097_s6 + $0x528] sm:$0xf] }
 0x177   : > { %4371 = vmatpush.bf16.msra.mxu2 %v5827_v38  ;;  %4340 = vmatmul.bf16.vlgmr.msrb.gmra.mxu3 %v8215_v7  ;;  %v5762_v38 = vld [vmem:[%s8097_s6 + $0x668] sm:$0xf]  ;;  %v5635_v46 = vor.u32 %v7419_v37, %v5634_v58  ;;  %v7479_v63 = vld [vmem:[%s8097_s6 + $0x754] sm:$0xf0] }
 0x178   : > { %4384 = vmatpush.bf16.msra.mxu3 %v5955_v12  ;;  %v4108_v12 = vadd.f32 %v4107_v35, %v4095_v28  ;;  %v5763_v48 = vor.u32 %v7451_v41, %v5762_v38  ;;  %v7379_v2 = vld [vmem:[%s8097_s6 + $0x434] sm:$0xf0]  ;;  %v5730_v10 = vld [vmem:[%s8097_s6 + $0x628] sm:$0xf] }
 0x179   : > { %4346 = vmatpush.bf16.msra.mxu0 %v5555_v52  ;;  %v4120_v52 = vpop.f32.mrf.mxu2  ;;  %v4096_v9 = vpop.f32.mrf.mxu0  ;;  %v7411_v8 = vld [vmem:[%s8097_s6 + $0x534] sm:$0xf0]  ;;  %v5858_v13 = vld [vmem:[%s8097_s6 + $0x728] sm:$0xf] }
 0x17a   : > { %4359 = vmatpush.bf16.msra.mxu1 %v5683_v53  ;;  %v5891_v53 = vor.u32 %v7483_v44, %v5890_v17  ;;  %v4121_v59 = vadd.f32 %v4120_v52, %v4108_v12  ;;  %v7443_v11 = vld [vmem:[%s8097_s6 + $0x634] sm:$0xf0]  ;;  %v5458_v16 = vld [vmem:[%s8097_s6 + $0x408] sm:$0xf] }
 0x17b   : > { %4372 = vmatpush.bf16.msra.mxu2 %v5811_v54  ;;  %v7415_v54 = vld [vmem:[%s8097_s6 + $0x554] sm:$0xf0]  ;;  %v5731_v25 = vor.u32 %v7443_v11, %v5730_v10  ;;  %v5586_v27 = vld [vmem:[%s8097_s6 + $0x508] sm:$0xf] }
 0x17c   : > { %4385 = vmatpush.bf16.msra.mxu3 %v5939_v60  ;;  %v4133_v60 = vpop.f32.mrf.mxu3  ;;  %v4109_v4 = vpop.f32.mrf.mxu1  ;;  %v7475_v14 = vld [vmem:[%s8097_s6 + $0x734] sm:$0xf0]  ;;  %v5714_v28 = vld [vmem:[%s8097_s6 + $0x608] sm:$0xf] }
 0x17d   : > { %4347 = vmatpush.bf16.msra.mxu0 %v5539_v23  ;;  %v8929_v61 = vadd.f32 %v4133_v60, %v4121_v59  ;;  %v5619_v23 = vor.u32 %v7415_v54, %v5618_v51  ;;  %v7407_v58 = vld [vmem:[%s8097_s6 + $0x514] sm:$0xf0]  ;;  %v5842_v38 = vld [vmem:[%s8097_s6 + $0x708] sm:$0xf] }
 0x17e   : > { %4360 = vmatpush.bf16.msra.mxu1 %v5667_v55  ;;  %v5747_v55 = vor.u32 %v7447_v57, %v5746_v56  ;;  %v7439_v37 = vld [vmem:[%s8097_s6 + $0x614] sm:$0xf0]  ;;  %v6082_v44 = vld [vmem:[%s8097_s6 + $0x8e8] sm:$0xf]  ;;  %v5587_v51 = vor.u32 %v7407_v58, %v5586_v27 }
 0x17f   : > { %4373 = vmatpush.bf16.msra.mxu2 %v5795_v1  ;;  %v5474_v1 = vld [vmem:[%s8097_s6 + $0x428] sm:$0xf]  ;;  %v7471_v41 = vld [vmem:[%s8097_s6 + $0x714] sm:$0xf0]  ;;  %v5715_v52 = vor.u32 %v7439_v37, %v5714_v28 }
 0x180   : > { %4386 = vmatpush.bf16.msra.mxu3 %v5923_v6  ;;  %v5875_v6 = vor.u32 %v7479_v63, %v5874_v62  ;;  %v7531_v12 = vld [vmem:[%s8097_s6 + $0x8f4] sm:$0xf0]  ;;  %v6338_v49 = vld [vmem:[%s8097_s6 + $0xae8] sm:$0xf]  ;;  %v5843_v56 = vor.u32 %v7471_v41, %v5842_v38 }
 0x181   : > { %4348 = vmatpush.bf16.msra.mxu0 %v5523_v15  ;;  %v5475_v15 = vor.u32 %v7379_v2, %v5474_v1  ;;  %v4122_v35 = vpop.f32.mrf.mxu2  ;;  %v7595_v50 = vld [vmem:[%s8097_s6 + $0xaf4] sm:$0xf0]  ;;  %v6083_v57 = vor.u32 %v7531_v12, %v6082_v44  ;;  %v6066_v62 = vld [vmem:[%s8097_s6 + $0x8c8] sm:$0xf] }
 0x182   : > { %4361 = vmatpush.bf16.msra.mxu1 %v5651_v18  ;;  %v7375_v18 = vld [vmem:[%s8097_s6 + $0x414] sm:$0xf0]  ;;  %v6339_v60 = vor.u32 %v7595_v50, %v6338_v49  ;;  %v6450_v2 = vld [vmem:[%s8097_s6 + $0xbc8] sm:$0xf] }
 0x183   : > { %4374 = vmatpush.bf16.msra.mxu2 %v5779_v20  ;;  %v5603_v20 = vor.u32 %v7411_v8, %v5602_v3  ;;  %v7627_v54 = vld [vmem:[%s8097_s6 + $0xbf4] sm:$0xf0]  ;;  %v6050_v10 = vld [vmem:[%s8097_s6 + $0x8a8] sm:$0xf] }
 0x184   : > { %4387 = vmatpush.bf16.msra.mxu3 %v5907_v19  ;;  %v5859_v19 = vor.u32 %v7475_v14, %v5858_v13  ;;  %v4135_v17 = vpop.f32.mrf.mxu3  ;;  %v7527_v63 = vld [vmem:[%s8097_s6 + $0x8d4] sm:$0xf0]  ;;  %v6178_v13 = vld [vmem:[%s8097_s6 + $0x9a8] sm:$0xf] }
 0x185   : > { %4349 = vmatpush.bf16.msra.mxu0 %v5507_v47  ;;  %v6210_v47 = vld [vmem:[%s8097_s6 + $0x9e8] sm:$0xf]  ;;  %v7591_v1 = vld [vmem:[%s8097_s6 + $0xad4] sm:$0xf0]  ;;  %v6067_v4 = vor.u32 %v7527_v63, %v6066_v62 }
 0x186   : > { %4362 = vmatpush.bf16.msra.mxu1 %v5635_v46  ;;  %v5459_v46 = vor.u32 %v7375_v18, %v5458_v16  ;;  %v7623_v3 = vld [vmem:[%s8097_s6 + $0xbd4] sm:$0xf0]  ;;  %v6306_v16 = vld [vmem:[%s8097_s6 + $0xaa8] sm:$0xf] }
 0x187   : > { %4375 = vmatpush.bf16.msra.mxu2 %v5763_v48  ;;  %v7563_v48 = vld [vmem:[%s8097_s6 + $0x9f4] sm:$0xf0]  ;;  %v6451_v14 = vor.u32 %v7623_v3, %v6450_v2  ;;  %v6034_v35 = vld [vmem:[%s8097_s6 + $0x888] sm:$0xf] }
 0x188   : > { %4388 = vmatpush.bf16.msra.mxu3 %v5891_v53  ;;  %v6466_v53 = vld [vmem:[%s8097_s6 + $0xbe8] sm:$0xf]  ;;  %v6211_v59 = vor.u32 %v7563_v48, %v6210_v47  ;;  %v7523_v11 = vld [vmem:[%s8097_s6 + $0x8b4] sm:$0xf0] }
 0x189   : > { %4350 = vmatpush.bf16.msra.mxu0 %v5491_v0  ;;  %v6194_v0 = vld [vmem:[%s8097_s6 + $0x9c8] sm:$0xf]  ;;  %v6467_v9 = vor.u32 %v7627_v54, %v6466_v53  ;;  %v7587_v18 = vld [vmem:[%s8097_s6 + $0xab4] sm:$0xf0]  ;;  %v6051_v27 = vor.u32 %v7523_v11, %v6050_v10 }
 0x18a   : > { %4363 = vmatpush.bf16.msra.mxu1 %v5619_v23  ;;  %v7559_v23 = vld [vmem:[%s8097_s6 + $0x9d4] sm:$0xf0]  ;;  %v6307_v28 = vor.u32 %v7587_v18, %v6306_v16  ;;  %v6162_v37 = vld [vmem:[%s8097_s6 + $0x988] sm:$0xf] }
 0x18b   : > { %4376 = vmatpush.bf16.msra.mxu2 %v5747_v55  ;;  %v6322_v55 = vld [vmem:[%s8097_s6 + $0xac8] sm:$0xf]  ;;  %v7551_v41 = vld [vmem:[%s8097_s6 + $0x994] sm:$0xf0] }
 0x18c   : > { %4389 = vmatpush.bf16.msra.mxu3 %v5875_v6  ;;  %v6195_v6 = vor.u32 %v7559_v23, %v6194_v0  ;;  %v6323_v8 = vor.u32 %v7591_v1, %v6322_v55  ;;  %v6290_v17 = vld [vmem:[%s8097_s6 + $0xa88] sm:$0xf]  ;;  %v7583_v44 = vld [vmem:[%s8097_s6 + $0xa94] sm:$0xf0]  ;;  %v6163_v50 = vor.u32 %v7551_v41, %v6162_v37 }
 0x18d   : > { %4351 = vmatpush.bf16.msra.mxu0 %v5475_v15  ;;  %v7555_v15 = vld [vmem:[%s8097_s6 + $0x9b4] sm:$0xf0]  ;;  %v6418_v47 = vld [vmem:[%s8097_s6 + $0xb88] sm:$0xf] }
 0x18e   : > { %4364 = vmatpush.bf16.msra.mxu1 %v5603_v20  ;;  %v6434_v20 = vld [vmem:[%s8097_s6 + $0xba8] sm:$0xf]  ;;  %v6179_v58 = vor.u32 %v7555_v15, %v6178_v13  ;;  %v7515_v53 = vld [vmem:[%s8097_s6 + $0x874] sm:$0xf0] }
 0x18f   : > { %4377 = vmatpush.bf16.msra.mxu2 %v5731_v25  ;;  %v7619_v25 = vld [vmem:[%s8097_s6 + $0xbb4] sm:$0xf0]  ;;  %v6146_v54 = vld [vmem:[%s8097_s6 + $0x968] sm:$0xf] }
 0x190   : > { %4390 = vmatpush.bf16.msra.mxu3 %v5859_v19  ;;  %v7519_v19 = vld [vmem:[%s8097_s6 + $0x894] sm:$0xf0]  ;;  %v6435_v38 = vor.u32 %v7619_v25, %v6434_v20  ;;  %v6402_v62 = vld [vmem:[%s8097_s6 + $0xb68] sm:$0xf] }
 0x191   : > { %4352 = vmatpush.bf16.msra.mxu0 %v5459_v46  ;;  %v8981_v12 = vpop.f32.mrf.mxu0  ;;  %v7615_v46 = vld [vmem:[%s8097_s6 + $0xb94] sm:$0xf0]  ;;  %v6035_v48 = vor.u32 %v7519_v19, %v6034_v35  ;;  %v6002_v55 = vld [vmem:[%s8097_s6 + $0x848] sm:$0xf] }
 0x192   : > { %4365 = vmatpush.bf16.msra.mxu1 %v5587_v51  ;;  %v8985_v49 = vpop.f32.mrf.mxu1  ;;  %v6291_v51 = vor.u32 %v7583_v44, %v6290_v17  ;;  %v7611_v63 = vld [vmem:[%s8097_s6 + $0xb74] sm:$0xf0]  ;;  %v6130_v2 = vld [vmem:[%s8097_s6 + $0x948] sm:$0xf] }
 0x193   : > { %4378 = vmatpush.bf16.msra.mxu2 %v5715_v52  ;;  %v6018_v52 = vld [vmem:[%s8097_s6 + $0x868] sm:$0xf]  ;;  %v7511_v1 = vld [vmem:[%s8097_s6 + $0x854] sm:$0xf0]  ;;  %v6403_v3 = vor.u32 %v7611_v63, %v6402_v62 }
 0x194   : > { %4391 = vmatpush.bf16.msra.mxu3 %v5843_v56  ;;  %4353 = vmatmul.bf16.vlgmr.msra.gmra.mxu0 %v8285_v42  ;;  %v6419_v56 = vor.u32 %v7615_v46, %v6418_v47  ;;  %v6019_v0 = vor.u32 %v7515_v53, %v6018_v52  ;;  %v7575_v10 = vld [vmem:[%s8097_s6 + $0xa54] sm:$0xf0]  ;;  %v6386_v13 = vld [vmem:[%s8097_s6 + $0xb48] sm:$0xf]  ;;  %v6003_v16 = vor.u32 %v7511_v1, %v6002_v55 }
 0x195   : > { %4397 = vmatpush.bf16.msrb.mxu0 %v6083_v57  ;;  %4366 = vmatmul.bf16.vlgmr.msra.gmra.mxu1 %v8289_v45  ;;  %v7547_v57 = vld [vmem:[%s8097_s6 + $0x974] sm:$0xf0]  ;;  %v6242_v37 = vld [vmem:[%s8097_s6 + $0xa28] sm:$0xf] }
 0x196   : > { %4410 = vmatpush.bf16.msrb.mxu1 %v6211_v59  ;;  %4379 = vmatmul.bf16.vlgmr.msra.gmra.mxu2 %v8281_v39  ;;  %v6274_v59 = vld [vmem:[%s8097_s6 + $0xa68] sm:$0xf]  ;;  %v7539_v19 = vld [vmem:[%s8097_s6 + $0x934] sm:$0xf0] }
 0x197   : > { %4423 = vmatpush.bf16.msrb.mxu2 %v6339_v60  ;;  %4392 = vmatmul.bf16.vlgmr.msra.gmra.mxu3 %v8287_v43  ;;  %v7579_v60 = vld [vmem:[%s8097_s6 + $0xa74] sm:$0xf0]  ;;  %v6370_v41 = vld [vmem:[%s8097_s6 + $0xb28] sm:$0xf] }
 0x198   : > { %4436 = vmatpush.bf16.msrb.mxu3 %v6467_v9  ;;  %v6147_v9 = vor.u32 %v7547_v57, %v6146_v54  ;;  %v6275_v23 = vor.u32 %v7579_v60, %v6274_v59  ;;  %v7603_v17 = vld [vmem:[%s8097_s6 + $0xb34] sm:$0xf0]  ;;  %v5970_v47 = vld [vmem:[%s8097_s6 + $0x808] sm:$0xf] }
 0x199   : > { %4398 = vmatpush.bf16.msrb.mxu0 %v6067_v4  ;;  %v8998_v4 = vpop.f32.mrf.mxu2  ;;  %v4148_v15 = vpop.f32.mrf.mxu0  ;;  %v7503_v46 = vld [vmem:[%s8097_s6 + $0x814] sm:$0xf0]  ;;  %v6226_v53 = vld [vmem:[%s8097_s6 + $0xa08] sm:$0xf]  ;;  %v6371_v54 = vor.u32 %v7603_v17, %v6370_v41 }
 0x19a   : > { %4411 = vmatpush.bf16.msrb.mxu1 %v6195_v6  ;;  %v7543_v6 = vld [vmem:[%s8097_s6 + $0x954] sm:$0xf0]  ;;  %v9003_v11 = vpop.f32.mrf.mxu3  ;;  %v4161_v18 = vpop.f32.mrf.mxu1  ;;  %v6354_v57 = vld [vmem:[%s8097_s6 + $0xb08] sm:$0xf] }
 0x19b   : > { %4424 = vmatpush.bf16.msrb.mxu2 %v6323_v8  ;;  %v6258_v8 = vld [vmem:[%s8097_s6 + $0xa48] sm:$0xf]  ;;  %v6131_v20 = vor.u32 %v7543_v6, %v6130_v2  ;;  %v7535_v52 = vld [vmem:[%s8097_s6 + $0x914] sm:$0xf0] }
 0x19c   : > { %4437 = vmatpush.bf16.msrb.mxu3 %v6451_v14  ;;  %v7607_v14 = vld [vmem:[%s8097_s6 + $0xb54] sm:$0xf0]  ;;  %v6259_v25 = vor.u32 %v7575_v10, %v6258_v8  ;;  %v6594_v62 = vld [vmem:[%s8097_s6 + $0xce8] sm:$0xf] }
 0x19d   : > { %4399 = vmatpush.bf16.msrb.mxu0 %v6051_v27  ;;  %v5986_v27 = vld [vmem:[%s8097_s6 + $0x828] sm:$0xf]  ;;  %v6387_v35 = vor.u32 %v7607_v14, %v6386_v13  ;;  %v7599_v59 = vld [vmem:[%s8097_s6 + $0xb14] sm:$0xf0] }
 0x19e   : > { %4412 = vmatpush.bf16.msrb.mxu1 %v6179_v58  ;;  %v7507_v58 = vld [vmem:[%s8097_s6 + $0x834] sm:$0xf0]  ;;  %v6850_v1 = vld [vmem:[%s8097_s6 + $0xee8] sm:$0xf]  ;;  %v6355_v13 = vor.u32 %v7599_v59, %v6354_v57 }
 0x19f   : > { %4425 = vmatpush.bf16.msrb.mxu2 %v6307_v28  ;;  %v6114_v28 = vld [vmem:[%s8097_s6 + $0x928] sm:$0xf]  ;;  %v5987_v44 = vor.u32 %v7507_v58, %v5986_v27  ;;  %v7659_v63 = vld [vmem:[%s8097_s6 + $0xcf4] sm:$0xf0] }
 0x1a0   : > { %4438 = vmatpush.bf16.msrb.mxu3 %v6435_v38  ;;  %v7571_v38 = vld [vmem:[%s8097_s6 + $0xa34] sm:$0xf0]  ;;  %v6978_v8 = vld [vmem:[%s8097_s6 + $0xfe8] sm:$0xf]  ;;  %v6595_v14 = vor.u32 %v7659_v63, %v6594_v62 }
 0x1a1   : > { %4400 = vmatpush.bf16.msrb.mxu0 %v6035_v48  ;;  %v6115_v48 = vor.u32 %v7539_v19, %v6114_v28  ;;  %v4174_v60 = vpop.f32.mrf.mxu2  ;;  %v7691_v55 = vld [vmem:[%s8097_s6 + $0xdf4] sm:$0xf0]  ;;  %v6578_v18 = vld [vmem:[%s8097_s6 + $0xcc8] sm:$0xf] }
 0x1a2   : > { %4413 = vmatpush.bf16.msrb.mxu1 %v6163_v50  ;;  %v6243_v50 = vor.u32 %v7571_v38, %v6242_v37  ;;  %v7723_v2 = vld [vmem:[%s8097_s6 + $0xef4] sm:$0xf0]  ;;  %v6834_v28 = vld [vmem:[%s8097_s6 + $0xec8] sm:$0xf] }
 0x1a3   : > { %4426 = vmatpush.bf16.msrb.mxu2 %v6291_v51  ;;  %v6098_v51 = vld [vmem:[%s8097_s6 + $0x908] sm:$0xf]  ;;  %v7755_v10 = vld [vmem:[%s8097_s6 + $0xff4] sm:$0xf0] }
 0x1a4   : > { %4439 = vmatpush.bf16.msrb.mxu3 %v6419_v56  ;;  %v7567_v56 = vld [vmem:[%s8097_s6 + $0xa14] sm:$0xf0]  ;;  %v6979_v27 = vor.u32 %v7755_v10, %v6978_v8  ;;  %v6962_v19 = vld [vmem:[%s8097_s6 + $0xfc8] sm:$0xf] }
 0x1a5   : > { %4401 = vmatpush.bf16.msrb.mxu0 %v6019_v0  ;;  %v6722_v0 = vld [vmem:[%s8097_s6 + $0xde8] sm:$0xf]  ;;  %v6227_v6 = vor.u32 %v7567_v56, %v6226_v53  ;;  %v7687_v58 = vld [vmem:[%s8097_s6 + $0xdd4] sm:$0xf0] }
 0x1a6   : > { %4414 = vmatpush.bf16.msrb.mxu1 %v6147_v9  ;;  %v4187_v9 = vpop.f32.mrf.mxu3  ;;  %v6723_v15 = vor.u32 %v7691_v55, %v6722_v0  ;;  %v7751_v37 = vld [vmem:[%s8097_s6 + $0xfd4] sm:$0xf0]  ;;  %v6946_v53 = vld [vmem:[%s8097_s6 + $0xfa8] sm:$0xf] }
 0x1a7   : > { %4427 = vmatpush.bf16.msrb.mxu2 %v6275_v23  ;;  %v5971_v23 = vor.u32 %v7503_v46, %v5970_v47  ;;  %v7651_v47 = vld [vmem:[%s8097_s6 + $0xcb4] sm:$0xf0]  ;;  %v6690_v46 = vld [vmem:[%s8097_s6 + $0xda8] sm:$0xf] }
 0x1a8   : > { %4440 = vmatpush.bf16.msrb.mxu3 %v6403_v3  ;;  %v6099_v3 = vor.u32 %v7535_v52, %v6098_v51  ;;  %v6818_v51 = vld [vmem:[%s8097_s6 + $0xea8] sm:$0xf]  ;;  %v7715_v52 = vld [vmem:[%s8097_s6 + $0xeb4] sm:$0xf0] }
 0x1a9   : > { %4402 = vmatpush.bf16.msrb.mxu0 %v6003_v16  ;;  %v6851_v16 = vor.u32 %v7723_v2, %v6850_v1  ;;  %v6819_v59 = vor.u32 %v7715_v52, %v6818_v51  ;;  %v6546_v60 = vld [vmem:[%s8097_s6 + $0xc88] sm:$0xf]  ;;  %v7647_v62 = vld [vmem:[%s8097_s6 + $0xc94] sm:$0xf0]  ;;  %v4147_v51 = vadd.f32 %v8981_v12, %v8929_v61 }
 0x1aa   : > { %4415 = vmatpush.bf16.msrb.mxu1 %v6131_v20  ;;  %v7655_v20 = vld [vmem:[%s8097_s6 + $0xcd4] sm:$0xf0]  ;;  %v6674_v63 = vld [vmem:[%s8097_s6 + $0xd88] sm:$0xf] }
 0x1ab   : > { %4428 = vmatpush.bf16.msrb.mxu2 %v6259_v25  ;;  %v6706_v25 = vld [vmem:[%s8097_s6 + $0xdc8] sm:$0xf]  ;;  %v6579_v38 = vor.u32 %v7655_v20, %v6578_v18  ;;  %v7679_v9 = vld [vmem:[%s8097_s6 + $0xd94] sm:$0xf0] }
 0x1ac   : > { %4441 = vmatpush.bf16.msrb.mxu3 %v6387_v35  ;;  %v7719_v35 = vld [vmem:[%s8097_s6 + $0xed4] sm:$0xf0]  ;;  %v6707_v41 = vor.u32 %v7687_v58, %v6706_v25  ;;  %v6930_v2 = vld [vmem:[%s8097_s6 + $0xf88] sm:$0xf]  ;;  %v6675_v10 = vor.u32 %v7679_v9, %v6674_v63 }
 0x1ad   : > { %4403 = vmatpush.bf16.msrb.mxu0 %v5987_v44  ;;  %v6835_v17 = vor.u32 %v7719_v35, %v6834_v28  ;;  %v6562_v44 = vld [vmem:[%s8097_s6 + $0xca8] sm:$0xf]  ;;  %v7711_v55 = vld [vmem:[%s8097_s6 + $0xe94] sm:$0xf0] }
 0x1ae   : > { %4416 = vmatpush.bf16.msrb.mxu1 %v6115_v48  ;;  %v6963_v48 = vor.u32 %v7751_v37, %v6962_v19  ;;  %v6563_v56 = vor.u32 %v7651_v47, %v6562_v44  ;;  %v7675_v20 = vld [vmem:[%s8097_s6 + $0xd74] sm:$0xf0]  ;;  %v6786_v25 = vld [vmem:[%s8097_s6 + $0xe68] sm:$0xf] }
 0x1af   : > { %4429 = vmatpush.bf16.msrb.mxu2 %v6243_v50  ;;  %v7683_v50 = vld [vmem:[%s8097_s6 + $0xdb4] sm:$0xf0]  ;;  %v6914_v58 = vld [vmem:[%s8097_s6 + $0xf68] sm:$0xf] }
 0x1b0   : > { %4442 = vmatpush.bf16.msrb.mxu3 %v6371_v54  ;;  %v7747_v54 = vld [vmem:[%s8097_s6 + $0xfb4] sm:$0xf0]  ;;  %v6691_v57 = vor.u32 %v7683_v50, %v6690_v46  ;;  %v6498_v61 = vld [vmem:[%s8097_s6 + $0xc28] sm:$0xf] }
 0x1b1   : > { %4404 = vmatpush.bf16.msrb.mxu0 %v5971_v23  ;;  %v6947_v0 = vor.u32 %v7747_v54, %v6946_v53  ;;  %v6802_v23 = vld [vmem:[%s8097_s6 + $0xe88] sm:$0xf]  ;;  %v9057_v1 = vpop.f32.mrf.mxu0  ;;  %v7739_v28 = vld [vmem:[%s8097_s6 + $0xf74] sm:$0xf0] }
 0x1b2   : > { %4417 = vmatpush.bf16.msrb.mxu1 %v6099_v3  ;;  %v7743_v3 = vld [vmem:[%s8097_s6 + $0xf94] sm:$0xf0]  ;;  %v9061_v8 = vpop.f32.mrf.mxu1  ;;  %v6915_v44 = vor.u32 %v7739_v28, %v6914_v58  ;;  %v6898_v53 = vld [vmem:[%s8097_s6 + $0xf48] sm:$0xf] }
 0x1b3   : > { %4430 = vmatpush.bf16.msrb.mxu2 %v6227_v6  ;;  %v6547_v6 = vor.u32 %v7647_v62, %v6546_v60  ;;  %v6931_v18 = vor.u32 %v7743_v3, %v6930_v2  ;;  %v7671_v46 = vld [vmem:[%s8097_s6 + $0xd54] sm:$0xf0]  ;;  %v6626_v63 = vld [vmem:[%s8097_s6 + $0xd28] sm:$0xf]  ;;  %v4160_v2 = vadd.f32 %v8985_v49, %v4147_v51 }
 0x1b4   : > { %4443 = vmatpush.bf16.msrb.mxu3 %v6355_v13  ;;  %4405 = vmatmul.bf16.vlgmr.msrb.gmra.mxu0 %v8356_v26  ;;  %v6803_v13 = vor.u32 %v7711_v55, %v6802_v23  ;;  %v7703_v50 = vld [vmem:[%s8097_s6 + $0xe54] sm:$0xf0]  ;;  %v6754_v23 = vld [vmem:[%s8097_s6 + $0xe28] sm:$0xf] }
 0x1b5   : > { %4449 = vmatpush.bf16.msra.mxu0 %v6595_v14  ;;  %4418 = vmatmul.bf16.vlgmr.msrb.gmra.mxu1 %v8363_v31  ;;  %v6530_v14 = vld [vmem:[%s8097_s6 + $0xc68] sm:$0xf]  ;;  %v7735_v54 = vld [vmem:[%s8097_s6 + $0xf54] sm:$0xf0] }
 0x1b6   : > { %4462 = vmatpush.bf16.msra.mxu1 %v6723_v15  ;;  %4431 = vmatmul.bf16.vlgmr.msrb.gmra.mxu2 %v8361_v30  ;;  %v7643_v15 = vld [vmem:[%s8097_s6 + $0xc74] sm:$0xf0]  ;;  %v6882_v3 = vld [vmem:[%s8097_s6 + $0xf28] sm:$0xf] }
 0x1b7   : > { %4475 = vmatpush.bf16.msra.mxu2 %v6851_v16  ;;  %4444 = vmatmul.bf16.vlgmr.msrb.gmra.mxu3 %v8367_v34  ;;  %v6658_v16 = vld [vmem:[%s8097_s6 + $0xd68] sm:$0xf]  ;;  %v6531_v35 = vor.u32 %v7643_v15, %v6530_v14  ;;  %v7635_v12 = vld [vmem:[%s8097_s6 + $0xc34] sm:$0xf0]  ;;  %v4173_v15 = vadd.f32 %v8998_v4, %v4160_v2  ;;  %v7301_v2 = vld [vmem:[%s8097_s6 + $0x1cc] sm:$0xf] }
 0x1b8   : > { %4488 = vmatpush.bf16.msra.mxu3 %v6979_v27  ;;  %v7707_v27 = vld [vmem:[%s8097_s6 + $0xe74] sm:$0xf0]  ;;  %v6659_v19 = vor.u32 %v7675_v20, %v6658_v16  ;;  %v6610_v49 = vld [vmem:[%s8097_s6 + $0xd08] sm:$0xf] }
 0x1b9   : > { %4450 = vmatpush.bf16.msra.mxu0 %v6579_v38  ;;  %v6787_v37 = vor.u32 %v7707_v27, %v6786_v25  ;;  %v6514_v38 = vld [vmem:[%s8097_s6 + $0xc48] sm:$0xf]  ;;  %v9074_v47 = vpop.f32.mrf.mxu2  ;;  %v7667_v9 = vld [vmem:[%s8097_s6 + $0xd34] sm:$0xf0] }
 0x1ba   : > { %4463 = vmatpush.bf16.msra.mxu1 %v6707_v41  ;;  %v7639_v41 = vld [vmem:[%s8097_s6 + $0xc54] sm:$0xf0]  ;;  %v9081_v52 = vpop.f32.mrf.mxu3  ;;  %v6627_v16 = vor.u32 %v7667_v9, %v6626_v63  ;;  %v6738_v25 = vld [vmem:[%s8097_s6 + $0xe08] sm:$0xf] }
 0x1bb   : > { %4476 = vmatpush.bf16.msra.mxu2 %v6835_v17  ;;  %v6642_v17 = vld [vmem:[%s8097_s6 + $0xd48] sm:$0xf]  ;;  %v7699_v55 = vld [vmem:[%s8097_s6 + $0xe34] sm:$0xf0] }
 0x1bc   : > { %4489 = vmatpush.bf16.msra.mxu3 %v6963_v48  ;;  %v6770_v48 = vld [vmem:[%s8097_s6 + $0xe48] sm:$0xf]  ;;  %v6643_v60 = vor.u32 %v7671_v46, %v6642_v17  ;;  %v7631_v14 = vld [vmem:[%s8097_s6 + $0xc14] sm:$0xf0]  ;;  %v7273_v46 = vld [vmem:[%s8097_s6 + $0xec] sm:$0xf] }
 0x1bd   : > { %4451 = vmatpush.bf16.msra.mxu0 %v6563_v56  ;;  %v4200_v56 = vpop.f32.mrf.mxu0  ;;  %v6771_v62 = vor.u32 %v7703_v50, %v6770_v48  ;;  %v7663_v20 = vld [vmem:[%s8097_s6 + $0xd14] sm:$0xf0]  ;;  %v6866_v28 = vld [vmem:[%s8097_s6 + $0xf08] sm:$0xf]  ;;  %v5060_v48 = vld [vmem:[%s8097_s6 + $0xf8] sm:$0xf0]  ;;  %v4186_v50 = vadd.f32 %v9003_v11, %v4173_v15 }
 0x1be   : > { %4464 = vmatpush.bf16.msra.mxu1 %v6691_v57  ;;  %v6515_v57 = vor.u32 %v7639_v41, %v6514_v38  ;;  %v7695_v58 = vld [vmem:[%s8097_s6 + $0xe14] sm:$0xf0]  ;;  %v7106_v4 = vld [vmem:[%s8097_s6 + $0x10e8] sm:$0xf]  ;;  %v6611_v51 = vor.u32 %v7663_v20, %v6610_v49  ;;  %v5188_v56 = vld [vmem:[%s8097_s6 + $0x1f8] sm:$0xf0] }
 0x1bf   : > { %4477 = vmatpush.bf16.msra.mxu2 %v6819_v59  ;;  %v4213_v59 = vpop.f32.mrf.mxu1  ;;  %v7234_v38 = vld [vmem:[%s8097_s6 + $0x11e8] sm:$0xf]  ;;  %v7783_v11 = vld [vmem:[%s8097_s6 + $0x10d4] sm:$0xf0]  ;;  %v7265_v20 = vld [vmem:[%s8097_s6 + $0xac] sm:$0xf] }
 0x1c0   : > { %4490 = vmatpush.bf16.msra.mxu3 %v6947_v0  ;;  %v6899_v0 = vor.u32 %v7735_v54, %v6898_v53  ;;  %v6739_v53 = vor.u32 %v7695_v58, %v6738_v25  ;;  %v7305_v54 = vld [vmem:[%s8097_s6 + $0x1ec] sm:$0xf]  ;;  %v7218_v63 = vld [vmem:[%s8097_s6 + $0x11c8] sm:$0xf]  ;;  %v7815_v9 = vld [vmem:[%s8097_s6 + $0x11d4] sm:$0xf0] }
 0x1c1   : > { %4452 = vmatpush.bf16.msra.mxu0 %v6547_v6  ;;  %v7731_v6 = vld [vmem:[%s8097_s6 + $0xf34] sm:$0xf0]  ;;  %v5028_v25 = vld [vmem:[%s8097_s6 + $0xb8] sm:$0xf0] }
 0x1c2   : > { %4465 = vmatpush.bf16.msra.mxu1 %v6675_v10  ;;  %v6499_v10 = vor.u32 %v7635_v12, %v6498_v61  ;;  %v6883_v27 = vor.u32 %v7731_v6, %v6882_v3  ;;  %v4239_v41 = vpop.f32.mrf.mxu3  ;;  %v5063_v61 = vor.u32 %v7273_v46, %v5060_v48  ;;  %v7090_v12 = vld [vmem:[%s8097_s6 + $0x10c8] sm:$0xf]  ;;  %v5172_v3 = vld [vmem:[%s8097_s6 + $0x1d8] sm:$0xf0]  ;;  %v7779_v15 = vld [vmem:[%s8097_s6 + $0x10b4] sm:$0xf0] }
 0x1c3   : > { %4478 = vmatpush.bf16.msra.mxu2 %v6803_v13  ;;  %v6482_v13 = vld [vmem:[%s8097_s6 + $0xc08] sm:$0xf]  ;;  %v7811_v49 = vld [vmem:[%s8097_s6 + $0x11b4] sm:$0xf0]  ;;  %v5156_v58 = vld [vmem:[%s8097_s6 + $0x1b8] sm:$0xf0] }
 0x1c4   : > { %4491 = vmatpush.bf16.msra.mxu3 %v6931_v18  ;;  %v6755_v18 = vor.u32 %v7699_v55, %v6754_v23  ;;  %v6483_v17 = vor.u32 %v7631_v14, %v6482_v13  ;;  %v7269_v23 = vld [vmem:[%s8097_s6 + $0xcc] sm:$0xf]  ;;  %v5044_v55 = vld [vmem:[%s8097_s6 + $0xd8] sm:$0xf0]  ;;  %v7074_v14 = vld [vmem:[%s8097_s6 + $0x10a8] sm:$0xf] }
 0x1c5   : > { %4453 = vmatpush.bf16.msra.mxu0 %v6531_v35  ;;  %v7727_v35 = vld [vmem:[%s8097_s6 + $0xf14] sm:$0xf0]  ;;  %v5047_v13 = vor.u32 %v7269_v23, %v5044_v55 }
 0x1c6   : > { %4466 = vmatpush.bf16.msra.mxu1 %v6659_v19  ;;  %v4226_v19 = vpop.f32.mrf.mxu2  ;;  %v7807_v41 = vld [vmem:[%s8097_s6 + $0x1194] sm:$0xf0] }
 0x1c7   : > { %4479 = vmatpush.bf16.msra.mxu2 %v6787_v37  ;;  %v7787_v37 = vld [vmem:[%s8097_s6 + $0x10f4] sm:$0xf0]  ;;  %v5031_v19 = vor.u32 %v7265_v20, %v5028_v25  ;;  %v7285_v25 = vld [vmem:[%s8097_s6 + $0x14c] sm:$0xf] }
 0x1c8   : > { %4492 = vmatpush.bf16.msra.mxu3 %v6915_v44  ;;  %v7819_v44 = vld [vmem:[%s8097_s6 + $0x11f4] sm:$0xf0]  ;;  %v7107_v59 = vor.u32 %v7787_v37, %v7106_v4  ;;  %v7186_v37 = vld [vmem:[%s8097_s6 + $0x1188] sm:$0xf] }
 0x1c9   : > { %4454 = vmatpush.bf16.msra.mxu0 %v6515_v57  ;;  %v6867_v57 = vor.u32 %v7727_v35, %v6866_v28  ;;  %v7075_v28 = vor.u32 %v7779_v15, %v7074_v14  ;;  %v7775_v4 = vld [vmem:[%s8097_s6 + $0x1094] sm:$0xf0] }
 0x1ca   : > { %4467 = vmatpush.bf16.msra.mxu1 %v6643_v60  ;;  %v4199_v60 = vadd.f32 %v9057_v1, %v4186_v50  ;;  %v7091_v1 = vor.u32 %v7783_v11, %v7090_v12  ;;  %v7293_v50 = vld [vmem:[%s8097_s6 + $0x18c] sm:$0xf]  ;;  %v7803_v12 = vld [vmem:[%s8097_s6 + $0x1174] sm:$0xf0] }
 0x1cb   : > { %4480 = vmatpush.bf16.msra.mxu2 %v6771_v62  ;;  %v7235_v62 = vor.u32 %v7819_v44, %v7234_v38  ;;  %v5012_v44 = vld [vmem:[%s8097_s6 + $0x98] sm:$0xf0]  ;;  %v7257_v11 = vld [vmem:[%s8097_s6 + $0x6c] sm:$0xf]  ;;  %v7799_v15 = vld [vmem:[%s8097_s6 + $0x1154] sm:$0xf0] }
 0x1cc   : > { %4493 = vmatpush.bf16.msra.mxu3 %v6899_v0  ;;  %v5191_v0 = vor.u32 %v7305_v54, %v5188_v56  ;;  %v4212_v6 = vadd.f32 %v9061_v8, %v4199_v60  ;;  %v7042_v60 = vld [vmem:[%s8097_s6 + $0x1068] sm:$0xf] }
 0x1cd   : > { %4455 = vmatpush.bf16.msra.mxu0 %v6499_v10  ;;  %v7219_v10 = vor.u32 %v7815_v9, %v7218_v63  ;;  %v4996_v63 = vld [vmem:[%s8097_s6 + $0x78] sm:$0xf0] }
 0x1ce   : > { %4468 = vmatpush.bf16.msra.mxu1 %v6627_v16  ;;  %v7202_v16 = vld [vmem:[%s8097_s6 + $0x11a8] sm:$0xf]  ;;  %v4225_v8 = vadd.f32 %v9074_v47, %v4212_v6  ;;  %v5124_v9 = vld [vmem:[%s8097_s6 + $0x178] sm:$0xf0]  ;;  %v7767_v6 = vld [vmem:[%s8097_s6 + $0x1054] sm:$0xf0] }
 0x1cf   : > { %4481 = vmatpush.bf16.msra.mxu2 %v6755_v18  ;;  %v5175_v18 = vor.u32 %v7301_v2, %v5172_v3  ;;  %v7203_v35 = vor.u32 %v7811_v49, %v7202_v16  ;;  %v7058_v47 = vld [vmem:[%s8097_s6 + $0x1088] sm:$0xf]  ;;  %v4999_v3 = vor.u32 %v7257_v11, %v4996_v63  ;;  %v7253_v16 = vld [vmem:[%s8097_s6 + $0x4c] sm:$0xf]  ;;  %v4948_v11 = vld [vmem:[%s8097_s6 + $0x18] sm:$0xf0] }
 0x1d0   : > { %4494 = vmatpush.bf16.msra.mxu3 %v6883_v27  ;;  %v7297_v27 = vld [vmem:[%s8097_s6 + $0x1ac] sm:$0xf]  ;;  %v4238_v46 = vadd.f32 %v9081_v52, %v4225_v8  ;;  %v7170_v52 = vld [vmem:[%s8097_s6 + $0x1168] sm:$0xf]  ;;  %v5108_v8 = vld [vmem:[%s8097_s6 + $0x158] sm:$0xf0] }
 0x1d1   : > { %4456 = vmatpush.bf16.msra.mxu0 %v6483_v17  ;;  %v5159_v38 = vor.u32 %v7297_v27, %v5156_v58  ;;  %v7261_v17 = vld [vmem:[%s8097_s6 + $0x8c] sm:$0xf]  ;;  %v4250_v48 = vpop.f32.mrf.mxu0  ;;  %v7171_v2 = vor.u32 %v7803_v12, %v7170_v52  ;;  %v294_v58 = vld [vmem:[#allocation2] sm:$0xff]  ;;  %v7791_v52 = vld [vmem:[%s8097_s6 + $0x1114] sm:$0xf0] }
 0x1d2   : > { %4469 = vmatpush.bf16.msra.mxu1 %v6611_v51  ;;  %v5140_v51 = vld [vmem:[%s8097_s6 + $0x198] sm:$0xf0]  ;;  %v4263_v54 = vpop.f32.mrf.mxu1  ;;  %v4251_v56 = vadd.f32 %v4250_v48, %v4238_v46  ;;  %v7249_v46 = vld [vmem:[%s8097_s6 + $0x2c] sm:$0xf] }
 0x1d3   : > { %4482 = vmatpush.bf16.msra.mxu2 %v6739_v53  ;;  %v7059_v53 = vor.u32 %v7775_v4, %v7058_v47  ;;  %v4964_v48 = vld [vmem:[%s8097_s6 + $0x38] sm:$0xf0]  ;;  %v7277_v63 = vld [vmem:[%s8097_s6 + $0x10c] sm:$0xf] }
 0x1d4   : > { %4495 = vmatpush.bf16.msra.mxu3 %v6867_v57  ;;  %4457 = vmatmul.bf16.vlgmr.msra.gmra.mxu0 %v8434_v24  ;;  %v7187_v57 = vor.u32 %v7807_v41, %v7186_v37  ;;  %v4264_v55 = vadd.f32 %v4263_v54, %v4251_v56  ;;  %v7010_v37 = vld [vmem:[%s8097_s6 + $0x1028] sm:$0xf] }
 0x1d5   : > { %4501 = vmatpush.bf16.msrb.mxu0 %v7107_v59  ;;  %4470 = vmatmul.bf16.vlgmr.msra.gmra.mxu1 %v8441_v32  ;;  %v5015_v59 = vor.u32 %v7261_v17, %v5012_v44  ;;  %v7138_v41 = vld [vmem:[%s8097_s6 + $0x1128] sm:$0xf]  ;;  %v5111_v17 = vor.u32 %v7285_v25, %v5108_v8  ;;  %v7795_v44 = vld [vmem:[%s8097_s6 + $0x1134] sm:$0xf0] }
 0x1d6   : > { %4514 = vmatpush.bf16.msrb.mxu1 %v7235_v62  ;;  %4483 = vmatmul.bf16.vlgmr.msra.gmra.mxu2 %v8439_v29  ;;  %v7771_v62 = vld [vmem:[%s8097_s6 + $0x1074] sm:$0xf0]  ;;  %v6994_v56 = vld [vmem:[%s8097_s6 + $0x1008] sm:$0xf] }
 0x1d7   : > { %4527 = vmatpush.bf16.msrb.mxu2 %v5063_v61  ;;  %4496 = vmatmul.bf16.vlgmr.msra.gmra.mxu3 %v8445_v36  ;;  %v5143_v61 = vor.u32 %v7293_v50, %v5140_v51  ;;  %v7043_v23 = vor.u32 %v7771_v62, %v7042_v60  ;;  %v7281_v51 = vld [vmem:[%s8097_s6 + $0x12c] sm:$0xf]  ;;  %v7139_v60 = vor.u32 %v7795_v44, %v7138_v41 }
 0x1d8   : > { %4540 = vmatpush.bf16.msrb.mxu3 %v5191_v0  ;;  %v7289_v0 = vld [vmem:[%s8097_s6 + $0x16c] sm:$0xf]  ;;  %v4967_v62 = vor.u32 %v7249_v46, %v4964_v48  ;;  %v5284_v48 = vld [vmem:[%s8097_s6 + $0x2b8] sm:$0xf0] }
 0x1d9   : > { %4502 = vmatpush.bf16.msrb.mxu0 %v7091_v1  ;;  %v7026_v1 = vld [vmem:[%s8097_s6 + $0x1048] sm:$0xf]  ;;  %v4276_v14 = vpop.f32.mrf.mxu2  ;;  %v4252_v27 = vpop.f32.mrf.mxu0  ;;  %v7329_v46 = vld [vmem:[%s8097_s6 + $0x2ac] sm:$0xf] }
 0x1da   : > { %4515 = vmatpush.bf16.msrb.mxu1 %v7219_v10  ;;  %v7154_v10 = vld [vmem:[%s8097_s6 + $0x1148] sm:$0xf]  ;;  %v4277_v49 = vadd.f32 %v4276_v14, %v4264_v55  ;;  %v4289_v20 = vpop.f32.mrf.mxu3  ;;  %v5316_v55 = vld [vmem:[%s8097_s6 + $0x2f8] sm:$0xf0]  ;;  %v7333_v27 = vld [vmem:[%s8097_s6 + $0x2cc] sm:$0xf] }
 0x1db   : > { %4528 = vmatpush.bf16.msrb.mxu2 %v5047_v13  ;;  %v5127_v13 = vor.u32 %v7289_v0, %v5124_v9  ;;  %v7155_v47 = vor.u32 %v7799_v15, %v7154_v10  ;;  %v5076_v0 = vld [vmem:[%s8097_s6 + $0x118] sm:$0xf0]  ;;  %v7401_v10 = vld [vmem:[%s8097_s6 + $0x4ec] sm:$0xf] }
 0x1dc   : > { %4541 = vmatpush.bf16.msrb.mxu3 %v5175_v18  ;;  %v4980_v18 = vld [vmem:[%s8097_s6 + $0x58] sm:$0xf0] }
 0x1dd   : > { %4503 = vmatpush.bf16.msrb.mxu0 %v7075_v28  ;;  %v7027_v28 = vor.u32 %v7767_v6, %v7026_v1  ;;  %v4983_v4 = vor.u32 %v7253_v16, %v4980_v18  ;;  %v5444_v6 = vld [vmem:[%s8097_s6 + $0x3f8] sm:$0xf0]  ;;  %v7433_v16 = vld [vmem:[%s8097_s6 + $0x5ec] sm:$0xf] }
 0x1de   : > { %4516 = vmatpush.bf16.msrb.mxu1 %v7203_v35  ;;  %v4265_v35 = vpop.f32.mrf.mxu1  ;;  %v5700_v18 = vld [vmem:[%s8097_s6 + $0x5f8] sm:$0xf0] }
 0x1df   : > { %4529 = vmatpush.bf16.msrb.mxu2 %v5031_v19  ;;  %v4290_v19 = vadd.f32 %v4289_v20, %v4277_v49  ;;  %v5079_v49 = vor.u32 %v7277_v63, %v5076_v0  ;;  %v5703_v35 = vor.u32 %v7433_v16, %v5700_v18  ;;  %v5396_v0 = vld [vmem:[%s8097_s6 + $0x398] sm:$0xf0]  ;;  %v7385_v18 = vld [vmem:[%s8097_s6 + $0x46c] sm:$0xf] }
 0x1e0   : > { %4542 = vmatpush.bf16.msrb.mxu3 %v5159_v38  ;;  %v7763_v38 = vld [vmem:[%s8097_s6 + $0x1034] sm:$0xf0]  ;;  %v5380_v16 = vld [vmem:[%s8097_s6 + $0x378] sm:$0xf0] }
 0x1e1   : > { %4504 = vmatpush.bf16.msrb.mxu0 %v7059_v53  ;;  %v4762_v50 = vadd.f32 %v4290_v19, %v294_v58  ;;  %v5092_v53 = vld [vmem:[%s8097_s6 + $0x138] sm:$0xf0]  ;;  %v7011_v54 = vor.u32 %v7763_v38, %v7010_v37  ;;  %v4278_v9 = vpop.f32.mrf.mxu2  ;;  %v7429_v37 = vld [vmem:[%s8097_s6 + $0x5cc] sm:$0xf] }
 0x1e2   : > { %4517 = vmatpush.bf16.msrb.mxu1 %v7187_v57  ;;  %v7759_v57 = vld [vmem:[%s8097_s6 + $0x1014] sm:$0xf0]  ;;  %v5095_v12 = vor.u32 %v7281_v51, %v5092_v53  ;;  %v5300_v58 = vld [vmem:[%s8097_s6 + $0x2d8] sm:$0xf0] }
 0x1e3   : > { %4530 = vmatpush.bf16.msrb.mxu2 %v5015_v59  ;;  %v7122_v59 = vld [vmem:[%s8097_s6 + $0x1108] sm:$0xf]  ;;  %4766 = vst [vmem:[#allocation2] sm:$0xff] %v4762_v50  ;;  %v6995_v1 = vor.u32 %v7759_v57, %v6994_v56  ;;  %v5428_v19 = vld [vmem:[%s8097_s6 + $0x3d8] sm:$0xf0]  ;;  %v5303_v41 = vor.u32 %v7333_v27, %v5300_v58 }
 0x1e4   : > { %4543 = vmatpush.bf16.msrb.mxu3 %v5143_v61  ;;  %v7245_v61 = vld [vmem:[%s8097_s6 + $0xc] sm:$0xf]  ;;  %v7123_v14 = vor.u32 %v7791_v52, %v7122_v59  ;;  %v5684_v38 = vld [vmem:[%s8097_s6 + $0x5d8] sm:$0xf0] }
 0x1e5   : > { %4505 = vmatpush.bf16.msrb.mxu0 %v7043_v23  ;;  %v7337_v23 = vld [vmem:[%s8097_s6 + $0x2ec] sm:$0xf]  ;;  %v4951_v15 = vor.u32 %v7245_v61, %v4948_v11  ;;  %v5687_v51 = vor.u32 %v7429_v37, %v5684_v38  ;;  %v5412_v53 = vld [vmem:[%s8097_s6 + $0x3b8] sm:$0xf0] }
 0x1e6   : > { %4518 = vmatpush.bf16.msrb.mxu1 %v7171_v2  ;;  %v7369_v2 = vld [vmem:[%s8097_s6 + $0x3ec] sm:$0xf]  ;;  %v5319_v20 = vor.u32 %v7337_v23, %v5316_v55  ;;  %v5540_v56 = vld [vmem:[%s8097_s6 + $0x4b8] sm:$0xf0] }
 0x1e7   : > { %4531 = vmatpush.bf16.msrb.mxu2 %v4999_v3  ;;  %v4291_v3 = vpop.f32.mrf.mxu3  ;;  %v5447_v25 = vor.u32 %v7369_v2, %v5444_v6  ;;  %v7361_v50 = vld [vmem:[%s8097_s6 + $0x3ac] sm:$0xf]  ;;  %v5668_v59 = vld [vmem:[%s8097_s6 + $0x5b8] sm:$0xf0] }
 0x1e8   : > { %4544 = vmatpush.bf16.msrb.mxu3 %v5127_v13  ;;  %v5572_v13 = vld [vmem:[%s8097_s6 + $0x4f8] sm:$0xf0]  ;;  %v7425_v57 = vld [vmem:[%s8097_s6 + $0x5ac] sm:$0xf] }
 0x1e9   : > { %4506 = vmatpush.bf16.msrb.mxu0 %v7027_v28  ;;  %v5575_v8 = vor.u32 %v7401_v10, %v5572_v13  ;;  %v7365_v28 = vld [vmem:[%s8097_s6 + $0x3cc] sm:$0xf]  ;;  %v5671_v63 = vor.u32 %v7425_v57, %v5668_v59  ;;  %v5524_v9 = vld [vmem:[%s8097_s6 + $0x498] sm:$0xf0] }
 0x1ea   : > { %4519 = vmatpush.bf16.msrb.mxu1 %v7155_v47  ;;  %v7397_v47 = vld [vmem:[%s8097_s6 + $0x4cc] sm:$0xf]  ;;  %v5652_v55 = vld [vmem:[%s8097_s6 + $0x598] sm:$0xf0] }
 0x1eb   : > { %4532 = vmatpush.bf16.msrb.mxu2 %v4983_v4  ;;  %v5556_v4 = vld [vmem:[%s8097_s6 + $0x4d8] sm:$0xf0]  ;;  %v7325_v61 = vld [vmem:[%s8097_s6 + $0x28c] sm:$0xf] }
 0x1ec   : > { %4545 = vmatpush.bf16.msrb.mxu3 %v5111_v17  ;;  %v5431_v17 = vor.u32 %v7365_v28, %v5428_v19  ;;  %v5559_v44 = vor.u32 %v7397_v47, %v5556_v4  ;;  %v7357_v11 = vld [vmem:[%s8097_s6 + $0x38c] sm:$0xf]  ;;  %v5252_v10 = vld [vmem:[%s8097_s6 + $0x278] sm:$0xf0] }
 0x1ed   : > { %4507 = vmatpush.bf16.msrb.mxu0 %v7011_v54  ;;  %v7393_v54 = vld [vmem:[%s8097_s6 + $0x4ac] sm:$0xf]  ;;  %v5399_v3 = vor.u32 %v7357_v11, %v5396_v0  ;;  %v5236_v19 = vld [vmem:[%s8097_s6 + $0x258] sm:$0xf0] }
 0x1ee   : > { %4520 = vmatpush.bf16.msrb.mxu1 %v7139_v60  ;;  %v5287_v60 = vor.u32 %v7329_v46, %v5284_v48  ;;  %v5543_v52 = vor.u32 %v7393_v54, %v5540_v56  ;;  %v7421_v23 = vld [vmem:[%s8097_s6 + $0x58c] sm:$0xf]  ;;  %v5364_v38 = vld [vmem:[%s8097_s6 + $0x358] sm:$0xf0] }
 0x1ef   : > { %4533 = vmatpush.bf16.msrb.mxu2 %v4967_v62  ;;  %v5415_v62 = vor.u32 %v7361_v50, %v5412_v53  ;;  %v7321_v6 = vld [vmem:[%s8097_s6 + $0x26c] sm:$0xf]  ;;  %v5620_v50 = vld [vmem:[%s8097_s6 + $0x558] sm:$0xf0] }
 0x1f0   : > { %4546 = vmatpush.bf16.msrb.mxu3 %v5095_v12  ;;  %v5268_v12 = vld [vmem:[%s8097_s6 + $0x298] sm:$0xf0]  ;;  %v7353_v13 = vld [vmem:[%s8097_s6 + $0x36c] sm:$0xf]  ;;  %v5255_v27 = vor.u32 %v7321_v6, %v5252_v10 }
 0x1f1   : > { %4508 = vmatpush.bf16.msrb.mxu0 %v6995_v1  ;;  %v4302_v2 = vpop.f32.mrf.mxu0  ;;  %v5383_v58 = vor.u32 %v7353_v13, %v5380_v16  ;;  %v7349_v47 = vld [vmem:[%s8097_s6 + $0x34c] sm:$0xf]  ;;  %v5588_v16 = vld [vmem:[%s8097_s6 + $0x518] sm:$0xf0] }
 0x1f2   : > { %4521 = vmatpush.bf16.msrb.mxu1 %v7123_v14  ;;  %v4315_v14 = vpop.f32.mrf.mxu1  ;;  %v7413_v48 = vld [vmem:[%s8097_s6 + $0x54c] sm:$0xf]  ;;  %v5367_v56 = vor.u32 %v7349_v47, %v5364_v38 }
 0x1f3   : > { %4534 = vmatpush.bf16.msrb.mxu2 %v4951_v15  ;;  %v5655_v15 = vor.u32 %v7421_v23, %v5652_v55  ;;  %v7313_v59 = vld [vmem:[%s8097_s6 + $0x22c] sm:$0xf]  ;;  %v5204_v55 = vld [vmem:[%s8097_s6 + $0x218] sm:$0xf0] }
 0x1f4   : > { %4547 = vmatpush.bf16.msrb.mxu3 %v5079_v49  ;;  %4509 = vmatmul.bf16.vlgmr.msrb.gmra.mxu0 %v8511_v33  ;;  %v5508_v49 = vld [vmem:[%s8097_s6 + $0x478] sm:$0xf0]  ;;  %v7377_v11 = vld [vmem:[%s8097_s6 + $0x42c] sm:$0xf] }
 0x1f5   : > { %4553 = vmatpush.bf16.msra.mxu0 %v5319_v20  ;;  %4522 = vmatmul.bf16.vlgmr.msrb.gmra.mxu1 %v8516_v40  ;;  %v4316_v20 = vadd.f32 %v4315_v14, %v4302_v2  ;;  %v5511_v28 = vor.u32 %v7385_v18, %v5508_v49  ;;  %v7409_v0 = vld [vmem:[%s8097_s6 + $0x52c] sm:$0xf]  ;;  %v5460_v14 = vld [vmem:[%s8097_s6 + $0x418] sm:$0xf0] }
 0x1f6   : > { %4566 = vmatpush.bf16.msra.mxu1 %v5447_v25  ;;  %4535 = vmatmul.bf16.vlgmr.msrb.gmra.mxu2 %v8226_v21  ;;  %v7389_v21 = vld [vmem:[%s8097_s6 + $0x48c] sm:$0xf] }
 0x1f7   : > { %4579 = vmatpush.bf16.msra.mxu2 %v5575_v8  ;;  %4548 = vmatmul.bf16.vlgmr.msrb.gmra.mxu3 %v8229_v22  ;;  %v5271_v22 = vor.u32 %v7325_v61, %v5268_v12  ;;  %v5527_v1 = vor.u32 %v7389_v21, %v5524_v9  ;;  %v7417_v25 = vld [vmem:[%s8097_s6 + $0x56c] sm:$0xf]  ;;  %v5636_v8 = vld [vmem:[%s8097_s6 + $0x578] sm:$0xf0]  ;;  %v5623_v61 = vor.u32 %v7413_v48, %v5620_v50 }
 0x1f8   : > { %4592 = vmatpush.bf16.msra.mxu3 %v5703_v35  ;;  %v7317_v35 = vld [vmem:[%s8097_s6 + $0x24c] sm:$0xf]  ;;  %v5639_v37 = vor.u32 %v7417_v25, %v5636_v8  ;;  %v5348_v12 = vld [vmem:[%s8097_s6 + $0x338] sm:$0xf0] }
 0x1f9   : > { %4554 = vmatpush.bf16.msra.mxu0 %v5303_v41  ;;  %v4328_v4 = vpop.f32.mrf.mxu2  ;;  %v7381_v41 = vld [vmem:[%s8097_s6 + $0x44c] sm:$0xf]  ;;  %v4304_v54 = vpop.f32.mrf.mxu0  ;;  %v5604_v21 = vld [vmem:[%s8097_s6 + $0x538] sm:$0xf0] }
 0x1fa   : > { %4567 = vmatpush.bf16.msra.mxu1 %v5431_v17  ;;  %v5492_v17 = vld [vmem:[%s8097_s6 + $0x458] sm:$0xf0]  ;;  %v4341_v46 = vpop.f32.mrf.mxu3  ;;  %v7309_v23 = vld [vmem:[%s8097_s6 + $0x20c] sm:$0xf]  ;;  %v5607_v13 = vor.u32 %v7409_v0, %v5604_v21 }
 0x1fb   : > { %4580 = vmatpush.bf16.msra.mxu2 %v5559_v44  ;;  %v4329_v44 = vadd.f32 %v4328_v4, %v4316_v20  ;;  %v5495_v57 = vor.u32 %v7381_v41, %v5492_v17  ;;  %v7373_v6 = vld [vmem:[%s8097_s6 + $0x40c] sm:$0xf]  ;;  %v5828_v20 = vld [vmem:[%s8097_s6 + $0x6f8] sm:$0xf0]  ;;  %v5207_v8 = vor.u32 %v7309_v23, %v5204_v55 }
 0x1fc   : > { %4593 = vmatpush.bf16.msra.mxu3 %v5687_v51  ;;  %v5239_v51 = vor.u32 %v7317_v35, %v5236_v19  ;;  %v7465_v49 = vld [vmem:[%s8097_s6 + $0x6ec] sm:$0xf]  ;;  %v5463_v19 = vor.u32 %v7373_v6, %v5460_v14  ;;  %v6212_v4 = vld [vmem:[%s8097_s6 + $0x9f8] sm:$0xf0] }
 0x1fd   : > { %4555 = vmatpush.bf16.msra.mxu0 %v5287_v60  ;;  %v9228_v53 = vadd.f32 %v4341_v46, %v4329_v44  ;;  %v5220_v60 = vld [vmem:[%s8097_s6 + $0x238] sm:$0xf0]  ;;  %v7497_v25 = vld [vmem:[%s8097_s6 + $0x7ec] sm:$0xf]  ;;  %v5831_v38 = vor.u32 %v7465_v49, %v5828_v20 }
 0x1fe   : > { %4568 = vmatpush.bf16.msra.mxu1 %v5415_v62  ;;  %v7345_v62 = vld [vmem:[%s8097_s6 + $0x32c] sm:$0xf]  ;;  %v5223_v9 = vor.u32 %v7313_v59, %v5220_v60  ;;  %v5812_v46 = vld [vmem:[%s8097_s6 + $0x6d8] sm:$0xf0] }
 0x1ff   : > { %4581 = vmatpush.bf16.msra.mxu2 %v5543_v52  ;;  %v4317_v52 = vpop.f32.mrf.mxu1  ;;  %v7561_v47 = vld [vmem:[%s8097_s6 + $0x9ec] sm:$0xf]  ;;  %v6196_v59 = vld [vmem:[%s8097_s6 + $0x9d8] sm:$0xf0] }
 0x200   : > { %4594 = vmatpush.bf16.msra.mxu3 %v5671_v63  ;;  %v5476_v63 = vld [vmem:[%s8097_s6 + $0x438] sm:$0xf0]  ;;  %v7461_v44 = vld [vmem:[%s8097_s6 + $0x6cc] sm:$0xf]  ;;  %v6215_v50 = vor.u32 %v7561_v47, %v6212_v4 }
 0x201   : > { %4556 = vmatpush.bf16.msra.mxu0 %v5271_v22  ;;  %v5351_v22 = vor.u32 %v7345_v62, %v5348_v12  ;;  %v5479_v2 = vor.u32 %v7377_v11, %v5476_v63  ;;  %v4330_v10 = vpop.f32.mrf.mxu2  ;;  %v7493_v48 = vld [vmem:[%s8097_s6 + $0x7cc] sm:$0xf]  ;;  %v5815_v60 = vor.u32 %v7461_v44, %v5812_v46  ;;  %v5796_v12 = vld [vmem:[%s8097_s6 + $0x6b8] sm:$0xf0] }
 0x202   : > { %4569 = vmatpush.bf16.msra.mxu1 %v5399_v3  ;;  %v7341_v3 = vld [vmem:[%s8097_s6 + $0x30c] sm:$0xf]  ;;  %v4343_v18 = vpop.f32.mrf.mxu3  ;;  %v5924_v0 = vld [vmem:[%s8097_s6 + $0x7b8] sm:$0xf0] }
 0x203   : > { %4582 = vmatpush.bf16.msra.mxu2 %v5527_v1  ;;  %v5332_v1 = vld [vmem:[%s8097_s6 + $0x318] sm:$0xf0]  ;;  %v7525_v54 = vld [vmem:[%s8097_s6 + $0x8cc] sm:$0xf] }
 0x204   : > { %4595 = vmatpush.bf16.msra.mxu3 %v5655_v15  ;;  %v7405_v15 = vld [vmem:[%s8097_s6 + $0x50c] sm:$0xf]  ;;  %v5335_v35 = vor.u32 %v7341_v3, %v5332_v1  ;;  %v6180_v55 = vld [vmem:[%s8097_s6 + $0x9b8] sm:$0xf0] }
 0x205   : > { %4557 = vmatpush.bf16.msra.mxu0 %v5255_v27  ;;  %v5956_v27 = vld [vmem:[%s8097_s6 + $0x7f8] sm:$0xf0]  ;;  %v7489_v11 = vld [vmem:[%s8097_s6 + $0x7ac] sm:$0xf] }
 0x206   : > { %4570 = vmatpush.bf16.msra.mxu1 %v5383_v58  ;;  %v7529_v58 = vld [vmem:[%s8097_s6 + $0x8ec] sm:$0xf]  ;;  %v5959_v41 = vor.u32 %v7497_v25, %v5956_v27  ;;  %v5780_v1 = vld [vmem:[%s8097_s6 + $0x698] sm:$0xf0] }
 0x207   : > { %4583 = vmatpush.bf16.msra.mxu2 %v5511_v28  ;;  %v6084_v28 = vld [vmem:[%s8097_s6 + $0x8f8] sm:$0xf0]  ;;  %v7521_v21 = vld [vmem:[%s8097_s6 + $0x8ac] sm:$0xf] }
 0x208   : > { %4596 = vmatpush.bf16.msra.mxu3 %v5639_v37  ;;  %v5591_v37 = vor.u32 %v7405_v15, %v5588_v16  ;;  %v6087_v17 = vor.u32 %v7529_v58, %v6084_v28  ;;  %v7553_v23 = vld [vmem:[%s8097_s6 + $0x9ac] sm:$0xf]  ;;  %v5908_v6 = vld [vmem:[%s8097_s6 + $0x798] sm:$0xf0] }
 0x209   : > { %4558 = vmatpush.bf16.msra.mxu0 %v5239_v51  ;;  %v5940_v51 = vld [vmem:[%s8097_s6 + $0x7d8] sm:$0xf0]  ;;  %v7453_v3 = vld [vmem:[%s8097_s6 + $0x68c] sm:$0xf] }
 0x20a   : > { %4571 = vmatpush.bf16.msra.mxu1 %v5367_v56  ;;  %v6068_v56 = vld [vmem:[%s8097_s6 + $0x8d8] sm:$0xf0]  ;;  %v5943_v62 = vor.u32 %v7493_v48, %v5940_v51  ;;  %v7517_v10 = vld [vmem:[%s8097_s6 + $0x88c] sm:$0xf] }
 0x20b   : > { %4584 = vmatpush.bf16.msra.mxu2 %v5495_v57  ;;  %v7557_v57 = vld [vmem:[%s8097_s6 + $0x9cc] sm:$0xf]  ;;  %v6071_v52 = vor.u32 %v7525_v54, %v6068_v56  ;;  %v6164_v15 = vld [vmem:[%s8097_s6 + $0x998] sm:$0xf0] }
 0x20c   : > { %4597 = vmatpush.bf16.msra.mxu3 %v5623_v61  ;;  %v7457_v61 = vld [vmem:[%s8097_s6 + $0x6ac] sm:$0xf]  ;;  %v6199_v63 = vor.u32 %v7557_v57, %v6196_v59  ;;  %v5764_v25 = vld [vmem:[%s8097_s6 + $0x678] sm:$0xf0] }
 0x20d   : > { %4559 = vmatpush.bf16.msra.mxu0 %v5223_v9  ;;  %v6052_v9 = vld [vmem:[%s8097_s6 + $0x8b8] sm:$0xf0]  ;;  %v7549_v14 = vld [vmem:[%s8097_s6 + $0x98c] sm:$0xf] }
 0x20e   : > { %4572 = vmatpush.bf16.msra.mxu1 %v5351_v22  ;;  %v5799_v22 = vor.u32 %v7457_v61, %v5796_v12  ;;  %v7449_v20 = vld [vmem:[%s8097_s6 + $0x66c] sm:$0xf]  ;;  %v6167_v28 = vor.u32 %v7549_v14, %v6164_v15  ;;  %v6020_v47 = vld [vmem:[%s8097_s6 + $0x878] sm:$0xf0] }
 0x20f   : > { %4585 = vmatpush.bf16.msra.mxu2 %v5479_v2  ;;  %v6055_v2 = vor.u32 %v7521_v21, %v6052_v9  ;;  %v7545_v4 = vld [vmem:[%s8097_s6 + $0x96c] sm:$0xf]  ;;  %v5748_v46 = vld [vmem:[%s8097_s6 + $0x658] sm:$0xf0] }
 0x210   : > { %4598 = vmatpush.bf16.msra.mxu3 %v5607_v13  ;;  %v6036_v13 = vld [vmem:[%s8097_s6 + $0x898] sm:$0xf0]  ;;  %v7445_v44 = vld [vmem:[%s8097_s6 + $0x64c] sm:$0xf] }
 0x211   : > { %4560 = vmatpush.bf16.msra.mxu0 %v5207_v8  ;;  %v4354_v16 = vpop.f32.mrf.mxu0  ;;  %v6039_v49 = vor.u32 %v7517_v10, %v6036_v13  ;;  %v7481_v8 = vld [vmem:[%s8097_s6 + $0x76c] sm:$0xf]  ;;  %v5876_v54 = vld [vmem:[%s8097_s6 + $0x758] sm:$0xf0]  ;;  %v5751_v61 = vor.u32 %v7445_v44, %v5748_v46 }
 0x212   : > { %4573 = vmatpush.bf16.msra.mxu1 %v5335_v35  ;;  %v4355_v27 = vadd.f32 %v4354_v16, %v9228_v53  ;;  %v4367_v58 = vpop.f32.mrf.mxu1  ;;  %v5892_v35 = vld [vmem:[%s8097_s6 + $0x778] sm:$0xf0]  ;;  %v7477_v48 = vld [vmem:[%s8097_s6 + $0x74c] sm:$0xf] }
 0x213   : > { %4586 = vmatpush.bf16.msra.mxu2 %v5463_v19  ;;  %v7513_v19 = vld [vmem:[%s8097_s6 + $0x86c] sm:$0xf]  ;;  %v5895_v53 = vor.u32 %v7481_v8, %v5892_v35  ;;  %v6004_v57 = vld [vmem:[%s8097_s6 + $0x858] sm:$0xf0] }
 0x214   : > { %4599 = vmatpush.bf16.msra.mxu3 %v5591_v37  ;;  %4561 = vmatmul.bf16.vlgmr.msra.gmra.mxu0 %v8212_v5  ;;  %v7485_v5 = vld [vmem:[%s8097_s6 + $0x78c] sm:$0xf]  ;;  %v6148_v37 = vld [vmem:[%s8097_s6 + $0x978] sm:$0xf0] }
 0x215   : > { %4605 = vmatpush.bf16.msrb.mxu0 %v5831_v38  ;;  %4574 = vmatmul.bf16.vlgmr.msra.gmra.mxu1 %v8215_v7  ;;  %v5783_v7 = vor.u32 %v7453_v3, %v5780_v1  ;;  %v5911_v18 = vor.u32 %v7485_v5, %v5908_v6  ;;  %v4368_v38 = vadd.f32 %v4367_v58, %v4355_v27  ;;  %v7509_v56 = vld [vmem:[%s8097_s6 + $0x84c] sm:$0xf]  ;;  %v5732_v9 = vld [vmem:[%s8097_s6 + $0x638] sm:$0xf0] }
 0x216   : > { %4618 = vmatpush.bf16.msrb.mxu1 %v5959_v41  ;;  %4587 = vmatmul.bf16.vlgmr.msra.gmra.mxu2 %v8285_v42  ;;  %v5927_v42 = vor.u32 %v7489_v11, %v5924_v0  ;;  %v5767_v41 = vor.u32 %v7449_v20, %v5764_v25  ;;  %v6151_v51 = vor.u32 %v7545_v4, %v6148_v37  ;;  %v7441_v21 = vld [vmem:[%s8097_s6 + $0x62c] sm:$0xf]  ;;  %v5988_v3 = vld [vmem:[%s8097_s6 + $0x838] sm:$0xf0] }
 0x217   : > { %4631 = vmatpush.bf16.msrb.mxu2 %v6087_v17  ;;  %4600 = vmatmul.bf16.vlgmr.msra.gmra.mxu3 %v8289_v45  ;;  %v6183_v45 = vor.u32 %v7553_v23, %v6180_v55  ;;  %v6023_v17 = vor.u32 %v7513_v19, %v6020_v47  ;;  %v6007_v0 = vor.u32 %v7509_v56, %v6004_v57  ;;  %v7473_v23 = vld [vmem:[%s8097_s6 + $0x72c] sm:$0xf]  ;;  %v6116_v5 = vld [vmem:[%s8097_s6 + $0x938] sm:$0xf0] }
 0x218   : > { %4644 = vmatpush.bf16.msrb.mxu3 %v6215_v50  ;;  %v7537_v1 = vld [vmem:[%s8097_s6 + $0x92c] sm:$0xf]  ;;  %v5716_v10 = vld [vmem:[%s8097_s6 + $0x618] sm:$0xf0] }
 0x219   : > { %4606 = vmatpush.bf16.msrb.mxu0 %v5815_v60  ;;  %v4380_v50 = vpop.f32.mrf.mxu2  ;;  %v4356_v11 = vpop.f32.mrf.mxu0  ;;  %v7437_v6 = vld [vmem:[%s8097_s6 + $0x60c] sm:$0xf]  ;;  %v5972_v20 = vld [vmem:[%s8097_s6 + $0x818] sm:$0xf0] }
 0x21a   : > { %4619 = vmatpush.bf16.msrb.mxu1 %v5943_v62  ;;  %v4381_v59 = vadd.f32 %v4380_v50, %v4368_v38  ;;  %v4393_v60 = vpop.f32.mrf.mxu3  ;;  %v7541_v62 = vld [vmem:[%s8097_s6 + $0x94c] sm:$0xf]  ;;  %v4369_v55 = vpop.f32.mrf.mxu1  ;;  %v6100_v8 = vld [vmem:[%s8097_s6 + $0x918] sm:$0xf0]  ;;  %v5719_v19 = vor.u32 %v7437_v6, %v5716_v10 }
 0x21b   : > { %4632 = vmatpush.bf16.msrb.mxu2 %v6071_v52  ;;  %v6132_v52 = vld [vmem:[%s8097_s6 + $0x958] sm:$0xf0]  ;;  %v7469_v15 = vld [vmem:[%s8097_s6 + $0x70c] sm:$0xf] }
 0x21c   : > { %4645 = vmatpush.bf16.msrb.mxu3 %v6199_v63  ;;  %v9299_v12 = vadd.f32 %v4393_v60, %v4381_v59  ;;  %v5879_v63 = vor.u32 %v7477_v48, %v5876_v54  ;;  %v7501_v16 = vld [vmem:[%s8097_s6 + $0x80c] sm:$0xf]  ;;  %v6468_v47 = vld [vmem:[%s8097_s6 + $0xbf8] sm:$0xf0] }
 0x21d   : > { %4607 = vmatpush.bf16.msrb.mxu0 %v5799_v22  ;;  %v6135_v22 = vor.u32 %v7541_v62, %v6132_v52  ;;  %v7533_v25 = vld [vmem:[%s8097_s6 + $0x90c] sm:$0xf]  ;;  %v6596_v37 = vld [vmem:[%s8097_s6 + $0xcf8] sm:$0xf0] }
 0x21e   : > { %4620 = vmatpush.bf16.msrb.mxu1 %v5927_v42  ;;  %v5860_v42 = vld [vmem:[%s8097_s6 + $0x738] sm:$0xf0]  ;;  %v7593_v58 = vld [vmem:[%s8097_s6 + $0xaec] sm:$0xf]  ;;  %v6103_v44 = vor.u32 %v7533_v25, %v6100_v8 }
 0x21f   : > { %4633 = vmatpush.bf16.msrb.mxu2 %v6055_v2  ;;  %v7505_v2 = vld [vmem:[%s8097_s6 + $0x82c] sm:$0xf]  ;;  %v5863_v13 = vor.u32 %v7473_v23, %v5860_v42  ;;  %v6324_v54 = vld [vmem:[%s8097_s6 + $0xad8] sm:$0xf0] }
 0x220   : > { %4646 = vmatpush.bf16.msrb.mxu3 %v6183_v45  ;;  %v5735_v45 = vor.u32 %v7441_v21, %v5732_v9  ;;  %v5991_v14 = vor.u32 %v7505_v2, %v5988_v3  ;;  %v7625_v35 = vld [vmem:[%s8097_s6 + $0xbec] sm:$0xf]  ;;  %v6452_v59 = vld [vmem:[%s8097_s6 + $0xbd8] sm:$0xf0] }
 0x221   : > { %4608 = vmatpush.bf16.msrb.mxu0 %v5783_v7  ;;  %v5844_v7 = vld [vmem:[%s8097_s6 + $0x718] sm:$0xf0]  ;;  %v7657_v4 = vld [vmem:[%s8097_s6 + $0xcec] sm:$0xf]  ;;  %v6471_v48 = vor.u32 %v7625_v35, %v6468_v47 }
 0x222   : > { %4621 = vmatpush.bf16.msrb.mxu1 %v5911_v18  ;;  %v4382_v18 = vpop.f32.mrf.mxu2  ;;  %v4395_v27 = vpop.f32.mrf.mxu3  ;;  %v5847_v38 = vor.u32 %v7469_v15, %v5844_v7  ;;  %v6599_v50 = vor.u32 %v7657_v4, %v6596_v37  ;;  %v7621_v56 = vld [vmem:[%s8097_s6 + $0xbcc] sm:$0xf]  ;;  %v6580_v62 = vld [vmem:[%s8097_s6 + $0xcd8] sm:$0xf0] }
 0x223   : > { %4634 = vmatpush.bf16.msrb.mxu2 %v6039_v49  ;;  %v6119_v49 = vor.u32 %v7537_v1, %v6116_v5  ;;  %v7653_v60 = vld [vmem:[%s8097_s6 + $0xccc] sm:$0xf]  ;;  %v6308_v9 = vld [vmem:[%s8097_s6 + $0xab8] sm:$0xf0] }
 0x224   : > { %4647 = vmatpush.bf16.msrb.mxu3 %v6167_v28  ;;  %v6340_v28 = vld [vmem:[%s8097_s6 + $0xaf8] sm:$0xf0]  ;;  %v7685_v52 = vld [vmem:[%s8097_s6 + $0xdcc] sm:$0xf] }
 0x225   : > { %4609 = vmatpush.bf16.msrb.mxu0 %v5767_v41  ;;  %v5975_v41 = vor.u32 %v7501_v16, %v5972_v20  ;;  %v6343_v46 = vor.u32 %v7593_v58, %v6340_v28  ;;  %v7585_v21 = vld [vmem:[%s8097_s6 + $0xaac] sm:$0xf]  ;;  %v6564_v2 = vld [vmem:[%s8097_s6 + $0xcb8] sm:$0xf0] }
 0x226   : > { %4622 = vmatpush.bf16.msrb.mxu1 %v5895_v53  ;;  %v7689_v53 = vld [vmem:[%s8097_s6 + $0xdec] sm:$0xf]  ;;  %v6692_v1 = vld [vmem:[%s8097_s6 + $0xdb8] sm:$0xf0] }
 0x227   : > { %4635 = vmatpush.bf16.msrb.mxu2 %v6023_v17  ;;  %v6724_v17 = vld [vmem:[%s8097_s6 + $0xdf8] sm:$0xf0]  ;;  %v7617_v23 = vld [vmem:[%s8097_s6 + $0xbac] sm:$0xf] }
 0x228   : > { %4648 = vmatpush.bf16.msrb.mxu3 %v6151_v51  ;;  %v7589_v51 = vld [vmem:[%s8097_s6 + $0xacc] sm:$0xf]  ;;  %v6727_v57 = vor.u32 %v7689_v53, %v6724_v17  ;;  %v6292_v10 = vld [vmem:[%s8097_s6 + $0xa98] sm:$0xf0] }
 0x229   : > { %4610 = vmatpush.bf16.msrb.mxu0 %v5751_v61  ;;  %v6708_v61 = vld [vmem:[%s8097_s6 + $0xdd8] sm:$0xf0]  ;;  %v6327_v11 = vor.u32 %v7589_v51, %v6324_v54  ;;  %v7649_v42 = vld [vmem:[%s8097_s6 + $0xcac] sm:$0xf] }
 0x22a   : > { %4623 = vmatpush.bf16.msrb.mxu1 %v5879_v63  ;;  %v6455_v63 = vor.u32 %v7621_v56, %v6452_v59  ;;  %v6711_v55 = vor.u32 %v7685_v52, %v6708_v61  ;;  %v7681_v3 = vld [vmem:[%s8097_s6 + $0xdac] sm:$0xf]  ;;  %v6548_v15 = vld [vmem:[%s8097_s6 + $0xc98] sm:$0xf0] }
 0x22b   : > { %4636 = vmatpush.bf16.msrb.mxu2 %v6007_v0  ;;  %v6583_v0 = vor.u32 %v7653_v60, %v6580_v62  ;;  %v7581_v6 = vld [vmem:[%s8097_s6 + $0xa8c] sm:$0xf]  ;;  %v6676_v16 = vld [vmem:[%s8097_s6 + $0xd98] sm:$0xf0] }
 0x22c   : > { %4649 = vmatpush.bf16.msrb.mxu3 %v6135_v22  ;;  %v6436_v22 = vld [vmem:[%s8097_s6 + $0xbb8] sm:$0xf0]  ;;  %v7677_v7 = vld [vmem:[%s8097_s6 + $0xd8c] sm:$0xf]  ;;  %v6295_v18 = vor.u32 %v7581_v6, %v6292_v10 }
 0x22d   : > { %4611 = vmatpush.bf16.msrb.mxu0 %v5735_v45  ;;  %v6439_v5 = vor.u32 %v7617_v23, %v6436_v22  ;;  %v6567_v45 = vor.u32 %v7649_v42, %v6564_v2  ;;  %v7577_v8 = vld [vmem:[%s8097_s6 + $0xa6c] sm:$0xf]  ;;  %v6276_v27 = vld [vmem:[%s8097_s6 + $0xa78] sm:$0xf0]  ;;  %v6679_v28 = vor.u32 %v7677_v7, %v6676_v16 }
 0x22e   : > { %4624 = vmatpush.bf16.msrb.mxu1 %v5863_v13  ;;  %v6420_v13 = vld [vmem:[%s8097_s6 + $0xb98] sm:$0xf0]  ;;  %v7609_v58 = vld [vmem:[%s8097_s6 + $0xb6c] sm:$0xf] }
 0x22f   : > { %4637 = vmatpush.bf16.msrb.mxu2 %v5991_v14  ;;  %v7645_v14 = vld [vmem:[%s8097_s6 + $0xc8c] sm:$0xf]  ;;  %v6404_v35 = vld [vmem:[%s8097_s6 + $0xb78] sm:$0xf0] }
 0x230   : > { %4650 = vmatpush.bf16.msrb.mxu3 %v6119_v49  ;;  %v6551_v25 = vor.u32 %v7645_v14, %v6548_v15  ;;  %v6532_v47 = vld [vmem:[%s8097_s6 + $0xc78] sm:$0xf0]  ;;  %v7673_v4 = vld [vmem:[%s8097_s6 + $0xd6c] sm:$0xf] }
 0x231   : > { %4612 = vmatpush.bf16.msrb.mxu0 %v5719_v19  ;;  %v7641_v19 = vld [vmem:[%s8097_s6 + $0xc6c] sm:$0xf]  ;;  %v6660_v37 = vld [vmem:[%s8097_s6 + $0xd78] sm:$0xf0] }
 0x232   : > { %4625 = vmatpush.bf16.msrb.mxu1 %v5847_v38  ;;  %v9355_v49 = vpop.f32.mrf.mxu1  ;;  %v6279_v38 = vor.u32 %v7577_v8, %v6276_v27  ;;  %v6535_v53 = vor.u32 %v7641_v19, %v6532_v47  ;;  %v7573_v17 = vld [vmem:[%s8097_s6 + $0xa4c] sm:$0xf]  ;;  %v6388_v51 = vld [vmem:[%s8097_s6 + $0xb58] sm:$0xf0] }
 0x233   : > { %4638 = vmatpush.bf16.msrb.mxu2 %v5975_v41  ;;  %v6407_v41 = vor.u32 %v7609_v58, %v6404_v35  ;;  %v7637_v54 = vld [vmem:[%s8097_s6 + $0xc4c] sm:$0xf]  ;;  %v6516_v56 = vld [vmem:[%s8097_s6 + $0xc58] sm:$0xf0] }
 0x234   : > { %4651 = vmatpush.bf16.msrb.mxu3 %v6103_v44  ;;  %4613 = vmatmul.bf16.vlgmr.msrb.gmra.mxu0 %v8281_v39  ;;  %v6311_v39 = vor.u32 %v7585_v21, %v6308_v9  ;;  %v6260_v44 = vld [vmem:[%s8097_s6 + $0xa58] sm:$0xf0]  ;;  %v7669_v59 = vld [vmem:[%s8097_s6 + $0xd4c] sm:$0xf] }
 0x235   : > { %4657 = vmatpush.bf16.msra.mxu0 %v6343_v46  ;;  %4626 = vmatmul.bf16.vlgmr.msrb.gmra.mxu1 %v8287_v43  ;;  %v6695_v43 = vor.u32 %v7681_v3, %v6692_v1  ;;  %v7605_v46 = vld [vmem:[%s8097_s6 + $0xb4c] sm:$0xf]  ;;  %v6644_v60 = vld [vmem:[%s8097_s6 + $0xd58] sm:$0xf0]  ;;  %v6263_v52 = vor.u32 %v7573_v17, %v6260_v44 }
 0x236   : > { %4670 = vmatpush.bf16.msra.mxu1 %v6471_v48  ;;  %4639 = vmatmul.bf16.vlgmr.msrb.gmra.mxu2 %v8356_v26  ;;  %v7613_v26 = vld [vmem:[%s8097_s6 + $0xb8c] sm:$0xf]  ;;  %v6663_v48 = vor.u32 %v7673_v4, %v6660_v37  ;;  %v6244_v21 = vld [vmem:[%s8097_s6 + $0xa38] sm:$0xf0]  ;;  %v6647_v23 = vor.u32 %v7669_v59, %v6644_v60 }
 0x237   : > { %4683 = vmatpush.bf16.msra.mxu2 %v6599_v50  ;;  %4652 = vmatmul.bf16.vlgmr.msrb.gmra.mxu3 %v8363_v31  ;;  %v9351_v31 = vpop.f32.mrf.mxu0  ;;  %v6423_v20 = vor.u32 %v7613_v26, %v6420_v13  ;;  %v7601_v9 = vld [vmem:[%s8097_s6 + $0xb2c] sm:$0xf]  ;;  %v6500_v42 = vld [vmem:[%s8097_s6 + $0xc38] sm:$0xf0] }
 0x238   : > { %4696 = vmatpush.bf16.msra.mxu3 %v6727_v57  ;;  %v7633_v22 = vld [vmem:[%s8097_s6 + $0xc2c] sm:$0xf]  ;;  %v6628_v3 = vld [vmem:[%s8097_s6 + $0xd38] sm:$0xf0] }
 0x239   : > { %4658 = vmatpush.bf16.msra.mxu0 %v6327_v11  ;;  %v9368_v50 = vpop.f32.mrf.mxu2  ;;  %v6391_v11 = vor.u32 %v7605_v46, %v6388_v51  ;;  %v7665_v2 = vld [vmem:[%s8097_s6 + $0xd2c] sm:$0xf]  ;;  %v6503_v6 = vor.u32 %v7633_v22, %v6500_v42  ;;  %v6356_v26 = vld [vmem:[%s8097_s6 + $0xb18] sm:$0xf0] }
 0x23a   : > { %4671 = vmatpush.bf16.msra.mxu1 %v6455_v63  ;;  %v9373_v57 = vpop.f32.mrf.mxu3  ;;  %v4421_v61 = vpop.f32.mrf.mxu1  ;;  %v6519_v63 = vor.u32 %v7637_v54, %v6516_v56  ;;  %v7597_v10 = vld [vmem:[%s8097_s6 + $0xb0c] sm:$0xf]  ;;  %v6631_v13 = vor.u32 %v7665_v2, %v6628_v3  ;;  %v6484_v14 = vld [vmem:[%s8097_s6 + $0xc18] sm:$0xf0] }
 0x23b   : > { %4684 = vmatpush.bf16.msra.mxu2 %v6583_v0  ;;  %v7569_v0 = vld [vmem:[%s8097_s6 + $0xa2c] sm:$0xf]  ;;  %v6612_v7 = vld [vmem:[%s8097_s6 + $0xd18] sm:$0xf0]  ;;  %v6359_v19 = vor.u32 %v7597_v10, %v6356_v26 }
 0x23c   : > { %4697 = vmatpush.bf16.msra.mxu3 %v6711_v55  ;;  %v6372_v55 = vld [vmem:[%s8097_s6 + $0xb38] sm:$0xf0]  ;;  %v6247_v1 = vor.u32 %v7569_v0, %v6244_v21  ;;  %v7661_v15 = vld [vmem:[%s8097_s6 + $0xd0c] sm:$0xf] }
 0x23d   : > { %4659 = vmatpush.bf16.msra.mxu0 %v6311_v39  ;;  %v7565_v39 = vld [vmem:[%s8097_s6 + $0xa0c] sm:$0xf]  ;;  %v6980_v58 = vld [vmem:[%s8097_s6 + $0xff8] sm:$0xf0] }
 0x23e   : > { %4672 = vmatpush.bf16.msra.mxu1 %v6439_v5  ;;  %v6228_v5 = vld [vmem:[%s8097_s6 + $0xa18] sm:$0xf0]  ;;  %v7817_v4 = vld [vmem:[%s8097_s6 + $0x11ec] sm:$0xf] }
 0x23f   : > { %4685 = vmatpush.bf16.msra.mxu2 %v6567_v45  ;;  %v4408_v62 = vpop.f32.mrf.mxu0  ;;  %v6375_v45 = vor.u32 %v7601_v9, %v6372_v55  ;;  %v6231_v27 = vor.u32 %v7565_v39, %v6228_v5  ;;  %v7108_v35 = vld [vmem:[%s8097_s6 + $0x10f8] sm:$0xf0]  ;;  %v7717_v44 = vld [vmem:[%s8097_s6 + $0xecc] sm:$0xf] }
 0x240   : > { %4698 = vmatpush.bf16.msra.mxu3 %v6695_v43  ;;  %v7629_v43 = vld [vmem:[%s8097_s6 + $0xc0c] sm:$0xf]  ;;  %v7236_v37 = vld [vmem:[%s8097_s6 + $0x11f8] sm:$0xf0] }
 0x241   : > { %4660 = vmatpush.bf16.msra.mxu0 %v6295_v18  ;;  %v4434_v16 = vpop.f32.mrf.mxu2  ;;  %v7721_v18 = vld [vmem:[%s8097_s6 + $0xeec] sm:$0xf]  ;;  %v6487_v47 = vor.u32 %v7629_v43, %v6484_v14  ;;  %v6836_v46 = vld [vmem:[%s8097_s6 + $0xed8] sm:$0xf0]  ;;  %v7239_v51 = vor.u32 %v7817_v4, %v7236_v37 }
 0x242   : > { %4673 = vmatpush.bf16.msra.mxu1 %v6423_v20  ;;  %v6852_v20 = vld [vmem:[%s8097_s6 + $0xef8] sm:$0xf0]  ;;  %v4447_v8 = vpop.f32.mrf.mxu3  ;;  %v7781_v56 = vld [vmem:[%s8097_s6 + $0x10cc] sm:$0xf] }
 0x243   : > { %4686 = vmatpush.bf16.msra.mxu2 %v6551_v25  ;;  %v7753_v25 = vld [vmem:[%s8097_s6 + $0xfec] sm:$0xf]  ;;  %v6964_v54 = vld [vmem:[%s8097_s6 + $0xfd8] sm:$0xf0] }
 0x244   : > { %4699 = vmatpush.bf16.msra.mxu3 %v6679_v28  ;;  %v7785_v28 = vld [vmem:[%s8097_s6 + $0x10ec] sm:$0xf]  ;;  %v7092_v59 = vld [vmem:[%s8097_s6 + $0x10d8] sm:$0xf0] }
 0x245   : > { %4661 = vmatpush.bf16.msra.mxu0 %v6279_v38  ;;  %v6615_v38 = vor.u32 %v7661_v15, %v6612_v7  ;;  %v7111_v17 = vor.u32 %v7785_v28, %v7108_v35  ;;  %v7813_v60 = vld [vmem:[%s8097_s6 + $0x11cc] sm:$0xf]  ;;  %v7220_v62 = vld [vmem:[%s8097_s6 + $0x11d8] sm:$0xf0] }
 0x246   : > { %4674 = vmatpush.bf16.msra.mxu1 %v6407_v41  ;;  %v6855_v41 = vor.u32 %v7721_v18, %v6852_v20  ;;  %v6820_v0 = vld [vmem:[%s8097_s6 + $0xeb8] sm:$0xf0]  ;;  %v7745_v21 = vld [vmem:[%s8097_s6 + $0xfac] sm:$0xf]  ;;  %v7223_v9 = vor.u32 %v7813_v60, %v7220_v62 }
 0x247   : > { %4687 = vmatpush.bf16.msra.mxu2 %v6535_v53  ;;  %v6983_v53 = vor.u32 %v7753_v25, %v6980_v58  ;;  %v7777_v55 = vld [vmem:[%s8097_s6 + $0x10ac] sm:$0xf]  ;;  %v7076_v22 = vld [vmem:[%s8097_s6 + $0x10b8] sm:$0xf0] }
 0x248   : > { %4700 = vmatpush.bf16.msra.mxu3 %v6663_v48  ;;  %v7749_v48 = vld [vmem:[%s8097_s6 + $0xfcc] sm:$0xf]  ;;  %v7204_v2 = vld [vmem:[%s8097_s6 + $0x11b8] sm:$0xf0] }
 0x249   : > { %4662 = vmatpush.bf16.msra.mxu0 %v6263_v52  ;;  %v6839_v52 = vor.u32 %v7717_v44, %v6836_v46  ;;  %v6967_v61 = vor.u32 %v7749_v48, %v6964_v54  ;;  %v7809_v42 = vld [vmem:[%s8097_s6 + $0x11ac] sm:$0xf]  ;;  %v6804_v5 = vld [vmem:[%s8097_s6 + $0xe98] sm:$0xf0] }
 0x24a   : > { %4675 = vmatpush.bf16.msra.mxu1 %v6391_v11  ;;  %v7095_v11 = vor.u32 %v7781_v56, %v7092_v59  ;;  %v7709_v39 = vld [vmem:[%s8097_s6 + $0xe8c] sm:$0xf]  ;;  %v7060_v10 = vld [vmem:[%s8097_s6 + $0x1098] sm:$0xf0] }
 0x24b   : > { %4688 = vmatpush.bf16.msra.mxu2 %v6519_v63  ;;  %v7713_v63 = vld [vmem:[%s8097_s6 + $0xeac] sm:$0xf]  ;;  %v7188_v43 = vld [vmem:[%s8097_s6 + $0x1198] sm:$0xf0] }
 0x24c   : > { %4701 = vmatpush.bf16.msra.mxu3 %v6647_v23  ;;  %v6948_v23 = vld [vmem:[%s8097_s6 + $0xfb8] sm:$0xf0]  ;;  %v7805_v26 = vld [vmem:[%s8097_s6 + $0x118c] sm:$0xf] }
 0x24d   : > { %4663 = vmatpush.bf16.msra.mxu0 %v6247_v1  ;;  %v6951_v3 = vor.u32 %v7745_v21, %v6948_v23  ;;  %v7079_v1 = vor.u32 %v7777_v55, %v7076_v22  ;;  %v7705_v16 = vld [vmem:[%s8097_s6 + $0xe6c] sm:$0xf]  ;;  %v6788_v18 = vld [vmem:[%s8097_s6 + $0xe78] sm:$0xf0]  ;;  %v7191_v25 = vor.u32 %v7805_v26, %v7188_v43 }
 0x24e   : > { %4676 = vmatpush.bf16.msra.mxu1 %v6375_v45  ;;  %v6932_v45 = vld [vmem:[%s8097_s6 + $0xf98] sm:$0xf0]  ;;  %v7737_v20 = vld [vmem:[%s8097_s6 + $0xf6c] sm:$0xf] }
 0x24f   : > { %4689 = vmatpush.bf16.msra.mxu2 %v6503_v6  ;;  %v7773_v6 = vld [vmem:[%s8097_s6 + $0x108c] sm:$0xf]  ;;  %v6916_v8 = vld [vmem:[%s8097_s6 + $0xf78] sm:$0xf0] }
 0x250   : > { %4702 = vmatpush.bf16.msra.mxu3 %v6631_v13  ;;  %v6807_v13 = vor.u32 %v7709_v39, %v6804_v5  ;;  %v7063_v7 = vor.u32 %v7773_v6, %v7060_v10  ;;  %v7044_v58 = vld [vmem:[%s8097_s6 + $0x1078] sm:$0xf0]  ;;  %v7801_v28 = vld [vmem:[%s8097_s6 + $0x116c] sm:$0xf] }
 0x251   : > { %4664 = vmatpush.bf16.msra.mxu0 %v6231_v27  ;;  %v7769_v27 = vld [vmem:[%s8097_s6 + $0x106c] sm:$0xf]  ;;  %v7172_v35 = vld [vmem:[%s8097_s6 + $0x1178] sm:$0xf0] }
 0x252   : > { %4677 = vmatpush.bf16.msra.mxu1 %v6359_v19  ;;  %v9431_v14 = vpop.f32.mrf.mxu1  ;;  %v6791_v19 = vor.u32 %v7705_v16, %v6788_v18  ;;  %v7047_v4 = vor.u32 %v7769_v27, %v7044_v58  ;;  %v7701_v37 = vld [vmem:[%s8097_s6 + $0xe4c] sm:$0xf]  ;;  %v6900_v46 = vld [vmem:[%s8097_s6 + $0xf58] sm:$0xf0] }
 0x253   : > { %4690 = vmatpush.bf16.msra.mxu2 %v6487_v47  ;;  %v6919_v47 = vor.u32 %v7737_v20, %v6916_v8  ;;  %v7765_v48 = vld [vmem:[%s8097_s6 + $0x104c] sm:$0xf]  ;;  %v7156_v59 = vld [vmem:[%s8097_s6 + $0x1158] sm:$0xf0] }
 0x254   : > { %4703 = vmatpush.bf16.msra.mxu3 %v6615_v38  ;;  %4665 = vmatmul.bf16.vlgmr.msra.gmra.mxu0 %v8361_v30  ;;  %v6823_v30 = vor.u32 %v7713_v63, %v6820_v0  ;;  %v6772_v38 = vld [vmem:[%s8097_s6 + $0xe58] sm:$0xf0]  ;;  %v7797_v56 = vld [vmem:[%s8097_s6 + $0x114c] sm:$0xf] }
 0x255   : > { %4709 = vmatpush.bf16.msrb.mxu0 %v6855_v41  ;;  %4678 = vmatmul.bf16.vlgmr.msra.gmra.mxu1 %v8367_v34  ;;  %v7207_v34 = vor.u32 %v7809_v42, %v7204_v2  ;;  %v7733_v41 = vld [vmem:[%s8097_s6 + $0xf4c] sm:$0xf]  ;;  %v6775_v62 = vor.u32 %v7701_v37, %v6772_v38  ;;  %v7159_v21 = vor.u32 %v7797_v56, %v7156_v59  ;;  %v7012_v55 = vld [vmem:[%s8097_s6 + $0x1038] sm:$0xf0] }
 0x256   : > { %4722 = vmatpush.bf16.msrb.mxu1 %v6983_v53  ;;  %4691 = vmatmul.bf16.vlgmr.msra.gmra.mxu2 %v8434_v24  ;;  %v7741_v24 = vld [vmem:[%s8097_s6 + $0xf8c] sm:$0xf]  ;;  %v4407_v53 = vadd.f32 %v9351_v31, %v9299_v12  ;;  %v6903_v31 = vor.u32 %v7733_v41, %v6900_v46  ;;  %v7140_v42 = vld [vmem:[%s8097_s6 + $0x1138] sm:$0xf0] }
 0x257   : > { %4735 = vmatpush.bf16.msrb.mxu2 %v7111_v17  ;;  %4704 = vmatmul.bf16.vlgmr.msra.gmra.mxu3 %v8441_v32  ;;  %v9427_v32 = vpop.f32.mrf.mxu0  ;;  %v6935_v15 = vor.u32 %v7741_v24, %v6932_v45  ;;  %v7175_v17 = vor.u32 %v7801_v28, %v7172_v35  ;;  %v7729_v63 = vld [vmem:[%s8097_s6 + $0xf2c] sm:$0xf]  ;;  %v6740_v39 = vld [vmem:[%s8097_s6 + $0xe18] sm:$0xf0] }
 0x258   : > { %4748 = vmatpush.bf16.msrb.mxu3 %v7239_v51  ;;  %v7028_v51 = vld [vmem:[%s8097_s6 + $0x1058] sm:$0xf0]  ;;  %v4420_v0 = vadd.f32 %v9355_v49, %v4407_v53  ;;  %v7761_v23 = vld [vmem:[%s8097_s6 + $0x102c] sm:$0xf] }
 0x259   : > { %4710 = vmatpush.bf16.msrb.mxu0 %v6839_v52  ;;  %v4484_v44 = vpop.f32.mrf.mxu2  ;;  %v7031_v52 = vor.u32 %v7765_v48, %v7028_v51  ;;  %v7793_v22 = vld [vmem:[%s8097_s6 + $0x112c] sm:$0xf]  ;;  %v6996_v6 = vld [vmem:[%s8097_s6 + $0x1018] sm:$0xf0] }
 0x25a   : > { %4723 = vmatpush.bf16.msrb.mxu1 %v6967_v61  ;;  %v4497_v54 = vpop.f32.mrf.mxu3  ;;  %v4473_v12 = vpop.f32.mrf.mxu1  ;;  %v7697_v61 = vld [vmem:[%s8097_s6 + $0xe2c] sm:$0xf]  ;;  %v4433_v2 = vadd.f32 %v9368_v50, %v4420_v0  ;;  %v7143_v24 = vor.u32 %v7793_v22, %v7140_v42  ;;  %v7124_v43 = vld [vmem:[%s8097_s6 + $0x1118] sm:$0xf0] }
 0x25b   : > { %4736 = vmatpush.bf16.msrb.mxu2 %v7095_v11  ;;  %v6756_v11 = vld [vmem:[%s8097_s6 + $0xe38] sm:$0xf0]  ;;  %v7725_v5 = vld [vmem:[%s8097_s6 + $0xf0c] sm:$0xf] }
 0x25c   : > { %4749 = vmatpush.bf16.msrb.mxu3 %v7223_v9  ;;  %v6884_v9 = vld [vmem:[%s8097_s6 + $0xf38] sm:$0xf0]  ;;  %v7757_v45 = vld [vmem:[%s8097_s6 + $0x100c] sm:$0xf] }
 0x25d   : > { %4711 = vmatpush.bf16.msrb.mxu0 %v6823_v30  ;;  %v6759_v30 = vor.u32 %v7697_v61, %v6756_v11  ;;  %v6887_v49 = vor.u32 %v7729_v63, %v6884_v9  ;;  %v7789_v26 = vld [vmem:[%s8097_s6 + $0x110c] sm:$0xf]  ;;  %v6999_v16 = vor.u32 %v7757_v45, %v6996_v6  ;;  %v295_v28 = vld [vmem:[#allocation2 + $0x18] sm:$0xff] }
 0x25e   : > { %4724 = vmatpush.bf16.msrb.mxu1 %v6951_v3  ;;  %v7015_v3 = vor.u32 %v7761_v23, %v7012_v55  ;;  %v7127_v20 = vor.u32 %v7789_v26, %v7124_v43 }
 0x25f   : > { %4737 = vmatpush.bf16.msrb.mxu2 %v7079_v1  ;;  %v4460_v60 = vpop.f32.mrf.mxu0  ;;  %v7693_v1 = vld [vmem:[%s8097_s6 + $0xe0c] sm:$0xf] }
 0x260   : > { %4750 = vmatpush.bf16.msrb.mxu3 %v7207_v34  ;;  %v6868_v34 = vld [vmem:[%s8097_s6 + $0xf18] sm:$0xf0] }
 0x261   : > { %4712 = vmatpush.bf16.msrb.mxu0 %v6807_v13  ;;  %v4486_v10 = vpop.f32.mrf.mxu2  ;;  %v4446_v13 = vadd.f32 %v9373_v57, %v4433_v2 }
 0x262   : > { %4725 = vmatpush.bf16.msrb.mxu1 %v6935_v15  ;;  %v4499_v50 = vpop.f32.mrf.mxu3  ;;  %v6743_v15 = vor.u32 %v7693_v1, %v6740_v39 }
 0x263   : > { %4738 = vmatpush.bf16.msrb.mxu2 %v7063_v7  ;;  %v6871_v7 = vor.u32 %v7725_v5, %v6868_v34  ;;  %v4459_v18 = vadd.f32 %v9427_v32, %v4446_v13 }
 0x264   : > { %4751 = vmatpush.bf16.msrb.mxu3 %v7191_v25 }
 0x265   : > { %4713 = vmatpush.bf16.msrb.mxu0 %v6791_v19  ;;  %v4472_v25 = vadd.f32 %v9431_v14, %v4459_v18 }
 0x266   : > { %4726 = vmatpush.bf16.msrb.mxu1 %v6919_v47 }
 0x267   : > { %4739 = vmatpush.bf16.msrb.mxu2 %v7047_v4  ;;  %v4485_v8 = vadd.f32 %v4484_v44, %v4472_v25 }
 0x268   : > { %4752 = vmatpush.bf16.msrb.mxu3 %v7175_v17 }
 0x269   : > { %4714 = vmatpush.bf16.msrb.mxu0 %v6775_v62  ;;  %v4498_v57 = vadd.f32 %v4497_v54, %v4485_v8 }
 0x26a   : > { %4727 = vmatpush.bf16.msrb.mxu1 %v6903_v31 }
 0x26b   : > { %4740 = vmatpush.bf16.msrb.mxu2 %v7031_v52 }
 0x26c   : > { %4753 = vmatpush.bf16.msrb.mxu3 %v7159_v21 }
 0x26d   : > { %4715 = vmatpush.bf16.msrb.mxu0 %v6759_v30 }
 0x26e   : > { %4728 = vmatpush.bf16.msrb.mxu1 %v6887_v49 }
 0x26f   : > { %4741 = vmatpush.bf16.msrb.mxu2 %v7015_v3 }
 0x270   : > { %4754 = vmatpush.bf16.msrb.mxu3 %v7143_v24 }
 0x271   : > { %4716 = vmatpush.bf16.msrb.mxu0 %v6743_v15  ;;  %v4510_v27 = vpop.f32.mrf.mxu0 }
 0x272   : > { %4729 = vmatpush.bf16.msrb.mxu1 %v6871_v7  ;;  %v4511_v32 = vadd.f32 %v4510_v27, %v4498_v57  ;;  %v4523_v58 = vpop.f32.mrf.mxu1  ;;  %v296_v7 = vld [vmem:[#allocation2 + $0x8] sm:$0xff] }
 0x273   : > { %4742 = vmatpush.bf16.msrb.mxu2 %v6999_v16 }
 0x274   : > { %4755 = vmatpush.bf16.msrb.mxu3 %v7127_v20  ;;  %4717 = vmatmul.bf16.vlgmr.msrb.gmra.mxu0 %v8439_v29  ;;  %v4524_v35 = vadd.f32 %v4523_v58, %v4511_v32 }
 0x275   : > { %4730 = vmatmul.bf16.vlgmr.msrb.gmra.mxu1 %v8445_v36 }
 0x276   : > { %4743 = vmatmul.bf16.vlgmr.msrb.gmra.mxu2 %v8511_v33  ;;  %v4763_v19 = vadd.f32 %v4524_v35, %v295_v28 }
 0x277   : > { %4756 = vmatmul.bf16.vlgmr.msrb.gmra.mxu3 %v8516_v40 }
 0x278   : > { %4767 = vst [vmem:[#allocation2 + $0x18] sm:$0xff] %v4763_v19 }
 0x279   : > { %v4536_v47 = vpop.f32.mrf.mxu2  ;;  %v4512_v4 = vpop.f32.mrf.mxu0 }
 0x27a   : > { %v4549_v14 = vpop.f32.mrf.mxu3  ;;  %v4525_v29 = vpop.f32.mrf.mxu1 }
 0x27b   : > { %v4550_v37 = vadd.f32 %v4549_v14, %v4536_v47 }
 0x281   : > { %v4538_v38 = vpop.f32.mrf.mxu2 }
 0x282   : > { %v4551_v41 = vpop.f32.mrf.mxu3 }
 0x291   : > { %v4562_v36 = vpop.f32.mrf.mxu0 }
 0x292   : > { %v4563_v53 = vadd.f32 %v4562_v36, %v4550_v37  ;;  %v4575_v33 = vpop.f32.mrf.mxu1 }
 0x294   : > { %v4576_v17 = vadd.f32 %v4575_v33, %v4563_v53 }
 0x299   : > { %v4588_v40 = vpop.f32.mrf.mxu2  ;;  %v4564_v51 = vpop.f32.mrf.mxu0 }
 0x29a   : > { %v4589_v44 = vadd.f32 %v4588_v40, %v4576_v17  ;;  %v4601_v46 = vpop.f32.mrf.mxu3  ;;  %v4577_v54 = vpop.f32.mrf.mxu1 }
 0x29c   : > { %v4602_v48 = vadd.f32 %v4601_v46, %v4589_v44 }
 0x2a1   : > { %v4590_v56 = vpop.f32.mrf.mxu2 }
 0x2a2   : > { %v4603_v59 = vpop.f32.mrf.mxu3 }
 0x2b1   : > { %v4614_v60 = vpop.f32.mrf.mxu0 }
 0x2b2   : > { %v4627_v62 = vpop.f32.mrf.mxu1  ;;  %v4615_v9 = vadd.f32 %v4614_v60, %v4602_v48 }
 0x2b4   : > { %v4628_v2 = vadd.f32 %v4627_v62, %v4615_v9 }
 0x2b9   : > { %v4640_v12 = vpop.f32.mrf.mxu2  ;;  %v4616_v52 = vpop.f32.mrf.mxu0 }
 0x2ba   : > { %v4653_v31 = vpop.f32.mrf.mxu3  ;;  %v4629_v61 = vpop.f32.mrf.mxu1  ;;  %v4641_v30 = vadd.f32 %v4640_v12, %v4628_v2 }
 0x2bc   : > { %v4654_v1 = vadd.f32 %v4653_v31, %v4641_v30 }
 0x2c1   : > { %v4642_v11 = vpop.f32.mrf.mxu2 }
 0x2c2   : > { %v4655_v63 = vpop.f32.mrf.mxu3 }
 0x2d1   : > { %v4666_v0 = vpop.f32.mrf.mxu0 }
 0x2d2   : > { %v4679_v21 = vpop.f32.mrf.mxu1  ;;  %v4667_v39 = vadd.f32 %v4666_v0, %v4654_v1 }
 0x2d4   : > { %v4680_v5 = vadd.f32 %v4679_v21, %v4667_v39 }
 0x2d9   : > { %v4692_v23 = vpop.f32.mrf.mxu2  ;;  %v4668_v22 = vpop.f32.mrf.mxu0 }
 0x2da   : > { %v4705_v55 = vpop.f32.mrf.mxu3  ;;  %v4681_v42 = vpop.f32.mrf.mxu1  ;;  %v4693_v24 = vadd.f32 %v4692_v23, %v4680_v5 }
 0x2dc   : > { %v4706_v34 = vadd.f32 %v4705_v55, %v4693_v24 }
 0x2e1   : > { %v4694_v49 = vpop.f32.mrf.mxu2 }
 0x2e2   : > { %v4707_v3 = vpop.f32.mrf.mxu3 }
 0x2f1   : > { %v4718_v45 = vpop.f32.mrf.mxu0 }
 0x2f2   : > { %v4731_v6 = vpop.f32.mrf.mxu1  ;;  %v4719_v10 = vadd.f32 %v4718_v45, %v4706_v34 }
 0x2f4   : > { %v4732_v26 = vadd.f32 %v4731_v6, %v4719_v10 }
 0x2f9   : > { %v4744_v43 = vpop.f32.mrf.mxu2  ;;  %v4720_v15 = vpop.f32.mrf.mxu0 }
 0x2fa   : > { %v4745_v50 = vadd.f32 %v4744_v43, %v4732_v26  ;;  %v4757_v13 = vpop.f32.mrf.mxu3  ;;  %v4733_v16 = vpop.f32.mrf.mxu1 }
 0x2fc   : > { %v4758_v18 = vadd.f32 %v4757_v13, %v4745_v50 }
 0x2fe   : > { %v4764_v20 = vadd.f32 %v4758_v18, %v296_v7  ;;  %4772 = sbr.rel (%p7240_p3) target bundleno = 781 (0x30d), region = 44 }
 0x300   : > { %4768 = vst [vmem:[#allocation2 + $0x8] sm:$0xff] %v4764_v20 }
 0x301   : > { %v4746_v25 = vpop.f32.mrf.mxu2 }
 0x302   : > { %v4759_v8 = vpop.f32.mrf.mxu3 }
 0x303   : > { %v4773_v57 = vld [vmem:[#allocation2 + $0x10] sm:$0xff]  ;;  %v4774_v27 = vld [vmem:[#allocation2] sm:$0xff]  ;;  %v4775_v35 = vld [vmem:[#allocation2 + $0x18] sm:$0xff] }
 0x304   : > { %v4777_v32 = vld [vmem:[%s273_s9] sm:$0xf] }
 0x305   : > { %v4779_v58 = vperm.slane %v4777_v32, 0  ;;  %v4780_v28 = vperm.slane %v4777_v32, 1  ;;  %v4781_v47 = vperm.slane %v4777_v32, 2  ;;  %v4782_v14 = vperm.slane %v4777_v32, 3 }
 0x307   : > { %v4776_v19 = vld [vmem:[#allocation2 + $0x8] sm:$0xff]  ;;  %v4787_v4 = vadd.f32 %v4779_v58, %v4773_v57  ;;  %v4788_v37 = vadd.f32 %v4780_v28, %v4774_v27  ;;  %v4789_v29 = vadd.f32 %v4781_v47, %v4775_v35 }
 0x308   : > { %v4790_v38 = vadd.f32 %v4782_v14, %v4776_v19 }
 0x309   : > { %v4791_v41 = vpack.c.bf16 %v4788_v37, %v4787_v4 }
 0x30a   : > { %v4792_v36 = vpack.c.bf16 %v4790_v38, %v4789_v29 }
 0x30b   : > { %4793 = vst [vmem:[%s8115_s20] sm:$0xff] %v4791_v41 }
 0x30c   : > { %4794 = vst [vmem:[%s8115_s20 + $0x8] sm:$0xff] %v4792_v36 }
 0x30d PF: > { %s16_s19 = sadd.s32 1, %s7993_s19   ;;  %s9516_s25 = sld [smem:[#allocation6_spill]] }
 0x30e   : > { %p13_p4 = scmp.ge.s32.totalorder %s16_s19, 10   ;;  %s9517_s12 = smov %s7969_s13 }
 0x30f   : > { %s9518_s13 = smov %s7973_s14  ;;  %s9519_s14 = smov %s8086_s5 }
 0x310   : > { %s9520_s15 = smov %s7985_s17  ;;  %s9521_s16 = smov %s7989_s18 }
 0x311   : > { %s9522_s17 = smov %s9525_s21  ;;  %15 = sbr.rel (!%p13_p4) target bundleno = 5 (0x5), region = 86 }
 0x313   : > { %s9523_s18 = smov %s9516_s25 }
 0x316   :  { %4825 = vsyncpa [#allocation4], 1 }
 0x317   :  { %4827 = vsyncpa [#allocation4 + $0x1], 1 }

</bundles_post_ra>
